<compile_context>
chip_gen: v6e
topology: v6e:2x2x1
jax: 0.10.0
libtpu: 0.0.40
codegen_flags: <defaults>
</compile_context>

<pallas_src>
import functools

import jax
import jax.numpy as jnp
from jax import lax
from jax.experimental import pallas as pl
from jax.experimental.pallas import tpu as pltpu


def _pick_row_tile(H, W, pooling):
    """Largest output-row tile (in h rows) that divides H, is even when pooling,
    and keeps a (tile*W, 128) f32 tile at <= ~64 KiB (16 vregs)."""
    step = 2 if pooling else 1
    best = step
    for cand in range(step, H + 1, step):
        if H % cand == 0 and cand * W <= 128:
            best = cand
    return best


def _convblock_kernel(x_ref, w_ref, gamma_ref, beta_ref, out_ref,
                      xp_ref, acc_ref, *pool_scratch, pooling, eps, th):
    """Fused Conv2d(3x3, s1, p1, bias=False) + BatchNorm2d (training-mode batch
    statistics) + ELU (+ optional 2x2 MaxPool).

    x_ref    : (N, H, W, Cin)      bf16 NHWC input (unpadded)
    w_ref    : (9, Cin, Cp)        bf16 weights, tap-major, Cout zero-padded to Cp
    gamma_ref: (1, Cp) f32         BN scale (padding lanes = 1)
    beta_ref : (1, Cp) f32         BN shift (padding lanes = 0)
    out_ref  : (N*Ho*Wo, Cp)       bf16, (n, h, w)-row-major flat output
    xp_ref   : (N, H+2, W+2, Cin)  bf16 zero-halo staging scratch
    acc_ref  : (N*H*W, Cp)         f32 conv-output scratch (tiled epilogue)
    pool_scratch (pooling only): (th//2, 2*Wo, Cp) f32 per-tile pool regroup
    """
    N, H, W, Cin = x_ref.shape
    Cp = out_ref.shape[-1]
    HB = H // th            # row tiles per image
    TR = th * W             # acc rows per tile

    # --- zero halo staged in VMEM (padding=1, 'zeros'); no concat copies ------
    xp_ref[...] = jnp.zeros_like(xp_ref)
    xp_ref[:, pl.ds(1, H), pl.ds(1, W), :] = x_ref[...]

    # --- pass 1: conv as 9 accumulated (TR, Cin)@(Cin, Cp) taps per row tile, -
    # --- with one-pass sum / sum-of-squares for the BN batch statistics -------
    # Static loops: tile count is tiny here; for large N/H this becomes a
    # fori_loop / grid axis (see wrapper TODO).
    csum = jnp.zeros((1, Cp), jnp.float32)
    csumsq = jnp.zeros((1, Cp), jnp.float32)
    for n in range(N):
        for hb in range(HB):
            h0 = hb * th
            acc = jnp.zeros((TR, Cp), jnp.float32)
            for kh in range(3):
                rows = xp_ref[n, pl.ds(h0 + kh, th), :, :]      # (th, W+2, Cin) bf16
                for kw in range(3):
                    tap = rows[:, kw:kw + W, :].reshape(TR, Cin)
                    acc = acc + jnp.dot(tap, w_ref[kh * 3 + kw],
                                        preferred_element_type=jnp.float32)
            csum = csum + jnp.sum(acc, axis=0, keepdims=True)
            csumsq = csumsq + jnp.sum(acc * acc, axis=0, keepdims=True)
            acc_ref[pl.ds((n * H + h0) * W, TR), :] = acc

    # --- BatchNorm folded into one per-channel affine (biased batch stats) ----
    # TODO(synk): running_mean/running_var momentum updates (training side
    # effect, not part of the forward output) are not modeled here.
    count = jnp.float32(N * H * W)
    mean = csum / count
    # TODO(synk): E[x^2]-E[x]^2 is less stable than the centered two-pass form
    # for very large-magnitude activations; fine at these scales.
    var = csumsq / count - mean * mean
    scale = gamma_ref[...] * lax.rsqrt(var + eps)
    shift = beta_ref[...] - mean * scale

    def affine_elu(v):
        y = v * scale + shift
        # TODO(synk): exp(x)-1 instead of expm1; ~1e-7 abs error near zero.
        return jnp.where(y > 0, y, jnp.exp(jnp.minimum(y, 0.0)) - 1.0)

    # --- pass 2: normalize + ELU (+ 2x2 max-pool), tiled through acc_ref ------
    if pooling:
        (pool_ref,) = pool_scratch
        Ho, Wo = H // 2, W // 2
        for n in range(N):
            for hb in range(HB):
                base = (n * H + hb * th) * W
                # W-pool via stride-2 sublane reads of the conv scratch
                # (rows are (h, w) row-major within the tile).
                ya = affine_elu(acc_ref[pl.ds(base, TR // 2, 2), :])
                yb = affine_elu(acc_ref[pl.ds(base + 1, TR // 2, 2), :])
                yw = jnp.maximum(ya, yb)                        # (th*Wo, Cp)
                # H-pool: regroup row pairs as (pair, 2*Wo) and max the halves.
                pool_ref[...] = yw.reshape(th // 2, 2 * Wo, Cp)
                yhw = jnp.maximum(pool_ref[:, pl.ds(0, Wo), :],
                                  pool_ref[:, pl.ds(Wo, Wo), :])
                obase = (n * Ho + hb * (th // 2)) * Wo
                out_ref[pl.ds(obase, (th // 2) * Wo), :] = (
                    yhw.reshape((th // 2) * Wo, Cp).astype(out_ref.dtype))
    else:
        for n in range(N):
            for hb in range(HB):
                base = (n * H + hb * th) * W
                y = affine_elu(acc_ref[pl.ds(base, TR), :])
                out_ref[pl.ds(base, TR), :] = y.astype(out_ref.dtype)


def conv_block_forward(x_nchw, w_oihw, gamma, beta, *, pooling=False, eps=1e-5,
                       interpret=False):
    """PyTorch-equivalent ConvBlock forward: NCHW in, NCHW out (float32)."""
    N, Cin, H, W = x_nchw.shape
    Cout = w_oihw.shape[0]
    assert w_oihw.shape == (Cout, Cin, 3, 3)
    if pooling:
        # nn.MaxPool2d((2, 2)) floor-mode; guard instead of silently dropping.
        assert H % 2 == 0 and W % 2 == 0, "2x2 max-pool expects even H and W"

    # Lane-dense channel padding: Cout -> multiple of 128 (full-width stores).
    Cp = max(128, -(-Cout // 128) * 128)
    th = _pick_row_tile(H, W, pooling)

    # Layout + dtype glue. bf16 feeds HBM->VMEM and the MXU; accumulation f32.
    # TODO(synk): when ConvBlocks are stacked, keep activations NHWC and
    # channel-padded between kernels; transpose/slice only at network boundaries.
    x_nhwc = jnp.transpose(x_nchw, (0, 2, 3, 1)).astype(jnp.bfloat16)
    w_k = jnp.transpose(w_oihw, (2, 3, 1, 0)).reshape(9, Cin, Cout)   # (kh*3+kw, cin, cout)
    w_k = jnp.pad(w_k, ((0, 0), (0, 0), (0, Cp - Cout))).astype(jnp.bfloat16)
    g = jnp.pad(gamma.astype(jnp.float32), (0, Cp - Cout),
                constant_values=1.0).reshape(1, Cp)
    b = jnp.pad(beta.astype(jnp.float32), (0, Cp - Cout)).reshape(1, Cp)

    Ho, Wo = (H // 2, W // 2) if pooling else (H, W)
    out_rows = N * Ho * Wo
    out_shape = jax.ShapeDtypeStruct((out_rows, Cp), jnp.bfloat16)

    scratch_shapes = [
        pltpu.VMEM((N, H + 2, W + 2, Cin), jnp.bfloat16),   # zero-halo staging
        pltpu.VMEM((N * H * W, Cp), jnp.float32),           # conv output
    ]
    if pooling:
        scratch_shapes.append(pltpu.VMEM((th // 2, 2 * Wo, Cp), jnp.float32))

    # VMEM budget from the actual buffer sum (x2 on in/out for double buffering).
    xp_bytes = N * (H + 2) * (W + 2) * Cin * 2
    acc_bytes = N * H * W * Cp * 4
    pool_bytes = (th // 2) * (2 * Wo) * Cp * 4 if pooling else 0
    io_bytes = (N * H * W * Cin * 2) + (9 * Cin * Cp * 2) + 2 * Cp * 4 + out_rows * Cp * 2
    vmem_limit = int(min(max(2 * io_bytes + xp_bytes + acc_bytes + pool_bytes + (2 << 20),
                             4 << 20), 32 << 20))

    kernel = functools.partial(_convblock_kernel, pooling=pooling, eps=eps, th=th)

    # Single VMEM-resident block: BN batch stats need the whole (N, H, W) extent,
    # which is why grid=(1,) — any tiling/grid change must switch BN to a
    # two-pass (sum/sumsq, then normalize) scheme.
    # TODO(synk): for large N/H/W, add a "parallel" row-block grid axis (2
    # TensorCores on v7x) with the two-pass BN scheme; toy size fits one block.
    y = pl.pallas_call(
        kernel,
        grid=(1,),
        in_specs=[
            pl.BlockSpec((N, H, W, Cin), lambda i: (0, 0, 0, 0)),
            pl.BlockSpec((9, Cin, Cp), lambda i: (0, 0, 0)),
            pl.BlockSpec((1, Cp), lambda i: (0, 0)),
            pl.BlockSpec((1, Cp), lambda i: (0, 0)),
        ],
        out_specs=pl.BlockSpec((out_rows, Cp), lambda i: (0, 0)),
        out_shape=out_shape,
        scratch_shapes=scratch_shapes,
        compiler_params=pltpu.CompilerParams(
            dimension_semantics=("arbitrary",),
            vmem_limit_bytes=vmem_limit),
        interpret=interpret,
    )(x_nhwc, w_k, g, b)

    # Drop channel padding, back to NCHW f32.
    y = y.reshape(N, Ho, Wo, Cp)[..., :Cout]
    return jnp.transpose(y, (0, 3, 1, 2)).astype(jnp.float32)


def conv_block_reference(x_nchw, w_oihw, gamma, beta, *, pooling=False, eps=1e-5):
    """Plain-JAX reference matching PyTorch forward semantics."""
    y = lax.conv_general_dilated(
        x_nchw.astype(jnp.float32), w_oihw.astype(jnp.float32),
        window_strides=(1, 1), padding=((1, 1), (1, 1)),
        dimension_numbers=("NCHW", "OIHW", "NCHW"))
    mean = jnp.mean(y, axis=(0, 2, 3), keepdims=True)
    var = jnp.var(y, axis=(0, 2, 3), keepdims=True)   # biased, as in torch BN training
    y = (y - mean) * lax.rsqrt(var + eps)
    y = y * gamma.reshape(1, -1, 1, 1) + beta.reshape(1, -1, 1, 1)
    y = jnp.where(y > 0, y, jnp.expm1(y))
    if pooling:
        y = lax.reduce_window(y, -jnp.inf, lax.max,
                              (1, 1, 2, 2), (1, 1, 2, 2), "VALID")
    return y


if __name__ == "__main__":
    key = jax.random.PRNGKey(0)
    kx, kw, kg, kb = jax.random.split(key, 4)

    N, Cin, H, W, Cout = 2, 4, 16, 16, 8
    x = jax.random.normal(kx, (N, Cin, H, W), jnp.float32)
    w = 0.1 * jax.random.normal(kw, (Cout, Cin, 3, 3), jnp.float32)
    gamma = 1.0 + 0.1 * jax.random.normal(kg, (Cout,), jnp.float32)
    beta = 0.1 * jax.random.normal(kb, (Cout,), jnp.float32)

    # Reference computed from the same bf16-rounded conv inputs the kernel feeds
    # the MXU (bf16 x bf16 products are exact in the f32 accumulator).
    x_r = x.astype(jnp.bfloat16).astype(jnp.float32)
    w_r = w.astype(jnp.bfloat16).astype(jnp.float32)

    # pooling=False (module default), on TPU.
    y = conv_block_forward(x, w, gamma, beta, pooling=False)
    jax.block_until_ready(y)
    assert y.shape == (N, Cout, H, W)
    y_ref = conv_block_reference(x_r, w_r, gamma, beta, pooling=False)
    err = float(jnp.max(jnp.abs(y - y_ref)))
    assert jnp.allclose(y, y_ref, atol=1e-2, rtol=1e-2), err

    # pooling=True, also on TPU.
    y_pool = conv_block_forward(x, w, gamma, beta, pooling=True)
    jax.block_until_ready(y_pool)
    assert y_pool.shape == (N, Cout, H // 2, W // 2)
    y_pool_ref = conv_block_reference(x_r, w_r, gamma, beta, pooling=True)
    err_p = float(jnp.max(jnp.abs(y_pool - y_pool_ref)))
    assert jnp.allclose(y_pool, y_pool_ref, atol=1e-2, rtol=1e-2), err_p

    print("KERNEL_OK")
</pallas_src>

<mosaic_0001>
module attributes {stable_mosaic.version = 11 : i64} {
  func.func @_convblock_kernel(%arg0: i32, %arg1: memref<2x16x16x4xbf16, #tpu.memory_space<vmem>>, %arg2: memref<9x4x128xbf16, #tpu.memory_space<vmem>>, %arg3: memref<1x128xf32, #tpu.memory_space<vmem>>, %arg4: memref<1x128xf32, #tpu.memory_space<vmem>>, %arg5: memref<512x128xbf16, #tpu.memory_space<vmem>>, %arg6: memref<2x18x18x4xbf16, #tpu.memory_space<vmem>>, %arg7: memref<512x128xf32, #tpu.memory_space<vmem>>) attributes {dimension_semantics = [#tpu.dimension_semantics<arbitrary>], iteration_bounds = array<i64: 1>, scalar_prefetch = 0 : i64, scratch_operands = 2 : i64, tpu.core_type = #tpu.core_type<tc>, window_params = [{pipeline_mode = #tpu.pipeline_mode<synchronous>, transform_indices = @transform_0, window_bounds = array<i64: 2, 16, 16, 4>}, {pipeline_mode = #tpu.pipeline_mode<synchronous>, transform_indices = @transform_1, window_bounds = array<i64: 9, 4, 128>}, {pipeline_mode = #tpu.pipeline_mode<synchronous>, transform_indices = @transform_2, window_bounds = array<i64: 1, 128>}, {pipeline_mode = #tpu.pipeline_mode<synchronous>, transform_indices = @transform_3, window_bounds = array<i64: 1, 128>}, {pipeline_mode = #tpu.pipeline_mode<synchronous>, transform_indices = @transform_4, window_bounds = array<i64: 512, 128>}]} {
    %cst = arith.constant 0.000000e+00 : bf16
    %0 = vector.broadcast %cst : bf16 to vector<2x18x18x4xbf16>
    %c0 = arith.constant 0 : index
    %c0_0 = arith.constant 0 : index
    %c0_1 = arith.constant 0 : index
    %c0_2 = arith.constant 0 : index
    %1 = vector.load %arg6[%c0, %c0_0, %c0_1, %c0_2] : memref<2x18x18x4xbf16, #tpu.memory_space<vmem>>, vector<2x18x18x4xbf16>
    tpu.vector_store %arg6[%c0, %c0_0, %c0_1, %c0_2], %0 {strides = array<i32>} : memref<2x18x18x4xbf16, #tpu.memory_space<vmem>>, vector<2x18x18x4xbf16>,
    %c0_3 = arith.constant 0 : index
    %c0_4 = arith.constant 0 : index
    %c0_5 = arith.constant 0 : index
    %c0_6 = arith.constant 0 : index
    %2 = vector.load %arg1[%c0_3, %c0_4, %c0_5, %c0_6] : memref<2x16x16x4xbf16, #tpu.memory_space<vmem>>, vector<2x16x16x4xbf16>
    %c0_7 = arith.constant 0 : index
    %c1 = arith.constant 1 : index
    %c1_8 = arith.constant 1 : index
    %c0_9 = arith.constant 0 : index
    %3 = vector.load %arg6[%c0_7, %c1, %c1_8, %c0_9] : memref<2x18x18x4xbf16, #tpu.memory_space<vmem>>, vector<2x16x16x4xbf16>
    tpu.vector_store %arg6[%c0_7, %c1, %c1_8, %c0_9], %2 {strides = array<i32>} : memref<2x18x18x4xbf16, #tpu.memory_space<vmem>>, vector<2x16x16x4xbf16>,
    %cst_10 = arith.constant 0.000000e+00 : f32
    %4 = vector.broadcast %cst_10 : f32 to vector<1x128xf32>
    %cst_11 = arith.constant 0.000000e+00 : f32
    %5 = vector.broadcast %cst_11 : f32 to vector<1x128xf32>
    %cst_12 = arith.constant 0.000000e+00 : f32
    %6 = vector.broadcast %cst_12 : f32 to vector<128x128xf32>
    %c0_13 = arith.constant 0 : index
    %c0_14 = arith.constant 0 : index
    %c0_15 = arith.constant 0 : index
    %c0_16 = arith.constant 0 : index
    %7 = vector.load %arg6[%c0_13, %c0_14, %c0_15, %c0_16] : memref<2x18x18x4xbf16, #tpu.memory_space<vmem>>, vector<1x8x18x4xbf16>
    %8 = vector.shape_cast %7 : vector<1x8x18x4xbf16> to vector<8x18x4xbf16>
    %9 = vector.extract_strided_slice %8 {offsets = [0, 0, 0], sizes = [8, 16, 4], strides = [1, 1, 1]} : vector<8x18x4xbf16> to vector<8x16x4xbf16>
    %10 = vector.shape_cast %9 : vector<8x16x4xbf16> to vector<128x4xbf16>
    %c0_17 = arith.constant 0 : index
    %c0_18 = arith.constant 0 : index
    %c0_19 = arith.constant 0 : index
    %11 = vector.load %arg2[%c0_17, %c0_18, %c0_19] : memref<9x4x128xbf16, #tpu.memory_space<vmem>>, vector<1x4x128xbf16>
    %12 = vector.shape_cast %11 : vector<1x4x128xbf16> to vector<4x128xbf16>
    %cst_20 = arith.constant dense<0.000000e+00> : vector<128x128xf32>
    %13 = tpu.matmul %10, %12, %cst_20 {dimension_numbers = #tpu.dot_dimension_numbers<[1], [0], [0], [1], [0, 0, 1, 1], [], []>} : vector<128x4xbf16>, vector<4x128xbf16>, vector<128x128xf32> -> vector<128x128xf32>
    %14 = arith.addf %6, %13 : vector<128x128xf32>
    %15 = vector.extract_strided_slice %8 {offsets = [0, 1, 0], sizes = [8, 16, 4], strides = [1, 1, 1]} : vector<8x18x4xbf16> to vector<8x16x4xbf16>
    %16 = vector.shape_cast %15 : vector<8x16x4xbf16> to vector<128x4xbf16>
    %c1_21 = arith.constant 1 : index
    %c0_22 = arith.constant 0 : index
    %c0_23 = arith.constant 0 : index
    %17 = vector.load %arg2[%c1_21, %c0_22, %c0_23] : memref<9x4x128xbf16, #tpu.memory_space<vmem>>, vector<1x4x128xbf16>
    %18 = vector.shape_cast %17 : vector<1x4x128xbf16> to vector<4x128xbf16>
    %cst_24 = arith.constant dense<0.000000e+00> : vector<128x128xf32>
    %19 = tpu.matmul %16, %18, %cst_24 {dimension_numbers = #tpu.dot_dimension_numbers<[1], [0], [0], [1], [0, 0, 1, 1], [], []>} : vector<128x4xbf16>, vector<4x128xbf16>, vector<128x128xf32> -> vector<128x128xf32>
    %20 = arith.addf %14, %19 : vector<128x128xf32>
    %21 = vector.extract_strided_slice %8 {offsets = [0, 2, 0], sizes = [8, 16, 4], strides = [1, 1, 1]} : vector<8x18x4xbf16> to vector<8x16x4xbf16>
    %22 = vector.shape_cast %21 : vector<8x16x4xbf16> to vector<128x4xbf16>
    %c2 = arith.constant 2 : index
    %c0_25 = arith.constant 0 : index
    %c0_26 = arith.constant 0 : index
    %23 = vector.load %arg2[%c2, %c0_25, %c0_26] : memref<9x4x128xbf16, #tpu.memory_space<vmem>>, vector<1x4x128xbf16>
    %24 = vector.shape_cast %23 : vector<1x4x128xbf16> to vector<4x128xbf16>
    %cst_27 = arith.constant dense<0.000000e+00> : vector<128x128xf32>
    %25 = tpu.matmul %22, %24, %cst_27 {dimension_numbers = #tpu.dot_dimension_numbers<[1], [0], [0], [1], [0, 0, 1, 1], [], []>} : vector<128x4xbf16>, vector<4x128xbf16>, vector<128x128xf32> -> vector<128x128xf32>
    %26 = arith.addf %20, %25 : vector<128x128xf32>
    %c0_28 = arith.constant 0 : index
    %c1_29 = arith.constant 1 : index
    %c0_30 = arith.constant 0 : index
    %c0_31 = arith.constant 0 : index
    %27 = vector.load %arg6[%c0_28, %c1_29, %c0_30, %c0_31] : memref<2x18x18x4xbf16, #tpu.memory_space<vmem>>, vector<1x8x18x4xbf16>
    %28 = vector.shape_cast %27 : vector<1x8x18x4xbf16> to vector<8x18x4xbf16>
    %29 = vector.extract_strided_slice %28 {offsets = [0, 0, 0], sizes = [8, 16, 4], strides = [1, 1, 1]} : vector<8x18x4xbf16> to vector<8x16x4xbf16>
    %30 = vector.shape_cast %29 : vector<8x16x4xbf16> to vector<128x4xbf16>
    %c3 = arith.constant 3 : index
    %c0_32 = arith.constant 0 : index
    %c0_33 = arith.constant 0 : index
    %31 = vector.load %arg2[%c3, %c0_32, %c0_33] : memref<9x4x128xbf16, #tpu.memory_space<vmem>>, vector<1x4x128xbf16>
    %32 = vector.shape_cast %31 : vector<1x4x128xbf16> to vector<4x128xbf16>
    %cst_34 = arith.constant dense<0.000000e+00> : vector<128x128xf32>
    %33 = tpu.matmul %30, %32, %cst_34 {dimension_numbers = #tpu.dot_dimension_numbers<[1], [0], [0], [1], [0, 0, 1, 1], [], []>} : vector<128x4xbf16>, vector<4x128xbf16>, vector<128x128xf32> -> vector<128x128xf32>
    %34 = arith.addf %26, %33 : vector<128x128xf32>
    %35 = vector.extract_strided_slice %28 {offsets = [0, 1, 0], sizes = [8, 16, 4], strides = [1, 1, 1]} : vector<8x18x4xbf16> to vector<8x16x4xbf16>
    %36 = vector.shape_cast %35 : vector<8x16x4xbf16> to vector<128x4xbf16>
    %c4 = arith.constant 4 : index
    %c0_35 = arith.constant 0 : index
    %c0_36 = arith.constant 0 : index
    %37 = vector.load %arg2[%c4, %c0_35, %c0_36] : memref<9x4x128xbf16, #tpu.memory_space<vmem>>, vector<1x4x128xbf16>
    %38 = vector.shape_cast %37 : vector<1x4x128xbf16> to vector<4x128xbf16>
    %cst_37 = arith.constant dense<0.000000e+00> : vector<128x128xf32>
    %39 = tpu.matmul %36, %38, %cst_37 {dimension_numbers = #tpu.dot_dimension_numbers<[1], [0], [0], [1], [0, 0, 1, 1], [], []>} : vector<128x4xbf16>, vector<4x128xbf16>, vector<128x128xf32> -> vector<128x128xf32>
    %40 = arith.addf %34, %39 : vector<128x128xf32>
    %41 = vector.extract_strided_slice %28 {offsets = [0, 2, 0], sizes = [8, 16, 4], strides = [1, 1, 1]} : vector<8x18x4xbf16> to vector<8x16x4xbf16>
    %42 = vector.shape_cast %41 : vector<8x16x4xbf16> to vector<128x4xbf16>
    %c5 = arith.constant 5 : index
    %c0_38 = arith.constant 0 : index
    %c0_39 = arith.constant 0 : index
    %43 = vector.load %arg2[%c5, %c0_38, %c0_39] : memref<9x4x128xbf16, #tpu.memory_space<vmem>>, vector<1x4x128xbf16>
    %44 = vector.shape_cast %43 : vector<1x4x128xbf16> to vector<4x128xbf16>
    %cst_40 = arith.constant dense<0.000000e+00> : vector<128x128xf32>
    %45 = tpu.matmul %42, %44, %cst_40 {dimension_numbers = #tpu.dot_dimension_numbers<[1], [0], [0], [1], [0, 0, 1, 1], [], []>} : vector<128x4xbf16>, vector<4x128xbf16>, vector<128x128xf32> -> vector<128x128xf32>
    %46 = arith.addf %40, %45 : vector<128x128xf32>
    %c0_41 = arith.constant 0 : index
    %c2_42 = arith.constant 2 : index
    %c0_43 = arith.constant 0 : index
    %c0_44 = arith.constant 0 : index
    %47 = vector.load %arg6[%c0_41, %c2_42, %c0_43, %c0_44] : memref<2x18x18x4xbf16, #tpu.memory_space<vmem>>, vector<1x8x18x4xbf16>
    %48 = vector.shape_cast %47 : vector<1x8x18x4xbf16> to vector<8x18x4xbf16>
    %49 = vector.extract_strided_slice %48 {offsets = [0, 0, 0], sizes = [8, 16, 4], strides = [1, 1, 1]} : vector<8x18x4xbf16> to vector<8x16x4xbf16>
    %50 = vector.shape_cast %49 : vector<8x16x4xbf16> to vector<128x4xbf16>
    %c6 = arith.constant 6 : index
    %c0_45 = arith.constant 0 : index
    %c0_46 = arith.constant 0 : index
    %51 = vector.load %arg2[%c6, %c0_45, %c0_46] : memref<9x4x128xbf16, #tpu.memory_space<vmem>>, vector<1x4x128xbf16>
    %52 = vector.shape_cast %51 : vector<1x4x128xbf16> to vector<4x128xbf16>
    %cst_47 = arith.constant dense<0.000000e+00> : vector<128x128xf32>
    %53 = tpu.matmul %50, %52, %cst_47 {dimension_numbers = #tpu.dot_dimension_numbers<[1], [0], [0], [1], [0, 0, 1, 1], [], []>} : vector<128x4xbf16>, vector<4x128xbf16>, vector<128x128xf32> -> vector<128x128xf32>
    %54 = arith.addf %46, %53 : vector<128x128xf32>
    %55 = vector.extract_strided_slice %48 {offsets = [0, 1, 0], sizes = [8, 16, 4], strides = [1, 1, 1]} : vector<8x18x4xbf16> to vector<8x16x4xbf16>
    %56 = vector.shape_cast %55 : vector<8x16x4xbf16> to vector<128x4xbf16>
    %c7 = arith.constant 7 : index
    %c0_48 = arith.constant 0 : index
    %c0_49 = arith.constant 0 : index
    %57 = vector.load %arg2[%c7, %c0_48, %c0_49] : memref<9x4x128xbf16, #tpu.memory_space<vmem>>, vector<1x4x128xbf16>
    %58 = vector.shape_cast %57 : vector<1x4x128xbf16> to vector<4x128xbf16>
    %cst_50 = arith.constant dense<0.000000e+00> : vector<128x128xf32>
    %59 = tpu.matmul %56, %58, %cst_50 {dimension_numbers = #tpu.dot_dimension_numbers<[1], [0], [0], [1], [0, 0, 1, 1], [], []>} : vector<128x4xbf16>, vector<4x128xbf16>, vector<128x128xf32> -> vector<128x128xf32>
    %60 = arith.addf %54, %59 : vector<128x128xf32>
    %61 = vector.extract_strided_slice %48 {offsets = [0, 2, 0], sizes = [8, 16, 4], strides = [1, 1, 1]} : vector<8x18x4xbf16> to vector<8x16x4xbf16>
    %62 = vector.shape_cast %61 : vector<8x16x4xbf16> to vector<128x4xbf16>
    %c8 = arith.constant 8 : index
    %c0_51 = arith.constant 0 : index
    %c0_52 = arith.constant 0 : index
    %63 = vector.load %arg2[%c8, %c0_51, %c0_52] : memref<9x4x128xbf16, #tpu.memory_space<vmem>>, vector<1x4x128xbf16>
    %64 = vector.shape_cast %63 : vector<1x4x128xbf16> to vector<4x128xbf16>
    %cst_53 = arith.constant dense<0.000000e+00> : vector<128x128xf32>
    %65 = tpu.matmul %62, %64, %cst_53 {dimension_numbers = #tpu.dot_dimension_numbers<[1], [0], [0], [1], [0, 0, 1, 1], [], []>} : vector<128x4xbf16>, vector<4x128xbf16>, vector<128x128xf32> -> vector<128x128xf32>
    %66 = arith.addf %60, %65 : vector<128x128xf32>
    %cst_54 = arith.constant dense<0.000000e+00> : vector<128xf32>
    %67 = vector.multi_reduction <add>, %66, %cst_54 [0] : vector<128x128xf32> to vector<128xf32>
    %68 = vector.shape_cast %67 : vector<128xf32> to vector<1x128xf32>
    %69 = arith.addf %4, %68 : vector<1x128xf32>
    %70 = arith.mulf %66, %66 : vector<128x128xf32>
    %cst_55 = arith.constant dense<0.000000e+00> : vector<128xf32>
    %71 = vector.multi_reduction <add>, %70, %cst_55 [0] : vector<128x128xf32> to vector<128xf32>
    %72 = vector.shape_cast %71 : vector<128xf32> to vector<1x128xf32>
    %73 = arith.addf %5, %72 : vector<1x128xf32>
    %c0_56 = arith.constant 0 : index
    %c0_57 = arith.constant 0 : index
    %74 = vector.load %arg7[%c0_56, %c0_57] : memref<512x128xf32, #tpu.memory_space<vmem>>, vector<128x128xf32>
    tpu.vector_store %arg7[%c0_56, %c0_57], %66 {strides = array<i32>} : memref<512x128xf32, #tpu.memory_space<vmem>>, vector<128x128xf32>,
    %cst_58 = arith.constant 0.000000e+00 : f32
    %75 = vector.broadcast %cst_58 : f32 to vector<128x128xf32>
    %c0_59 = arith.constant 0 : index
    %c8_60 = arith.constant 8 : index
    %c0_61 = arith.constant 0 : index
    %c0_62 = arith.constant 0 : index
    %76 = vector.load %arg6[%c0_59, %c8_60, %c0_61, %c0_62] : memref<2x18x18x4xbf16, #tpu.memory_space<vmem>>, vector<1x8x18x4xbf16>
    %77 = vector.shape_cast %76 : vector<1x8x18x4xbf16> to vector<8x18x4xbf16>
    %78 = vector.extract_strided_slice %77 {offsets = [0, 0, 0], sizes = [8, 16, 4], strides = [1, 1, 1]} : vector<8x18x4xbf16> to vector<8x16x4xbf16>
    %79 = vector.shape_cast %78 : vector<8x16x4xbf16> to vector<128x4xbf16>
    %c0_63 = arith.constant 0 : index
    %c0_64 = arith.constant 0 : index
    %c0_65 = arith.constant 0 : index
    %80 = vector.load %arg2[%c0_63, %c0_64, %c0_65] : memref<9x4x128xbf16, #tpu.memory_space<vmem>>, vector<1x4x128xbf16>
    %81 = vector.shape_cast %80 : vector<1x4x128xbf16> to vector<4x128xbf16>
    %cst_66 = arith.constant dense<0.000000e+00> : vector<128x128xf32>
    %82 = tpu.matmul %79, %81, %cst_66 {dimension_numbers = #tpu.dot_dimension_numbers<[1], [0], [0], [1], [0, 0, 1, 1], [], []>} : vector<128x4xbf16>, vector<4x128xbf16>, vector<128x128xf32> -> vector<128x128xf32>
    %83 = arith.addf %75, %82 : vector<128x128xf32>
    %84 = vector.extract_strided_slice %77 {offsets = [0, 1, 0], sizes = [8, 16, 4], strides = [1, 1, 1]} : vector<8x18x4xbf16> to vector<8x16x4xbf16>
    %85 = vector.shape_cast %84 : vector<8x16x4xbf16> to vector<128x4xbf16>
    %c1_67 = arith.constant 1 : index
    %c0_68 = arith.constant 0 : index
    %c0_69 = arith.constant 0 : index
    %86 = vector.load %arg2[%c1_67, %c0_68, %c0_69] : memref<9x4x128xbf16, #tpu.memory_space<vmem>>, vector<1x4x128xbf16>
    %87 = vector.shape_cast %86 : vector<1x4x128xbf16> to vector<4x128xbf16>
    %cst_70 = arith.constant dense<0.000000e+00> : vector<128x128xf32>
    %88 = tpu.matmul %85, %87, %cst_70 {dimension_numbers = #tpu.dot_dimension_numbers<[1], [0], [0], [1], [0, 0, 1, 1], [], []>} : vector<128x4xbf16>, vector<4x128xbf16>, vector<128x128xf32> -> vector<128x128xf32>
    %89 = arith.addf %83, %88 : vector<128x128xf32>
    %90 = vector.extract_strided_slice %77 {offsets = [0, 2, 0], sizes = [8, 16, 4], strides = [1, 1, 1]} : vector<8x18x4xbf16> to vector<8x16x4xbf16>
    %91 = vector.shape_cast %90 : vector<8x16x4xbf16> to vector<128x4xbf16>
    %c2_71 = arith.constant 2 : index
    %c0_72 = arith.constant 0 : index
    %c0_73 = arith.constant 0 : index
    %92 = vector.load %arg2[%c2_71, %c0_72, %c0_73] : memref<9x4x128xbf16, #tpu.memory_space<vmem>>, vector<1x4x128xbf16>
    %93 = vector.shape_cast %92 : vector<1x4x128xbf16> to vector<4x128xbf16>
    %cst_74 = arith.constant dense<0.000000e+00> : vector<128x128xf32>
    %94 = tpu.matmul %91, %93, %cst_74 {dimension_numbers = #tpu.dot_dimension_numbers<[1], [0], [0], [1], [0, 0, 1, 1], [], []>} : vector<128x4xbf16>, vector<4x128xbf16>, vector<128x128xf32> -> vector<128x128xf32>
    %95 = arith.addf %89, %94 : vector<128x128xf32>
    %c0_75 = arith.constant 0 : index
    %c9 = arith.constant 9 : index
    %c0_76 = arith.constant 0 : index
    %c0_77 = arith.constant 0 : index
    %96 = vector.load %arg6[%c0_75, %c9, %c0_76, %c0_77] : memref<2x18x18x4xbf16, #tpu.memory_space<vmem>>, vector<1x8x18x4xbf16>
    %97 = vector.shape_cast %96 : vector<1x8x18x4xbf16> to vector<8x18x4xbf16>
    %98 = vector.extract_strided_slice %97 {offsets = [0, 0, 0], sizes = [8, 16, 4], strides = [1, 1, 1]} : vector<8x18x4xbf16> to vector<8x16x4xbf16>
    %99 = vector.shape_cast %98 : vector<8x16x4xbf16> to vector<128x4xbf16>
    %c3_78 = arith.constant 3 : index
    %c0_79 = arith.constant 0 : index
    %c0_80 = arith.constant 0 : index
    %100 = vector.load %arg2[%c3_78, %c0_79, %c0_80] : memref<9x4x128xbf16, #tpu.memory_space<vmem>>, vector<1x4x128xbf16>
    %101 = vector.shape_cast %100 : vector<1x4x128xbf16> to vector<4x128xbf16>
    %cst_81 = arith.constant dense<0.000000e+00> : vector<128x128xf32>
    %102 = tpu.matmul %99, %101, %cst_81 {dimension_numbers = #tpu.dot_dimension_numbers<[1], [0], [0], [1], [0, 0, 1, 1], [], []>} : vector<128x4xbf16>, vector<4x128xbf16>, vector<128x128xf32> -> vector<128x128xf32>
    %103 = arith.addf %95, %102 : vector<128x128xf32>
    %104 = vector.extract_strided_slice %97 {offsets = [0, 1, 0], sizes = [8, 16, 4], strides = [1, 1, 1]} : vector<8x18x4xbf16> to vector<8x16x4xbf16>
    %105 = vector.shape_cast %104 : vector<8x16x4xbf16> to vector<128x4xbf16>
    %c4_82 = arith.constant 4 : index
    %c0_83 = arith.constant 0 : index
    %c0_84 = arith.constant 0 : index
    %106 = vector.load %arg2[%c4_82, %c0_83, %c0_84] : memref<9x4x128xbf16, #tpu.memory_space<vmem>>, vector<1x4x128xbf16>
    %107 = vector.shape_cast %106 : vector<1x4x128xbf16> to vector<4x128xbf16>
    %cst_85 = arith.constant dense<0.000000e+00> : vector<128x128xf32>
    %108 = tpu.matmul %105, %107, %cst_85 {dimension_numbers = #tpu.dot_dimension_numbers<[1], [0], [0], [1], [0, 0, 1, 1], [], []>} : vector<128x4xbf16>, vector<4x128xbf16>, vector<128x128xf32> -> vector<128x128xf32>
    %109 = arith.addf %103, %108 : vector<128x128xf32>
    %110 = vector.extract_strided_slice %97 {offsets = [0, 2, 0], sizes = [8, 16, 4], strides = [1, 1, 1]} : vector<8x18x4xbf16> to vector<8x16x4xbf16>
    %111 = vector.shape_cast %110 : vector<8x16x4xbf16> to vector<128x4xbf16>
    %c5_86 = arith.constant 5 : index
    %c0_87 = arith.constant 0 : index
    %c0_88 = arith.constant 0 : index
    %112 = vector.load %arg2[%c5_86, %c0_87, %c0_88] : memref<9x4x128xbf16, #tpu.memory_space<vmem>>, vector<1x4x128xbf16>
    %113 = vector.shape_cast %112 : vector<1x4x128xbf16> to vector<4x128xbf16>
    %cst_89 = arith.constant dense<0.000000e+00> : vector<128x128xf32>
    %114 = tpu.matmul %111, %113, %cst_89 {dimension_numbers = #tpu.dot_dimension_numbers<[1], [0], [0], [1], [0, 0, 1, 1], [], []>} : vector<128x4xbf16>, vector<4x128xbf16>, vector<128x128xf32> -> vector<128x128xf32>
    %115 = arith.addf %109, %114 : vector<128x128xf32>
    %c0_90 = arith.constant 0 : index
    %c10 = arith.constant 10 : index
    %c0_91 = arith.constant 0 : index
    %c0_92 = arith.constant 0 : index
    %116 = vector.load %arg6[%c0_90, %c10, %c0_91, %c0_92] : memref<2x18x18x4xbf16, #tpu.memory_space<vmem>>, vector<1x8x18x4xbf16>
    %117 = vector.shape_cast %116 : vector<1x8x18x4xbf16> to vector<8x18x4xbf16>
    %118 = vector.extract_strided_slice %117 {offsets = [0, 0, 0], sizes = [8, 16, 4], strides = [1, 1, 1]} : vector<8x18x4xbf16> to vector<8x16x4xbf16>
    %119 = vector.shape_cast %118 : vector<8x16x4xbf16> to vector<128x4xbf16>
    %c6_93 = arith.constant 6 : index
    %c0_94 = arith.constant 0 : index
    %c0_95 = arith.constant 0 : index
    %120 = vector.load %arg2[%c6_93, %c0_94, %c0_95] : memref<9x4x128xbf16, #tpu.memory_space<vmem>>, vector<1x4x128xbf16>
    %121 = vector.shape_cast %120 : vector<1x4x128xbf16> to vector<4x128xbf16>
    %cst_96 = arith.constant dense<0.000000e+00> : vector<128x128xf32>
    %122 = tpu.matmul %119, %121, %cst_96 {dimension_numbers = #tpu.dot_dimension_numbers<[1], [0], [0], [1], [0, 0, 1, 1], [], []>} : vector<128x4xbf16>, vector<4x128xbf16>, vector<128x128xf32> -> vector<128x128xf32>
    %123 = arith.addf %115, %122 : vector<128x128xf32>
    %124 = vector.extract_strided_slice %117 {offsets = [0, 1, 0], sizes = [8, 16, 4], strides = [1, 1, 1]} : vector<8x18x4xbf16> to vector<8x16x4xbf16>
    %125 = vector.shape_cast %124 : vector<8x16x4xbf16> to vector<128x4xbf16>
    %c7_97 = arith.constant 7 : index
    %c0_98 = arith.constant 0 : index
    %c0_99 = arith.constant 0 : index
    %126 = vector.load %arg2[%c7_97, %c0_98, %c0_99] : memref<9x4x128xbf16, #tpu.memory_space<vmem>>, vector<1x4x128xbf16>
    %127 = vector.shape_cast %126 : vector<1x4x128xbf16> to vector<4x128xbf16>
    %cst_100 = arith.constant dense<0.000000e+00> : vector<128x128xf32>
    %128 = tpu.matmul %125, %127, %cst_100 {dimension_numbers = #tpu.dot_dimension_numbers<[1], [0], [0], [1], [0, 0, 1, 1], [], []>} : vector<128x4xbf16>, vector<4x128xbf16>, vector<128x128xf32> -> vector<128x128xf32>
    %129 = arith.addf %123, %128 : vector<128x128xf32>
    %130 = vector.extract_strided_slice %117 {offsets = [0, 2, 0], sizes = [8, 16, 4], strides = [1, 1, 1]} : vector<8x18x4xbf16> to vector<8x16x4xbf16>
    %131 = vector.shape_cast %130 : vector<8x16x4xbf16> to vector<128x4xbf16>
    %c8_101 = arith.constant 8 : index
    %c0_102 = arith.constant 0 : index
    %c0_103 = arith.constant 0 : index
    %132 = vector.load %arg2[%c8_101, %c0_102, %c0_103] : memref<9x4x128xbf16, #tpu.memory_space<vmem>>, vector<1x4x128xbf16>
    %133 = vector.shape_cast %132 : vector<1x4x128xbf16> to vector<4x128xbf16>
    %cst_104 = arith.constant dense<0.000000e+00> : vector<128x128xf32>
    %134 = tpu.matmul %131, %133, %cst_104 {dimension_numbers = #tpu.dot_dimension_numbers<[1], [0], [0], [1], [0, 0, 1, 1], [], []>} : vector<128x4xbf16>, vector<4x128xbf16>, vector<128x128xf32> -> vector<128x128xf32>
    %135 = arith.addf %129, %134 : vector<128x128xf32>
    %cst_105 = arith.constant dense<0.000000e+00> : vector<128xf32>
    %136 = vector.multi_reduction <add>, %135, %cst_105 [0] : vector<128x128xf32> to vector<128xf32>
    %137 = vector.shape_cast %136 : vector<128xf32> to vector<1x128xf32>
    %138 = arith.addf %69, %137 : vector<1x128xf32>
    %139 = arith.mulf %135, %135 : vector<128x128xf32>
    %cst_106 = arith.constant dense<0.000000e+00> : vector<128xf32>
    %140 = vector.multi_reduction <add>, %139, %cst_106 [0] : vector<128x128xf32> to vector<128xf32>
    %141 = vector.shape_cast %140 : vector<128xf32> to vector<1x128xf32>
    %142 = arith.addf %73, %141 : vector<1x128xf32>
    %c128 = arith.constant 128 : index
    %c0_107 = arith.constant 0 : index
    %143 = vector.load %arg7[%c128, %c0_107] : memref<512x128xf32, #tpu.memory_space<vmem>>, vector<128x128xf32>
    tpu.vector_store %arg7[%c128, %c0_107], %135 {strides = array<i32>} : memref<512x128xf32, #tpu.memory_space<vmem>>, vector<128x128xf32>,
    %cst_108 = arith.constant 0.000000e+00 : f32
    %144 = vector.broadcast %cst_108 : f32 to vector<128x128xf32>
    %c1_109 = arith.constant 1 : index
    %c0_110 = arith.constant 0 : index
    %c0_111 = arith.constant 0 : index
    %c0_112 = arith.constant 0 : index
    %145 = vector.load %arg6[%c1_109, %c0_110, %c0_111, %c0_112] : memref<2x18x18x4xbf16, #tpu.memory_space<vmem>>, vector<1x8x18x4xbf16>
    %146 = vector.shape_cast %145 : vector<1x8x18x4xbf16> to vector<8x18x4xbf16>
    %147 = vector.extract_strided_slice %146 {offsets = [0, 0, 0], sizes = [8, 16, 4], strides = [1, 1, 1]} : vector<8x18x4xbf16> to vector<8x16x4xbf16>
    %148 = vector.shape_cast %147 : vector<8x16x4xbf16> to vector<128x4xbf16>
    %c0_113 = arith.constant 0 : index
    %c0_114 = arith.constant 0 : index
    %c0_115 = arith.constant 0 : index
    %149 = vector.load %arg2[%c0_113, %c0_114, %c0_115] : memref<9x4x128xbf16, #tpu.memory_space<vmem>>, vector<1x4x128xbf16>
    %150 = vector.shape_cast %149 : vector<1x4x128xbf16> to vector<4x128xbf16>
    %cst_116 = arith.constant dense<0.000000e+00> : vector<128x128xf32>
    %151 = tpu.matmul %148, %150, %cst_116 {dimension_numbers = #tpu.dot_dimension_numbers<[1], [0], [0], [1], [0, 0, 1, 1], [], []>} : vector<128x4xbf16>, vector<4x128xbf16>, vector<128x128xf32> -> vector<128x128xf32>
    %152 = arith.addf %144, %151 : vector<128x128xf32>
    %153 = vector.extract_strided_slice %146 {offsets = [0, 1, 0], sizes = [8, 16, 4], strides = [1, 1, 1]} : vector<8x18x4xbf16> to vector<8x16x4xbf16>
    %154 = vector.shape_cast %153 : vector<8x16x4xbf16> to vector<128x4xbf16>
    %c1_117 = arith.constant 1 : index
    %c0_118 = arith.constant 0 : index
    %c0_119 = arith.constant 0 : index
    %155 = vector.load %arg2[%c1_117, %c0_118, %c0_119] : memref<9x4x128xbf16, #tpu.memory_space<vmem>>, vector<1x4x128xbf16>
    %156 = vector.shape_cast %155 : vector<1x4x128xbf16> to vector<4x128xbf16>
    %cst_120 = arith.constant dense<0.000000e+00> : vector<128x128xf32>
    %157 = tpu.matmul %154, %156, %cst_120 {dimension_numbers = #tpu.dot_dimension_numbers<[1], [0], [0], [1], [0, 0, 1, 1], [], []>} : vector<128x4xbf16>, vector<4x128xbf16>, vector<128x128xf32> -> vector<128x128xf32>
    %158 = arith.addf %152, %157 : vector<128x128xf32>
    %159 = vector.extract_strided_slice %146 {offsets = [0, 2, 0], sizes = [8, 16, 4], strides = [1, 1, 1]} : vector<8x18x4xbf16> to vector<8x16x4xbf16>
    %160 = vector.shape_cast %159 : vector<8x16x4xbf16> to vector<128x4xbf16>
    %c2_121 = arith.constant 2 : index
    %c0_122 = arith.constant 0 : index
    %c0_123 = arith.constant 0 : index
    %161 = vector.load %arg2[%c2_121, %c0_122, %c0_123] : memref<9x4x128xbf16, #tpu.memory_space<vmem>>, vector<1x4x128xbf16>
    %162 = vector.shape_cast %161 : vector<1x4x128xbf16> to vector<4x128xbf16>
    %cst_124 = arith.constant dense<0.000000e+00> : vector<128x128xf32>
    %163 = tpu.matmul %160, %162, %cst_124 {dimension_numbers = #tpu.dot_dimension_numbers<[1], [0], [0], [1], [0, 0, 1, 1], [], []>} : vector<128x4xbf16>, vector<4x128xbf16>, vector<128x128xf32> -> vector<128x128xf32>
    %164 = arith.addf %158, %163 : vector<128x128xf32>
    %c1_125 = arith.constant 1 : index
    %c1_126 = arith.constant 1 : index
    %c0_127 = arith.constant 0 : index
    %c0_128 = arith.constant 0 : index
    %165 = vector.load %arg6[%c1_125, %c1_126, %c0_127, %c0_128] : memref<2x18x18x4xbf16, #tpu.memory_space<vmem>>, vector<1x8x18x4xbf16>
    %166 = vector.shape_cast %165 : vector<1x8x18x4xbf16> to vector<8x18x4xbf16>
    %167 = vector.extract_strided_slice %166 {offsets = [0, 0, 0], sizes = [8, 16, 4], strides = [1, 1, 1]} : vector<8x18x4xbf16> to vector<8x16x4xbf16>
    %168 = vector.shape_cast %167 : vector<8x16x4xbf16> to vector<128x4xbf16>
    %c3_129 = arith.constant 3 : index
    %c0_130 = arith.constant 0 : index
    %c0_131 = arith.constant 0 : index
    %169 = vector.load %arg2[%c3_129, %c0_130, %c0_131] : memref<9x4x128xbf16, #tpu.memory_space<vmem>>, vector<1x4x128xbf16>
    %170 = vector.shape_cast %169 : vector<1x4x128xbf16> to vector<4x128xbf16>
    %cst_132 = arith.constant dense<0.000000e+00> : vector<128x128xf32>
    %171 = tpu.matmul %168, %170, %cst_132 {dimension_numbers = #tpu.dot_dimension_numbers<[1], [0], [0], [1], [0, 0, 1, 1], [], []>} : vector<128x4xbf16>, vector<4x128xbf16>, vector<128x128xf32> -> vector<128x128xf32>
    %172 = arith.addf %164, %171 : vector<128x128xf32>
    %173 = vector.extract_strided_slice %166 {offsets = [0, 1, 0], sizes = [8, 16, 4], strides = [1, 1, 1]} : vector<8x18x4xbf16> to vector<8x16x4xbf16>
    %174 = vector.shape_cast %173 : vector<8x16x4xbf16> to vector<128x4xbf16>
    %c4_133 = arith.constant 4 : index
    %c0_134 = arith.constant 0 : index
    %c0_135 = arith.constant 0 : index
    %175 = vector.load %arg2[%c4_133, %c0_134, %c0_135] : memref<9x4x128xbf16, #tpu.memory_space<vmem>>, vector<1x4x128xbf16>
    %176 = vector.shape_cast %175 : vector<1x4x128xbf16> to vector<4x128xbf16>
    %cst_136 = arith.constant dense<0.000000e+00> : vector<128x128xf32>
    %177 = tpu.matmul %174, %176, %cst_136 {dimension_numbers = #tpu.dot_dimension_numbers<[1], [0], [0], [1], [0, 0, 1, 1], [], []>} : vector<128x4xbf16>, vector<4x128xbf16>, vector<128x128xf32> -> vector<128x128xf32>
    %178 = arith.addf %172, %177 : vector<128x128xf32>
    %179 = vector.extract_strided_slice %166 {offsets = [0, 2, 0], sizes = [8, 16, 4], strides = [1, 1, 1]} : vector<8x18x4xbf16> to vector<8x16x4xbf16>
    %180 = vector.shape_cast %179 : vector<8x16x4xbf16> to vector<128x4xbf16>
    %c5_137 = arith.constant 5 : index
    %c0_138 = arith.constant 0 : index
    %c0_139 = arith.constant 0 : index
    %181 = vector.load %arg2[%c5_137, %c0_138, %c0_139] : memref<9x4x128xbf16, #tpu.memory_space<vmem>>, vector<1x4x128xbf16>
    %182 = vector.shape_cast %181 : vector<1x4x128xbf16> to vector<4x128xbf16>
    %cst_140 = arith.constant dense<0.000000e+00> : vector<128x128xf32>
    %183 = tpu.matmul %180, %182, %cst_140 {dimension_numbers = #tpu.dot_dimension_numbers<[1], [0], [0], [1], [0, 0, 1, 1], [], []>} : vector<128x4xbf16>, vector<4x128xbf16>, vector<128x128xf32> -> vector<128x128xf32>
    %184 = arith.addf %178, %183 : vector<128x128xf32>
    %c1_141 = arith.constant 1 : index
    %c2_142 = arith.constant 2 : index
    %c0_143 = arith.constant 0 : index
    %c0_144 = arith.constant 0 : index
    %185 = vector.load %arg6[%c1_141, %c2_142, %c0_143, %c0_144] : memref<2x18x18x4xbf16, #tpu.memory_space<vmem>>, vector<1x8x18x4xbf16>
    %186 = vector.shape_cast %185 : vector<1x8x18x4xbf16> to vector<8x18x4xbf16>
    %187 = vector.extract_strided_slice %186 {offsets = [0, 0, 0], sizes = [8, 16, 4], strides = [1, 1, 1]} : vector<8x18x4xbf16> to vector<8x16x4xbf16>
    %188 = vector.shape_cast %187 : vector<8x16x4xbf16> to vector<128x4xbf16>
    %c6_145 = arith.constant 6 : index
    %c0_146 = arith.constant 0 : index
    %c0_147 = arith.constant 0 : index
    %189 = vector.load %arg2[%c6_145, %c0_146, %c0_147] : memref<9x4x128xbf16, #tpu.memory_space<vmem>>, vector<1x4x128xbf16>
    %190 = vector.shape_cast %189 : vector<1x4x128xbf16> to vector<4x128xbf16>
    %cst_148 = arith.constant dense<0.000000e+00> : vector<128x128xf32>
    %191 = tpu.matmul %188, %190, %cst_148 {dimension_numbers = #tpu.dot_dimension_numbers<[1], [0], [0], [1], [0, 0, 1, 1], [], []>} : vector<128x4xbf16>, vector<4x128xbf16>, vector<128x128xf32> -> vector<128x128xf32>
    %192 = arith.addf %184, %191 : vector<128x128xf32>
    %193 = vector.extract_strided_slice %186 {offsets = [0, 1, 0], sizes = [8, 16, 4], strides = [1, 1, 1]} : vector<8x18x4xbf16> to vector<8x16x4xbf16>
    %194 = vector.shape_cast %193 : vector<8x16x4xbf16> to vector<128x4xbf16>
    %c7_149 = arith.constant 7 : index
    %c0_150 = arith.constant 0 : index
    %c0_151 = arith.constant 0 : index
    %195 = vector.load %arg2[%c7_149, %c0_150, %c0_151] : memref<9x4x128xbf16, #tpu.memory_space<vmem>>, vector<1x4x128xbf16>
    %196 = vector.shape_cast %195 : vector<1x4x128xbf16> to vector<4x128xbf16>
    %cst_152 = arith.constant dense<0.000000e+00> : vector<128x128xf32>
    %197 = tpu.matmul %194, %196, %cst_152 {dimension_numbers = #tpu.dot_dimension_numbers<[1], [0], [0], [1], [0, 0, 1, 1], [], []>} : vector<128x4xbf16>, vector<4x128xbf16>, vector<128x128xf32> -> vector<128x128xf32>
    %198 = arith.addf %192, %197 : vector<128x128xf32>
    %199 = vector.extract_strided_slice %186 {offsets = [0, 2, 0], sizes = [8, 16, 4], strides = [1, 1, 1]} : vector<8x18x4xbf16> to vector<8x16x4xbf16>
    %200 = vector.shape_cast %199 : vector<8x16x4xbf16> to vector<128x4xbf16>
    %c8_153 = arith.constant 8 : index
    %c0_154 = arith.constant 0 : index
    %c0_155 = arith.constant 0 : index
    %201 = vector.load %arg2[%c8_153, %c0_154, %c0_155] : memref<9x4x128xbf16, #tpu.memory_space<vmem>>, vector<1x4x128xbf16>
    %202 = vector.shape_cast %201 : vector<1x4x128xbf16> to vector<4x128xbf16>
    %cst_156 = arith.constant dense<0.000000e+00> : vector<128x128xf32>
    %203 = tpu.matmul %200, %202, %cst_156 {dimension_numbers = #tpu.dot_dimension_numbers<[1], [0], [0], [1], [0, 0, 1, 1], [], []>} : vector<128x4xbf16>, vector<4x128xbf16>, vector<128x128xf32> -> vector<128x128xf32>
    %204 = arith.addf %198, %203 : vector<128x128xf32>
    %cst_157 = arith.constant dense<0.000000e+00> : vector<128xf32>
    %205 = vector.multi_reduction <add>, %204, %cst_157 [0] : vector<128x128xf32> to vector<128xf32>
    %206 = vector.shape_cast %205 : vector<128xf32> to vector<1x128xf32>
    %207 = arith.addf %138, %206 : vector<1x128xf32>
    %208 = arith.mulf %204, %204 : vector<128x128xf32>
    %cst_158 = arith.constant dense<0.000000e+00> : vector<128xf32>
    %209 = vector.multi_reduction <add>, %208, %cst_158 [0] : vector<128x128xf32> to vector<128xf32>
    %210 = vector.shape_cast %209 : vector<128xf32> to vector<1x128xf32>
    %211 = arith.addf %142, %210 : vector<1x128xf32>
    %c256 = arith.constant 256 : index
    %c0_159 = arith.constant 0 : index
    %212 = vector.load %arg7[%c256, %c0_159] : memref<512x128xf32, #tpu.memory_space<vmem>>, vector<128x128xf32>
    tpu.vector_store %arg7[%c256, %c0_159], %204 {strides = array<i32>} : memref<512x128xf32, #tpu.memory_space<vmem>>, vector<128x128xf32>,
    %cst_160 = arith.constant 0.000000e+00 : f32
    %213 = vector.broadcast %cst_160 : f32 to vector<128x128xf32>
    %c1_161 = arith.constant 1 : index
    %c8_162 = arith.constant 8 : index
    %c0_163 = arith.constant 0 : index
    %c0_164 = arith.constant 0 : index
    %214 = vector.load %arg6[%c1_161, %c8_162, %c0_163, %c0_164] : memref<2x18x18x4xbf16, #tpu.memory_space<vmem>>, vector<1x8x18x4xbf16>
    %215 = vector.shape_cast %214 : vector<1x8x18x4xbf16> to vector<8x18x4xbf16>
    %216 = vector.extract_strided_slice %215 {offsets = [0, 0, 0], sizes = [8, 16, 4], strides = [1, 1, 1]} : vector<8x18x4xbf16> to vector<8x16x4xbf16>
    %217 = vector.shape_cast %216 : vector<8x16x4xbf16> to vector<128x4xbf16>
    %c0_165 = arith.constant 0 : index
    %c0_166 = arith.constant 0 : index
    %c0_167 = arith.constant 0 : index
    %218 = vector.load %arg2[%c0_165, %c0_166, %c0_167] : memref<9x4x128xbf16, #tpu.memory_space<vmem>>, vector<1x4x128xbf16>
    %219 = vector.shape_cast %218 : vector<1x4x128xbf16> to vector<4x128xbf16>
    %cst_168 = arith.constant dense<0.000000e+00> : vector<128x128xf32>
    %220 = tpu.matmul %217, %219, %cst_168 {dimension_numbers = #tpu.dot_dimension_numbers<[1], [0], [0], [1], [0, 0, 1, 1], [], []>} : vector<128x4xbf16>, vector<4x128xbf16>, vector<128x128xf32> -> vector<128x128xf32>
    %221 = arith.addf %213, %220 : vector<128x128xf32>
    %222 = vector.extract_strided_slice %215 {offsets = [0, 1, 0], sizes = [8, 16, 4], strides = [1, 1, 1]} : vector<8x18x4xbf16> to vector<8x16x4xbf16>
    %223 = vector.shape_cast %222 : vector<8x16x4xbf16> to vector<128x4xbf16>
    %c1_169 = arith.constant 1 : index
    %c0_170 = arith.constant 0 : index
    %c0_171 = arith.constant 0 : index
    %224 = vector.load %arg2[%c1_169, %c0_170, %c0_171] : memref<9x4x128xbf16, #tpu.memory_space<vmem>>, vector<1x4x128xbf16>
    %225 = vector.shape_cast %224 : vector<1x4x128xbf16> to vector<4x128xbf16>
    %cst_172 = arith.constant dense<0.000000e+00> : vector<128x128xf32>
    %226 = tpu.matmul %223, %225, %cst_172 {dimension_numbers = #tpu.dot_dimension_numbers<[1], [0], [0], [1], [0, 0, 1, 1], [], []>} : vector<128x4xbf16>, vector<4x128xbf16>, vector<128x128xf32> -> vector<128x128xf32>
    %227 = arith.addf %221, %226 : vector<128x128xf32>
    %228 = vector.extract_strided_slice %215 {offsets = [0, 2, 0], sizes = [8, 16, 4], strides = [1, 1, 1]} : vector<8x18x4xbf16> to vector<8x16x4xbf16>
    %229 = vector.shape_cast %228 : vector<8x16x4xbf16> to vector<128x4xbf16>
    %c2_173 = arith.constant 2 : index
    %c0_174 = arith.constant 0 : index
    %c0_175 = arith.constant 0 : index
    %230 = vector.load %arg2[%c2_173, %c0_174, %c0_175] : memref<9x4x128xbf16, #tpu.memory_space<vmem>>, vector<1x4x128xbf16>
    %231 = vector.shape_cast %230 : vector<1x4x128xbf16> to vector<4x128xbf16>
    %cst_176 = arith.constant dense<0.000000e+00> : vector<128x128xf32>
    %232 = tpu.matmul %229, %231, %cst_176 {dimension_numbers = #tpu.dot_dimension_numbers<[1], [0], [0], [1], [0, 0, 1, 1], [], []>} : vector<128x4xbf16>, vector<4x128xbf16>, vector<128x128xf32> -> vector<128x128xf32>
    %233 = arith.addf %227, %232 : vector<128x128xf32>
    %c1_177 = arith.constant 1 : index
    %c9_178 = arith.constant 9 : index
    %c0_179 = arith.constant 0 : index
    %c0_180 = arith.constant 0 : index
    %234 = vector.load %arg6[%c1_177, %c9_178, %c0_179, %c0_180] : memref<2x18x18x4xbf16, #tpu.memory_space<vmem>>, vector<1x8x18x4xbf16>
    %235 = vector.shape_cast %234 : vector<1x8x18x4xbf16> to vector<8x18x4xbf16>
    %236 = vector.extract_strided_slice %235 {offsets = [0, 0, 0], sizes = [8, 16, 4], strides = [1, 1, 1]} : vector<8x18x4xbf16> to vector<8x16x4xbf16>
    %237 = vector.shape_cast %236 : vector<8x16x4xbf16> to vector<128x4xbf16>
    %c3_181 = arith.constant 3 : index
    %c0_182 = arith.constant 0 : index
    %c0_183 = arith.constant 0 : index
    %238 = vector.load %arg2[%c3_181, %c0_182, %c0_183] : memref<9x4x128xbf16, #tpu.memory_space<vmem>>, vector<1x4x128xbf16>
    %239 = vector.shape_cast %238 : vector<1x4x128xbf16> to vector<4x128xbf16>
    %cst_184 = arith.constant dense<0.000000e+00> : vector<128x128xf32>
    %240 = tpu.matmul %237, %239, %cst_184 {dimension_numbers = #tpu.dot_dimension_numbers<[1], [0], [0], [1], [0, 0, 1, 1], [], []>} : vector<128x4xbf16>, vector<4x128xbf16>, vector<128x128xf32> -> vector<128x128xf32>
    %241 = arith.addf %233, %240 : vector<128x128xf32>
    %242 = vector.extract_strided_slice %235 {offsets = [0, 1, 0], sizes = [8, 16, 4], strides = [1, 1, 1]} : vector<8x18x4xbf16> to vector<8x16x4xbf16>
    %243 = vector.shape_cast %242 : vector<8x16x4xbf16> to vector<128x4xbf16>
    %c4_185 = arith.constant 4 : index
    %c0_186 = arith.constant 0 : index
    %c0_187 = arith.constant 0 : index
    %244 = vector.load %arg2[%c4_185, %c0_186, %c0_187] : memref<9x4x128xbf16, #tpu.memory_space<vmem>>, vector<1x4x128xbf16>
    %245 = vector.shape_cast %244 : vector<1x4x128xbf16> to vector<4x128xbf16>
    %cst_188 = arith.constant dense<0.000000e+00> : vector<128x128xf32>
    %246 = tpu.matmul %243, %245, %cst_188 {dimension_numbers = #tpu.dot_dimension_numbers<[1], [0], [0], [1], [0, 0, 1, 1], [], []>} : vector<128x4xbf16>, vector<4x128xbf16>, vector<128x128xf32> -> vector<128x128xf32>
    %247 = arith.addf %241, %246 : vector<128x128xf32>
    %248 = vector.extract_strided_slice %235 {offsets = [0, 2, 0], sizes = [8, 16, 4], strides = [1, 1, 1]} : vector<8x18x4xbf16> to vector<8x16x4xbf16>
    %249 = vector.shape_cast %248 : vector<8x16x4xbf16> to vector<128x4xbf16>
    %c5_189 = arith.constant 5 : index
    %c0_190 = arith.constant 0 : index
    %c0_191 = arith.constant 0 : index
    %250 = vector.load %arg2[%c5_189, %c0_190, %c0_191] : memref<9x4x128xbf16, #tpu.memory_space<vmem>>, vector<1x4x128xbf16>
    %251 = vector.shape_cast %250 : vector<1x4x128xbf16> to vector<4x128xbf16>
    %cst_192 = arith.constant dense<0.000000e+00> : vector<128x128xf32>
    %252 = tpu.matmul %249, %251, %cst_192 {dimension_numbers = #tpu.dot_dimension_numbers<[1], [0], [0], [1], [0, 0, 1, 1], [], []>} : vector<128x4xbf16>, vector<4x128xbf16>, vector<128x128xf32> -> vector<128x128xf32>
    %253 = arith.addf %247, %252 : vector<128x128xf32>
    %c1_193 = arith.constant 1 : index
    %c10_194 = arith.constant 10 : index
    %c0_195 = arith.constant 0 : index
    %c0_196 = arith.constant 0 : index
    %254 = vector.load %arg6[%c1_193, %c10_194, %c0_195, %c0_196] : memref<2x18x18x4xbf16, #tpu.memory_space<vmem>>, vector<1x8x18x4xbf16>
    %255 = vector.shape_cast %254 : vector<1x8x18x4xbf16> to vector<8x18x4xbf16>
    %256 = vector.extract_strided_slice %255 {offsets = [0, 0, 0], sizes = [8, 16, 4], strides = [1, 1, 1]} : vector<8x18x4xbf16> to vector<8x16x4xbf16>
    %257 = vector.shape_cast %256 : vector<8x16x4xbf16> to vector<128x4xbf16>
    %c6_197 = arith.constant 6 : index
    %c0_198 = arith.constant 0 : index
    %c0_199 = arith.constant 0 : index
    %258 = vector.load %arg2[%c6_197, %c0_198, %c0_199] : memref<9x4x128xbf16, #tpu.memory_space<vmem>>, vector<1x4x128xbf16>
    %259 = vector.shape_cast %258 : vector<1x4x128xbf16> to vector<4x128xbf16>
    %cst_200 = arith.constant dense<0.000000e+00> : vector<128x128xf32>
    %260 = tpu.matmul %257, %259, %cst_200 {dimension_numbers = #tpu.dot_dimension_numbers<[1], [0], [0], [1], [0, 0, 1, 1], [], []>} : vector<128x4xbf16>, vector<4x128xbf16>, vector<128x128xf32> -> vector<128x128xf32>
    %261 = arith.addf %253, %260 : vector<128x128xf32>
    %262 = vector.extract_strided_slice %255 {offsets = [0, 1, 0], sizes = [8, 16, 4], strides = [1, 1, 1]} : vector<8x18x4xbf16> to vector<8x16x4xbf16>
    %263 = vector.shape_cast %262 : vector<8x16x4xbf16> to vector<128x4xbf16>
    %c7_201 = arith.constant 7 : index
    %c0_202 = arith.constant 0 : index
    %c0_203 = arith.constant 0 : index
    %264 = vector.load %arg2[%c7_201, %c0_202, %c0_203] : memref<9x4x128xbf16, #tpu.memory_space<vmem>>, vector<1x4x128xbf16>
    %265 = vector.shape_cast %264 : vector<1x4x128xbf16> to vector<4x128xbf16>
    %cst_204 = arith.constant dense<0.000000e+00> : vector<128x128xf32>
    %266 = tpu.matmul %263, %265, %cst_204 {dimension_numbers = #tpu.dot_dimension_numbers<[1], [0], [0], [1], [0, 0, 1, 1], [], []>} : vector<128x4xbf16>, vector<4x128xbf16>, vector<128x128xf32> -> vector<128x128xf32>
    %267 = arith.addf %261, %266 : vector<128x128xf32>
    %268 = vector.extract_strided_slice %255 {offsets = [0, 2, 0], sizes = [8, 16, 4], strides = [1, 1, 1]} : vector<8x18x4xbf16> to vector<8x16x4xbf16>
    %269 = vector.shape_cast %268 : vector<8x16x4xbf16> to vector<128x4xbf16>
    %c8_205 = arith.constant 8 : index
    %c0_206 = arith.constant 0 : index
    %c0_207 = arith.constant 0 : index
    %270 = vector.load %arg2[%c8_205, %c0_206, %c0_207] : memref<9x4x128xbf16, #tpu.memory_space<vmem>>, vector<1x4x128xbf16>
    %271 = vector.shape_cast %270 : vector<1x4x128xbf16> to vector<4x128xbf16>
    %cst_208 = arith.constant dense<0.000000e+00> : vector<128x128xf32>
    %272 = tpu.matmul %269, %271, %cst_208 {dimension_numbers = #tpu.dot_dimension_numbers<[1], [0], [0], [1], [0, 0, 1, 1], [], []>} : vector<128x4xbf16>, vector<4x128xbf16>, vector<128x128xf32> -> vector<128x128xf32>
    %273 = arith.addf %267, %272 : vector<128x128xf32>
    %cst_209 = arith.constant dense<0.000000e+00> : vector<128xf32>
    %274 = vector.multi_reduction <add>, %273, %cst_209 [0] : vector<128x128xf32> to vector<128xf32>
    %275 = vector.shape_cast %274 : vector<128xf32> to vector<1x128xf32>
    %276 = arith.addf %207, %275 : vector<1x128xf32>
    %277 = arith.mulf %273, %273 : vector<128x128xf32>
    %cst_210 = arith.constant dense<0.000000e+00> : vector<128xf32>
    %278 = vector.multi_reduction <add>, %277, %cst_210 [0] : vector<128x128xf32> to vector<128xf32>
    %279 = vector.shape_cast %278 : vector<128xf32> to vector<1x128xf32>
    %280 = arith.addf %211, %279 : vector<1x128xf32>
    %c384 = arith.constant 384 : index
    %c0_211 = arith.constant 0 : index
    %281 = vector.load %arg7[%c384, %c0_211] : memref<512x128xf32, #tpu.memory_space<vmem>>, vector<128x128xf32>
    tpu.vector_store %arg7[%c384, %c0_211], %273 {strides = array<i32>} : memref<512x128xf32, #tpu.memory_space<vmem>>, vector<128x128xf32>,
    %cst_212 = arith.constant 5.120000e+02 : f32
    %282 = vector.broadcast %cst_212 : f32 to vector<1x128xf32>
    %283 = arith.divf %276, %282 : vector<1x128xf32>
    %cst_213 = arith.constant 5.120000e+02 : f32
    %284 = vector.broadcast %cst_213 : f32 to vector<1x128xf32>
    %285 = arith.divf %280, %284 : vector<1x128xf32>
    %286 = arith.mulf %283, %283 : vector<1x128xf32>
    %287 = arith.subf %285, %286 : vector<1x128xf32>
    %c0_214 = arith.constant 0 : index
    %c0_215 = arith.constant 0 : index
    %288 = vector.load %arg3[%c0_214, %c0_215] : memref<1x128xf32, #tpu.memory_space<vmem>>, vector<1x128xf32>
    %cst_216 = arith.constant 9.99999974E-6 : f32
    %289 = vector.broadcast %cst_216 : f32 to vector<1x128xf32>
    %290 = arith.addf %287, %289 : vector<1x128xf32>
    %291 = math.rsqrt %290 : vector<1x128xf32>
    %292 = arith.mulf %288, %291 : vector<1x128xf32>
    %c0_217 = arith.constant 0 : index
    %c0_218 = arith.constant 0 : index
    %293 = vector.load %arg4[%c0_217, %c0_218] : memref<1x128xf32, #tpu.memory_space<vmem>>, vector<1x128xf32>
    %294 = arith.mulf %283, %292 : vector<1x128xf32>
    %295 = arith.subf %293, %294 : vector<1x128xf32>
    %c0_219 = arith.constant 0 : index
    %c0_220 = arith.constant 0 : index
    %296 = vector.load %arg7[%c0_219, %c0_220] : memref<512x128xf32, #tpu.memory_space<vmem>>, vector<128x128xf32>
    %297 = vector.broadcast %292 : vector<1x128xf32> to vector<128x128xf32>
    %298 = arith.mulf %296, %297 : vector<128x128xf32>
    %299 = vector.broadcast %295 : vector<1x128xf32> to vector<128x128xf32>
    %300 = arith.addf %298, %299 : vector<128x128xf32>
    %cst_221 = arith.constant 0.000000e+00 : f32
    %301 = vector.broadcast %cst_221 : f32 to vector<128x128xf32>
    %302 = arith.cmpf ogt, %300, %301 : vector<128x128xf32>
    %cst_222 = arith.constant 0.000000e+00 : f32
    %303 = vector.broadcast %cst_222 : f32 to vector<128x128xf32>
    %304 = arith.minimumf %300, %303 : vector<128x128xf32>
    %305 = math.exp %304 : vector<128x128xf32>
    %cst_223 = arith.constant 1.000000e+00 : f32
    %306 = vector.broadcast %cst_223 : f32 to vector<128x128xf32>
    %307 = arith.subf %305, %306 : vector<128x128xf32>
    %308 = arith.select %302, %300, %307 : vector<128x128xi1>, vector<128x128xf32>
    %309 = arith.truncf %308 : vector<128x128xf32> to vector<128x128xbf16>
    %c0_224 = arith.constant 0 : index
    %c0_225 = arith.constant 0 : index
    %310 = vector.load %arg5[%c0_224, %c0_225] : memref<512x128xbf16, #tpu.memory_space<vmem>>, vector<128x128xbf16>
    tpu.vector_store %arg5[%c0_224, %c0_225], %309 {strides = array<i32>} : memref<512x128xbf16, #tpu.memory_space<vmem>>, vector<128x128xbf16>,
    %c128_226 = arith.constant 128 : index
    %c0_227 = arith.constant 0 : index
    %311 = vector.load %arg7[%c128_226, %c0_227] : memref<512x128xf32, #tpu.memory_space<vmem>>, vector<128x128xf32>
    %312 = vector.broadcast %292 : vector<1x128xf32> to vector<128x128xf32>
    %313 = arith.mulf %311, %312 : vector<128x128xf32>
    %314 = vector.broadcast %295 : vector<1x128xf32> to vector<128x128xf32>
    %315 = arith.addf %313, %314 : vector<128x128xf32>
    %cst_228 = arith.constant 0.000000e+00 : f32
    %316 = vector.broadcast %cst_228 : f32 to vector<128x128xf32>
    %317 = arith.cmpf ogt, %315, %316 : vector<128x128xf32>
    %cst_229 = arith.constant 0.000000e+00 : f32
    %318 = vector.broadcast %cst_229 : f32 to vector<128x128xf32>
    %319 = arith.minimumf %315, %318 : vector<128x128xf32>
    %320 = math.exp %319 : vector<128x128xf32>
    %cst_230 = arith.constant 1.000000e+00 : f32
    %321 = vector.broadcast %cst_230 : f32 to vector<128x128xf32>
    %322 = arith.subf %320, %321 : vector<128x128xf32>
    %323 = arith.select %317, %315, %322 : vector<128x128xi1>, vector<128x128xf32>
    %324 = arith.truncf %323 : vector<128x128xf32> to vector<128x128xbf16>
    %c128_231 = arith.constant 128 : index
    %c0_232 = arith.constant 0 : index
    %325 = vector.load %arg5[%c128_231, %c0_232] : memref<512x128xbf16, #tpu.memory_space<vmem>>, vector<128x128xbf16>
    tpu.vector_store %arg5[%c128_231, %c0_232], %324 {strides = array<i32>} : memref<512x128xbf16, #tpu.memory_space<vmem>>, vector<128x128xbf16>,
    %c256_233 = arith.constant 256 : index
    %c0_234 = arith.constant 0 : index
    %326 = vector.load %arg7[%c256_233, %c0_234] : memref<512x128xf32, #tpu.memory_space<vmem>>, vector<128x128xf32>
    %327 = vector.broadcast %292 : vector<1x128xf32> to vector<128x128xf32>
    %328 = arith.mulf %326, %327 : vector<128x128xf32>
    %329 = vector.broadcast %295 : vector<1x128xf32> to vector<128x128xf32>
    %330 = arith.addf %328, %329 : vector<128x128xf32>
    %cst_235 = arith.constant 0.000000e+00 : f32
    %331 = vector.broadcast %cst_235 : f32 to vector<128x128xf32>
    %332 = arith.cmpf ogt, %330, %331 : vector<128x128xf32>
    %cst_236 = arith.constant 0.000000e+00 : f32
    %333 = vector.broadcast %cst_236 : f32 to vector<128x128xf32>
    %334 = arith.minimumf %330, %333 : vector<128x128xf32>
    %335 = math.exp %334 : vector<128x128xf32>
    %cst_237 = arith.constant 1.000000e+00 : f32
    %336 = vector.broadcast %cst_237 : f32 to vector<128x128xf32>
    %337 = arith.subf %335, %336 : vector<128x128xf32>
    %338 = arith.select %332, %330, %337 : vector<128x128xi1>, vector<128x128xf32>
    %339 = arith.truncf %338 : vector<128x128xf32> to vector<128x128xbf16>
    %c256_238 = arith.constant 256 : index
    %c0_239 = arith.constant 0 : index
    %340 = vector.load %arg5[%c256_238, %c0_239] : memref<512x128xbf16, #tpu.memory_space<vmem>>, vector<128x128xbf16>
    tpu.vector_store %arg5[%c256_238, %c0_239], %339 {strides = array<i32>} : memref<512x128xbf16, #tpu.memory_space<vmem>>, vector<128x128xbf16>,
    %c384_240 = arith.constant 384 : index
    %c0_241 = arith.constant 0 : index
    %341 = vector.load %arg7[%c384_240, %c0_241] : memref<512x128xf32, #tpu.memory_space<vmem>>, vector<128x128xf32>
    %342 = vector.broadcast %292 : vector<1x128xf32> to vector<128x128xf32>
    %343 = arith.mulf %341, %342 : vector<128x128xf32>
    %344 = vector.broadcast %295 : vector<1x128xf32> to vector<128x128xf32>
    %345 = arith.addf %343, %344 : vector<128x128xf32>
    %cst_242 = arith.constant 0.000000e+00 : f32
    %346 = vector.broadcast %cst_242 : f32 to vector<128x128xf32>
    %347 = arith.cmpf ogt, %345, %346 : vector<128x128xf32>
    %cst_243 = arith.constant 0.000000e+00 : f32
    %348 = vector.broadcast %cst_243 : f32 to vector<128x128xf32>
    %349 = arith.minimumf %345, %348 : vector<128x128xf32>
    %350 = math.exp %349 : vector<128x128xf32>
    %cst_244 = arith.constant 1.000000e+00 : f32
    %351 = vector.broadcast %cst_244 : f32 to vector<128x128xf32>
    %352 = arith.subf %350, %351 : vector<128x128xf32>
    %353 = arith.select %347, %345, %352 : vector<128x128xi1>, vector<128x128xf32>
    %354 = arith.truncf %353 : vector<128x128xf32> to vector<128x128xbf16>
    %c384_245 = arith.constant 384 : index
    %c0_246 = arith.constant 0 : index
    %355 = vector.load %arg5[%c384_245, %c0_246] : memref<512x128xbf16, #tpu.memory_space<vmem>>, vector<128x128xbf16>
    tpu.vector_store %arg5[%c384_245, %c0_246], %354 {strides = array<i32>} : memref<512x128xbf16, #tpu.memory_space<vmem>>, vector<128x128xbf16>,
    return
  }
  func.func @transform_0(%arg0: i32) -> (i32, i32, i32, i32) {
    %c0_i32 = arith.constant 0 : i32
    %c0_i32_0 = arith.constant 0 : i32
    %c0_i32_1 = arith.constant 0 : i32
    %c0_i32_2 = arith.constant 0 : i32
    %c0_i32_3 = arith.constant 0 : i32
    return %c0_i32, %c0_i32_0, %c0_i32_1, %c0_i32_2 : i32, i32, i32, i32
  }
  func.func @transform_1(%arg0: i32) -> (i32, i32, i32) {
    %c0_i32 = arith.constant 0 : i32
    %c0_i32_0 = arith.constant 0 : i32
    %c0_i32_1 = arith.constant 0 : i32
    %c0_i32_2 = arith.constant 0 : i32
    return %c0_i32, %c0_i32_0, %c0_i32_1 : i32, i32, i32
  }
  func.func @transform_2(%arg0: i32) -> (i32, i32) {
    %c0_i32 = arith.constant 0 : i32
    %c0_i32_0 = arith.constant 0 : i32
    %c0_i32_1 = arith.constant 0 : i32
    return %c0_i32, %c0_i32_0 : i32, i32
  }
  func.func @transform_3(%arg0: i32) -> (i32, i32) {
    %c0_i32 = arith.constant 0 : i32
    %c0_i32_0 = arith.constant 0 : i32
    %c0_i32_1 = arith.constant 0 : i32
    return %c0_i32, %c0_i32_0 : i32, i32
  }
  func.func @transform_4(%arg0: i32) -> (i32, i32) {
    %c0_i32 = arith.constant 0 : i32
    %c0_i32_0 = arith.constant 0 : i32
    %c0_i32_1 = arith.constant 0 : i32
    return %c0_i32, %c0_i32_0 : i32, i32
  }
}

</mosaic_0001>

<bundles_post_ra>
// kernel: tpu_custom_call.1
= control target key start
LH: loop header
LB: loop body
LE: loop exit
PB: predicated region body
PF: predicated region fallthrough
CT: control target
= control target key end

     0   :  { %vm1337_vm0 = vcmask 1041408   ;;  %vm19_vm1 = vcmask 27648   ;;  %v14025_v5 = vmov 0   ;;  %vm22_vm2 = vcmask 24576   ;;  %s20895_s0 = inlined_call_operand.vmem [shape: bf16[2,16,16,4], index: 0, kind: input, shape index: {}]   ;;  %s20896_s1 = inlined_call_operand.vmem [shape: bf16[9,4,128], index: 1, kind: input, shape index: {}]   ;;  %s20897_s2 = inlined_call_operand.vmem [shape: f32[1,128], index: 2, kind: input, shape index: {}]   ;;  %s20898_s3 = inlined_call_operand.vmem [shape: f32[1,128], index: 3, kind: input, shape index: {}]   ;;  %s20899_s4 = inlined_call_operand.hbm [shape: bf16[512,128], index: 4, kind: output, shape index: {}]  }
   0x1   :  { %v1090_v0 = vld [vmem:[%s20896_s1] sm:$0x3]  ;;  %v11696_v1 = vld [vmem:[%s20896_s1 + $0x2] sm:$0x3]  ;;  %20 = vst.msk [vmem:[#allocation2] sm:$0xf] %vm19_vm1, %v14025_v5 }
   0x2   :  { %13756 = vmatprep.subr.msk.bf16.mxu1 %vm1337_vm0, %v1090_v0  ;;  %v1503_v2 = vsel %vm1337_vm0, %v1090_v0, 0  ;;  %13755 = vmatprep.subr.msk.bf16.mxu0 %vm1337_vm0, %v11696_v1  ;;  %v14064_v3 = vsel %vm1337_vm0, %v11696_v1, 0  ;;  %v14069_v4 = vld [vmem:[%s20895_s0] sm:$0xf]  ;;  %21 = vst.msk [vmem:[#allocation2 + $0x4] sm:$0xf] %vm19_vm1, %v14025_v5 }
   0x3   :  { %13126 = vmatpush3.bf16.msra.mxu1 %v1503_v2  ;;  %24 = vst.msk [vmem:[#allocation2 + $0xc] sm:$0xf] %vm19_vm1, %v14025_v5  ;;  %25 = vst.msk [vmem:[#allocation2 + $0x10] sm:$0xf] %vm19_vm1, %v14025_v5  ;;  %13108 = vmatpush3.bf16.msra.mxu0 %v14064_v3  ;;  %v130_v6 = vld [vmem:[%s20895_s0 + $0x4] sm:$0xf] }
   0x4   :  { %27 = vst.msk [vmem:[#allocation2 + $0x18] sm:$0xf] %vm19_vm1, %v14025_v5  ;;  %28 = vst.msk [vmem:[#allocation2 + $0x1c] sm:$0xf] %vm19_vm1, %v14025_v5  ;;  %vm193_vm3 = vsmask.f32 256 }
   0x5   :  { %30 = vst.msk [vmem:[#allocation2 + $0x24] sm:$0xf] %vm19_vm1, %v14025_v5  ;;  %31 = vst.msk [vmem:[#allocation2 + $0x28] sm:$0xf] %vm19_vm1, %v14025_v5  ;;  %v197_v7 = vshrl.u32 %v14069_v4, 16  ;;  %v200_v8 = vshll.u32 %v14069_v4, 16 }
   0x6   :  { %33 = vst.msk [vmem:[#allocation2 + $0x30] sm:$0xf] %vm19_vm1, %v14025_v5  ;;  %34 = vst.msk [vmem:[#allocation2 + $0x34] sm:$0xf] %vm19_vm1, %v14025_v5  ;;  %vm194_vm4 = vsmask.f32 4368 }
   0x7   :  { %36 = vst.msk [vmem:[#allocation2 + $0x3c] sm:$0xf] %vm19_vm1, %v14025_v5  ;;  %37 = vst.msk [vmem:[#allocation2 + $0x40] sm:$0xf] %vm19_vm1, %v14025_v5  ;;  %v205_v9 = vshrl.u32 %v130_v6, 16  ;;  %v208_v10 = vshll.u32 %v130_v6, 16 }
   0x8   :  { %39 = vst.msk [vmem:[#allocation2 + $0x48] sm:$0xf] %vm19_vm1, %v14025_v5  ;;  %40 = vst.msk [vmem:[#allocation2 + $0x4c] sm:$0xf] %vm19_vm1, %v14025_v5  ;;  %v199_v11 = vrot.slane %v197_v7, 7  ;;  %vm1312_vm8 = vcmask 31744  }
   0x9   :  { %42 = vst.msk [vmem:[#allocation2 + $0x54] sm:$0xf] %vm19_vm1, %v14025_v5  ;;  %43 = vst.msk [vmem:[#allocation2 + $0x58] sm:$0xf] %vm19_vm1, %v14025_v5  ;;  %vm838_vm5 = vsmask.f32 7938 }
   0xa   :  { %45 = vst.msk [vmem:[#allocation2 + $0x60] sm:$0xf] %vm19_vm1, %v14025_v5  ;;  %46 = vst.msk [vmem:[#allocation2 + $0x64] sm:$0xf] %vm19_vm1, %v14025_v5  ;;  %vm1091_vm6 = vsmask.f32 3328  ;;  %v202_v15 = vor.u32 %v200_v8, %v199_v11 }
   0xb   :  { %48 = vst.msk [vmem:[#allocation2 + $0x6c] sm:$0xf] %vm19_vm1, %v14025_v5  ;;  %49 = vst.msk [vmem:[#allocation2 + $0x70] sm:$0xf] %vm19_vm1, %v14025_v5  ;;  %v207_v12 = vrot.slane %v205_v9, 7  ;;  %v20974_v14 = vmov 0 }
   0xc   :  { %51 = vst.msk [vmem:[#allocation2 + $0x78] sm:$0xf] %vm19_vm1, %v14025_v5  ;;  %52 = vst.msk [vmem:[#allocation2 + $0x7c] sm:$0xf] %vm19_vm1, %v14025_v5  ;;  %vm1092_vm7 = vsmask.f32 7440 }
   0xd   :  { %54 = vst.msk [vmem:[#allocation2 + $0x84] sm:$0xf] %vm19_vm1, %v14025_v5  ;;  %55 = vst.msk [vmem:[#allocation2 + $0x88] sm:$0xf] %vm19_vm1, %v14025_v5  ;;  %v11737_v13 = vld [vmem:[%s20896_s1 + $0x4] sm:$0x3]  ;;  %v210_v19 = vor.u32 %v208_v10, %v207_v12 }
   0xe   :  { %57 = vst.msk [vmem:[#allocation2 + $0x90] sm:$0xf] %vm19_vm1, %v14025_v5  ;;  %58 = vst.msk [vmem:[#allocation2 + $0x94] sm:$0xf] %vm19_vm1, %v14025_v5  ;;  %v203_v16 = vrot.slane %v199_v11, 4  ;;  %13757 = vmatprep.subr.msk.bf16.mxu0 %vm1337_vm0, %v11737_v13  ;;  %v212_v20 = vrot.slane %v207_v12, 4 }
   0xf   :  { %60 = vst.msk [vmem:[#allocation2 + $0x9c] sm:$0xf] %vm19_vm1, %v14025_v5  ;;  %61 = vst.msk [vmem:[#allocation2 + $0xa0] sm:$0xf] %vm19_vm1, %v14025_v5  ;;  %v11754_v17 = vld [vmem:[%s20896_s1 + $0x6] sm:$0x3] }
  0x10   :  { %63 = vst.msk [vmem:[#allocation2 + $0xa8] sm:$0xf] %vm19_vm1, %v14025_v5  ;;  %64 = vst.msk [vmem:[#allocation2 + $0xac] sm:$0xf] %vm19_vm1, %v14025_v5  ;;  %v131_v18 = vld [vmem:[%s20895_s0 + $0x8] sm:$0xf]  ;;  %13758 = vmatprep.subr.msk.bf16.mxu1 %vm1337_vm0, %v11754_v17 }
  0x11   :  { %66 = vst.msk [vmem:[#allocation2 + $0xb4] sm:$0xf] %vm19_vm1, %v14025_v5  ;;  %67 = vst.msk [vmem:[#allocation2 + $0xb8] sm:$0xf] %vm19_vm1, %v14025_v5  ;;  %v14310_v21 = vsel %vm1337_vm0, %v11737_v13, 0  ;;  %v14314_v22 = vsel %vm1337_vm0, %v11754_v17, 0 }
  0x12   :  { %69 = vst.msk [vmem:[#allocation2 + $0xc0] sm:$0xf] %vm19_vm1, %v14025_v5  ;;  %70 = vst.msk [vmem:[#allocation2 + $0xc4] sm:$0xf] %vm19_vm1, %v14025_v5  ;;  %v132_v23 = vld [vmem:[%s20895_s0 + $0xc] sm:$0xf] }
  0x13   :  { %72 = vst.msk [vmem:[#allocation2 + $0xcc] sm:$0xf] %vm19_vm1, %v14025_v5  ;;  %73 = vst.msk [vmem:[#allocation2 + $0xd0] sm:$0xf] %vm19_vm1, %v14025_v5  ;;  %v20977_v24 = vmov 0  ;;  %v214_v25 = vshrl.u32 %v131_v18, 16 }
  0x14   :  { %75 = vst.msk [vmem:[#allocation2 + $0xd8] sm:$0xf] %vm19_vm1, %v14025_v5  ;;  %76 = vst.msk [vmem:[#allocation2 + $0xdc] sm:$0xf] %vm19_vm1, %v14025_v5  ;;  %v217_v26 = vshll.u32 %v131_v18, 16  ;;  %v222_v27 = vshrl.u32 %v132_v23, 16 }
  0x15   :  { %78 = vst.msk [vmem:[#allocation2 + $0xe4] sm:$0xf] %vm19_vm1, %v14025_v5  ;;  %79 = vst.msk [vmem:[#allocation2 + $0xe8] sm:$0xf] %vm19_vm1, %v14025_v5  ;;  %v225_v28 = vshll.u32 %v132_v23, 16  ;;  %v20980_v37 = vmov 0 }
  0x16   :  { %81 = vst.msk [vmem:[#allocation2 + $0xf0] sm:$0xf] %vm19_vm1, %v14025_v5  ;;  %82 = vst.msk [vmem:[#allocation2 + $0xf4] sm:$0xf] %vm19_vm1, %v14025_v5  ;;  %v14325_v29 = vld [vmem:[#allocation2] sm:$0xf] }
  0x17   :  { %84 = vst.msk [vmem:[#allocation2 + $0xfc] sm:$0xf] %vm19_vm1, %v14025_v5  ;;  %85 = vst.msk [vmem:[#allocation2 + $0x100] sm:$0xf] %vm19_vm1, %v14025_v5  ;;  %v14327_v30 = vld [vmem:[#allocation2 + $0x4] sm:$0xf] }
  0x18   :  { %87 = vst.msk [vmem:[#allocation2 + $0x108] sm:$0xf] %vm19_vm1, %v14025_v5  ;;  %88 = vst.msk [vmem:[#allocation2 + $0x10c] sm:$0xf] %vm19_vm1, %v14025_v5  ;;  %v840_v32 = vld [vmem:[#allocation2 + $0xc] sm:$0xf]  ;;  %v11713_v36 = vcombine.low %v14325_v29, %v14327_v30 }
  0x19   :  { %90 = vst.msk [vmem:[#allocation2 + $0x114] sm:$0xf] %vm19_vm1, %v14025_v5  ;;  %91 = vst.msk [vmem:[#allocation2 + $0x118] sm:$0xf] %vm19_vm1, %v14025_v5  ;;  %v1095_v33 = vshrl.u32 %v14325_v29, 16  ;;  %v1098_v34 = vshll.u32 %v14325_v29, 16 }
  0x1a   :  { %93 = vst.msk [vmem:[#allocation2 + $0x120] sm:$0xf] %vm19_vm1, %v14025_v5  ;;  %94 = vst.msk [vmem:[#allocation2 + $0x124] sm:$0xf] %vm19_vm1, %v14025_v5  ;;  %v1108_v35 = vshrl.u32 %v14327_v30, 16  ;;  %v11729_v39 = vrot.slane %v14325_v29, 9  ;;  %13127 = vmatprep.mubr.msk.bf16.mxu1 %vm1312_vm8, %v11713_v36 }
  0x1b   :  { %96 = vst.msk [vmem:[#allocation2 + $0x12c] sm:$0xf] %vm19_vm1, %v14025_v5  ;;  %97 = vst.msk [vmem:[#allocation2 + $0x130] sm:$0xf] %vm19_vm1, %v14025_v5  ;;  %v1615_v40 = vrot.slane %v14327_v30, 5  ;;  %v1104_v42 = vshll.u32 %v14327_v30, 16 }
  0x1c   :  { %99 = vst.msk [vmem:[#allocation2 + $0x138] sm:$0xf] %vm19_vm1, %v14025_v5  ;;  %100 = vst.msk [vmem:[#allocation2 + $0x13c] sm:$0xf] %vm19_vm1, %v14025_v5  ;;  %v1097_v44 = vrot.slane %v1095_v33, 4  ;;  %v1100_v45 = vrot.slane %v1098_v34, 5 }
  0x1d   :  { %102 = vst.msk [vmem:[#allocation2 + $0x144] sm:$0xf] %vm19_vm1, %v14025_v5  ;;  %103 = vst.msk [vmem:[#allocation2 + $0x148] sm:$0xf] %vm19_vm1, %v14025_v5  ;;  %v1110_v46 = vrot.slane %v1108_v35, 4  ;;  %v14357_v49 = vrot.slane %v1615_v40, 4 }
  0x1e   :  { %105 = vst.msk [vmem:[#allocation2 + $0x150] sm:$0xf] %vm19_vm1, %v14025_v5  ;;  %106 = vst.msk [vmem:[#allocation2 + $0x154] sm:$0xf] %vm19_vm1, %v14025_v5  ;;  %v133_v48 = vld [vmem:[%s20895_s0 + $0x10] sm:$0xf]  ;;  %v1101_v54 = vor.u32 %v1100_v45, %v1097_v44 }
  0x1f   :  { %108 = vst.msk [vmem:[#allocation2 + $0x15c] sm:$0xf] %vm19_vm1, %v14025_v5  ;;  %109 = vst.msk [vmem:[#allocation2 + $0x160] sm:$0xf] %vm19_vm1, %v14025_v5  ;;  %v1106_v50 = vrot.slane %v1104_v42, 5  ;;  %vm1610_vm12 = vcmask 1042432  }
  0x20   :  { %111 = vst.msk [vmem:[#allocation2 + $0x168] sm:$0xf] %vm19_vm1, %v14025_v5  ;;  %112 = vst.msk [vmem:[#allocation2 + $0x16c] sm:$0xf] %vm19_vm1, %v14025_v5  ;;  %v134_v53 = vld [vmem:[%s20895_s0 + $0x14] sm:$0xf] }
  0x21   :  { %114 = vst.msk [vmem:[#allocation2 + $0x174] sm:$0xf] %vm19_vm1, %v14025_v5  ;;  %115 = vst.msk [vmem:[#allocation2 + $0x178] sm:$0xf] %vm19_vm1, %v14025_v5  ;;  %vm1611_vm13 = vcmask 1046532   ;;  %v216_v56 = vrot.slane %v214_v25, 7  ;;  %v1111_v59 = vor.u32 %v1110_v46, %v1106_v50 }
  0x22   :  { %117 = vst.msk [vmem:[#allocation2 + $0x180] sm:$0xf] %vm19_vm1, %v14025_v5  ;;  %118 = vst.msk [vmem:[#allocation2 + $0x184] sm:$0xf] %vm19_vm1, %v14025_v5  ;;  %v14365_v57 = vrot.slane %v222_v27, 7  ;;  %v231_v60 = vshrl.u32 %v133_v48, 16 }
  0x23   :  { %120 = vst.msk [vmem:[#allocation2 + $0x18c] sm:$0xf] %vm19_vm1, %v14025_v5  ;;  %121 = vst.msk [vmem:[#allocation2 + $0x190] sm:$0xf] %vm19_vm1, %v14025_v5  ;;  %v234_v61 = vshll.u32 %v133_v48, 16  ;;  %v239_v62 = vshrl.u32 %v134_v53, 16  ;;  %v219_v0 = vor.u32 %v217_v26, %v216_v56 }
  0x24   :  { %123 = vst.msk [vmem:[#allocation2 + $0x198] sm:$0xf] %vm19_vm1, %v14025_v5  ;;  %124 = vst.msk [vmem:[#allocation2 + $0x19c] sm:$0xf] %vm19_vm1, %v14025_v5  ;;  %v1102_v63 = vrot.slane %v1101_v54, 4  ;;  %v220_v1 = vrot.slane %v216_v56, 4  ;;  %v227_v2 = vor.u32 %v225_v28, %v14365_v57 }
  0x25   :  { %126 = vst.msk [vmem:[#allocation2 + $0x1a4] sm:$0xf] %vm19_vm1, %v14025_v5  ;;  %127 = vst.msk [vmem:[#allocation2 + $0x1a8] sm:$0xf] %vm19_vm1, %v14025_v5  ;;  %v849_v3 = vld [vmem:[#allocation2 + $0x18] sm:$0xf] }
  0x26   :  { %23 = vst.msk [vmem:[#allocation2 + $0x8] sm:$0x1] %vm22_vm2, %v14025_v5  ;;  %26 = vst.msk [vmem:[#allocation2 + $0x14] sm:$0x1] %vm22_vm2, %v14025_v5  ;;  %v233_v6 = vrot.slane %v231_v60, 7  ;;  %v241_v7 = vrot.slane %v239_v62, 7 }
  0x27   :  { %29 = vst.msk [vmem:[#allocation2 + $0x20] sm:$0x1] %vm22_vm2, %v14025_v5  ;;  %32 = vst.msk [vmem:[#allocation2 + $0x2c] sm:$0x1] %vm22_vm2, %v14025_v5  ;;  %v242_v8 = vshll.u32 %v134_v53, 16  ;;  %v229_v54 = vrot.slane %v14365_v57, 4 }
  0x28   :  { %35 = vst.msk [vmem:[#allocation2 + $0x38] sm:$0x1] %vm22_vm2, %v14025_v5  ;;  %38 = vst.msk [vmem:[#allocation2 + $0x44] sm:$0x1] %vm22_vm2, %v14025_v5  ;;  %v236_v18 = vor.u32 %v234_v61, %v233_v6  ;;  %v856_v26 = vld [vmem:[#allocation2 + $0x24] sm:$0xf] }
  0x29   :  { %41 = vst.msk [vmem:[#allocation2 + $0x50] sm:$0x1] %vm22_vm2, %v14025_v5  ;;  %44 = vst.msk [vmem:[#allocation2 + $0x5c] sm:$0x1] %vm22_vm2, %v14025_v5  ;;  %v237_v45 = vrot.slane %v233_v6, 4  ;;  %v244_v46 = vor.u32 %v242_v8, %v241_v7 }
  0x2a   :  { %47 = vst.msk [vmem:[#allocation2 + $0x68] sm:$0x1] %vm22_vm2, %v14025_v5  ;;  %50 = vst.msk [vmem:[#allocation2 + $0x74] sm:$0x1] %vm22_vm2, %v14025_v5 }
  0x2b   :  { %53 = vst.msk [vmem:[#allocation2 + $0x80] sm:$0x1] %vm22_vm2, %v14025_v5  ;;  %56 = vst.msk [vmem:[#allocation2 + $0x8c] sm:$0x1] %vm22_vm2, %v14025_v5 }
  0x2c   :  { %59 = vst.msk [vmem:[#allocation2 + $0x98] sm:$0x1] %vm22_vm2, %v14025_v5  ;;  %62 = vst.msk [vmem:[#allocation2 + $0xa4] sm:$0x1] %vm22_vm2, %v14025_v5 }
  0x2d   :  { %65 = vst.msk [vmem:[#allocation2 + $0xb0] sm:$0x1] %vm22_vm2, %v14025_v5  ;;  %68 = vst.msk [vmem:[#allocation2 + $0xbc] sm:$0x1] %vm22_vm2, %v14025_v5  ;;  %v14343_v38 = vld [vmem:[#allocation2 + $0x8] sm:$0x1] }
  0x2e   :  { %71 = vst.msk [vmem:[#allocation2 + $0xc8] sm:$0x1] %vm22_vm2, %v14025_v5  ;;  %74 = vst.msk [vmem:[#allocation2 + $0xd4] sm:$0x1] %vm22_vm2, %v14025_v5  ;;  %v846_v43 = vld [vmem:[#allocation2 + $0x14] sm:$0x1] }
  0x2f   :  { %77 = vst.msk [vmem:[#allocation2 + $0xe0] sm:$0x1] %vm22_vm2, %v14025_v5  ;;  %80 = vst.msk [vmem:[#allocation2 + $0xec] sm:$0x1] %vm22_vm2, %v14025_v5  ;;  %v1114_v47 = vshll.u32 %v14343_v38, 16  ;;  %v1618_v51 = vrot.slane %v14343_v38, 5 }
  0x30   :  { %83 = vst.msk [vmem:[#allocation2 + $0xf8] sm:$0x1] %vm22_vm2, %v14025_v5  ;;  %86 = vst.msk [vmem:[#allocation2 + $0x104] sm:$0x1] %vm22_vm2, %v14025_v5  ;;  %v853_v34 = vld [vmem:[#allocation2 + $0x20] sm:$0x1] }
  0x31   :  { %89 = vst.msk [vmem:[#allocation2 + $0x110] sm:$0x1] %vm22_vm2, %v14025_v5  ;;  %92 = vst.msk [vmem:[#allocation2 + $0x11c] sm:$0x1] %vm22_vm2, %v14025_v5  ;;  %v1116_v55 = vrot.slane %v1114_v47, 5 }
  0x32   :  { %95 = vst.msk [vmem:[#allocation2 + $0x128] sm:$0x1] %vm22_vm2, %v14025_v5  ;;  %98 = vst.msk [vmem:[#allocation2 + $0x134] sm:$0x1] %vm22_vm2, %v14025_v5  ;;  %v860_v48 = vld [vmem:[#allocation2 + $0x2c] sm:$0x1] }
  0x33   :  { %101 = vst.msk [vmem:[#allocation2 + $0x140] sm:$0x1] %vm22_vm2, %v14025_v5  ;;  %104 = vst.msk [vmem:[#allocation2 + $0x14c] sm:$0x1] %vm22_vm2, %v14025_v5 }
  0x34   :  { %107 = vst.msk [vmem:[#allocation2 + $0x158] sm:$0x1] %vm22_vm2, %v14025_v5  ;;  %110 = vst.msk [vmem:[#allocation2 + $0x164] sm:$0x1] %vm22_vm2, %v14025_v5 }
  0x35   :  { %113 = vst.msk [vmem:[#allocation2 + $0x170] sm:$0x1] %vm22_vm2, %v14025_v5  ;;  %116 = vst.msk [vmem:[#allocation2 + $0x17c] sm:$0x1] %vm22_vm2, %v14025_v5 }
  0x36   :  { %119 = vst.msk [vmem:[#allocation2 + $0x188] sm:$0x1] %vm22_vm2, %v14025_v5  ;;  %122 = vst.msk [vmem:[#allocation2 + $0x194] sm:$0x1] %vm22_vm2, %v14025_v5 }
  0x37   :  { %125 = vst.msk [vmem:[#allocation2 + $0x1a0] sm:$0x1] %vm22_vm2, %v14025_v5  ;;  %128 = vst.msk [vmem:[#allocation2 + $0x1ac] sm:$0x1] %vm22_vm2, %v14025_v5  ;;  %v1112_v5 = vrot.slane %v1111_v59, 4 }
  0x38   :  { %vm14298_vm9 = vmor %vm193_vm3, %vm194_vm4 }
  0x39   :  { %v20975_v14 = vsel %vm14298_vm9, 4294967295, %v20974_v14  ;;  %vm14321_vm10 = vmand %vm19_vm1, %vm838_vm5  ;;  %v211_v31 = vsel %vm14298_vm9, %v203_v16, %v210_v19  ;;  %v228_v16 = vsel %vm14298_vm9, %v220_v1, %v227_v2  ;;  %v245_v59 = vsel %vm14298_vm9, %v237_v45, %v244_v46  ;;  %v863_v1 = vld [vmem:[#allocation2 + $0x30] sm:$0xf] }
  0x3a   :  { %20976 = vst [vmem:[#allocation7_spill] sm:$0xff] %v20975_v14  ;;  %v20978_v24 = vsel %vm14321_vm10, 4294967295, %v20977_v24  ;;  %843 = vst.msk [vmem:[#allocation2 + $0x10] sm:$0xf] %vm19_vm1, %v211_v31  ;;  %v841_v41 = vsel %vm14321_vm10, %v202_v15, %v840_v32  ;;  %v850_v17 = vsel %vm14321_vm10, %v219_v0, %v849_v3  ;;  %v857_v47 = vsel %vm14321_vm10, %v236_v18, %v856_v26 }
  0x3b   :  { %20979 = vst [vmem:[#allocation8_spill] sm:$0xff] %v20978_v24  ;;  %vm14339_vm11 = vmand %vm22_vm2, %vm193_vm3 }
  0x3c   :  { %v20981_v37 = vsel %vm14339_vm11, 4294967295, %v20980_v37  ;;  %842 = vst [vmem:[#allocation2 + $0xc] sm:$0xf] %v841_v41  ;;  %v847_v52 = vsel %vm14339_vm11, %v212_v20, %v846_v43  ;;  %vm14369_vm14 = vmor %vm1091_vm6, %vm1092_vm7  ;;  %v135_v43 = vld [vmem:[%s20895_s0 + $0x18] sm:$0xf] }
  0x3d   :  { %20982 = vst [vmem:[#allocation9_spill] sm:$0xff] %v20981_v37  ;;  %848 = vst [vmem:[#allocation2 + $0x14] sm:$0x1] %v847_v52  ;;  %v1107_v11 = vsel %vm14369_vm14, %v1102_v63, %v1106_v50  ;;  %v1117_v15 = vsel %vm14369_vm14, %v1112_v5, %v1116_v55  ;;  %v136_v50 = vld [vmem:[%s20895_s0 + $0x1c] sm:$0xf]  ;;  %v246_v55 = vrot.slane %v241_v7, 4  ;;  %v854_v63 = vsel %vm14339_vm11, %v229_v54, %v853_v34 }
  0x3e   :  { %851 = vst [vmem:[#allocation2 + $0x18] sm:$0xf] %v850_v17  ;;  %852 = vst.msk [vmem:[#allocation2 + $0x1c] sm:$0xf] %vm19_vm1, %v228_v16  ;;  %v11697_v28 = vcombine.low %v1107_v11, %v1117_v15  ;;  %v248_v60 = vshrl.u32 %v135_v43, 16  ;;  %v251_v61 = vshll.u32 %v135_v43, 16 }
  0x3f   :  { %858 = vst [vmem:[#allocation2 + $0x24] sm:$0xf] %v857_v47  ;;  %vm14417_vm15 = vmor %vm1610_vm12, %vm1611_vm13  ;;  %v861_v57 = vsel %vm14339_vm11, %v246_v55, %v860_v48  ;;  %v256_v0 = vshrl.u32 %v136_v50, 16  ;;  %v259_v7 = vshll.u32 %v136_v50, 16  ;;  %v137_v16 = vld [vmem:[%s20895_s0 + $0x20] sm:$0xf] }
  0x40   :  { %13109 = vmatprep.mubr.msk.bf16.mxu0 %vm1312_vm8, %v11697_v28  ;;  %859 = vst.msk [vmem:[#allocation2 + $0x28] sm:$0xf] %vm19_vm1, %v245_v59  ;;  %855 = vst [vmem:[#allocation2 + $0x20] sm:$0x1] %v854_v63  ;;  %v250_v6 = vrot.slane %v248_v60, 7  ;;  %v14440_v8 = vsel %vm14417_vm15, %v11729_v39, %v1615_v40  ;;  %v265_v34 = vshrl.u32 %v137_v16, 16 }
  0x41   :  { %v14374_v4 = vld [vmem:[#allocation2 + $0x10] sm:$0xf]  ;;  %862 = vst [vmem:[#allocation2 + $0x2c] sm:$0x1] %v861_v57  ;;  %v268_v43 = vshll.u32 %v137_v16, 16 }
  0x42   :  { %v1132_v9 = vshrl.u32 %v14374_v4, 16  ;;  %v1622_v10 = vrot.slane %v14374_v4, 5  ;;  %v1128_v12 = vshll.u32 %v14374_v4, 16  ;;  %v253_v40 = vor.u32 %v251_v61, %v250_v6  ;;  %v14502_v16 = vld [vmem:[%s20896_s1 + $0xa] sm:$0x3] }
  0x43   :  { %v14381_v13 = vld [vmem:[#allocation2 + $0xc] sm:$0xf]  ;;  %v267_v48 = vrot.slane %v265_v34, 7 }
  0x44   :  { %v1119_v19 = vshrl.u32 %v14381_v13, 16  ;;  %v1122_v20 = vshll.u32 %v14381_v13, 16  ;;  %v11714_v23 = vcombine.low %v14381_v13, %v14374_v4  ;;  %v11730_v25 = vrot.slane %v14381_v13, 9  ;;  %v14399_v31 = vld [vmem:[#allocation2 + $0x14] sm:$0x1] }
  0x45   :  { %v14397_v27 = vrot.slane %v1622_v10, 4  ;;  %v1130_v32 = vrot.slane %v1128_v12, 5  ;;  %v1134_v33 = vrot.slane %v1132_v9, 4  ;;  %v1138_v41 = vshll.u32 %v14399_v31, 16  ;;  %v14430_v3 = vld [vmem:[#allocation2 + $0x18] sm:$0xf] }
  0x46   :  { %13128 = vmatmul.mubr.msk.bf16.vlgmr.msra.gmra.mxu1 %vm1312_vm8, %v11714_v23  ;;  %v1121_v35 = vrot.slane %v1119_v19, 4  ;;  %v1124_v36 = vrot.slane %v1122_v20, 5  ;;  %v1625_v42 = vrot.slane %v14399_v31, 5  ;;  %v14432_v5 = vld [vmem:[#allocation2 + $0x1c] sm:$0xf]  ;;  %v1143_v11 = vshrl.u32 %v14430_v3, 16 }
  0x47   :  { %v1135_v44 = vor.u32 %v1134_v33, %v1130_v32  ;;  %13162 = vmatpush3.bf16.msra.mxu1 %v14314_v22  ;;  %v1140_v53 = vrot.slane %v1138_v41, 5  ;;  %v20985_v22 = vmov 0  ;;  %v1146_v12 = vshll.u32 %v14430_v3, 16  ;;  %v14456_v23 = vld [vmem:[%s20895_s0 + $0x24] sm:$0xf] }
  0x48   :  { %v1125_v52 = vor.u32 %v1124_v36, %v1121_v35  ;;  %v20986_v22 = vsel %vm14417_vm15, 4294967295, %v20985_v22  ;;  %v1156_v15 = vshrl.u32 %v14432_v5, 16  ;;  %v11715_v29 = vcombine.low %v14430_v3, %v14432_v5  ;;  %v14460_v26 = vld [vmem:[#allocation2 + $0x24] sm:$0xf]  ;;  %v14471_v45 = vld [vmem:[#allocation2 + $0x28] sm:$0xf]  ;;  %13760 = vmatprep.subr.msk.bf16.mxu1 %vm1337_vm0, %v14502_v16 }
  0x49   :  { %20987 = vst [vmem:[#allocation10_spill] sm:$0xff] %v20986_v22  ;;  %v1136_v56 = vrot.slane %v1135_v44, 4  ;;  %v1152_v39 = vshll.u32 %v14432_v5, 16  ;;  %v1145_v17 = vrot.slane %v1143_v11, 4  ;;  %v1148_v18 = vrot.slane %v1146_v12, 5 }
  0x4a   :  { %v1126_v62 = vrot.slane %v1125_v52, 4  ;;  %v1158_v19 = vrot.slane %v1156_v15, 4  ;;  %v254_v20 = vrot.slane %v250_v6, 4  ;;  %13131 = vmatprep.mubr.msk.bf16.mxu1 %vm1312_vm8, %v11715_v29  ;;  %v864_v33 = vsel %vm14321_vm10, %v253_v40, %v863_v1  ;;  %v14469_v44 = vld [vmem:[#allocation2 + $0xc] sm:$0xf] }
  0x4b   :  { %v1141_v2 = vsel %vm14369_vm14, %v1136_v56, %v1140_v53  ;;  %v1154_v28 = vrot.slane %v1152_v39, 5  ;;  %v1167_v35 = vshrl.u32 %v14460_v26, 16  ;;  %v1170_v36 = vshll.u32 %v14460_v26, 16  ;;  %865 = vst [vmem:[#allocation2 + $0x30] sm:$0xf] %v864_v33 }
  0x4c   :  { %v1131_v9 = vsel %vm14369_vm14, %v1126_v62, %v1130_v32  ;;  %v14462_v32 = vrot.slane %v256_v0, 7  ;;  %v1149_v41 = vor.u32 %v1148_v18, %v1145_v17  ;;  %v273_v50 = vshrl.u32 %v14456_v23, 16  ;;  %v14475_v52 = vld [vmem:[#allocation2 + $0x10] sm:$0xf]  ;;  %v14480_v54 = vld [vmem:[#allocation2 + $0x20] sm:$0x1] }
  0x4d   :  { %v11698_v30 = vcombine.low %v1131_v9, %v1141_v2  ;;  %v1159_v46 = vor.u32 %v1158_v19, %v1154_v28  ;;  %v11716_v53 = vcombine.low %v14460_v26, %v14471_v45  ;;  %v14482_v56 = vld [vmem:[#allocation2 + $0x2c] sm:$0x1]  ;;  %v11755_v59 = vcombine.low %v14469_v44, %v14475_v52  ;;  %v870_v6 = vld [vmem:[#allocation2 + $0x3c] sm:$0xf]  ;;  %v14497_v15 = vld [vmem:[%s20896_s1 + $0x8] sm:$0x3] }
  0x4e   :  { %v261_v47 = vor.u32 %v259_v7, %v14462_v32  ;;  %v1150_v55 = vrot.slane %v1149_v41, 4  ;;  %v1162_v61 = vshll.u32 %v14480_v54, 16  ;;  %v1169_v62 = vrot.slane %v1167_v35, 4  ;;  %v139_v33 = vld [vmem:[%s20895_s0 + $0x28] sm:$0xf] }
  0x4f   :  { %13110 = vmatmul.mubr.msk.bf16.vlgmr.msra.gmra.mxu0 %vm1312_vm8, %v11698_v30  ;;  %v1160_v60 = vrot.slane %v1159_v46, 4  ;;  %v1172_v63 = vrot.slane %v1170_v36, 5  ;;  %13132 = vmatmul.mubr.msk.bf16.gmra.mxu1 %vm1312_vm8, %v11716_v53  ;;  %v1176_v0 = vshll.u32 %v14471_v45, 16  ;;  %v1186_v2 = vshll.u32 %v14482_v56, 16  ;;  %v874_v46 = vld [vmem:[#allocation2 + $0x44] sm:$0x1] }
  0x50   :  { %13144 = vmatpush3.bf16.msra.mxu0 %v14310_v21  ;;  %v1180_v21 = vshrl.u32 %v14471_v45, 16  ;;  %v1155_v57 = vsel %vm14369_vm14, %v1150_v55, %v1154_v28  ;;  %v1164_v7 = vrot.slane %v1162_v61, 5  ;;  %v262_v11 = vsel %vm14298_vm9, %v254_v20, %v261_v47 }
  0x51   :  { %v1173_v9 = vor.u32 %v1172_v63, %v1169_v62  ;;  %v270_v12 = vor.u32 %v268_v43, %v267_v48  ;;  %v1178_v30 = vrot.slane %v1176_v0, 5  ;;  %v1188_v29 = vrot.slane %v1186_v2, 5  ;;  %866 = vst.msk [vmem:[#allocation2 + $0x34] sm:$0xf] %vm19_vm1, %v262_v11  ;;  %13759 = vmatprep.subr.msk.bf16.mxu0 %vm1337_vm0, %v14497_v15  ;;  %v867_v43 = vld [vmem:[#allocation2 + $0x38] sm:$0x1] }
  0x52   :  { %v1182_v1 = vrot.slane %v1180_v21, 4  ;;  %v271_v39 = vrot.slane %v267_v48, 4  ;;  %v275_v40 = vrot.slane %v273_v50, 7  ;;  %v1165_v17 = vsel %vm14369_vm14, %v1160_v60, %v1164_v7  ;;  %v14511_v19 = vld [vmem:[#allocation2 + $0x30] sm:$0xf] }
  0x53   :  { %v1174_v18 = vrot.slane %v1173_v9, 4  ;;  %v276_v20 = vshll.u32 %v14456_v23, 16  ;;  %v871_v28 = vsel %vm14321_vm10, %v270_v12, %v870_v6  ;;  %v11699_v34 = vcombine.low %v1155_v57, %v1165_v17  ;;  %v140_v21 = vld [vmem:[%s20895_s0 + $0x2c] sm:$0xf]  ;;  %v141_v62 = vld [vmem:[%s20895_s0 + $0x30] sm:$0xf] }
  0x54   :  { %v1183_v35 = vor.u32 %v1182_v1, %v1178_v30  ;;  %v1191_v36 = vshrl.u32 %v14511_v19, 16  ;;  %v1194_v41 = vshll.u32 %v14511_v19, 16  ;;  %872 = vst [vmem:[#allocation2 + $0x3c] sm:$0xf] %v871_v28  ;;  %v263_v48 = vrot.slane %v14462_v32, 4 }
  0x55   :  { %v1179_v47 = vsel %vm14369_vm14, %v1174_v18, %v1178_v30  ;;  %v278_v23 = vor.u32 %v276_v20, %v275_v40  ;;  %v280_v50 = vrot.slane %v275_v40, 4  ;;  %13113 = vmatprep.mubr.msk.bf16.mxu0 %vm1312_vm8, %v11699_v34  ;;  %v282_v61 = vshrl.u32 %v139_v33, 16  ;;  %v877_v9 = vld [vmem:[#allocation2 + $0x48] sm:$0xf]  ;;  %v884_v28 = vld [vmem:[#allocation2 + $0x54] sm:$0xf] }
  0x56   :  { %v1184_v53 = vrot.slane %v1183_v35, 4  ;;  %v1193_v55 = vrot.slane %v1191_v36, 4  ;;  %v1196_v60 = vrot.slane %v1194_v41, 5  ;;  %v868_v32 = vsel %vm14339_vm11, %v263_v48, %v867_v43 }
  0x57   :  { %v279_v63 = vsel %vm14298_vm9, %v271_v39, %v278_v23  ;;  %v875_v57 = vsel %vm14339_vm11, %v280_v50, %v874_v46  ;;  %v285_v0 = vshll.u32 %v139_v33, 16  ;;  %869 = vst [vmem:[#allocation2 + $0x38] sm:$0x1] %v868_v32  ;;  %v284_v6 = vrot.slane %v282_v61, 7  ;;  %v14546_v33 = vld [vmem:[#allocation2 + $0x18] sm:$0xf] }
  0x58   :  { %v1189_v1 = vsel %vm14369_vm14, %v1184_v53, %v1188_v29  ;;  %873 = vst.msk [vmem:[#allocation2 + $0x40] sm:$0xf] %vm19_vm1, %v279_v63  ;;  %v1197_v2 = vor.u32 %v1196_v60, %v1193_v55  ;;  %876 = vst [vmem:[#allocation2 + $0x44] sm:$0x1] %v875_v57  ;;  %v290_v7 = vshrl.u32 %v140_v21, 16  ;;  %v293_v30 = vshll.u32 %v140_v21, 16 }
  0x59   :  { %v11700_v11 = vcombine.low %v1179_v47, %v1189_v1  ;;  %v14540_v12 = vld [vmem:[#allocation2 + $0x34] sm:$0xf]  ;;  %v299_v39 = vshrl.u32 %v141_v62, 16  ;;  %v302_v40 = vshll.u32 %v141_v62, 16  ;;  %v287_v35 = vor.u32 %v285_v0, %v284_v6  ;;  %v14556_v50 = vld [vmem:[#allocation2 + $0x1c] sm:$0xf] }
  0x5a   :  { %v1204_v17 = vshrl.u32 %v14540_v12, 16  ;;  %v11717_v18 = vcombine.low %v14511_v19, %v14540_v12  ;;  %v1198_v29 = vrot.slane %v1197_v2, 4  ;;  %v1200_v20 = vshll.u32 %v14540_v12, 16  ;;  %v142_v57 = vld [vmem:[%s20895_s0 + $0x34] sm:$0xf] }
  0x5b   :  { %13114 = vmatmul.mubr.msk.bf16.gmra.mxu0 %vm1312_vm8, %v11700_v11  ;;  %v14549_v34 = vld [vmem:[#allocation2 + $0x3c] sm:$0xf]  ;;  %v288_v36 = vrot.slane %v284_v6, 4  ;;  %v292_v41 = vrot.slane %v290_v7, 7  ;;  %v14551_v43 = vrot.slane %v299_v39, 7  ;;  %v878_v53 = vsel %vm14321_vm10, %v287_v35, %v877_v9 }
  0x5c   :  { %13135 = vmatprep.mubr.msk.bf16.mxu1 %vm1312_vm8, %v11717_v18  ;;  %v1215_v46 = vshrl.u32 %v14549_v34, 16  ;;  %v1218_v47 = vshll.u32 %v14549_v34, 16  ;;  %v1202_v23 = vrot.slane %v1200_v20, 5  ;;  %v1206_v48 = vrot.slane %v1204_v17, 4  ;;  %879 = vst [vmem:[#allocation2 + $0x48] sm:$0xf] %v878_v53 }
  0x5d   :  { %v295_v21 = vor.u32 %v293_v30, %v292_v41  ;;  %v304_v55 = vor.u32 %v302_v40, %v14551_v43  ;;  %v305_v60 = vrot.slane %v14551_v43, 4  ;;  %v11756_v9 = vcombine.low %v14546_v33, %v14556_v50 }
  0x5e   :  { %v1203_v61 = vsel %vm14369_vm14, %v1198_v29, %v1202_v23  ;;  %v1207_v62 = vor.u32 %v1206_v48, %v1202_v23  ;;  %v1217_v63 = vrot.slane %v1215_v46, 4  ;;  %v1220_v32 = vrot.slane %v1218_v47, 5  ;;  %v14569_v1 = vld [vmem:[#allocation2 + $0x38] sm:$0x1] }
  0x5f   :  { %v14567_v0 = vld [vmem:[#allocation2 + $0x40] sm:$0xf]  ;;  %v14571_v2 = vld [vmem:[#allocation2 + $0x44] sm:$0x1]  ;;  %v296_v6 = vsel %vm14298_vm9, %v288_v36, %v295_v21  ;;  %v885_v7 = vsel %vm14321_vm10, %v304_v55, %v884_v28  ;;  %v14584_v11 = vsel %vm14417_vm15, %v14357_v49, %v1618_v51  ;;  %v1210_v17 = vshll.u32 %v14569_v1, 16 }
  0x60   :  { %v1228_v30 = vshrl.u32 %v14567_v0, 16  ;;  %v11718_v39 = vcombine.low %v14549_v34, %v14567_v0  ;;  %v1208_v40 = vrot.slane %v1207_v62, 4  ;;  %880 = vst.msk [vmem:[#allocation2 + $0x4c] sm:$0xf] %vm19_vm1, %v296_v6  ;;  %886 = vst [vmem:[#allocation2 + $0x54] sm:$0xf] %v885_v7  ;;  %v1221_v18 = vor.u32 %v1220_v32, %v1217_v63 }
  0x61   :  { %v1224_v29 = vshll.u32 %v14567_v0, 16  ;;  %v1234_v38 = vshll.u32 %v14571_v2, 16  ;;  %v307_v20 = vshrl.u32 %v142_v57, 16  ;;  %v881_v28 = vld [vmem:[#allocation2 + $0x50] sm:$0x1]  ;;  %v1212_v49 = vrot.slane %v1210_v17, 5 }
  0x62   :  { %13136 = vmatmul.mubr.msk.bf16.gmra.mxu1 %vm1312_vm8, %v11718_v39  ;;  %v1230_v51 = vrot.slane %v1228_v30, 4  ;;  %v310_v35 = vshll.u32 %v142_v57, 16  ;;  %v297_v36 = vrot.slane %v292_v41, 4  ;;  %v1222_v43 = vrot.slane %v1221_v18, 4  ;;  %v888_v39 = vld [vmem:[#allocation2 + $0x5c] sm:$0x1] }
  0x63   :  { %v1226_v46 = vrot.slane %v1224_v29, 5  ;;  %v1236_v47 = vrot.slane %v1234_v38, 5  ;;  %v309_v23 = vrot.slane %v307_v20, 7  ;;  %v1213_v48 = vsel %vm14369_vm14, %v1208_v40, %v1212_v49  ;;  %v14602_v41 = vld [vmem:[#allocation2 + $0x48] sm:$0xf] }
  0x64   :  { %v882_v21 = vsel %vm14339_vm11, %v297_v36, %v881_v28  ;;  %v2042_v53 = vshrl.u32 %v14469_v44, 16  ;;  %v2045_v55 = vshll.u32 %v14469_v44, 16  ;;  %v11701_v62 = vcombine.low %v1203_v61, %v1213_v48 }
  0x65   :  { %v1227_v63 = vsel %vm14369_vm14, %v1222_v43, %v1226_v46  ;;  %v1231_v32 = vor.u32 %v1230_v51, %v1226_v46  ;;  %v312_v57 = vor.u32 %v310_v35, %v309_v23  ;;  %883 = vst [vmem:[#allocation2 + $0x50] sm:$0x1] %v882_v21  ;;  %v1239_v6 = vshrl.u32 %v14602_v41, 16 }
  0x66   :  { %v1242_v7 = vshll.u32 %v14602_v41, 16  ;;  %v314_v30 = vrot.slane %v309_v23, 4  ;;  %v2055_v40 = vshrl.u32 %v14475_v52, 16  ;;  %13117 = vmatprep.mubr.msk.bf16.mxu0 %vm1312_vm8, %v11701_v62  ;;  %v11738_v20 = vcombine.low %v14440_v8, %v14584_v11 }
  0x67   :  { %v1232_v17 = vrot.slane %v1231_v32, 4  ;;  %v14608_v61 = vld [vmem:[#allocation2 + $0x4c] sm:$0xf]  ;;  %v313_v18 = vsel %vm14298_vm9, %v305_v60, %v312_v57  ;;  %v14612_v29 = vld [vmem:[#allocation2 + $0x54] sm:$0xf]  ;;  %v1241_v36 = vrot.slane %v1239_v6, 4 }
  0x68   :  { %v1252_v28 = vshrl.u32 %v14608_v61, 16  ;;  %v11719_v49 = vcombine.low %v14602_v41, %v14608_v61  ;;  %887 = vst.msk [vmem:[#allocation2 + $0x58] sm:$0xf] %vm19_vm1, %v313_v18  ;;  %v1263_v51 = vshrl.u32 %v14612_v29, 16  ;;  %v1266_v35 = vshll.u32 %v14612_v29, 16 }
  0x69   :  { %v1237_v60 = vsel %vm14369_vm14, %v1232_v17, %v1236_v47  ;;  %v1244_v43 = vrot.slane %v1242_v7, 5  ;;  %v1248_v46 = vshll.u32 %v14608_v61, 16  ;;  %v889_v21 = vsel %vm14339_vm11, %v314_v30, %v888_v39  ;;  %v14629_v32 = vld [vmem:[#allocation2 + $0x24] sm:$0xf]  ;;  %v14632_v6 = vld [vmem:[#allocation2 + $0x28] sm:$0xf] }
  0x6a   :  { %v11702_v23 = vcombine.low %v1227_v63, %v1237_v60  ;;  %13139 = vmatprep.mubr.msk.bf16.mxu1 %vm1312_vm8, %v11719_v49  ;;  %v1254_v48 = vrot.slane %v1252_v28, 4  ;;  %v1265_v62 = vrot.slane %v1263_v51, 4  ;;  %890 = vst [vmem:[#allocation2 + $0x5c] sm:$0x1] %v889_v21  ;;  %v1268_v38 = vrot.slane %v1266_v35, 5 }
  0x6b   :  { %v1245_v57 = vor.u32 %v1244_v43, %v1241_v36  ;;  %v1250_v18 = vrot.slane %v1248_v46, 5  ;;  %v2069_v47 = vshll.u32 %v14546_v33, 16  ;;  %v14644_v30 = vsel %vm14417_vm15, %v11730_v25, %v1622_v10  ;;  %v14707_v21 = vld [vmem:[#allocation2 + $0x48] sm:$0xf]  ;;  %v14714_v31 = vld [vmem:[#allocation2 + $0x4c] sm:$0xf] }
  0x6c   :  { %13118 = vmatmul.mubr.msk.bf16.gmra.mxu0 %vm1312_vm8, %v11702_v23  ;;  %v14635_v63 = vld [vmem:[#allocation2 + $0x50] sm:$0x1]  ;;  %v14651_v39 = vsel %vm14417_vm15, %v14397_v27, %v1625_v42  ;;  %v14655_v17 = vsel %vm1337_vm0, %v14497_v15, 0  ;;  %v1269_v13 = vor.u32 %v1268_v38, %v1265_v62  ;;  %v14662_v25 = vsel %vm1337_vm0, %v14502_v16, 0  ;;  %v14669_v15 = vld [vmem:[#allocation2 + $0x34] sm:$0xf] }
  0x6d   :  { %v1246_v28 = vrot.slane %v1245_v57, 4  ;;  %v1255_v49 = vor.u32 %v1254_v48, %v1250_v18  ;;  %v1258_v4 = vshll.u32 %v14635_v63, 16  ;;  %v11739_v10 = vcombine.low %v14644_v30, %v14651_v39  ;;  %v14667_v42 = vld [vmem:[#allocation2 + $0x30] sm:$0xf] }
  0x6e   :  { %v11757_v27 = vcombine.low %v14629_v32, %v14632_v6  ;;  %v1270_v36 = vrot.slane %v1269_v13, 4  ;;  %v11758_v62 = vcombine.low %v14667_v42, %v14669_v15  ;;  %v11731_v57 = vrot.slane %v14430_v3, 9 }
  0x6f   :  { %v14671_v51 = vld [vmem:[#allocation2 + $0x58] sm:$0xf]  ;;  %v1251_v38 = vsel %vm14369_vm14, %v1246_v28, %v1250_v18  ;;  %v1256_v35 = vrot.slane %v1255_v49, 4  ;;  %v1260_v60 = vrot.slane %v1258_v4, 5  ;;  %v14686_v18 = vld [vmem:[#allocation2 + $0x3c] sm:$0xf] }
  0x70   :  { %v1276_v16 = vshrl.u32 %v14671_v51, 16  ;;  %v11720_v43 = vcombine.low %v14612_v29, %v14671_v51  ;;  %v1272_v46 = vshll.u32 %v14671_v51, 16  ;;  %v11732_v23 = vrot.slane %v14460_v26, 9 }
  0x71   :  { %v1261_v48 = vsel %vm14369_vm14, %v1256_v35, %v1260_v60  ;;  %v14689_v49 = vld [vmem:[#allocation2 + $0x5c] sm:$0x1]  ;;  %v1636_v60 = vrot.slane %v14471_v45, 5  ;;  %v14742_v45 = vld [vmem:[#allocation2 + $0x54] sm:$0xf]  ;;  %v1664_v7 = vrot.slane %v14671_v51, 5 }
  0x72   :  { %13140 = vmatmul.mubr.msk.bf16.gmra.mxu1 %vm1312_vm8, %v11720_v43  ;;  %v11703_v28 = vcombine.low %v1251_v38, %v1261_v48  ;;  %v1274_v4 = vrot.slane %v1272_v46, 5  ;;  %v1278_v13 = vrot.slane %v1276_v16, 4  ;;  %v1282_v35 = vshll.u32 %v14689_v49, 16  ;;  %v14700_v38 = vld [vmem:[#allocation2 + $0x40] sm:$0xf] }
  0x73   :  { %13163 = vmatprep.mubr.msk.bf16.mxu1 %vm1312_vm8, %v11755_v59  ;;  %v1629_v43 = vrot.slane %v14432_v5, 5  ;;  %v1632_v48 = vrot.slane %v14480_v54, 5  ;;  %v11759_v54 = vcombine.low %v14686_v18, %v14700_v38 }
  0x74   :  { %13121 = vmatprep.mubr.msk.bf16.mxu0 %vm1312_vm8, %v11703_v28  ;;  %v1275_v16 = vsel %vm14369_vm14, %v1270_v36, %v1274_v4  ;;  %v1279_v46 = vor.u32 %v1278_v13, %v1274_v4  ;;  %v1284_v59 = vrot.slane %v1282_v35, 5  ;;  %v1639_v36 = vrot.slane %v14482_v56, 5 }
  0x75   :  { %v14711_v3 = vsel %vm14417_vm15, %v11731_v57, %v1629_v43  ;;  %v1631_v5 = vrot.slane %v1629_v43, 4  ;;  %v14726_v57 = vsel %vm14417_vm15, %v11732_v23, %v1636_v60  ;;  %v1638_v13 = vrot.slane %v1636_v60, 4  ;;  %v14761_v60 = vld [vmem:[%s20896_s1 + $0xe] sm:$0x3] }
  0x76   :  { %v1280_v28 = vrot.slane %v1279_v46, 4  ;;  %v11760_v46 = vcombine.low %v14707_v21, %v14714_v31  ;;  %v11734_v23 = vrot.slane %v14549_v34, 9  ;;  %v1650_v43 = vrot.slane %v14567_v0, 5 }
  0x77   :  { %v14722_v4 = vsel %vm14417_vm15, %v1631_v5, %v1632_v48  ;;  %v14738_v5 = vsel %vm14417_vm15, %v1638_v13, %v1639_v36  ;;  %v11733_v13 = vrot.slane %v14511_v19, 9  ;;  %v1653_v36 = vrot.slane %v14571_v2, 5  ;;  %v144_v19 = vld [vmem:[%s20895_s0 + $0x3c] sm:$0xf] }
  0x78   :  { %v1285_v35 = vsel %vm14369_vm14, %v1280_v28, %v1284_v59  ;;  %v11740_v56 = vcombine.low %v14711_v3, %v14722_v4  ;;  %v14744_v59 = vld [vmem:[#allocation2 + $0x58] sm:$0xf]  ;;  %v14789_v8 = vsel %vm14417_vm15, %v11734_v23, %v1650_v43  ;;  %v1652_v2 = vrot.slane %v1650_v43, 4 }
  0x79   :  { %v11704_v48 = vcombine.low %v1275_v16, %v1285_v35  ;;  %v143_v28 = vld [vmem:[%s20895_s0 + $0x38] sm:$0xf]  ;;  %v11741_v16 = vcombine.low %v14726_v57, %v14738_v5  ;;  %v1643_v35 = vrot.slane %v14540_v12, 5  ;;  %v11761_v0 = vcombine.low %v14742_v45, %v14744_v59 }
  0x7a   :  { %13164 = vmatmul.mubr.msk.bf16.vlgmr.msra.gmra.mxu1 %vm1312_vm8, %v11756_v9  ;;  %v1646_v9 = vrot.slane %v14569_v1, 5  ;;  %v14803_v43 = vsel %vm14417_vm15, %v1652_v2, %v1653_v36  ;;  %v327_v23 = vshll.u32 %v144_v19, 16  ;;  %v1667_v36 = vrot.slane %v14689_v49, 5 }
  0x7b   :  { %13122 = vmatmul.mubr.msk.bf16.gmra.mxu0 %vm1312_vm8, %v11704_v48  ;;  %13198 = vmatpush3.bf16.msra.mxu1 %v14662_v25  ;;  %v14782_v12 = vsel %vm14417_vm15, %v11733_v13, %v1643_v35  ;;  %v1645_v34 = vrot.slane %v1643_v35, 4  ;;  %v319_v48 = vshll.u32 %v143_v28, 16  ;;  %v324_v13 = vshrl.u32 %v144_v19, 16  ;;  %v1837_v19 = vld [vmem:[#allocation2 + $0x14] sm:$0x1] }
  0x7c   :  { %13145 = vmatprep.mubr.msk.bf16.mxu0 %vm1312_vm8, %v11738_v20  ;;  %13167 = vmatprep.mubr.msk.bf16.mxu1 %vm1312_vm8, %v11757_v27  ;;  %v316_v27 = vshrl.u32 %v143_v28, 16  ;;  %v11735_v20 = vrot.slane %v14602_v41, 9  ;;  %v11743_v11 = vcombine.low %v14789_v8, %v14803_v43  ;;  %v1657_v28 = vrot.slane %v14608_v61, 5 }
  0x7d   :  { %13762 = vmatprep.subr.msk.bf16.mxu1 %vm1337_vm0, %v14761_v60  ;;  %v14797_v25 = vsel %vm14417_vm15, %v1645_v34, %v1646_v9  ;;  %v14808_v26 = vrot.slane %v324_v13, 7  ;;  %v891_v9 = vld [vmem:[#allocation2 + $0x60] sm:$0xf]  ;;  %v1660_v34 = vrot.slane %v14635_v63, 5  ;;  %v11736_v35 = vrot.slane %v14612_v29, 9 }
  0x7e   :  { %v318_v1 = vrot.slane %v316_v27, 7  ;;  %v14822_v61 = vsel %vm14417_vm15, %v11735_v20, %v1657_v28  ;;  %v11813_v29 = vld [vmem:[%s20896_s1 + $0xc] sm:$0x3]  ;;  %v1659_v63 = vrot.slane %v1657_v28, 4  ;;  %v11788_v49 = vrot.slane %v14469_v44, 9 }
  0x7f   :  { %v329_v27 = vor.u32 %v327_v23, %v14808_v26  ;;  %v14837_v51 = vsel %vm14417_vm15, %v11736_v35, %v1664_v7  ;;  %v11789_v3 = vrot.slane %v14546_v33, 9  ;;  %v2416_v4 = vrot.slane %v14556_v50, 5 }
  0x80   :  { %v321_v41 = vor.u32 %v319_v48, %v318_v1  ;;  %v322_v2 = vrot.slane %v318_v1, 4  ;;  %v1840_v1 = vld [vmem:[#allocation2 + $0x20] sm:$0x1] }
  0x82   :  { %13168 = vmatmul.mubr.msk.bf16.gmra.mxu1 %vm1312_vm8, %v11758_v62  ;;  %v1666_v62 = vrot.slane %v1664_v7, 4  ;;  %v330_v30 = vsel %vm14298_vm9, %v322_v2, %v329_v27  ;;  %v892_v39 = vsel %vm14321_vm10, %v321_v41, %v891_v9  ;;  %v14853_v7 = vsel %vm14417_vm15, %v1659_v63, %v1660_v34 }
  0x83   :  { %13146 = vmatmul.mubr.msk.bf16.vlgmr.msra.gmra.mxu0 %vm1312_vm8, %v11739_v10  ;;  %13171 = vmatprep.mubr.msk.bf16.mxu1 %vm1312_vm8, %v11759_v54  ;;  %v2409_v10 = vrot.slane %v14475_v52, 5  ;;  %v2412_v54 = vrot.slane %v1837_v19, 5  ;;  %893 = vst [vmem:[#allocation2 + $0x60] sm:$0xf] %v892_v39  ;;  %894 = vst.msk [vmem:[#allocation2 + $0x64] sm:$0xf] %vm19_vm1, %v330_v30 }
  0x84   :  { %13180 = vmatpush3.bf16.msra.mxu0 %v14655_v17  ;;  %13149 = vmatprep.mubr.msk.bf16.mxu0 %vm1312_vm8, %v11740_v56  ;;  %v14857_v17 = vsel %vm14417_vm15, %v1666_v62, %v1667_v36  ;;  %v11744_v56 = vcombine.low %v14822_v61, %v14853_v7 }
  0x85   :  { %13761 = vmatprep.subr.msk.bf16.mxu0 %vm1337_vm0, %v11813_v29  ;;  %v11745_v20 = vcombine.low %v14837_v51, %v14857_v17  ;;  %v2410_v48 = vsel %vm14417_vm15, %v11788_v49, %v2409_v10  ;;  %v2411_v13 = vrot.slane %v2409_v10, 4 }
  0x86   :  { %9 = vsyncpa [#allocation5], 0  ;;  %v14870_v35 = vsel %vm14417_vm15, %v11789_v3, %v2416_v4  ;;  %v2418_v23 = vrot.slane %v2416_v4, 4  ;;  %v2419_v9 = vrot.slane %v1840_v1, 5  ;;  %v2044_v28 = vrot.slane %v2042_v53, 4 }
  0x87   :  { %v2413_v34 = vsel %vm14417_vm15, %v2411_v13, %v2412_v54  ;;  %v2047_v36 = vrot.slane %v2045_v55, 5  ;;  %v2051_v41 = vshll.u32 %v14475_v52, 16  ;;  %v2057_v2 = vrot.slane %v2055_v40, 4 }
  0x88   :  { %v11797_v27 = vcombine.low %v2410_v48, %v2413_v34  ;;  %v14883_v63 = vsel %vm14417_vm15, %v2418_v23, %v2419_v9  ;;  %v2061_v62 = vshll.u32 %v1837_v19, 16  ;;  %v20988_v49 = vshrl.u32 %v14546_v33, 16 }
  0x89   :  { %v11798_v44 = vcombine.low %v14870_v35, %v14883_v63  ;;  %v2048_v55 = vor.u32 %v2047_v36, %v2044_v28  ;;  %v2053_v52 = vrot.slane %v2051_v41, 5  ;;  %v2071_v40 = vrot.slane %v2069_v47, 5  ;;  %v1846_v36 = vld [vmem:[#allocation2 + $0x38] sm:$0x1] }
  0x8a   :  { %v2068_v53 = vrot.slane %v20988_v49, 4  ;;  %13172 = vmatmul.mubr.msk.bf16.gmra.mxu1 %vm1312_vm8, %v11760_v46  ;;  %v2063_v19 = vrot.slane %v2061_v62, 5  ;;  %v2075_v46 = vshll.u32 %v14556_v50, 16  ;;  %v20989_v30 = vshrl.u32 %v14556_v50, 16  ;;  %v14910_v47 = vld [vmem:[#allocation2 + $0x60] sm:$0xf] }
  0x8b   :  { %13150 = vmatmul.mubr.msk.bf16.gmra.mxu0 %vm1312_vm8, %v11741_v16  ;;  %13175 = vmatprep.mubr.msk.bf16.mxu1 %vm1312_vm8, %v11761_v0  ;;  %v2085_v10 = vshll.u32 %v1840_v1, 16  ;;  %v20990_v33 = vcombine.low %v14782_v12, %v14797_v25  ;;  %v14912_v57 = vld [vmem:[#allocation2 + $0x64] sm:$0xf]  ;;  %v2049_v5 = vrot.slane %v2048_v55, 4  ;;  %v2058_v16 = vor.u32 %v2057_v2, %v2053_v52  ;;  %v1843_v25 = vld [vmem:[#allocation2 + $0x2c] sm:$0x1] }
  0x8c   :  { %v2081_v39 = vrot.slane %v20989_v30, 4  ;;  %v2072_v54 = vor.u32 %v2071_v40, %v2068_v53  ;;  %v14915_v0 = vsel %vm1337_vm0, %v11813_v29, 0  ;;  %v11762_v50 = vcombine.low %v14910_v47, %v14912_v57 }
  0x8d   :  { %13153 = vmatprep.mubr.msk.bf16.mxu0 %vm1312_vm8, %v20990_v33  ;;  %v2210_v1 = vshrl.u32 %v14910_v47, 16  ;;  %v2213_v3 = vshll.u32 %v14910_v47, 16  ;;  %v2223_v12 = vshrl.u32 %v14912_v57, 16  ;;  %v2054_v4 = vsel %vm14369_vm14, %v2049_v5, %v2053_v52 }
  0x8e   :  { %v2059_v48 = vrot.slane %v2058_v16, 4  ;;  %v2073_v13 = vrot.slane %v2072_v54, 4  ;;  %v2077_v23 = vrot.slane %v2075_v46, 5  ;;  %v2087_v9 = vrot.slane %v2085_v10, 5 }
  0x8f   :  { %v3079_v29 = vsel %vm1337_vm0, %v14761_v60, 0  ;;  %v11790_v28 = vrot.slane %v14629_v32, 9  ;;  %v2423_v34 = vrot.slane %v14632_v6, 5  ;;  %v2426_v49 = vrot.slane %v1843_v25, 5 }
  0x90   :  { %v2064_v41 = vsel %vm14369_vm14, %v2059_v48, %v2063_v19  ;;  %v2078_v2 = vsel %vm14369_vm14, %v2073_v13, %v2077_v23  ;;  %v2082_v62 = vor.u32 %v2081_v39, %v2077_v23  ;;  %v11791_v60 = vrot.slane %v14667_v42, 9 }
  0x91   :  { %v11772_v53 = vcombine.low %v2054_v4, %v2064_v41  ;;  %v2424_v55 = vsel %vm14417_vm15, %v11790_v28, %v2423_v34  ;;  %v2425_v52 = vrot.slane %v2423_v34, 4  ;;  %v2430_v46 = vrot.slane %v14669_v15, 5 }
  0x92   :  { %13176 = vmatmul.mubr.msk.bf16.gmra.mxu1 %vm1312_vm8, %v11762_v50  ;;  %v2083_v40 = vrot.slane %v2082_v62, 4  ;;  %v2433_v30 = vrot.slane %v1846_v36, 5  ;;  %v20991_v19 = vshrl.u32 %v14629_v32, 16  ;;  %v20992_v33 = vshll.u32 %v14629_v32, 16  ;;  %v1849_v62 = vld [vmem:[#allocation2 + $0x44] sm:$0x1] }
  0x93   :  { %13154 = vmatmul.mubr.msk.bf16.gmra.mxu0 %vm1312_vm8, %v11743_v11  ;;  %13199 = vmatprep.mubr.msk.bf16.mxu1 %vm1312_vm8, %v11797_v27  ;;  %v2427_v39 = vsel %vm14417_vm15, %v2425_v52, %v2426_v49  ;;  %v2099_v16 = vshll.u32 %v14632_v6, 16  ;;  %v20993_v54 = vshrl.u32 %v14632_v6, 16  ;;  %v14959_v43 = vsel %vm14417_vm15, %v11791_v60, %v2430_v46 }
  0x94   :  { %v2092_v10 = vrot.slane %v20991_v19, 4  ;;  %v2095_v5 = vrot.slane %v20992_v33, 5  ;;  %13157 = vmatprep.mubr.msk.bf16.mxu0 %vm1312_vm8, %v11744_v56  ;;  %v2088_v8 = vsel %vm14369_vm14, %v2083_v40, %v2087_v9  ;;  %v11799_v11 = vcombine.low %v2424_v55, %v2427_v39  ;;  %v14980_v19 = vld [vmem:[%s20896_s1 + $0x2] sm:$0x3]  ;;  %v1852_v33 = vld [vmem:[#allocation2 + $0x50] sm:$0x1] }
  0x95   :  { %v2105_v50 = vrot.slane %v20993_v54, 4  ;;  %v2432_v32 = vrot.slane %v2430_v46, 4  ;;  %v14961_v27 = vcombine.low %v2078_v2, %v2088_v8  ;;  %v2101_v48 = vrot.slane %v2099_v16, 5 }
  0x96   :  { %v2096_v4 = vor.u32 %v2095_v5, %v2092_v10  ;;  %v2109_v6 = vshll.u32 %v1843_v25, 16  ;;  %v20994_v61 = vshrl.u32 %v14667_v42, 16  ;;  %v20995_v56 = vshll.u32 %v14667_v42, 16 }
  0x97   :  { %v2434_v13 = vsel %vm14417_vm15, %v2432_v32, %v2433_v30  ;;  %v2123_v9 = vshll.u32 %v14669_v15, 16  ;;  %v2106_v41 = vor.u32 %v2105_v50, %v2101_v48  ;;  %v20996_v25 = vshrl.u32 %v14669_v15, 16 }
  0x98   :  { %v2116_v7 = vrot.slane %v20994_v61, 4  ;;  %v2119_v23 = vrot.slane %v20995_v56, 5  ;;  %v11800_v28 = vcombine.low %v14959_v43, %v2434_v13  ;;  %v2097_v34 = vrot.slane %v2096_v4, 4 }
  0x99   :  { %v2111_v2 = vrot.slane %v2109_v6, 5  ;;  %v2125_v55 = vrot.slane %v2123_v9, 5  ;;  %v2129_v52 = vrot.slane %v20996_v25, 4  ;;  %v2133_v60 = vshll.u32 %v1846_v36, 16 }
  0x9a   :  { %v2120_v49 = vor.u32 %v2119_v23, %v2116_v7  ;;  %v2102_v40 = vsel %vm14369_vm14, %v2097_v34, %v2101_v48  ;;  %v2107_v46 = vrot.slane %v2106_v41, 4  ;;  %v11792_v42 = vrot.slane %v14686_v18, 9  ;;  %13200 = vmatmul.mubr.msk.bf16.vlgmr.msra.gmra.mxu1 %vm1312_vm8, %v11798_v44 }
  0x9b   :  { %v2437_v30 = vrot.slane %v14700_v38, 5  ;;  %v2130_v36 = vor.u32 %v2129_v52, %v2125_v55  ;;  %v2135_v10 = vrot.slane %v2133_v60, 5  ;;  %v2440_v39 = vrot.slane %v1849_v62, 5  ;;  %13158 = vmatmul.mubr.msk.bf16.gmra.mxu0 %vm1312_vm8, %v11745_v20  ;;  %13234 = vmatpush3.bf16.msra.mxu1 %v3079_v29  ;;  %v1855_v60 = vld [vmem:[#allocation2 + $0x5c] sm:$0x1] }
  0x9c   :  { %v2121_v15 = vrot.slane %v2120_v49, 4  ;;  %v2112_v5 = vsel %vm14369_vm14, %v2107_v46, %v2111_v2  ;;  %v11793_v63 = vrot.slane %v14707_v21, 9  ;;  %13181 = vmatprep.mubr.msk.bf16.mxu0 %vm1312_vm8, %v11772_v53  ;;  %13203 = vmatprep.mubr.msk.bf16.mxu1 %vm1312_vm8, %v11799_v11  ;;  %v2444_v20 = vrot.slane %v14714_v31, 5 }
  0x9d   :  { %v2438_v16 = vsel %vm14417_vm15, %v11792_v42, %v2437_v30  ;;  %v2439_v35 = vrot.slane %v2437_v30, 4  ;;  %v11774_v44 = vcombine.low %v2102_v40, %v2112_v5  ;;  %v2131_v17 = vrot.slane %v2130_v36, 4  ;;  %13764 = vmatprep.subr.msk.bf16.mxu1 %vm1337_vm0, %v14980_v19  ;;  %v15028_v30 = vld [vmem:[%s20896_s1 + $0x10] sm:$0x3]  ;;  %v895_v5 = vld [vmem:[#allocation2 + $0x68] sm:$0x1] }
  0x9e   :  { %v2126_v51 = vsel %vm14369_vm14, %v2121_v15, %v2125_v55  ;;  %v2447_v54 = vrot.slane %v1852_v33, 5  ;;  %v20997_v50 = vshrl.u32 %v14686_v18, 16  ;;  %v20998_v43 = vshll.u32 %v14686_v18, 16 }
  0x9f   :  { %v2441_v29 = vsel %vm14417_vm15, %v2439_v35, %v2440_v39  ;;  %v2136_v53 = vsel %vm14369_vm14, %v2131_v17, %v2135_v10  ;;  %v2445_v4 = vsel %vm14417_vm15, %v11793_v63, %v2444_v20  ;;  %v2446_v48 = vrot.slane %v2444_v20, 4 }
  0xa0   :  { %v2140_v8 = vrot.slane %v20997_v50, 4  ;;  %v2143_v32 = vrot.slane %v20998_v43, 5  ;;  %v11801_v11 = vcombine.low %v2438_v16, %v2441_v29  ;;  %v11775_v6 = vcombine.low %v2126_v51, %v2136_v53 }
  0xa1   :  { %v2147_v61 = vshll.u32 %v14700_v38, 16  ;;  %v20999_v7 = vshrl.u32 %v14700_v38, 16  ;;  %v2448_v18 = vsel %vm14417_vm15, %v2446_v48, %v2447_v54  ;;  %v2157_v23 = vshll.u32 %v1849_v62, 16 }
  0xa2   :  { %v2144_v13 = vor.u32 %v2143_v32, %v2140_v8  ;;  %v21000_v9 = vshrl.u32 %v14707_v21, 16  ;;  %v21001_v41 = vshll.u32 %v14707_v21, 16  ;;  %v11802_v49 = vcombine.low %v2445_v4, %v2448_v18  ;;  %13204 = vmatmul.mubr.msk.bf16.gmra.mxu1 %vm1312_vm8, %v11800_v28 }
  0xa3   :  { %v2153_v56 = vrot.slane %v20999_v7, 4  ;;  %v2149_v25 = vrot.slane %v2147_v61, 5  ;;  %v2171_v52 = vshll.u32 %v14714_v31, 16  ;;  %v2159_v38 = vrot.slane %v2157_v23, 5  ;;  %13182 = vmatmul.mubr.msk.bf16.vlgmr.msra.gmra.mxu0 %vm1312_vm8, %v14961_v27  ;;  %13207 = vmatprep.mubr.msk.bf16.mxu1 %vm1312_vm8, %v11801_v11  ;;  %v15065_v7 = vld [vmem:[#allocation2 + $0x18] sm:$0xf] }
  0xa4   :  { %v2164_v34 = vrot.slane %v21000_v9, 4  ;;  %v2167_v2 = vrot.slane %v21001_v41, 5  ;;  %v2145_v55 = vrot.slane %v2144_v13, 4  ;;  %v21002_v46 = vshrl.u32 %v14714_v31, 16  ;;  %13216 = vmatpush3.bf16.msra.mxu0 %v14915_v0  ;;  %13185 = vmatprep.mubr.msk.bf16.mxu0 %vm1312_vm8, %v11774_v44 }
  0xa5   :  { %v2181_v62 = vshll.u32 %v1852_v33, 16  ;;  %v2154_v28 = vor.u32 %v2153_v56, %v2149_v25  ;;  %v2173_v15 = vrot.slane %v2171_v52, 5  ;;  %v11794_v36 = vrot.slane %v14742_v45, 9  ;;  %13763 = vmatprep.subr.msk.bf16.mxu0 %vm1337_vm0, %v15028_v30 }
  0xa6   :  { %v2168_v40 = vor.u32 %v2167_v2, %v2164_v34  ;;  %v2177_v42 = vrot.slane %v21002_v46, 4  ;;  %v2150_v21 = vsel %vm14369_vm14, %v2145_v55, %v2149_v25  ;;  %v2451_v39 = vrot.slane %v14744_v59, 5 }
  0xa7   :  { %v2183_v10 = vrot.slane %v2181_v62, 5  ;;  %v2454_v33 = vrot.slane %v1855_v60, 5  ;;  %v2155_v27 = vrot.slane %v2154_v28, 4  ;;  %v331_v35 = vrot.slane %v14808_v26, 4 }
  0xa8   :  { %v2169_v31 = vrot.slane %v2168_v40, 4  ;;  %v2178_v16 = vor.u32 %v2177_v42, %v2173_v15  ;;  %v11795_v63 = vrot.slane %v14910_v47, 9  ;;  %v2452_v44 = vsel %vm14417_vm15, %v11794_v36, %v2451_v39 }
  0xa9   :  { %v2453_v51 = vrot.slane %v2451_v39, 4  ;;  %v2458_v17 = vrot.slane %v14912_v57, 5  ;;  %v2160_v20 = vsel %vm14369_vm14, %v2155_v27, %v2159_v38  ;;  %v896_v26 = vsel %vm14339_vm11, %v331_v35, %v895_v5 }
  0xaa   :  { %v2174_v0 = vsel %vm14369_vm14, %v2169_v31, %v2173_v15  ;;  %v2179_v29 = vrot.slane %v2178_v16, 4  ;;  %v21003_v54 = vshrl.u32 %v14742_v45, 16  ;;  %v11776_v8 = vcombine.low %v2150_v21, %v2160_v20  ;;  %897 = vst [vmem:[#allocation2 + $0x68] sm:$0x1] %v896_v26  ;;  %13208 = vmatmul.mubr.msk.bf16.gmra.mxu1 %vm1312_vm8, %v11802_v49  ;;  %v15077_v49 = vld [vmem:[#allocation2 + $0x1c] sm:$0xf] }
  0xab   :  { %v2455_v43 = vsel %vm14417_vm15, %v2453_v51, %v2454_v33  ;;  %v15058_v32 = vsel %vm14417_vm15, %v11795_v63, %v2458_v17  ;;  %v2460_v53 = vrot.slane %v2458_v17, 4  ;;  %v21004_v48 = vshll.u32 %v14742_v45, 16  ;;  %13186 = vmatmul.mubr.msk.bf16.gmra.mxu0 %vm1312_vm8, %v11775_v6  ;;  %v15088_v15 = vld [vmem:[#allocation2 + $0x20] sm:$0x1]  ;;  %v15090_v33 = vld [vmem:[#allocation2 + $0x24] sm:$0xf] }
  0xac   :  { %v2188_v50 = vrot.slane %v21003_v54, 4  ;;  %v2184_v11 = vsel %vm14369_vm14, %v2179_v29, %v2183_v10  ;;  %v11803_v4 = vcombine.low %v2452_v44, %v2455_v43  ;;  %v2195_v61 = vshll.u32 %v14744_v59, 16  ;;  %13189 = vmatprep.mubr.msk.bf16.mxu0 %vm1312_vm8, %v11776_v8  ;;  %v15096_v63 = vld [vmem:[#allocation2 + $0x28] sm:$0xf]  ;;  %v15103_v54 = vld [vmem:[#allocation2 + $0x2c] sm:$0x1] }
  0xad   :  { %v2191_v13 = vrot.slane %v21004_v48, 5  ;;  %v11777_v56 = vcombine.low %v2174_v0, %v2184_v11  ;;  %v21005_v18 = vshrl.u32 %v14744_v59, 16  ;;  %v2205_v9 = vshll.u32 %v1855_v60, 16 }
  0xae   :  { %v2212_v34 = vrot.slane %v2210_v1, 4  ;;  %13211 = vmatprep.mubr.msk.bf16.mxu1 %vm1312_vm8, %v11803_v4  ;;  %v2197_v41 = vrot.slane %v2195_v61, 5  ;;  %v2215_v2 = vrot.slane %v2213_v3, 5  ;;  %v2219_v55 = vshll.u32 %v14912_v57, 16  ;;  %v15114_v61 = vld [vmem:[#allocation2 + $0x30] sm:$0xf] }
  0xaf   :  { %v2201_v23 = vrot.slane %v21005_v18, 4  ;;  %v2192_v45 = vor.u32 %v2191_v13, %v2188_v50  ;;  %v2207_v59 = vrot.slane %v2205_v9, 5  ;;  %v2225_v25 = vrot.slane %v2223_v12, 4 }
  0xb0   :  { %v2837_v1 = vshrl.u32 %v15065_v7, 16  ;;  %v2840_v6 = vshll.u32 %v15065_v7, 16  ;;  %v2216_v38 = vor.u32 %v2215_v2, %v2212_v34  ;;  %v2221_v40 = vrot.slane %v2219_v55, 5  ;;  %v15118_v34 = vld [vmem:[#allocation2 + $0x34] sm:$0xf] }
  0xb1   :  { %v2193_v52 = vrot.slane %v2192_v45, 4  ;;  %v2202_v60 = vor.u32 %v2201_v23, %v2197_v41  ;;  %v2846_v46 = vshll.u32 %v15077_v49, 16  ;;  %v2850_v42 = vshrl.u32 %v15077_v49, 16  ;;  %v1858_v62 = vld [vmem:[#allocation2 + $0x68] sm:$0x1] }
  0xb2   :  { %v2839_v47 = vrot.slane %v2837_v1, 4  ;;  %v2842_v3 = vrot.slane %v2840_v6, 5  ;;  %v2217_v12 = vrot.slane %v2216_v38, 4  ;;  %v2226_v28 = vor.u32 %v2225_v25, %v2221_v40 }
  0xb3   :  { %v2198_v21 = vsel %vm14369_vm14, %v2193_v52, %v2197_v41  ;;  %v2203_v57 = vrot.slane %v2202_v60, 4  ;;  %v2461_v36 = vrot.slane %v1858_v62, 5  ;;  %v2229_v31 = vshll.u32 %v1858_v62, 16  ;;  %13190 = vmatmul.mubr.msk.bf16.gmra.mxu0 %vm1312_vm8, %v11777_v56  ;;  %v15132_v60 = vld [vmem:[#allocation2 + $0x3c] sm:$0xf] }
  0xb4   :  { %v2843_v10 = vor.u32 %v2842_v3, %v2839_v47  ;;  %v2848_v39 = vrot.slane %v2846_v46, 5  ;;  %v2222_v27 = vsel %vm14369_vm14, %v2217_v12, %v2221_v40  ;;  %v2227_v16 = vrot.slane %v2226_v28, 4  ;;  %v15145_v28 = vld [vmem:[#allocation2 + $0x44] sm:$0x1] }
  0xb5   :  { %v2208_v5 = vsel %vm14369_vm14, %v2203_v57, %v2207_v59  ;;  %v2852_v35 = vrot.slane %v2850_v42, 4  ;;  %v2462_v0 = vsel %vm14417_vm15, %v2460_v53, %v2461_v36  ;;  %v2231_v51 = vrot.slane %v2229_v31, 5  ;;  %v15130_v59 = vld [vmem:[#allocation2 + $0x38] sm:$0x1] }
  0xb6   :  { %v11778_v44 = vcombine.low %v2198_v21, %v2208_v5  ;;  %v2844_v17 = vrot.slane %v2843_v10, 4  ;;  %v11804_v20 = vcombine.low %v15058_v32, %v2462_v0  ;;  %v2856_v26 = vshll.u32 %v15088_v15, 16  ;;  %v15142_v21 = vld [vmem:[#allocation2 + $0x40] sm:$0xf] }
  0xb7   :  { %v2853_v29 = vor.u32 %v2852_v35, %v2848_v39  ;;  %v2861_v50 = vshrl.u32 %v15090_v33, 16  ;;  %v2232_v8 = vsel %vm14369_vm14, %v2227_v16, %v2231_v51  ;;  %v2864_v53 = vshll.u32 %v15090_v33, 16 }
  0xb8   :  { %13193 = vmatprep.mubr.msk.bf16.mxu0 %vm1312_vm8, %v11778_v44  ;;  %v2849_v43 = vsel %vm14369_vm14, %v2844_v17, %v2848_v39  ;;  %v2870_v11 = vshll.u32 %v15096_v63, 16  ;;  %13212 = vmatmul.mubr.msk.bf16.gmra.mxu1 %vm1312_vm8, %v11804_v20  ;;  %v11779_v32 = vcombine.low %v2222_v27, %v2232_v8  ;;  %v2858_v48 = vrot.slane %v2856_v26, 5 }
  0xb9   :  { %v2854_v4 = vrot.slane %v2853_v29, 4  ;;  %v2863_v13 = vrot.slane %v2861_v50, 4  ;;  %v2866_v56 = vrot.slane %v2864_v53, 5  ;;  %v2874_v23 = vshrl.u32 %v15096_v63, 16  ;;  %v15157_v29 = vld [vmem:[#allocation2 + $0x48] sm:$0xf] }
  0xba   :  { %v2872_v18 = vrot.slane %v2870_v11, 5  ;;  %v2880_v9 = vshll.u32 %v15103_v54, 16  ;;  %v11814_v41 = vcombine.low %v15065_v7, %v15077_v49  ;;  %v11815_v2 = vcombine.low %v15090_v33, %v15096_v63  ;;  %v15159_v53 = vld [vmem:[#allocation2 + $0x4c] sm:$0xf] }
  0xbb   :  { %v2859_v45 = vsel %vm14369_vm14, %v2854_v4, %v2858_v48  ;;  %v15128_v55 = vsel %vm1337_vm0, %v15028_v30, 0  ;;  %v2867_v1 = vor.u32 %v2866_v56, %v2863_v13  ;;  %v2876_v6 = vrot.slane %v2874_v23, 4  ;;  %13194 = vmatmul.mubr.msk.bf16.gmra.mxu0 %vm1312_vm8, %v11779_v32  ;;  %v15166_v13 = vld [vmem:[%s20896_s1 + $0x4] sm:$0x3] }
  0xbc   :  { %v11831_v25 = vcombine.low %v2849_v43, %v2859_v45  ;;  %v2882_v52 = vrot.slane %v2880_v9, 5  ;;  %v3768_v38 = vsel %vm1337_vm0, %v14980_v19, 0  ;;  %v2885_v40 = vshrl.u32 %v15114_v61, 16  ;;  %13217 = vmatprep.mubr.msk.bf16.mxu0 %vm1312_vm8, %v11814_v41  ;;  %v15173_v9 = vld [vmem:[#allocation2 + $0x50] sm:$0x1] }
  0xbd   :  { %v2888_v47 = vshll.u32 %v15114_v61, 16  ;;  %v2894_v3 = vshll.u32 %v15118_v34, 16  ;;  %v2868_v30 = vrot.slane %v2867_v1, 4  ;;  %v2877_v46 = vor.u32 %v2876_v6, %v2872_v18 }
  0xbe   :  { %13235 = vmatprep.mubr.msk.bf16.mxu1 %vm1312_vm8, %v11831_v25  ;;  %v2898_v42 = vshrl.u32 %v15118_v34, 16  ;;  %v2904_v62 = vshll.u32 %v15130_v59, 16  ;;  %v2887_v57 = vrot.slane %v2885_v40, 4  ;;  %v2909_v36 = vshrl.u32 %v15132_v60, 16  ;;  %v15185_v40 = vld [vmem:[%s20896_s1] sm:$0x3] }
  0xbf   :  { %v2890_v19 = vrot.slane %v2888_v47, 5  ;;  %v2896_v12 = vrot.slane %v2894_v3, 5  ;;  %v2873_v31 = vsel %vm14369_vm14, %v2868_v30, %v2872_v18  ;;  %v2878_v10 = vrot.slane %v2877_v46, 4  ;;  %v15189_v46 = vld [vmem:[#allocation2 + $0x58] sm:$0xf] }
  0xc0   :  { %v2900_v39 = vrot.slane %v2898_v42, 4  ;;  %v2906_v5 = vrot.slane %v2904_v62, 5  ;;  %v2911_v16 = vrot.slane %v2909_v36, 4  ;;  %v2912_v35 = vshll.u32 %v15132_v60, 16  ;;  %v15199_v36 = vld [vmem:[#allocation2 + $0x5c] sm:$0x1] }
  0xc1   :  { %v2891_v27 = vor.u32 %v2890_v19, %v2887_v57  ;;  %v2918_v0 = vshll.u32 %v15142_v21, 16  ;;  %v2883_v44 = vsel %vm14369_vm14, %v2878_v10, %v2882_v52  ;;  %v2922_v17 = vshrl.u32 %v15142_v21, 16  ;;  %v15180_v52 = vld [vmem:[#allocation2 + $0x54] sm:$0xf] }
  0xc2   :  { %v2901_v51 = vor.u32 %v2900_v39, %v2896_v12  ;;  %v2928_v20 = vshll.u32 %v15145_v28, 16  ;;  %v11832_v26 = vcombine.low %v2873_v31, %v2883_v44  ;;  %v2914_v8 = vrot.slane %v2912_v35, 5 }
  0xc3   :  { %v2892_v50 = vrot.slane %v2891_v27, 4  ;;  %v2920_v43 = vrot.slane %v2918_v0, 5  ;;  %v2924_v32 = vrot.slane %v2922_v17, 4  ;;  %v11816_v48 = vcombine.low %v15114_v61, %v15118_v34  ;;  %13218 = vmatmul.mubr.msk.bf16.vlgmr.msra.gmra.mxu0 %vm1312_vm8, %v11815_v2 }
  0xc4   :  { %v2902_v11 = vrot.slane %v2901_v51, 4  ;;  %v2930_v4 = vrot.slane %v2928_v20, 5  ;;  %13236 = vmatmul.mubr.msk.bf16.vlgmr.msra.gmra.mxu1 %vm1312_vm8, %v11832_v26  ;;  %v2915_v18 = vor.u32 %v2914_v8, %v2911_v16  ;;  %v11817_v23 = vcombine.low %v15132_v60, %v15142_v21  ;;  %13252 = vmatpush3.bf16.msra.mxu0 %v15128_v55  ;;  %v15208_v51 = vld [vmem:[#allocation2 + $0x60] sm:$0xf]  ;;  %v15212_v8 = vld [vmem:[#allocation2 + $0x64] sm:$0xf] }
  0xc5   :  { %v2897_v56 = vsel %vm14369_vm14, %v2892_v50, %v2896_v12  ;;  %v2933_v45 = vshrl.u32 %v15157_v29, 16  ;;  %13270 = vmatpush3.bf16.msra.mxu1 %v3768_v38  ;;  %v2925_v25 = vor.u32 %v2924_v32, %v2920_v43  ;;  %v2936_v1 = vshll.u32 %v15157_v29, 16  ;;  %13221 = vmatprep.mubr.msk.bf16.mxu0 %vm1312_vm8, %v11816_v48 }
  0xc6   :  { %v2907_v41 = vsel %vm14369_vm14, %v2902_v11, %v2906_v5  ;;  %v2942_v6 = vshll.u32 %v15159_v53, 16  ;;  %v2916_v3 = vrot.slane %v2915_v18, 4  ;;  %v2946_v30 = vshrl.u32 %v15159_v53, 16  ;;  %13766 = vmatprep.subr.msk.bf16.mxu1 %vm1337_vm0, %v15166_v13  ;;  %13765 = vmatprep.subr.msk.bf16.mxu0 %vm1337_vm0, %v15185_v40 }
  0xc7   :  { %v11833_v47 = vcombine.low %v2897_v56, %v2907_v41  ;;  %v2935_v38 = vrot.slane %v2933_v45, 4  ;;  %v2926_v42 = vrot.slane %v2925_v25, 4  ;;  %v2938_v62 = vrot.slane %v2936_v1, 5  ;;  %v15221_v45 = vld [vmem:[#allocation2 + $0x68] sm:$0x1] }
  0xc8   :  { %v2944_v57 = vrot.slane %v2942_v6, 5  ;;  %v2952_v19 = vshll.u32 %v15173_v9, 16  ;;  %v2921_v2 = vsel %vm14369_vm14, %v2916_v3, %v2920_v43  ;;  %v2948_v12 = vrot.slane %v2946_v30, 4  ;;  %v145_v3 = vld [vmem:[%s20895_s0 + $0x40] sm:$0xf] }
  0xc9   :  { %13239 = vmatprep.mubr.msk.bf16.mxu1 %vm1312_vm8, %v11833_v47  ;;  %v2957_v31 = vshrl.u32 %v15180_v52, 16  ;;  %v2960_v10 = vshll.u32 %v15180_v52, 16  ;;  %v2931_v55 = vsel %vm14369_vm14, %v2926_v42, %v2930_v4  ;;  %v2939_v39 = vor.u32 %v2938_v62, %v2935_v38 }
  0xca   :  { %v2954_v5 = vrot.slane %v2952_v19, 5  ;;  %v2966_v27 = vshll.u32 %v15189_v46, 16  ;;  %v11834_v16 = vcombine.low %v2921_v2, %v2931_v55  ;;  %v2949_v35 = vor.u32 %v2948_v12, %v2944_v57 }
  0xcb   :  { %v2959_v0 = vrot.slane %v2957_v31, 4  ;;  %v2962_v44 = vrot.slane %v2960_v10, 5  ;;  %v2940_v17 = vrot.slane %v2939_v39, 4  ;;  %v2970_v26 = vshrl.u32 %v15189_v46, 16  ;;  %13222 = vmatmul.mubr.msk.bf16.gmra.mxu0 %vm1312_vm8, %v11817_v23  ;;  %v146_v23 = vld [vmem:[%s20895_s0 + $0x44] sm:$0xf] }
  0xcc   :  { %v2968_v20 = vrot.slane %v2966_v27, 5  ;;  %v2976_v50 = vshll.u32 %v15199_v36, 16  ;;  %13240 = vmatmul.mubr.msk.bf16.gmra.mxu1 %vm1312_vm8, %v11834_v16  ;;  %v2950_v43 = vrot.slane %v2949_v35, 4  ;;  %v11818_v32 = vcombine.low %v15157_v29, %v15159_v53 }
  0xcd   :  { %v2963_v11 = vor.u32 %v2962_v44, %v2959_v0  ;;  %v11819_v4 = vcombine.low %v15180_v52, %v15189_v46  ;;  %v2945_v48 = vsel %vm14369_vm14, %v2940_v17, %v2944_v57  ;;  %v2972_v56 = vrot.slane %v2970_v26, 4  ;;  %v898_v26 = vld [vmem:[#allocation2 + $0x6c] sm:$0xf] }
  0xce   :  { %v2978_v18 = vrot.slane %v2976_v50, 5  ;;  %v2981_v41 = vshrl.u32 %v15208_v51, 16  ;;  %v2955_v25 = vsel %vm14369_vm14, %v2950_v43, %v2954_v5  ;;  %v2984_v6 = vshll.u32 %v15208_v51, 16  ;;  %13225 = vmatprep.mubr.msk.bf16.mxu0 %vm1312_vm8, %v11818_v32  ;;  %v15241_v5 = vld [vmem:[#allocation2 + $0x60] sm:$0xf] }
  0xcf   :  { %v2964_v1 = vrot.slane %v2963_v11, 4  ;;  %v2990_v47 = vshll.u32 %v15212_v8, 16  ;;  %v11835_v38 = vcombine.low %v2945_v48, %v2955_v25  ;;  %v2973_v30 = vor.u32 %v2972_v56, %v2968_v20  ;;  %v15247_v48 = vld [vmem:[#allocation2 + $0x64] sm:$0xf] }
  0xd0   :  { %v2983_v42 = vrot.slane %v2981_v41, 4  ;;  %v2994_v62 = vshrl.u32 %v15212_v8, 16  ;;  %v2986_v19 = vrot.slane %v2984_v6, 5  ;;  %v3000_v12 = vshll.u32 %v15221_v45, 16  ;;  %v902_v6 = vld [vmem:[#allocation2 + $0x74] sm:$0x1] }
  0xd1   :  { %v2969_v57 = vsel %vm14369_vm14, %v2964_v1, %v2968_v20  ;;  %v2992_v2 = vrot.slane %v2990_v47, 5  ;;  %13243 = vmatprep.mubr.msk.bf16.mxu1 %vm1312_vm8, %v11835_v38  ;;  %v2974_v31 = vrot.slane %v2973_v30, 4  ;;  %v333_v55 = vshrl.u32 %v145_v3, 16  ;;  %v15255_v30 = vld [vmem:[#allocation2 + $0x68] sm:$0x1] }
  0xd2   :  { %v2996_v10 = vrot.slane %v2994_v62, 4  ;;  %v336_v39 = vshll.u32 %v145_v3, 16  ;;  %v2987_v27 = vor.u32 %v2986_v19, %v2983_v42  ;;  %v3002_v16 = vrot.slane %v3000_v12, 5 }
  0xd3   :  { %v341_v35 = vshrl.u32 %v146_v23, 16  ;;  %v344_v0 = vshll.u32 %v146_v23, 16  ;;  %v2979_v44 = vsel %vm14369_vm14, %v2974_v31, %v2978_v18  ;;  %v335_v20 = vrot.slane %v333_v55, 7  ;;  %13226 = vmatmul.mubr.msk.bf16.gmra.mxu0 %vm1312_vm8, %v11819_v4 }
  0xd4   :  { %v2997_v17 = vor.u32 %v2996_v10, %v2992_v2  ;;  %v11820_v50 = vcombine.low %v15208_v51, %v15212_v8  ;;  %v11836_v43 = vcombine.low %v2969_v57, %v2979_v44  ;;  %v2988_v11 = vrot.slane %v2987_v27, 4 }
  0xd5   :  { %v343_v32 = vrot.slane %v341_v35, 7  ;;  %v3527_v56 = vshrl.u32 %v15241_v5, 16  ;;  %v338_v25 = vor.u32 %v336_v39, %v335_v20  ;;  %v339_v1 = vrot.slane %v335_v20, 4 }
  0xd6   :  { %v2998_v41 = vrot.slane %v2997_v17, 4  ;;  %v3530_v47 = vshll.u32 %v15241_v5, 16  ;;  %13244 = vmatmul.mubr.msk.bf16.gmra.mxu1 %vm1312_vm8, %v11836_v43  ;;  %v2993_v18 = vsel %vm14369_vm14, %v2988_v11, %v2992_v2  ;;  %13229 = vmatprep.mubr.msk.bf16.mxu0 %vm1312_vm8, %v11820_v50  ;;  %v3536_v19 = vshll.u32 %v15247_v48, 16  ;;  %v147_v43 = vld [vmem:[%s20895_s0 + $0x48] sm:$0xf] }
  0xd7   :  { %v346_v3 = vor.u32 %v344_v0, %v343_v32  ;;  %v348_v38 = vrot.slane %v343_v32, 4  ;;  %v3529_v42 = vrot.slane %v3527_v56, 4  ;;  %v899_v23 = vsel %vm14321_vm10, %v338_v25, %v898_v26 }
  0xd8   :  { %v3003_v62 = vsel %vm14369_vm14, %v2998_v41, %v3002_v16  ;;  %v3532_v57 = vrot.slane %v3530_v47, 5  ;;  %900 = vst [vmem:[#allocation2 + $0x6c] sm:$0xf] %v899_v23  ;;  %v3540_v31 = vshrl.u32 %v15247_v48, 16  ;;  %v3538_v55 = vrot.slane %v3536_v19, 5 }
  0xd9   :  { %v11837_v4 = vcombine.low %v2993_v18, %v3003_v62  ;;  %v347_v2 = vsel %vm14298_vm9, %v339_v1, %v346_v3  ;;  %v903_v12 = vsel %vm14339_vm11, %v348_v38, %v902_v6  ;;  %v3546_v39 = vshll.u32 %v15255_v30, 16 }
  0xda   :  { %901 = vst.msk [vmem:[#allocation2 + $0x70] sm:$0xf] %vm19_vm1, %v347_v2  ;;  %904 = vst [vmem:[#allocation2 + $0x74] sm:$0x1] %v903_v12  ;;  %v3533_v10 = vor.u32 %v3532_v57, %v3529_v42  ;;  %v11847_v27 = vrot.slane %v15065_v7, 9  ;;  %v3542_v16 = vrot.slane %v3540_v31, 4 }
  0xdb   :  { %13247 = vmatprep.mubr.msk.bf16.mxu1 %vm1312_vm8, %v11837_v4  ;;  %v3204_v35 = vrot.slane %v15077_v49, 5  ;;  %v3207_v0 = vrot.slane %v15088_v15, 5  ;;  %v11848_v44 = vrot.slane %v15090_v33, 9  ;;  %v3548_v20 = vrot.slane %v3546_v39, 5  ;;  %v148_v15 = vld [vmem:[%s20895_s0 + $0x4c] sm:$0xf] }
  0xdc   :  { %v3534_v17 = vrot.slane %v3533_v10, 4  ;;  %v3211_v26 = vrot.slane %v15096_v63, 5  ;;  %v3214_v50 = vrot.slane %v15103_v54, 5  ;;  %v3543_v7 = vor.u32 %v3542_v16, %v3538_v55 }
  0xdd   :  { %v3205_v11 = vsel %vm14417_vm15, %v11847_v27, %v3204_v35  ;;  %v3206_v32 = vrot.slane %v3204_v35, 4  ;;  %v15284_v49 = vsel %vm1337_vm0, %v15185_v40, 0  ;;  %v15297_v56 = vsel %vm1337_vm0, %v15166_v13, 0 }
  0xde   :  { %v3539_v33 = vsel %vm14369_vm14, %v3534_v17, %v3538_v55  ;;  %v15293_v63 = vsel %vm14417_vm15, %v11848_v44, %v3211_v26  ;;  %v3213_v54 = vrot.slane %v3211_v26, 4  ;;  %v3544_v41 = vrot.slane %v3543_v7, 4 }
  0xdf   :  { %v3208_v40 = vsel %vm14417_vm15, %v3206_v32, %v3207_v0  ;;  %v350_v25 = vshrl.u32 %v147_v43, 16  ;;  %v353_v1 = vshll.u32 %v147_v43, 16  ;;  %v15301_v6 = vld [vmem:[#allocation2 + $0x6c] sm:$0xf]  ;;  %v358_v38 = vshrl.u32 %v148_v15, 16 }
  0xe0   :  { %v15303_v47 = vld [vmem:[#allocation2 + $0x6c] sm:$0xf]  ;;  %v11856_v18 = vcombine.low %v3205_v11, %v3208_v40  ;;  %v3215_v3 = vsel %vm14417_vm15, %v3213_v54, %v3214_v50  ;;  %v361_v42 = vshll.u32 %v148_v15, 16  ;;  %v3005_v23 = vshrl.u32 %v15301_v6, 16 }
  0xe1   :  { %v15307_v62 = vld [vmem:[#allocation2 + $0x70] sm:$0xf]  ;;  %v15309_v13 = vld [vmem:[#allocation2 + $0x74] sm:$0x1]  ;;  %v3008_v57 = vshll.u32 %v15301_v6, 16  ;;  %v3549_v19 = vsel %vm14369_vm14, %v3544_v41, %v3548_v20  ;;  %v11857_v4 = vcombine.low %v15293_v63, %v3215_v3  ;;  %v3551_v0 = vshrl.u32 %v15303_v47, 16 }
  0xe2   :  { %v3014_v2 = vshll.u32 %v15307_v62, 16  ;;  %v3018_v12 = vshrl.u32 %v15307_v62, 16  ;;  %v3024_v31 = vshll.u32 %v15309_v13, 16  ;;  %v11821_v10 = vcombine.low %v15301_v6, %v15307_v62  ;;  %v15321_v55 = vld [vmem:[#allocation2 + $0x70] sm:$0xf] }
  0xe3   :  { %v3007_v39 = vrot.slane %v3005_v23, 4  ;;  %v3010_v27 = vrot.slane %v3008_v57, 5  ;;  %v11873_v16 = vcombine.low %v3539_v33, %v3549_v19  ;;  %v15323_v35 = vld [vmem:[#allocation2 + $0x74] sm:$0x1]  ;;  %v3554_v26 = vshll.u32 %v15303_v47, 16 }
  0xe4   :  { %v3016_v44 = vrot.slane %v3014_v2, 5  ;;  %v3020_v17 = vrot.slane %v3018_v12, 4  ;;  %v3026_v20 = vrot.slane %v3024_v31, 5  ;;  %13230 = vmatmul.mubr.msk.bf16.gmra.mxu0 %vm1312_vm8, %v11821_v10  ;;  %v3553_v43 = vrot.slane %v3551_v0, 4  ;;  %v905_v23 = vld [vmem:[#allocation2 + $0x78] sm:$0xf] }
  0xe5   :  { %v3011_v50 = vor.u32 %v3010_v27, %v3007_v39  ;;  %v3560_v7 = vshll.u32 %v15321_v55, 16  ;;  %v3564_v11 = vshrl.u32 %v15321_v55, 16  ;;  %13253 = vmatprep.mubr.msk.bf16.mxu0 %vm1312_vm8, %v11856_v18  ;;  %v3556_v15 = vrot.slane %v3554_v26, 5  ;;  %v149_v31 = vld [vmem:[%s20895_s0 + $0x50] sm:$0xf] }
  0xe6   :  { %v3021_v32 = vor.u32 %v3020_v17, %v3016_v44  ;;  %v3570_v33 = vshll.u32 %v15323_v35, 16  ;;  %v352_v63 = vrot.slane %v350_v25, 7  ;;  %v360_v3 = vrot.slane %v358_v38, 7  ;;  %v909_v25 = vld [vmem:[#allocation2 + $0x80] sm:$0x1] }
  0xe7   :  { %v3012_v54 = vrot.slane %v3011_v50, 4  ;;  %v3562_v41 = vrot.slane %v3560_v7, 5  ;;  %v3566_v40 = vrot.slane %v3564_v11, 4  ;;  %v3557_v19 = vor.u32 %v3556_v15, %v3553_v43  ;;  %v150_v38 = vld [vmem:[%s20895_s0 + $0x54] sm:$0xf] }
  0xe8   :  { %v3022_v57 = vrot.slane %v3021_v32, 4  ;;  %v3572_v2 = vrot.slane %v3570_v33, 5  ;;  %v355_v12 = vor.u32 %v353_v1, %v352_v63  ;;  %v356_v39 = vrot.slane %v352_v63, 4  ;;  %v15349_v7 = vld [vmem:[%s20896_s1 + $0x6] sm:$0x3] }
  0xe9   :  { %v3017_v18 = vsel %vm14369_vm14, %v3012_v54, %v3016_v44  ;;  %v3567_v10 = vor.u32 %v3566_v40, %v3562_v41  ;;  %v363_v27 = vor.u32 %v361_v42, %v360_v3  ;;  %v3558_v17 = vrot.slane %v3557_v19, 4 }
  0xea   :  { %v3027_v0 = vsel %vm14369_vm14, %v3022_v57, %v3026_v20  ;;  %v365_v1 = vrot.slane %v360_v3, 4  ;;  %v906_v26 = vsel %vm14321_vm10, %v355_v12, %v905_v23  ;;  %v367_v42 = vshrl.u32 %v149_v31, 16  ;;  %v916_v23 = vld [vmem:[#allocation2 + $0x8c] sm:$0x1] }
  0xeb   :  { %v11838_v50 = vcombine.low %v3017_v18, %v3027_v0  ;;  %v3568_v43 = vrot.slane %v3567_v10, 4  ;;  %v364_v44 = vsel %vm14298_vm9, %v356_v39, %v363_v27  ;;  %907 = vst [vmem:[#allocation2 + $0x78] sm:$0xf] %v906_v26  ;;  %v3563_v20 = vsel %vm14369_vm14, %v3558_v17, %v3562_v41  ;;  %v912_v41 = vld [vmem:[#allocation2 + $0x84] sm:$0xf] }
  0xec   :  { %13254 = vmatmul.mubr.msk.bf16.vlgmr.msra.gmra.mxu0 %vm1312_vm8, %v11857_v4  ;;  %908 = vst.msk [vmem:[#allocation2 + $0x7c] sm:$0xf] %vm19_vm1, %v364_v44  ;;  %v910_v11 = vsel %vm14339_vm11, %v365_v1, %v909_v25  ;;  %v370_v32 = vshll.u32 %v149_v31, 16  ;;  %v375_v15 = vshrl.u32 %v150_v38, 16  ;;  %v369_v63 = vrot.slane %v367_v42, 7 }
  0xed   :  { %13248 = vmatmul.mubr.msk.bf16.gmra.mxu1 %vm1312_vm8, %v11838_v50  ;;  %v3573_v33 = vsel %vm14369_vm14, %v3568_v43, %v3572_v2  ;;  %13288 = vmatpush3.bf16.msra.mxu0 %v15284_v49  ;;  %911 = vst [vmem:[#allocation2 + $0x80] sm:$0x1] %v910_v11  ;;  %v378_v54 = vshll.u32 %v150_v38, 16  ;;  %v11849_v4 = vrot.slane %v15114_v61, 9  ;;  %v3218_v57 = vrot.slane %v15118_v34, 5 }
  0xee   :  { %13271 = vmatprep.mubr.msk.bf16.mxu1 %vm1312_vm8, %v11873_v16  ;;  %v11874_v40 = vcombine.low %v3563_v20, %v3573_v33  ;;  %v377_v3 = vrot.slane %v375_v15, 7  ;;  %v3221_v19 = vrot.slane %v15130_v59, 5  ;;  %13767 = vmatprep.subr.msk.bf16.mxu0 %vm1337_vm0, %v15349_v7  ;;  %v372_v2 = vor.u32 %v370_v32, %v369_v63  ;;  %v151_v61 = vld [vmem:[%s20895_s0 + $0x58] sm:$0xf]  ;;  %v152_v17 = vld [vmem:[%s20895_s0 + $0x5c] sm:$0xf] }
  0xef   :  { %v373_v49 = vrot.slane %v369_v63, 4  ;;  %v11850_v12 = vrot.slane %v15132_v60, 9  ;;  %v3225_v31 = vrot.slane %v15142_v21, 5  ;;  %v3219_v34 = vsel %vm14417_vm15, %v11849_v4, %v3218_v57  ;;  %v15400_v42 = vld [vmem:[%s20896_s1 + $0x8] sm:$0x3] }
  0xf0   :  { %v380_v16 = vor.u32 %v378_v54, %v377_v3  ;;  %v382_v18 = vrot.slane %v377_v3, 4  ;;  %v3220_v10 = vrot.slane %v3218_v57, 4  ;;  %v913_v59 = vsel %vm14321_vm10, %v372_v2, %v912_v41  ;;  %v919_v63 = vld [vmem:[#allocation2 + $0x90] sm:$0xf] }
  0xf1   :  { %v3226_v39 = vsel %vm14417_vm15, %v11850_v12, %v3225_v31  ;;  %v3227_v27 = vrot.slane %v3225_v31, 4  ;;  %v3228_v60 = vrot.slane %v15145_v28, 5  ;;  %914 = vst [vmem:[#allocation2 + $0x84] sm:$0xf] %v913_v59  ;;  %v384_v1 = vshrl.u32 %v151_v61, 16 }
  0xf2   :  { %v15379_v21 = vld [vmem:[#allocation2 + $0x78] sm:$0xf]  ;;  %v381_v25 = vsel %vm14298_vm9, %v373_v49, %v380_v16  ;;  %v917_v38 = vsel %vm14339_vm11, %v382_v18, %v916_v23  ;;  %v3222_v0 = vsel %vm14417_vm15, %v3220_v10, %v3221_v19  ;;  %v387_v3 = vshll.u32 %v151_v61, 16  ;;  %v153_v23 = vld [vmem:[%s20895_s0 + $0x60] sm:$0xf] }
  0xf3   :  { %v15390_v26 = vld [vmem:[#allocation2 + $0x7c] sm:$0xf]  ;;  %v3575_v28 = vshrl.u32 %v15379_v21, 16  ;;  %v3578_v50 = vshll.u32 %v15379_v21, 16  ;;  %915 = vst.msk [vmem:[#allocation2 + $0x88] sm:$0xf] %vm19_vm1, %v381_v25  ;;  %v11858_v43 = vcombine.low %v3219_v34, %v3222_v0  ;;  %v3229_v44 = vsel %vm14417_vm15, %v3227_v27, %v3228_v60 }
  0xf4   :  { %918 = vst [vmem:[#allocation2 + $0x8c] sm:$0x1] %v917_v38  ;;  %v15402_v20 = vld [vmem:[#allocation2 + $0x80] sm:$0x1]  ;;  %v3584_v11 = vshll.u32 %v15390_v26, 16  ;;  %v3588_v32 = vshrl.u32 %v15390_v26, 16  ;;  %v11859_v15 = vcombine.low %v3226_v39, %v3229_v44 }
  0xf5   :  { %v386_v33 = vrot.slane %v384_v1, 7  ;;  %13272 = vmatmul.mubr.msk.bf16.vlgmr.msra.gmra.mxu1 %vm1312_vm8, %v11874_v40  ;;  %v3577_v54 = vrot.slane %v3575_v28, 4  ;;  %v3580_v41 = vrot.slane %v3578_v50, 5  ;;  %v3594_v4 = vshll.u32 %v15402_v20, 16  ;;  %13257 = vmatprep.mubr.msk.bf16.mxu0 %vm1312_vm8, %v11858_v43  ;;  %v154_v40 = vld [vmem:[%s20895_s0 + $0x64] sm:$0xf] }
  0xf6   :  { %13306 = vmatpush3.bf16.msra.mxu1 %v15297_v56  ;;  %v3586_v57 = vrot.slane %v3584_v11, 5  ;;  %v3590_v19 = vrot.slane %v3588_v32, 4  ;;  %13258 = vmatmul.mubr.msk.bf16.gmra.mxu0 %vm1312_vm8, %v11859_v15  ;;  %v392_v49 = vshrl.u32 %v152_v17, 16  ;;  %v395_v61 = vshll.u32 %v152_v17, 16 }
  0xf7   :  { %v390_v2 = vrot.slane %v386_v33, 4  ;;  %v3581_v12 = vor.u32 %v3580_v41, %v3577_v54  ;;  %v3596_v31 = vrot.slane %v3594_v4, 5  ;;  %v389_v16 = vor.u32 %v387_v3, %v386_v33  ;;  %13768 = vmatprep.subr.msk.bf16.mxu1 %vm1337_vm0, %v15400_v42 }
  0xf8   :  { %v3591_v18 = vor.u32 %v3590_v19, %v3586_v57  ;;  %v394_v34 = vrot.slane %v392_v49, 7  ;;  %v401_v56 = vshrl.u32 %v153_v23, 16  ;;  %v404_v10 = vshll.u32 %v153_v23, 16  ;;  %v15419_v39 = vld [vmem:[#allocation2 + $0x84] sm:$0xf] }
  0xf9   :  { %v3582_v59 = vrot.slane %v3581_v12, 4  ;;  %v920_v27 = vsel %vm14321_vm10, %v389_v16, %v919_v63  ;;  %v409_v60 = vshrl.u32 %v154_v40, 16  ;;  %v412_v25 = vshll.u32 %v154_v40, 16  ;;  %v923_v23 = vld [vmem:[#allocation2 + $0x98] sm:$0x1] }
  0xfa   :  { %v3592_v38 = vrot.slane %v3591_v18, 4  ;;  %v15423_v0 = vld [vmem:[#allocation2 + $0x88] sm:$0xf]  ;;  %v3599_v17 = vshrl.u32 %v15419_v39, 16  ;;  %v397_v28 = vor.u32 %v395_v61, %v394_v34  ;;  %921 = vst [vmem:[#allocation2 + $0x90] sm:$0xf] %v920_v27 }
  0xfb   :  { %v15425_v1 = vld [vmem:[#allocation2 + $0x8c] sm:$0x1]  ;;  %v3587_v50 = vsel %vm14369_vm14, %v3582_v59, %v3586_v57  ;;  %v3602_v43 = vshll.u32 %v15419_v39, 16  ;;  %v3608_v44 = vshll.u32 %v15423_v0, 16  ;;  %v3612_v11 = vshrl.u32 %v15423_v0, 16 }
  0xfc   :  { %v3597_v32 = vsel %vm14369_vm14, %v3592_v38, %v3596_v31  ;;  %v3601_v15 = vrot.slane %v3599_v17, 4  ;;  %v3618_v33 = vshll.u32 %v15425_v1, 16  ;;  %v398_v63 = vsel %vm14298_vm9, %v390_v2, %v397_v28  ;;  %v926_v16 = vld [vmem:[#allocation2 + $0x9c] sm:$0xf]  ;;  %v930_v17 = vld [vmem:[#allocation2 + $0xa4] sm:$0x1] }
  0xfd   :  { %v11875_v54 = vcombine.low %v3587_v50, %v3597_v32  ;;  %v3604_v41 = vrot.slane %v3602_v43, 5  ;;  %v3610_v4 = vrot.slane %v3608_v44, 5  ;;  %v3614_v3 = vrot.slane %v3612_v11, 4  ;;  %922 = vst.msk [vmem:[#allocation2 + $0x94] sm:$0xf] %vm19_vm1, %v398_v63 }
  0xfe   :  { %v3620_v57 = vrot.slane %v3618_v33, 5  ;;  %v399_v19 = vrot.slane %v394_v34, 4  ;;  %v403_v49 = vrot.slane %v401_v56, 7  ;;  %v411_v40 = vrot.slane %v409_v60, 7 }
  0xff   :  { %13275 = vmatprep.mubr.msk.bf16.mxu1 %vm1312_vm8, %v11875_v54  ;;  %v3605_v12 = vor.u32 %v3604_v41, %v3601_v15  ;;  %v3615_v31 = vor.u32 %v3614_v3, %v3610_v4  ;;  %v11851_v61 = vrot.slane %v15157_v29, 9  ;;  %v3232_v2 = vrot.slane %v15159_v53, 5  ;;  %v155_v15 = vld [vmem:[%s20895_s0 + $0x68] sm:$0xf] }
 0x100   :  { %v924_v18 = vsel %vm14339_vm11, %v399_v19, %v923_v23  ;;  %v406_v59 = vor.u32 %v404_v10, %v403_v49  ;;  %v407_v27 = vrot.slane %v403_v49, 4  ;;  %v414_v38 = vor.u32 %v412_v25, %v411_v40 }
 0x101   :  { %v3606_v28 = vrot.slane %v3605_v12, 4  ;;  %v3616_v34 = vrot.slane %v3615_v31, 4  ;;  %925 = vst [vmem:[#allocation2 + $0x98] sm:$0x1] %v924_v18  ;;  %v15444_v56 = vld [vmem:[#allocation2 + $0x90] sm:$0xf]  ;;  %v3233_v50 = vsel %vm14417_vm15, %v11851_v61, %v3232_v2 }
 0x102   :  { %v416_v60 = vrot.slane %v411_v40, 4  ;;  %v3623_v29 = vshrl.u32 %v15444_v56, 16  ;;  %v3626_v53 = vshll.u32 %v15444_v56, 16  ;;  %v415_v43 = vsel %vm14298_vm9, %v407_v27, %v414_v38 }
 0x103   :  { %v927_v10 = vsel %vm14321_vm10, %v406_v59, %v926_v16  ;;  %v3611_v25 = vsel %vm14369_vm14, %v3606_v28, %v3610_v4  ;;  %v3621_v44 = vsel %vm14369_vm14, %v3616_v34, %v3620_v57  ;;  %929 = vst.msk [vmem:[#allocation2 + $0xa0] sm:$0xf] %vm19_vm1, %v415_v43  ;;  %v3234_v32 = vrot.slane %v3232_v2, 4 }
 0x104   :  { %928 = vst [vmem:[#allocation2 + $0x9c] sm:$0xf] %v927_v10  ;;  %v931_v11 = vsel %vm14339_vm11, %v416_v60, %v930_v17  ;;  %v11876_v33 = vcombine.low %v3611_v25, %v3621_v44  ;;  %v15464_v63 = vld [vmem:[#allocation2 + $0x94] sm:$0xf]  ;;  %v3625_v54 = vrot.slane %v3623_v29, 4  ;;  %v3628_v41 = vrot.slane %v3626_v53, 5 }
 0x105   :  { %932 = vst [vmem:[#allocation2 + $0xa4] sm:$0x1] %v931_v11  ;;  %v3235_v4 = vrot.slane %v15173_v9, 5  ;;  %v3632_v3 = vshll.u32 %v15464_v63, 16  ;;  %v3636_v23 = vshrl.u32 %v15464_v63, 16  ;;  %v11852_v57 = vrot.slane %v15180_v52, 9 }
 0x106   :  { %v3239_v19 = vrot.slane %v15189_v46, 5  ;;  %13276 = vmatmul.mubr.msk.bf16.gmra.mxu1 %vm1312_vm8, %v11876_v33  ;;  %v3629_v49 = vor.u32 %v3628_v41, %v3625_v54  ;;  %v3242_v12 = vrot.slane %v15199_v36, 5  ;;  %v156_v9 = vld [vmem:[%s20895_s0 + $0x6c] sm:$0xf]  ;;  %v418_v31 = vshrl.u32 %v155_v15, 16  ;;  %v15478_v16 = vpop.f32.mrf.mxu1 }
 0x107   :  { %v3236_v40 = vsel %vm14417_vm15, %v3234_v32, %v3235_v4  ;;  %v3634_v61 = vrot.slane %v3632_v3, 5  ;;  %v3638_v2 = vrot.slane %v3636_v23, 4  ;;  %v421_v17 = vshll.u32 %v155_v15, 16  ;;  %v157_v41 = vld [vmem:[%s20895_s0 + $0x70] sm:$0xf] }
 0x108   :  { %v11860_v52 = vcombine.low %v3233_v50, %v3236_v40  ;;  %v3240_v46 = vsel %vm14417_vm15, %v11852_v57, %v3239_v19  ;;  %v15482_v18 = vld [vmem:[#allocation2 + $0x98] sm:$0x1]  ;;  %v3630_v59 = vrot.slane %v3629_v49, 4  ;;  %v3241_v27 = vrot.slane %v3239_v19, 4  ;;  %v15494_v44 = vpop.f32.mrf.mxu1  ;;  %v933_v19 = vld [vmem:[#allocation2 + $0xa8] sm:$0xf] }
 0x109   :  { %v420_v38 = vrot.slane %v418_v31, 7  ;;  %v3639_v36 = vor.u32 %v3638_v2, %v3634_v61  ;;  %v3642_v28 = vshll.u32 %v15482_v18, 16  ;;  %v426_v34 = vshrl.u32 %v156_v9, 16  ;;  %v158_v31 = vld [vmem:[%s20895_s0 + $0x74] sm:$0xf] }
 0x10a   :  { %13261 = vmatprep.mubr.msk.bf16.mxu0 %vm1312_vm8, %v11860_v52  ;;  %v429_v60 = vshll.u32 %v156_v9, 16  ;;  %v3635_v29 = vsel %vm14369_vm14, %v3630_v59, %v3634_v61  ;;  %v15490_v53 = vld [vmem:[#allocation2 + $0xa0] sm:$0xf]  ;;  %v3243_v43 = vsel %vm14417_vm15, %v3241_v27, %v3242_v12  ;;  %v937_v27 = vld [vmem:[#allocation2 + $0xb0] sm:$0x1] }
 0x10b   :  { %v15488_v50 = vld [vmem:[#allocation2 + $0x9c] sm:$0xf]  ;;  %v423_v10 = vor.u32 %v421_v17, %v420_v38  ;;  %v424_v25 = vrot.slane %v420_v38, 4  ;;  %v3640_v11 = vrot.slane %v3639_v36, 4  ;;  %v3644_v32 = vrot.slane %v3642_v28, 5  ;;  %v15512_v38 = vpop.f32.mrf.mxu1 }
 0x10c   :  { %v15496_v15 = vld [vmem:[#allocation2 + $0xa4] sm:$0x1]  ;;  %v3647_v33 = vshrl.u32 %v15488_v50, 16  ;;  %v3650_v54 = vshll.u32 %v15488_v50, 16  ;;  %v3656_v4 = vshll.u32 %v15490_v53, 16  ;;  %v3660_v3 = vshrl.u32 %v15490_v53, 16 }
 0x10d   :  { %v3666_v23 = vshll.u32 %v15496_v15, 16  ;;  %v11861_v57 = vcombine.low %v3240_v46, %v3243_v43  ;;  %v3645_v49 = vsel %vm14369_vm14, %v3640_v11, %v3644_v32  ;;  %v428_v9 = vrot.slane %v426_v34, 7  ;;  %v15866_v22 = vld [vmem:[#allocation2 + $0x9c] sm:$0xf] }
 0x10e   :  { %v3649_v40 = vrot.slane %v3647_v33, 4  ;;  %v3652_v12 = vrot.slane %v3650_v54, 5  ;;  %v11877_v61 = vcombine.low %v3635_v29, %v3645_v49  ;;  %v3658_v2 = vrot.slane %v3656_v4, 5  ;;  %v940_v49 = vld [vmem:[#allocation2 + $0xb4] sm:$0xf] }
 0x10f   :  { %v3662_v52 = vrot.slane %v3660_v3, 4  ;;  %v3668_v59 = vrot.slane %v3666_v23, 5  ;;  %13262 = vmatmul.mubr.msk.bf16.gmra.mxu0 %vm1312_vm8, %v11861_v57  ;;  %v431_v17 = vor.u32 %v429_v60, %v428_v9  ;;  %v433_v36 = vrot.slane %v428_v9, 4  ;;  %v15517_v32 = vpop.f32.mrf.mxu0 }
 0x110   :  { %v3653_v46 = vor.u32 %v3652_v12, %v3649_v40  ;;  %v934_v28 = vsel %vm14321_vm10, %v423_v10, %v933_v19  ;;  %13279 = vmatprep.mubr.msk.bf16.mxu1 %vm1312_vm8, %v11877_v61  ;;  %v435_v43 = vshrl.u32 %v157_v41, 16  ;;  %v438_v29 = vshll.u32 %v157_v41, 16  ;;  %v15525_v41 = vpop.f32.mrf.mxu1 }
 0x111   :  { %v3663_v34 = vor.u32 %v3662_v52, %v3658_v2  ;;  %935 = vst [vmem:[#allocation2 + $0xa8] sm:$0xf] %v934_v28  ;;  %v443_v11 = vshrl.u32 %v158_v31, 16  ;;  %v432_v54 = vsel %vm14298_vm9, %v424_v25, %v431_v17  ;;  %v938_v60 = vsel %vm14339_vm11, %v433_v36, %v937_v27  ;;  %21006 = vst [vmem:[#allocation11_spill] sm:$0xff] %v15525_v41  ;;  %v944_v27 = vld [vmem:[#allocation2 + $0xbc] sm:$0x1] }
 0x112   :  { %v3654_v33 = vrot.slane %v3653_v46, 4  ;;  %v446_v4 = vshll.u32 %v158_v31, 16  ;;  %936 = vst.msk [vmem:[#allocation2 + $0xac] sm:$0xf] %vm19_vm1, %v432_v54  ;;  %939 = vst [vmem:[#allocation2 + $0xb0] sm:$0x1] %v938_v60 }
 0x113   :  { %v3664_v3 = vrot.slane %v3663_v34, 4  ;;  %v437_v10 = vrot.slane %v435_v43, 7  ;;  %v445_v23 = vrot.slane %v443_v11, 7  ;;  %v11853_v57 = vrot.slane %v15208_v51, 9  ;;  %v15534_v51 = vpop.f32.mrf.mxu0 }
 0x114   :  { %v3659_v19 = vsel %vm14369_vm14, %v3654_v33, %v3658_v2  ;;  %v3246_v25 = vrot.slane %v15212_v8, 5  ;;  %v3249_v40 = vrot.slane %v15221_v45, 5  ;;  %v11854_v12 = vrot.slane %v15301_v6, 9 }
 0x115   :  { %v3669_v9 = vsel %vm14369_vm14, %v3664_v3, %v3668_v59  ;;  %v440_v31 = vor.u32 %v438_v29, %v437_v10  ;;  %v441_v61 = vrot.slane %v437_v10, 4  ;;  %v448_v52 = vor.u32 %v446_v4, %v445_v23  ;;  %v15543_v59 = vpop.f32.mrf.mxu1  ;;  %v15558_v4 = vpop.f32.mrf.mxu0 }
 0x116   :  { %v11878_v46 = vcombine.low %v3659_v19, %v3669_v9  ;;  %v450_v17 = vrot.slane %v445_v23, 4  ;;  %v3247_v2 = vsel %vm14417_vm15, %v11853_v57, %v3246_v25  ;;  %v3248_v36 = vrot.slane %v3246_v25, 4 }
 0x117   :  { %v449_v8 = vsel %vm14298_vm9, %v441_v61, %v448_v52  ;;  %v941_v45 = vsel %vm14321_vm10, %v440_v31, %v940_v49  ;;  %v3253_v6 = vrot.slane %v15307_v62, 5  ;;  %v3256_v29 = vrot.slane %v15309_v13, 5  ;;  %v15571_v31 = vpop.f32.mrf.mxu1 }
 0x118   :  { %13280 = vmatmul.mubr.msk.bf16.gmra.mxu1 %vm1312_vm8, %v11878_v46  ;;  %v15546_v28 = vld [vmem:[#allocation2 + $0xa8] sm:$0xf]  ;;  %942 = vst [vmem:[#allocation2 + $0xb4] sm:$0xf] %v941_v45  ;;  %943 = vst.msk [vmem:[#allocation2 + $0xb8] sm:$0xf] %vm19_vm1, %v449_v8  ;;  %v945_v34 = vsel %vm14339_vm11, %v450_v17, %v944_v27  ;;  %v3250_v43 = vsel %vm14417_vm15, %v3248_v36, %v3249_v40  ;;  %v11889_v19 = vcombine.low %v15241_v5, %v15247_v48 }
 0x119   :  { %v4041_v11 = vrot.slane %v15247_v48, 5  ;;  %v3671_v62 = vshrl.u32 %v15546_v28, 16  ;;  %v3674_v33 = vshll.u32 %v15546_v28, 16  ;;  %946 = vst [vmem:[#allocation2 + $0xbc] sm:$0x1] %v945_v34  ;;  %v11862_v54 = vcombine.low %v3247_v2, %v3250_v43  ;;  %v15578_v2 = vpop.f32.mrf.mxu0 }
 0x11a   :  { %v11905_v60 = vrot.slane %v15241_v5, 9  ;;  %v15560_v3 = vld [vmem:[#allocation2 + $0xac] sm:$0xf]  ;;  %v15562_v10 = vld [vmem:[#allocation2 + $0xb0] sm:$0x1]  ;;  %v3254_v23 = vsel %vm14417_vm15, %v11854_v12, %v3253_v6  ;;  %v3255_v13 = vrot.slane %v3253_v6, 4 }
 0x11b   :  { %v4043_v57 = vrot.slane %v4041_v11, 4  ;;  %v3673_v49 = vrot.slane %v3671_v62, 4  ;;  %v3676_v25 = vrot.slane %v3674_v33, 5  ;;  %v3680_v40 = vshll.u32 %v15560_v3, 16  ;;  %13265 = vmatprep.mubr.msk.bf16.mxu0 %vm1312_vm8, %v11862_v54  ;;  %21007 = vst [vmem:[#allocation12_spill] sm:$0xff] %v15578_v2  ;;  %v15593_v33 = vpop.f32.mrf.mxu1 }
 0x11c   :  { %v3684_v9 = vshrl.u32 %v15560_v3, 16  ;;  %v3690_v61 = vshll.u32 %v15562_v10, 16  ;;  %v3257_v12 = vsel %vm14417_vm15, %v3255_v13, %v3256_v29  ;;  %v4044_v52 = vrot.slane %v15255_v30, 5 }
 0x11d   :  { %v11906_v27 = vrot.slane %v15303_v47, 9  ;;  %v3677_v5 = vor.u32 %v3676_v25, %v3673_v49  ;;  %v3682_v48 = vrot.slane %v3680_v40, 5  ;;  %v11863_v17 = vcombine.low %v3254_v23, %v3257_v12  ;;  %v15609_v40 = vpop.f32.mrf.mxu0 }
 0x11e   :  { %v3686_v46 = vrot.slane %v3684_v9, 4  ;;  %v3692_v36 = vrot.slane %v3690_v61, 5  ;;  %v15582_v8 = vsel %vm14417_vm15, %v11905_v60, %v4041_v11  ;;  %v4048_v45 = vrot.slane %v15321_v55, 5 }
 0x11f   :  { %v3678_v6 = vrot.slane %v3677_v5, 4  ;;  %v15585_v43 = vld [vmem:[#allocation2 + $0xb4] sm:$0xf]  ;;  %v15587_v30 = vld [vmem:[#allocation2 + $0xb8] sm:$0xf]  ;;  %13266 = vmatmul.mubr.msk.bf16.gmra.mxu0 %vm1312_vm8, %v11863_v17  ;;  %v4045_v29 = vsel %vm14417_vm15, %v4043_v57, %v4044_v52  ;;  %v4051_v62 = vrot.slane %v15323_v35, 5  ;;  %v15616_v17 = vpop.f32.mrf.mxu1 }
 0x120   :  { %v3687_v34 = vor.u32 %v3686_v46, %v3682_v48  ;;  %v15595_v54 = vld [vmem:[#allocation2 + $0xbc] sm:$0x1]  ;;  %v3695_v11 = vshrl.u32 %v15585_v43, 16  ;;  %v3698_v60 = vshll.u32 %v15585_v43, 16  ;;  %v3704_v23 = vshll.u32 %v15587_v30, 16  ;;  %13289 = vmatprep.mubr.msk.bf16.mxu0 %vm1312_vm8, %v11889_v19  ;;  %21008 = vst [vmem:[#allocation13_spill] sm:$0xff] %v15616_v17 }
 0x121   :  { %v3708_v13 = vshrl.u32 %v15587_v30, 16  ;;  %v3683_v49 = vsel %vm14369_vm14, %v3678_v6, %v3682_v48  ;;  %v3714_v35 = vshll.u32 %v15595_v54, 16  ;;  %v15607_v25 = vsel %vm14417_vm15, %v11906_v27, %v4048_v45 }
 0x122   :  { %v3688_v57 = vrot.slane %v3687_v34, 4  ;;  %v3697_v9 = vrot.slane %v3695_v11, 4  ;;  %v3700_v61 = vrot.slane %v3698_v60, 5  ;;  %v3706_v12 = vrot.slane %v3704_v23, 5 }
 0x123   :  { %v3710_v52 = vrot.slane %v3708_v13, 4  ;;  %v11914_v19 = vcombine.low %v15582_v8, %v4045_v29  ;;  %v4050_v46 = vrot.slane %v4048_v45, 4  ;;  %v11890_v48 = vcombine.low %v15303_v47, %v15321_v55  ;;  %v15626_v45 = vpop.f32.mrf.mxu0 }
 0x124   :  { %v3693_v5 = vsel %vm14369_vm14, %v3688_v57, %v3692_v36  ;;  %v3701_v27 = vor.u32 %v3700_v61, %v3697_v9  ;;  %v3716_v41 = vrot.slane %v3714_v35, 5  ;;  %v4351_v60 = vsel %vm1337_vm0, %v15349_v7, 0  ;;  %v15642_v35 = vpop.f32.mrf.mxu1 }
 0x125   :  { %v11879_v6 = vcombine.low %v3683_v49, %v3693_v5  ;;  %v3711_v34 = vor.u32 %v3710_v52, %v3706_v12  ;;  %v15620_v11 = vsel %vm14417_vm15, %v4050_v46, %v4051_v62  ;;  %v11907_v36 = vrot.slane %v15379_v21, 9  ;;  %v15635_v62 = vld [vmem:[%s20896_s1 + $0xa] sm:$0x3] }
 0x126   :  { %v4055_v8 = vrot.slane %v15390_v26, 5  ;;  %v3702_v47 = vrot.slane %v3701_v27, 4  ;;  %v11915_v29 = vcombine.low %v15607_v25, %v15620_v11  ;;  %v4062_v23 = vrot.slane %v15423_v0, 5 }
 0x127   :  { %13283 = vmatprep.mubr.msk.bf16.mxu1 %vm1312_vm8, %v11879_v6  ;;  %v3712_v55 = vrot.slane %v3711_v34, 4  ;;  %13290 = vmatmul.mubr.msk.bf16.vlgmr.msra.gmra.mxu0 %vm1312_vm8, %v11890_v48  ;;  %v4058_v13 = vrot.slane %v15402_v20, 5  ;;  %v11908_v49 = vrot.slane %v15419_v39, 9  ;;  %v11891_v57 = vcombine.low %v15379_v21, %v15390_v26  ;;  %v15652_v20 = vpop.f32.mrf.mxu0  ;;  %v15667_v48 = vpop.f32.mrf.mxu1 }
 0x128   :  { %v4057_v7 = vrot.slane %v4055_v8, 4  ;;  %v3707_v25 = vsel %vm14369_vm14, %v3702_v47, %v3706_v12  ;;  %13324 = vmatpush3.bf16.msra.mxu0 %v4351_v60  ;;  %v4064_v61 = vrot.slane %v4062_v23, 4  ;;  %v4065_v52 = vrot.slane %v15425_v1, 5 }
 0x129   :  { %v3717_v9 = vsel %vm14369_vm14, %v3712_v55, %v3716_v41  ;;  %13293 = vmatprep.mubr.msk.bf16.mxu0 %vm1312_vm8, %v11891_v57  ;;  %13769 = vmatprep.subr.msk.bf16.mxu0 %vm1337_vm0, %v15635_v62  ;;  %v4056_v21 = vsel %vm14417_vm15, %v11907_v36, %v4055_v8  ;;  %v4069_v26 = vrot.slane %v15464_v63, 5  ;;  %v15662_v1 = vsel %vm14417_vm15, %v11908_v49, %v4062_v23  ;;  %v15709_v49 = vld [vmem:[%s20896_s1 + $0xc] sm:$0x3] }
 0x12a   :  { %v11880_v5 = vcombine.low %v3707_v25, %v3717_v9  ;;  %v4059_v41 = vsel %vm14417_vm15, %v4057_v7, %v4058_v13  ;;  %v11892_v12 = vcombine.low %v15419_v39, %v15423_v0  ;;  %v4076_v46 = vrot.slane %v15490_v53, 5  ;;  %v15679_v0 = vpop.f32.mrf.mxu0 }
 0x12b   :  { %v15672_v6 = vsel %vm14417_vm15, %v4064_v61, %v4065_v52  ;;  %v11909_v27 = vrot.slane %v15444_v56, 9  ;;  %v11910_v34 = vrot.slane %v15488_v50, 9  ;;  %v11893_v11 = vcombine.low %v15444_v56, %v15464_v63  ;;  %21009 = vst [vmem:[#allocation14_spill] sm:$0xff] %v15679_v0  ;;  %v15690_v63 = vld [vmem:[#allocation2 + $0x70] sm:$0xf] }
 0x12c   :  { %13284 = vmatmul.mubr.msk.bf16.gmra.mxu1 %vm1312_vm8, %v11880_v5  ;;  %v4071_v60 = vrot.slane %v4069_v26, 4  ;;  %v4072_v39 = vrot.slane %v15482_v18, 5  ;;  %v4078_v36 = vrot.slane %v4076_v46, 4  ;;  %v4079_v8 = vrot.slane %v15496_v15, 5  ;;  %v15692_v18 = vpop.f32.mrf.mxu1  ;;  %v15718_v52 = vld [vmem:[#allocation2 + $0x78] sm:$0xf] }
 0x12d   :  { %13307 = vmatprep.mubr.msk.bf16.mxu1 %vm1312_vm8, %v11914_v19  ;;  %v15682_v19 = vld [vmem:[#allocation2 + $0x6c] sm:$0xf]  ;;  %v4708_v47 = vsel %vm1337_vm0, %v15400_v42, 0  ;;  %v11916_v55 = vcombine.low %v4056_v21, %v4059_v41  ;;  %v4083_v56 = vrot.slane %v15560_v3, 5  ;;  %v15696_v15 = vsel %vm14417_vm15, %v11909_v27, %v4069_v26  ;;  %v15729_v41 = vld [vmem:[#allocation2 + $0x7c] sm:$0xf] }
 0x12e   :  { %v15700_v7 = vsel %vm14417_vm15, %v11910_v34, %v4076_v46  ;;  %v11894_v42 = vcombine.low %v15488_v50, %v15490_v53  ;;  %v11911_v13 = vrot.slane %v15546_v28, 9  ;;  %v15713_v57 = vsel %vm14417_vm15, %v4071_v60, %v4072_v39  ;;  %v15720_v50 = vpop.f32.mrf.mxu0  ;;  %21010 = vst [vmem:[#allocation15_spill] sm:$0xff] %v15729_v41  ;;  %v15735_v34 = vpop.f32.mrf.mxu1 }
 0x12f   :  { %13294 = vmatmul.mubr.msk.bf16.gmra.mxu0 %vm1312_vm8, %v11892_v12  ;;  %v4086_v25 = vrot.slane %v15562_v10, 5  ;;  %v11912_v9 = vrot.slane %v15585_v43, 9  ;;  %v4467_v61 = vshrl.u32 %v15682_v19, 16  ;;  %v15724_v53 = vsel %vm14417_vm15, %v4078_v36, %v4079_v8  ;;  %21011 = vst [vmem:[#allocation16_spill] sm:$0xff] %v15735_v34 }
 0x130   :  { %13297 = vmatprep.mubr.msk.bf16.mxu0 %vm1312_vm8, %v11893_v11  ;;  %v4090_v5 = vrot.slane %v15587_v30, 5  ;;  %v4470_v21 = vshll.u32 %v15682_v19, 16  ;;  %v4476_v26 = vshll.u32 %v15690_v63, 16  ;;  %v4085_v10 = vrot.slane %v4083_v56, 4  ;;  %v15738_v11 = vld [vmem:[#allocation2 + $0x74] sm:$0x1]  ;;  %v15744_v8 = vpop.f32.mrf.mxu0 }
 0x131   :  { %v11895_v12 = vcombine.low %v15546_v28, %v15560_v3  ;;  %v4469_v46 = vrot.slane %v4467_v61, 4  ;;  %v4480_v27 = vshrl.u32 %v15690_v63, 16  ;;  %v4491_v36 = vshrl.u32 %v15718_v52, 16 }
 0x132   :  { %v4472_v60 = vrot.slane %v4470_v21, 5  ;;  %v15740_v39 = vrot.slane %v4476_v26, 5  ;;  %v15748_v28 = vsel %vm14417_vm15, %v11911_v13, %v4083_v56  ;;  %v4092_v61 = vrot.slane %v4090_v5, 4  ;;  %v15754_v26 = vld [vmem:[#allocation2 + $0x80] sm:$0x1]  ;;  %v15764_v0 = vpop.f32.mrf.mxu1 }
 0x133   :  { %v4482_v3 = vrot.slane %v4480_v27, 4  ;;  %v4493_v23 = vrot.slane %v4491_v36, 4  ;;  %v15759_v56 = vsel %vm14417_vm15, %v4085_v10, %v4086_v25  ;;  %v4093_v13 = vrot.slane %v15595_v54, 5  ;;  %v15773_v10 = vld [vmem:[#allocation2 + $0x84] sm:$0xf]  ;;  %v15775_v54 = vpop.f32.mrf.mxu0 }
 0x134   :  { %13308 = vmatmul.mubr.msk.bf16.vlgmr.msra.gmra.mxu1 %vm1312_vm8, %v11915_v29  ;;  %v4494_v29 = vshll.u32 %v15718_v52, 16  ;;  %v4473_v21 = vor.u32 %v4472_v60, %v4469_v46  ;;  %v4486_v17 = vshll.u32 %v15738_v11, 16  ;;  %v11918_v46 = vcombine.low %v15696_v15, %v15713_v57  ;;  %v15786_v57 = vld [vmem:[#allocation2 + $0x88] sm:$0xf] }
 0x135   :  { %13342 = vmatpush3.bf16.msra.mxu1 %v4708_v47  ;;  %13311 = vmatprep.mubr.msk.bf16.mxu1 %vm1312_vm8, %v11916_v55  ;;  %v4500_v47 = vshll.u32 %v15729_v41, 16  ;;  %v4504_v55 = vshrl.u32 %v15729_v41, 16  ;;  %v4483_v27 = vor.u32 %v4482_v3, %v15740_v39  ;;  %v15779_v36 = vsel %vm14417_vm15, %v11912_v9, %v4090_v5  ;;  %21012 = vst [vmem:[#allocation17_spill] sm:$0xff] %v15786_v57 }
 0x136   :  { %13770 = vmatprep.subr.msk.bf16.mxu1 %vm1337_vm0, %v15709_v49  ;;  %v4496_v34 = vrot.slane %v4494_v29, 5  ;;  %v4474_v29 = vrot.slane %v4473_v21, 4  ;;  %v4510_v3 = vshll.u32 %v15754_v26, 16  ;;  %v15784_v15 = vadd.f32 %v15478_v16, %v15517_v32 }
 0x137   :  { %13298 = vmatmul.mubr.msk.bf16.gmra.mxu0 %vm1312_vm8, %v11894_v42  ;;  %v15771_v42 = vrot.slane %v4500_v47, 5  ;;  %v4506_v25 = vrot.slane %v4504_v55, 4  ;;  %v11920_v47 = vcombine.low %v15748_v28, %v15759_v56  ;;  %v11896_v55 = vcombine.low %v15585_v43, %v15587_v30 }
 0x138   :  { %13301 = vmatprep.mubr.msk.bf16.mxu0 %vm1312_vm8, %v11895_v12  ;;  %v15788_v12 = vpop.f32.mrf.mxu1  ;;  %v4497_v60 = vor.u32 %v4496_v34, %v4493_v23  ;;  %v15796_v9 = vadd.f32 %v15494_v44, %v15534_v51  ;;  %v21014_v5 = vcombine.low %v15662_v1, %v15672_v6  ;;  %v15804_v16 = vsel %vm14417_vm15, %v4092_v61, %v4093_v13  ;;  %v15815_v1 = vld [vmem:[#allocation2 + $0x90] sm:$0xf]  ;;  %v15817_v6 = vpop.f32.mrf.mxu0  ;;  %v15825_v13 = vld [vmem:[#allocation2 + $0x94] sm:$0xf] }
 0x139   :  { %v4484_v32 = vrot.slane %v4483_v27, 4  ;;  %v4488_v21 = vrot.slane %v4486_v17, 5  ;;  %v4515_v28 = vshrl.u32 %v15773_v10, 16  ;;  %v4507_v44 = vor.u32 %v4506_v25, %v15771_v42  ;;  %21015 = vst [vmem:[#allocation19_spill] sm:$0xff] %v15815_v1  ;;  %21016 = vst [vmem:[#allocation20_spill] sm:$0xff] %v15817_v6 }
 0x13a   :  { %21013 = vst [vmem:[#allocation18_spill] sm:$0xff] %v15796_v9  ;;  %v15807_v56 = vpop.f32.mrf.mxu1  ;;  %v11931_v51 = vcombine.low %v15682_v19, %v15690_v63  ;;  %v4518_v43 = vshll.u32 %v15773_v10, 16  ;;  %v4524_v30 = vshll.u32 %v15786_v57, 16  ;;  %v4479_v17 = vsel %vm14369_vm14, %v4474_v29, %v15740_v39  ;;  %21017 = vst [vmem:[#allocation21_spill] sm:$0xff] %v15825_v13  ;;  %v15831_v25 = vld [vmem:[#allocation2 + $0x8c] sm:$0x1] }
 0x13b   :  { %v15822_v23 = vrot.slane %v4510_v3, 5  ;;  %v4517_v34 = vrot.slane %v4515_v28, 4  ;;  %v4528_v61 = vshrl.u32 %v15786_v57, 16  ;;  %21019 = vst [vmem:[#allocation23_spill] sm:$0xff] %v15831_v25  ;;  %v15837_v6 = vadd.f32 %v15512_v38, %v15558_v4  ;;  %v15842_v3 = vld [vmem:[#allocation2 + $0x98] sm:$0x1] }
 0x13c   :  { %13312 = vmatmul.mubr.msk.bf16.gmra.mxu1 %vm1312_vm8, %v21014_v5  ;;  %v15827_v27 = vpop.f32.mrf.mxu1  ;;  %v4520_v5 = vrot.slane %v4518_v43, 5  ;;  %v15833_v2 = vrot.slane %v4524_v30, 5  ;;  %v4489_v39 = vsel %vm14369_vm14, %v4484_v32, %v4488_v21  ;;  %v4542_v28 = vshll.u32 %v15815_v1, 16  ;;  %v15853_v30 = vpop.f32.mrf.mxu0 }
 0x13d   :  { %13315 = vmatprep.mubr.msk.bf16.mxu1 %vm1312_vm8, %v11918_v46  ;;  %21018 = vst [vmem:[#allocation22_spill] sm:$0xff] %v15827_v27  ;;  %v15829_v46 = vrot.slane %v4497_v60, 4  ;;  %21020 = vst [vmem:[#allocation24_spill] sm:$0xff] %v15837_v6  ;;  %v4530_v29 = vrot.slane %v4528_v61, 4  ;;  %v4539_v60 = vshrl.u32 %v15815_v1, 16  ;;  %v15848_v43 = vrot.slane %v4507_v44, 4 }
 0x13e   :  { %v15846_v27 = vpop.f32.mrf.mxu1  ;;  %v4521_v38 = vor.u32 %v4520_v5, %v4517_v34  ;;  %v4548_v4 = vshll.u32 %v15825_v13, 16  ;;  %v11932_v21 = vcombine.low %v15718_v52, %v15729_v41  ;;  %v4534_v44 = vshll.u32 %v15831_v25, 16  ;;  %v15868_v9 = vpop.f32.mrf.mxu0 }
 0x13f   :  { %13302 = vmatmul.mubr.msk.bf16.gmra.mxu0 %vm1312_vm8, %v11896_v55  ;;  %21021 = vst [vmem:[#allocation25_spill] sm:$0xff] %v15846_v27  ;;  %v4552_v55 = vshrl.u32 %v15825_v13, 16  ;;  %v4531_v61 = vor.u32 %v4530_v29, %v15833_v2  ;;  %v4541_v34 = vrot.slane %v4539_v60, 4  ;;  %v4544_v5 = vrot.slane %v4542_v28, 5 }
 0x140   :  { %13325 = vmatprep.mubr.msk.bf16.mxu0 %vm1312_vm8, %v11931_v51  ;;  %v15861_v27 = vpop.f32.mrf.mxu1  ;;  %v4937_v51 = vsel %vm1337_vm0, %v15635_v62, 0  ;;  %v4558_v6 = vshll.u32 %v15842_v3, 16  ;;  %v21023_v32 = vcombine.low %v15700_v7, %v15724_v53  ;;  %v11948_v29 = vcombine.low %v4479_v17, %v4489_v39  ;;  %v15878_v62 = vld [vmem:[#allocation2 + $0xa0] sm:$0xf]  ;;  %v15897_v39 = vpop.f32.mrf.mxu0 }
 0x141   :  { %21022 = vst [vmem:[#allocation26_spill] sm:$0xff] %v15861_v27  ;;  %v15874_v25 = vrot.slane %v4521_v38, 4  ;;  %v15876_v27 = vrot.slane %v4548_v4, 5  ;;  %v4554_v41 = vrot.slane %v4552_v55, 4  ;;  %v4503_v28 = vsel %vm14369_vm14, %v15829_v46, %v15771_v42 }
 0x142   :  { %v15880_v60 = vpop.f32.mrf.mxu1  ;;  %v4513_v7 = vsel %vm14369_vm14, %v15848_v43, %v15822_v23  ;;  %v11933_v53 = vcombine.low %v15773_v10, %v15786_v57  ;;  %v15895_v17 = vadd.f32 %v15543_v59, %v15609_v40  ;;  %v4532_v42 = vrot.slane %v4531_v61, 4  ;;  %v15908_v23 = vld [vmem:[#allocation2 + $0xa4] sm:$0x1]  ;;  %v15919_v61 = vpop.f32.mrf.mxu0 }
 0x143   :  { %21024 = vst [vmem:[#allocation27_spill] sm:$0xff] %v15880_v60  ;;  %v4536_v46 = vrot.slane %v4534_v44, 5  ;;  %v15906_v38 = vadd.f32 %v15571_v31, %v15626_v45  ;;  %21027 = vst [vmem:[#allocation30_spill] sm:$0xff] %v15908_v23  ;;  %v4563_v43 = vshrl.u32 %v15866_v22, 16  ;;  %v4545_v59 = vor.u32 %v4544_v5, %v4541_v34  ;;  %v15917_v60 = vld [vmem:[#allocation2 + $0xa8] sm:$0xf] }
 0x144   :  { %13316 = vmatmul.mubr.msk.bf16.gmra.mxu1 %vm1312_vm8, %v21023_v32  ;;  %21025 = vst [vmem:[#allocation28_spill] sm:$0xff] %v15895_v17  ;;  %v15911_v4 = vpop.f32.mrf.mxu1  ;;  %v15913_v40 = vrot.slane %v4558_v6, 5  ;;  %v4566_v55 = vshll.u32 %v15866_v22, 16  ;;  %v4572_v32 = vshll.u32 %v15878_v62, 16  ;;  %21029 = vst [vmem:[#allocation32_spill] sm:$0xff] %v15919_v61  ;;  %v4527_v31 = vsel %vm14369_vm14, %v15874_v25, %v15833_v2 }
 0x145   :  { %13319 = vmatprep.mubr.msk.bf16.mxu1 %vm1312_vm8, %v11920_v47  ;;  %v15902_v47 = vld [vmem:[%s20896_s1 + $0xe] sm:$0x3]  ;;  %21026 = vst [vmem:[#allocation29_spill] sm:$0xff] %v15906_v38  ;;  %21028 = vst [vmem:[#allocation31_spill] sm:$0xff] %v15911_v4  ;;  %v4555_v45 = vor.u32 %v4554_v41, %v15876_v27  ;;  %v4565_v44 = vrot.slane %v4563_v43, 4  ;;  %v4576_v6 = vshrl.u32 %v15878_v62, 16  ;;  %v15939_v2 = vadd.f32 %v15593_v33, %v15652_v20  ;;  %v15941_v41 = vpop.f32.mrf.mxu0 }
 0x146   :  { %v15928_v34 = vld [vmem:[#allocation2 + $0xac] sm:$0xf]  ;;  %v15930_v5 = vpop.f32.mrf.mxu1  ;;  %v4568_v61 = vrot.slane %v4566_v55, 5  ;;  %v15935_v4 = vrot.slane %v4572_v32, 5  ;;  %v4537_v25 = vsel %vm14369_vm14, %v4532_v42, %v4536_v46  ;;  %v4590_v33 = vshll.u32 %v15917_v60, 16 }
 0x147   :  { %13326 = vmatmul.mubr.msk.bf16.vlgmr.msra.gmra.mxu0 %vm1312_vm8, %v11932_v21  ;;  %21030 = vst [vmem:[#allocation33_spill] sm:$0xff] %v15930_v5  ;;  %v11934_v21 = vcombine.low %v15815_v1, %v15825_v13  ;;  %21031 = vst [vmem:[#allocation34_spill] sm:$0xff] %v15939_v2  ;;  %v4578_v43 = vrot.slane %v4576_v6, 4  ;;  %v15946_v5 = vld [vmem:[#allocation2 + $0xb0] sm:$0x1]  ;;  %v4596_v20 = vshll.u32 %v15928_v34, 16  ;;  %v15956_v42 = vpop.f32.mrf.mxu0  ;;  %v21033_v46 = vcombine.low %v15779_v36, %v15804_v16 }
 0x148   :  { %13360 = vmatpush3.bf16.msra.mxu0 %v4937_v51  ;;  %13329 = vmatprep.mubr.msk.bf16.mxu0 %vm1312_vm8, %v11933_v53  ;;  %v4582_v51 = vshll.u32 %v15908_v23, 16  ;;  %v4587_v53 = vshrl.u32 %v15917_v60, 16  ;;  %v15951_v55 = vpop.f32.mrf.mxu1  ;;  %v4569_v32 = vor.u32 %v4568_v61, %v4565_v44  ;;  %v4600_v2 = vshrl.u32 %v15928_v34, 16  ;;  %v15973_v36 = vld [vmem:[#allocation2 + $0xb4] sm:$0xf] }
 0x149   :  { %13771 = vmatprep.subr.msk.bf16.mxu0 %vm1337_vm0, %v15902_v47  ;;  %21032 = vst [vmem:[#allocation35_spill] sm:$0xff] %v15951_v55  ;;  %v15962_v6 = vrot.slane %v4545_v59, 4  ;;  %v15964_v23 = vrot.slane %v4555_v45, 4  ;;  %v4579_v55 = vor.u32 %v4578_v43, %v15935_v4  ;;  %v4592_v1 = vrot.slane %v4590_v33, 5  ;;  %v15975_v16 = vpop.f32.mrf.mxu0 }
 0x14a   :  { %v4589_v61 = vrot.slane %v4587_v53, 4  ;;  %v15967_v44 = vpop.f32.mrf.mxu1  ;;  %v15970_v38 = vrot.slane %v4596_v20, 5  ;;  %v4602_v13 = vrot.slane %v4600_v2, 4  ;;  %v4606_v17 = vshll.u32 %v15946_v5, 16 }
 0x14b   :  { %21034 = vst [vmem:[#allocation36_spill] sm:$0xff] %v15967_v44  ;;  %v11949_v59 = vcombine.low %v4503_v28, %v4513_v7  ;;  %v5143_v45 = vsel %vm1337_vm0, %v15709_v49, 0  ;;  %v4570_v43 = vrot.slane %v4569_v32, 4  ;;  %v11935_v53 = vcombine.low %v15866_v22, %v15878_v62  ;;  %v15987_v44 = vld [vmem:[#allocation2 + $0xb8] sm:$0xf]  ;;  %v15989_v57 = vpop.f32.mrf.mxu0 }
 0x14c   :  { %13320 = vmatmul.mubr.msk.bf16.gmra.mxu1 %vm1312_vm8, %v21033_v46  ;;  %v15981_v46 = vpop.f32.mrf.mxu1  ;;  %v4580_v33 = vrot.slane %v4579_v55, 4  ;;  %v4584_v20 = vrot.slane %v4582_v51, 5  ;;  %v15985_v2 = vadd.f32 %v15642_v35, %v15720_v50  ;;  %21036 = vst [vmem:[#allocation38_spill] sm:$0xff] %v15989_v57  ;;  %v4593_v49 = vor.u32 %v4592_v1, %v4589_v61 }
 0x14d   :  { %13343 = vmatprep.mubr.msk.bf16.mxu1 %vm1312_vm8, %v11948_v29  ;;  %21035 = vst [vmem:[#allocation37_spill] sm:$0xff] %v15981_v46  ;;  %v11950_v29 = vcombine.low %v4527_v31, %v4537_v25  ;;  %v4603_v28 = vor.u32 %v4602_v13, %v15970_v38  ;;  %v15995_v7 = vadd.f32 %v15667_v48, %v15744_v8  ;;  %v4611_v31 = vshrl.u32 %v15973_v36, 16  ;;  %v159_v8 = vld [vmem:[%s20895_s0 + $0x78] sm:$0xf]  ;;  %v160_v13 = vld [vmem:[%s20895_s0 + $0x7c] sm:$0xf] }
 0x14e   :  { %v15998_v25 = vpop.f32.mrf.mxu1  ;;  %v4551_v35 = vsel %vm14369_vm14, %v15962_v6, %v15876_v27  ;;  %v4561_v50 = vsel %vm14369_vm14, %v15964_v23, %v15913_v40  ;;  %v16008_v1 = vrot.slane %v4606_v17, 5  ;;  %v4614_v48 = vshll.u32 %v15973_v36, 16  ;;  %v16018_v27 = vpop.f32.mrf.mxu0  ;;  %v16023_v17 = vld [vmem:[#allocation2 + $0xbc] sm:$0x1] }
 0x14f   :  { %13330 = vmatmul.mubr.msk.bf16.gmra.mxu0 %vm1312_vm8, %v11934_v21  ;;  %21037 = vst [vmem:[#allocation39_spill] sm:$0xff] %v15998_v25  ;;  %v4575_v23 = vsel %vm14369_vm14, %v4570_v43, %v15935_v4  ;;  %v4613_v40 = vrot.slane %v4611_v31, 4  ;;  %v4620_v21 = vshll.u32 %v15987_v44, 16  ;;  %v4624_v51 = vshrl.u32 %v15987_v44, 16  ;;  %v16040_v4 = vld [vmem:[%s20896_s1 + $0x10] sm:$0x3] }
 0x150   :  { %13333 = vmatprep.mubr.msk.bf16.mxu0 %vm1312_vm8, %v11935_v53  ;;  %v16027_v55 = vpop.f32.mrf.mxu1  ;;  %v4585_v32 = vsel %vm14369_vm14, %v4580_v33, %v4584_v20  ;;  %v11936_v6 = vcombine.low %v15917_v60, %v15928_v34  ;;  %v4616_v61 = vrot.slane %v4614_v48, 5  ;;  %v16035_v53 = vadd.f32 %v15692_v18, %v15775_v54  ;;  %v16042_v43 = vpop.f32.mrf.mxu0 }
 0x151   :  { %21038 = vst [vmem:[#allocation40_spill] sm:$0xff] %v16027_v55  ;;  %v4594_v31 = vrot.slane %v4593_v49, 4  ;;  %v4604_v46 = vrot.slane %v4603_v28, 4  ;;  %v16045_v33 = vrot.slane %v4620_v21, 5  ;;  %v4626_v20 = vrot.slane %v4624_v51, 4 }
 0x152   :  { %21039 = vst [vmem:[#allocation41_spill] sm:$0xff] %v16035_v53  ;;  %v16047_v57 = vpop.f32.mrf.mxu1  ;;  %v4630_v18 = vshll.u32 %v16023_v17, 16  ;;  %v452_v54 = vshrl.u32 %v159_v8, 16  ;;  %v455_v48 = vshll.u32 %v159_v8, 16  ;;  %v460_v55 = vshrl.u32 %v160_v13, 16  ;;  %v16051_v25 = vpop.f32.mrf.mxu0 }
 0x153   :  { %21040 = vst [vmem:[#allocation42_spill] sm:$0xff] %v16047_v57  ;;  %v4617_v53 = vor.u32 %v4616_v61, %v4613_v40  ;;  %v463_v49 = vshll.u32 %v160_v13, 16  ;;  %v11937_v28 = vcombine.low %v15973_v36, %v15987_v44  ;;  %v16062_v8 = vadd.f32 %v15764_v0, %v15853_v30  ;;  %v21069_v57 = vld [vmem:[#allocation34_spill] sm:$0xff] }
 0x154   :  { %13344 = vmatmul.mubr.msk.bf16.vlgmr.msra.gmra.mxu1 %vm1312_vm8, %v11949_v59  ;;  %v4627_v59 = vor.u32 %v4626_v20, %v16045_v33  ;;  %v462_v21 = vrot.slane %v460_v55, 7  ;;  %v16064_v51 = vpop.f32.mrf.mxu0  ;;  %v11951_v40 = vcombine.low %v4551_v35, %v4561_v50  ;;  %v11952_v61 = vcombine.low %v4575_v23, %v4585_v32  ;;  %v947_v20 = vld [vmem:[#allocation2 + $0xc0] sm:$0xf]  ;;  %v951_v23 = vld [vmem:[#allocation2 + $0xc8] sm:$0x1] }
 0x155   :  { %13378 = vmatpush3.bf16.msra.mxu1 %v5143_v45  ;;  %13347 = vmatprep.mubr.msk.bf16.mxu1 %vm1312_vm8, %v11950_v29  ;;  %v16058_v45 = vpop.f32.mrf.mxu1  ;;  %v454_v29 = vrot.slane %v452_v54, 7  ;;  %21042 = vst [vmem:[#allocation44_spill] sm:$0xff] %v16064_v51  ;;  %v4599_v13 = vsel %vm14369_vm14, %v4594_v31, %v15970_v38  ;;  %v4609_v0 = vsel %vm14369_vm14, %v4604_v46, %v16008_v1  ;;  %v16080_v38 = vld [vmem:[#allocation2 + $0x78] sm:$0xf]  ;;  %v16084_v54 = vld [vmem:[#allocation2 + $0x7c] sm:$0xf] }
 0x156   :  { %13772 = vmatprep.subr.msk.bf16.mxu1 %vm1337_vm0, %v16040_v4  ;;  %21041 = vst [vmem:[#allocation43_spill] sm:$0xff] %v16058_v45  ;;  %v16072_v45 = vadd.f32 %v15788_v12, %v15868_v9  ;;  %v465_v50 = vor.u32 %v463_v49, %v462_v21  ;;  %v16082_v32 = vpop.f32.mrf.mxu0  ;;  %v4628_v31 = vrot.slane %v4627_v59, 4  ;;  %v4632_v12 = vrot.slane %v4630_v18, 5  ;;  %v16150_v59 = vld [vmem:[#allocation2 + $0x90] sm:$0xf] }
 0x157   :  { %13334 = vmatmul.mubr.msk.bf16.gmra.mxu0 %vm1312_vm8, %v11936_v6  ;;  %v16074_v55 = vpop.f32.mrf.mxu1  ;;  %v457_v30 = vor.u32 %v455_v48, %v454_v29  ;;  %v458_v35 = vrot.slane %v454_v29, 4  ;;  %v4618_v6 = vrot.slane %v4617_v53, 4  ;;  %v467_v9 = vrot.slane %v462_v21, 4  ;;  %v21058_v53 = vld [vmem:[#allocation23_spill] sm:$0xff] }
 0x158   :  { %21043 = vst [vmem:[#allocation45_spill] sm:$0xff] %v16074_v55  ;;  %13337 = vmatprep.mubr.msk.bf16.mxu0 %vm1312_vm8, %v11937_v28  ;;  %v16094_v48 = vadd.f32 %v15807_v56, %v15897_v39  ;;  %v16096_v49 = vpop.f32.mrf.mxu0  ;;  %v11953_v56 = vcombine.low %v4599_v13, %v4609_v0  ;;  %v11964_v21 = vrot.slane %v15682_v19, 9  ;;  %v4836_v13 = vrot.slane %v15738_v11, 5 }
 0x159   :  { %v16086_v51 = vpop.f32.mrf.mxu1  ;;  %v466_v46 = vsel %vm14298_vm9, %v458_v35, %v465_v50  ;;  %v948_v1 = vsel %vm14321_vm10, %v457_v30, %v947_v20  ;;  %v952_v28 = vsel %vm14339_vm11, %v467_v9, %v951_v23  ;;  %v4623_v30 = vsel %vm14369_vm14, %v4618_v6, %v16045_v33  ;;  %v16119_v50 = vld [vmem:[#allocation2 + $0x84] sm:$0xf]  ;;  %v21047_v9 = vld [vmem:[#allocation15_spill] sm:$0xff]  ;;  %v21048_v6 = vld [vmem:[#allocation18_spill] sm:$0xff] }
 0x15a   :  { %21044 = vst [vmem:[#allocation46_spill] sm:$0xff] %v16086_v51  ;;  %949 = vst [vmem:[#allocation2 + $0xc0] sm:$0xf] %v948_v1  ;;  %v16112_v20 = vpop.f32.mrf.mxu0  ;;  %v4633_v35 = vsel %vm14369_vm14, %v4628_v31, %v4632_v12  ;;  %v16126_v19 = vadd.f32 %v15941_v41, %v15784_v15  ;;  %v11965_v23 = vrot.slane %v15718_v52, 9  ;;  %v4840_v33 = vrot.slane %v21047_v9, 5 }
 0x15b   :  { %950 = vst.msk [vmem:[#allocation2 + $0xc4] sm:$0xf] %vm19_vm1, %v466_v46  ;;  %v16105_v29 = vpop.f32.mrf.mxu1  ;;  %953 = vst [vmem:[#allocation2 + $0xc8] sm:$0x1] %v952_v28  ;;  %v16134_v31 = vadd.f32 %v15956_v42, %v21048_v6  ;;  %v11954_v52 = vcombine.low %v4623_v30, %v4633_v35  ;;  %v21052_v30 = vld [vmem:[#allocation24_spill] sm:$0xff]  ;;  %v11966_v24 = vrot.slane %v15773_v10, 9 }
 0x15c   :  { %13348 = vmatmul.mubr.msk.bf16.gmra.mxu1 %vm1312_vm8, %v11951_v40  ;;  %21045 = vst [vmem:[#allocation47_spill] sm:$0xff] %v16105_v29  ;;  %v4833_v40 = vrot.slane %v15690_v63, 5  ;;  %v16136_v12 = vpop.f32.mrf.mxu0  ;;  %v16164_v35 = vadd.f32 %v15975_v16, %v21052_v30  ;;  %v16174_v11 = vsel %vm14417_vm15, %v11965_v23, %v4840_v33  ;;  %v4842_v15 = vrot.slane %v4840_v33, 4 }
 0x15d   :  { %13351 = vmatprep.mubr.msk.bf16.mxu1 %vm1312_vm8, %v11952_v61  ;;  %v16121_v61 = vld [vmem:[#allocation2 + $0x88] sm:$0xf]  ;;  %v16128_v63 = vpop.f32.mrf.mxu1  ;;  %21049 = vst [vmem:[#allocation15_spill] sm:$0xff] %v16136_v12  ;;  %v4850_v51 = vrot.slane %v21058_v53, 5 }
 0x15e   :  { %21046 = vst [vmem:[#allocation48_spill] sm:$0xff] %v16128_v63  ;;  %v4835_v0 = vrot.slane %v4833_v40, 4  ;;  %v4834_v1 = vsel %vm14417_vm15, %v11964_v21, %v4833_v40  ;;  %v16152_v46 = vpop.f32.mrf.mxu0  ;;  %v16158_v21 = vsel %vm1337_vm0, %v15902_v47, 0  ;;  %v16160_v40 = vld [vmem:[#allocation2 + $0x94] sm:$0xf]  ;;  %v16178_v47 = vsel %vm1337_vm0, %v16040_v4, 0 }
 0x15f   :  { %v16143_v28 = vpop.f32.mrf.mxu1 }
 0x160   :  { %21051 = vst [vmem:[#allocation18_spill] sm:$0xff] %v16143_v28  ;;  %v4837_v6 = vsel %vm14417_vm15, %v4835_v0, %v4836_v13  ;;  %v16180_v39 = vpop.f32.mrf.mxu0 }
 0x161   :  { %v16166_v42 = vpop.f32.mrf.mxu1  ;;  %v16168_v13 = vld [vmem:[#allocation2 + $0xc0] sm:$0xf]  ;;  %v11973_v9 = vcombine.low %v4834_v1, %v4837_v6 }
 0x162   :  { %21053 = vst [vmem:[#allocation10_spill] sm:$0xff] %v16166_v42  ;;  %v16170_v0 = vld [vmem:[#allocation2 + $0xc4] sm:$0xf]  ;;  %v16183_v16 = vld [vmem:[#allocation2 + $0xc8] sm:$0x1]  ;;  %v4635_v30 = vshrl.u32 %v16168_v13, 16  ;;  %v16198_v63 = vpop.f32.mrf.mxu0 }
 0x163   :  { %v4638_v18 = vshll.u32 %v16168_v13, 16  ;;  %v4644_v1 = vshll.u32 %v16170_v0, 16  ;;  %v4648_v23 = vshrl.u32 %v16170_v0, 16  ;;  %v16189_v6 = vpop.f32.mrf.mxu1  ;;  %v4654_v4 = vshll.u32 %v16183_v16, 16 }
 0x164   :  { %13352 = vmatmul.mubr.msk.bf16.gmra.mxu1 %vm1312_vm8, %v11953_v56  ;;  %21054 = vst [vmem:[#allocation24_spill] sm:$0xff] %v16189_v6  ;;  %v11938_v33 = vcombine.low %v16168_v13, %v16170_v0  ;;  %v4637_v12 = vrot.slane %v4635_v30, 4  ;;  %v21057_v56 = vld [vmem:[#allocation17_spill] sm:$0xff]  ;;  %v16210_v55 = vpop.f32.mrf.mxu0 }
 0x165   :  { %13355 = vmatprep.mubr.msk.bf16.mxu1 %vm1312_vm8, %v11954_v52  ;;  %v4640_v42 = vrot.slane %v4638_v18, 5  ;;  %v4646_v37 = vrot.slane %v4644_v1, 5  ;;  %v4650_v14 = vrot.slane %v4648_v23, 4  ;;  %v16200_v28 = vpop.f32.mrf.mxu1  ;;  %v21056_v52 = vrot.slane %v15754_v26, 5  ;;  %21059 = vst [vmem:[#allocation17_spill] sm:$0xff] %v16210_v55 }
 0x166   :  { %21055 = vst [vmem:[#allocation49_spill] sm:$0xff] %v16200_v28  ;;  %13338 = vmatmul.mubr.msk.bf16.gmra.mxu0 %vm1312_vm8, %v11938_v33  ;;  %v4847_v29 = vrot.slane %v21057_v56, 5  ;;  %v4656_v1 = vrot.slane %v4654_v4, 5  ;;  %v16213_v23 = vld [vmem:[#allocation2 + $0x9c] sm:$0xf] }
 0x167   :  { %v4844_v6 = vsel %vm14417_vm15, %v4842_v15, %v21056_v52  ;;  %v4641_v18 = vor.u32 %v4640_v42, %v4637_v12  ;;  %v4651_v30 = vor.u32 %v4650_v14, %v4646_v37  ;;  %13361 = vmatprep.mubr.msk.bf16.mxu0 %vm1312_vm8, %v11973_v9  ;;  %v21060_v33 = vld [vmem:[#allocation28_spill] sm:$0xff]  ;;  %v16219_v15 = vpop.f32.mrf.mxu1  ;;  %v16222_v56 = vld [vmem:[#allocation2 + $0xa0] sm:$0xf]  ;;  %v16229_v9 = vpop.f32.mrf.mxu0 }
 0x168   :  { %v16217_v26 = vadd.f32 %v16018_v27, %v21060_v33  ;;  %21062 = vst [vmem:[#allocation28_spill] sm:$0xff] %v16219_v15  ;;  %v4849_v53 = vrot.slane %v4847_v29, 4  ;;  %v21063_v52 = vld [vmem:[#allocation21_spill] sm:$0xff]  ;;  %v4848_v27 = vsel %vm14417_vm15, %v11966_v24, %v4847_v29  ;;  %v21066_v33 = vld [vmem:[#allocation19_spill] sm:$0xff]  ;;  %v11974_v10 = vcombine.low %v16174_v11, %v4844_v6 }
 0x169   :  { %v4854_v55 = vrot.slane %v21063_v52, 5  ;;  %v21064_v12 = vld [vmem:[#allocation29_spill] sm:$0xff]  ;;  %v4642_v42 = vrot.slane %v4641_v18, 4  ;;  %v4652_v4 = vrot.slane %v4651_v30, 4  ;;  %v11967_v28 = vrot.slane %v21066_v33, 9  ;;  %v16234_v15 = vpop.f32.mrf.mxu1  ;;  %v16244_v18 = vpop.f32.mrf.mxu0 }
 0x16a   :  { %21061 = vst [vmem:[#allocation23_spill] sm:$0xff] %v16217_v26  ;;  %v16227_v14 = vadd.f32 %v16042_v43, %v21064_v12  ;;  %21067 = vst [vmem:[#allocation29_spill] sm:$0xff] %v16234_v15  ;;  %v4851_v52 = vsel %vm14417_vm15, %v4849_v53, %v4850_v51  ;;  %v16240_v12 = vld [vmem:[#allocation2 + $0xa8] sm:$0xf]  ;;  %v16258_v15 = vadd.f32 %v16051_v25, %v21069_v57  ;;  %v21071_v25 = vrot.slane %v15842_v3, 5  ;;  %v21077_v11 = vld [vmem:[#allocation41_spill] sm:$0xff] }
 0x16b   :  { %v4856_v43 = vrot.slane %v4854_v55, 4  ;;  %v4647_v24 = vsel %vm14369_vm14, %v4642_v42, %v4646_v37  ;;  %v4657_v29 = vsel %vm14369_vm14, %v4652_v4, %v4656_v1  ;;  %v16253_v30 = vpop.f32.mrf.mxu1  ;;  %v11975_v33 = vcombine.low %v4848_v27, %v4851_v52  ;;  %v16260_v26 = vpop.f32.mrf.mxu0  ;;  %v16273_v27 = vld [vmem:[%s20896_s1 + $0x2] sm:$0x3]  ;;  %v21072_v1 = vld [vmem:[#allocation30_spill] sm:$0xff] }
 0x16c   :  { %21065 = vst [vmem:[#allocation21_spill] sm:$0xff] %v16227_v14  ;;  %v16242_v14 = vld [vmem:[#allocation2 + $0xac] sm:$0xf]  ;;  %21068 = vst [vmem:[#allocation19_spill] sm:$0xff] %v16253_v30  ;;  %v11955_v51 = vcombine.low %v4647_v24, %v4657_v29  ;;  %v4855_v42 = vsel %vm14417_vm15, %v11967_v28, %v4854_v55  ;;  %v16268_v24 = vld [vmem:[#allocation2 + $0xb4] sm:$0xf]  ;;  %v16297_v3 = vadd.f32 %v16082_v32, %v15985_v2 }
 0x16d   :  { %v16275_v57 = vpop.f32.mrf.mxu1  ;;  %v4858_v55 = vsel %vm14417_vm15, %v4856_v43, %v21071_v25  ;;  %v16283_v28 = vld [vmem:[#allocation2 + $0xb8] sm:$0xf]  ;;  %v11968_v52 = vrot.slane %v15866_v22, 9  ;;  %v4861_v29 = vrot.slane %v15878_v62, 5  ;;  %v4864_v53 = vrot.slane %v21072_v1, 5  ;;  %v16288_v6 = vpop.f32.mrf.mxu0 }
 0x16e   :  { %21070 = vst [vmem:[#allocation34_spill] sm:$0xff] %v16275_v57  ;;  %13356 = vmatmul.mubr.msk.bf16.gmra.mxu1 %vm1312_vm8, %v11955_v51  ;;  %13362 = vmatmul.mubr.msk.bf16.vlgmr.msra.gmra.mxu0 %vm1312_vm8, %v11974_v10  ;;  %21073 = vst [vmem:[#allocation30_spill] sm:$0xff] %v16288_v6  ;;  %v21074_v51 = vcombine.low %v16080_v38, %v16084_v54  ;;  %v11969_v10 = vrot.slane %v15917_v60, 9  ;;  %v4868_v22 = vrot.slane %v15928_v34, 5  ;;  %v16305_v43 = vld [vmem:[#allocation2 + $0xc0] sm:$0xf] }
 0x16f   :  { %13396 = vmatpush3.bf16.msra.mxu0 %v16158_v21  ;;  %v16303_v62 = vadd.f32 %v16096_v49, %v15995_v7  ;;  %v16307_v1 = vpop.f32.mrf.mxu1  ;;  %13365 = vmatprep.mubr.msk.bf16.mxu0 %vm1312_vm8, %v11975_v33  ;;  %v4863_v32 = vrot.slane %v4861_v29, 4  ;;  %v16313_v60 = vld [vmem:[#allocation2 + $0xc4] sm:$0xf]  ;;  %v16317_v34 = vpop.f32.mrf.mxu0  ;;  %v11976_v7 = vcombine.low %v4855_v42, %v4858_v55  ;;  %v16331_v37 = vadd.f32 %v16112_v20, %v21077_v11  ;;  %v16343_v2 = vld [vmem:[#allocation2 + $0xcc] sm:$0xf] }
 0x170   :  { %13379 = vmatprep.mubr.msk.bf16.mxu1 %vm1312_vm8, %v21074_v51  ;;  %21075 = vst [vmem:[#allocation50_spill] sm:$0xff] %v16307_v1  ;;  %13773 = vmatprep.subr.msk.bf16.mxu0 %vm1337_vm0, %v16273_v27  ;;  %v4862_v51 = vsel %vm14417_vm15, %v11968_v52, %v4861_v29  ;;  %v4870_v4 = vrot.slane %v4868_v22, 4  ;;  %v16338_v33 = vsel %vm14417_vm15, %v11969_v10, %v4868_v22  ;;  %v16348_v11 = vld [vmem:[#allocation2 + $0xd0] sm:$0xf]  ;;  %v11970_v55 = vrot.slane %v15973_v36, 9 }
 0x171   :  { %v16324_v25 = vpop.f32.mrf.mxu1  ;;  %v4865_v21 = vsel %vm14417_vm15, %v4863_v32, %v4864_v53  ;;  %v16333_v42 = vpop.f32.mrf.mxu0  ;;  %v4875_v49 = vrot.slane %v15987_v44, 5  ;;  %v4878_v52 = vrot.slane %v16023_v17, 5  ;;  %v16358_v29 = vadd.f32 %v16152_v46, %v16062_v8  ;;  %v5055_v22 = vld [vmem:[#allocation2 + $0x80] sm:$0x1] }
 0x172   :  { %21076 = vst [vmem:[#allocation51_spill] sm:$0xff] %v16324_v25  ;;  %v11977_v32 = vcombine.low %v4862_v51, %v4865_v21  ;;  %v4882_v21 = vrot.slane %v16170_v0, 5  ;;  %v16364_v51 = vld [vmem:[%s20896_s1] sm:$0x3]  ;;  %v21079_v44 = vcombine.low %v16119_v50, %v16121_v61  ;;  %v21080_v36 = vrot.slane %v15946_v5, 5 }
 0x173   :  { %v16345_v53 = vpop.f32.mrf.mxu1  ;;  %v16352_v10 = vpop.f32.mrf.mxu0  ;;  %v4877_v8 = vrot.slane %v4875_v49, 4  ;;  %v11971_v46 = vrot.slane %v16168_v13, 9  ;;  %v16378_v0 = vadd.f32 %v16180_v39, %v16072_v45  ;;  %v21083_v5 = vcombine.low %v16150_v59, %v16160_v40 }
 0x174   :  { %21078 = vst [vmem:[#allocation41_spill] sm:$0xff] %v16345_v53  ;;  %v4872_v17 = vsel %vm14417_vm15, %v4870_v4, %v21080_v36  ;;  %v4876_v4 = vsel %vm14417_vm15, %v11970_v55, %v4875_v49  ;;  %v4884_v13 = vrot.slane %v4882_v21, 4  ;;  %v5625_v45 = vrot.slane %v16084_v54, 5 }
 0x175   :  { %v16380_v20 = vpop.f32.mrf.mxu0  ;;  %v16382_v57 = vpop.f32.mrf.mxu1  ;;  %v5632_v36 = vrot.slane %v16121_v61, 5  ;;  %v5628_v39 = vrot.slane %v5055_v22, 5  ;;  %v21086_v55 = vrot.slane %v16183_v16, 5  ;;  %v5268_v25 = vshll.u32 %v16084_v54, 16 }
 0x176   :  { %13380 = vmatmul.mubr.msk.bf16.vlgmr.msra.gmra.mxu1 %vm1312_vm8, %v21079_v44  ;;  %13366 = vmatmul.mubr.msk.bf16.gmra.mxu0 %vm1312_vm8, %v11976_v7  ;;  %21081 = vst [vmem:[#allocation52_spill] sm:$0xff] %v16380_v20  ;;  %21082 = vst [vmem:[#allocation53_spill] sm:$0xff] %v16382_v57  ;;  %v12023_v7 = vrot.slane %v16080_v38, 9  ;;  %v16400_v44 = vadd.f32 %v16198_v63, %v16094_v48  ;;  %v5058_v57 = vld [vmem:[#allocation2 + $0x8c] sm:$0x1]  ;;  %v16412_v48 = vsel %vm14417_vm15, %v11971_v46, %v4882_v21 }
 0x177   :  { %13414 = vmatpush3.bf16.msra.mxu1 %v16178_v47  ;;  %13383 = vmatprep.mubr.msk.bf16.mxu1 %vm1312_vm8, %v21083_v5  ;;  %v4879_v47 = vsel %vm14417_vm15, %v4877_v8, %v4878_v52  ;;  %v16405_v49 = vpop.f32.mrf.mxu0  ;;  %v5627_v5 = vrot.slane %v5625_v45, 4  ;;  %v11978_v52 = vcombine.low %v16338_v33, %v4872_v17  ;;  %v12024_v63 = vrot.slane %v16119_v50, 9 }
 0x178   :  { %13369 = vmatprep.mubr.msk.bf16.mxu0 %vm1312_vm8, %v11977_v32  ;;  %21084 = vst [vmem:[#allocation54_spill] sm:$0xff] %v16400_v44  ;;  %13774 = vmatprep.subr.msk.bf16.mxu1 %vm1337_vm0, %v16364_v51  ;;  %v11979_v8 = vcombine.low %v4876_v4, %v4879_v47  ;;  %v16417_v6 = vpop.f32.mrf.mxu1  ;;  %v4886_v32 = vsel %vm14417_vm15, %v4884_v13, %v21086_v55  ;;  %v21087_v33 = vshrl.u32 %v16080_v38, 16  ;;  %v21088_v21 = vshll.u32 %v16080_v38, 16  ;;  %v21091_v38 = vld [vmem:[#allocation25_spill] sm:$0xff] }
 0x179   :  { %v16415_v20 = vpop.f32.mrf.mxu0  ;;  %21085 = vst [vmem:[#allocation55_spill] sm:$0xff] %v16417_v6  ;;  %v16425_v53 = vsel %vm14417_vm15, %v12023_v7, %v5625_v45  ;;  %v5634_v4 = vrot.slane %v5632_v36, 4  ;;  %v5635_v47 = vrot.slane %v5058_v57, 5  ;;  %v21089_v6 = vshrl.u32 %v16084_v54, 16 }
 0x17a   :  { %v5261_v17 = vrot.slane %v21087_v33, 4  ;;  %v5264_v46 = vrot.slane %v21088_v21, 5  ;;  %v16436_v13 = vpop.f32.mrf.mxu1  ;;  %v16440_v7 = vsel %vm14417_vm15, %v5627_v5, %v5628_v39  ;;  %v5278_v55 = vshll.u32 %v5055_v22, 16 }
 0x17b   :  { %v5274_v16 = vrot.slane %v21089_v6, 4  ;;  %v16434_v1 = vpop.f32.mrf.mxu0  ;;  %21090 = vst [vmem:[#allocation56_spill] sm:$0xff] %v16436_v13  ;;  %v2027_v33 = vadd.f32 %v21091_v38, %v16126_v19  ;;  %v21092_v21 = vcombine.low %v16213_v23, %v16222_v56  ;;  %v5270_v54 = vrot.slane %v5268_v25, 5 }
 0x17c   :  { %v5265_v45 = vor.u32 %v5264_v46, %v5261_v17  ;;  %v21093_v6 = vshrl.u32 %v16119_v50, 16  ;;  %v21094_v30 = vshll.u32 %v16119_v50, 16  ;;  %v5292_v5 = vshll.u32 %v16121_v61, 16  ;;  %v16456_v17 = vpop.f32.mrf.mxu1 }
 0x17d   :  { %v16454_v22 = vpop.f32.mrf.mxu0  ;;  %21096 = vst [vmem:[#allocation57_spill] sm:$0xff] %v16456_v17  ;;  %v21097_v19 = vcombine.low %v16240_v12, %v16242_v14  ;;  %v16464_v46 = vadd.f32 %v16229_v9, %v2027_v33  ;;  %v21098_v50 = vshrl.u32 %v16121_v61, 16  ;;  %v5275_v38 = vor.u32 %v5274_v16, %v5270_v54  ;;  %v21099_v9 = vld [vmem:[#allocation26_spill] sm:$0xff]  ;;  %v5061_v33 = vld [vmem:[#allocation2 + $0x98] sm:$0x1] }
 0x17e   :  { %13384 = vmatmul.mubr.msk.bf16.gmra.mxu1 %vm1312_vm8, %v21092_v21  ;;  %13370 = vmatmul.mubr.msk.bf16.gmra.mxu0 %vm1312_vm8, %v11978_v52  ;;  %v5285_v13 = vrot.slane %v21093_v6, 4  ;;  %v5288_v39 = vrot.slane %v21094_v30, 5  ;;  %21095 = vst [vmem:[#allocation25_spill] sm:$0xff] %v16454_v22  ;;  %v5266_v25 = vrot.slane %v5265_v45, 4  ;;  %v5280_v52 = vrot.slane %v5278_v55, 5 }
 0x17f   :  { %13387 = vmatprep.mubr.msk.bf16.mxu1 %vm1312_vm8, %v21097_v19  ;;  %13373 = vmatprep.mubr.msk.bf16.mxu0 %vm1312_vm8, %v11979_v8  ;;  %v5298_v30 = vrot.slane %v21098_v50, 4  ;;  %v5294_v6 = vrot.slane %v5292_v5, 5  ;;  %v5302_v22 = vshll.u32 %v5058_v57, 16  ;;  %v16468_v17 = vpop.f32.mrf.mxu0  ;;  %v11980_v44 = vcombine.low %v16412_v48, %v4886_v32  ;;  %v16498_v50 = vld [vmem:[#allocation2 + $0xa4] sm:$0x1] }
 0x180   :  { %v5289_v21 = vor.u32 %v5288_v39, %v5285_v13  ;;  %v16473_v19 = vsel %vm14417_vm15, %v12024_v63, %v5632_v36  ;;  %v5271_v8 = vsel %vm14369_vm14, %v5266_v25, %v5270_v54  ;;  %v2025_v45 = vadd.f32 %v21099_v9, %v16134_v31  ;;  %v16481_v39 = vpop.f32.mrf.mxu1 }
 0x181   :  { %v5276_v61 = vrot.slane %v5275_v38, 4  ;;  %v5299_v16 = vor.u32 %v5298_v30, %v5294_v6  ;;  %v5304_v13 = vrot.slane %v5302_v22, 5  ;;  %v16479_v57 = vpop.f32.mrf.mxu0  ;;  %21100 = vst [vmem:[#allocation26_spill] sm:$0xff] %v16481_v39  ;;  %v16487_v36 = vsel %vm14417_vm15, %v5634_v4, %v5635_v47  ;;  %v21101_v22 = vld [vmem:[#allocation27_spill] sm:$0xff] }
 0x182   :  { %v5290_v55 = vrot.slane %v5289_v21, 4  ;;  %v16490_v48 = vadd.f32 %v16244_v18, %v2025_v45  ;;  %v5639_v31 = vrot.slane %v16160_v40, 5  ;;  %v12025_v5 = vrot.slane %v16150_v59, 9 }
 0x183   :  { %v5281_v63 = vsel %vm14369_vm14, %v5276_v61, %v5280_v52  ;;  %v5300_v54 = vrot.slane %v5299_v16, 4  ;;  %v2028_v25 = vadd.f32 %v21101_v22, %v16164_v35  ;;  %v16500_v30 = vpop.f32.mrf.mxu0  ;;  %v5642_v38 = vrot.slane %v5061_v33, 5 }
 0x184   :  { %v12007_v4 = vcombine.low %v5271_v8, %v5281_v63  ;;  %v5295_v18 = vsel %vm14369_vm14, %v5290_v55, %v5294_v6  ;;  %v5641_v47 = vrot.slane %v5639_v31, 4  ;;  %v21102_v21 = vcombine.low %v16268_v24, %v16283_v28  ;;  %v16516_v6 = vpop.f32.mrf.mxu1 }
 0x185   :  { %v5305_v35 = vsel %vm14369_vm14, %v5300_v54, %v5304_v13  ;;  %v16512_v52 = vadd.f32 %v16260_v26, %v2028_v25  ;;  %v12026_v8 = vrot.slane %v16213_v23, 9  ;;  %v5646_v9 = vrot.slane %v16222_v56, 5  ;;  %21103 = vst [vmem:[#allocation27_spill] sm:$0xff] %v16516_v6  ;;  %v16518_v45 = vpop.f32.mrf.mxu0 }
 0x186   :  { %13388 = vmatmul.mubr.msk.bf16.gmra.mxu1 %vm1312_vm8, %v21102_v21  ;;  %13374 = vmatmul.mubr.msk.bf16.gmra.mxu0 %vm1312_vm8, %v11980_v44  ;;  %21104 = vst [vmem:[#allocation58_spill] sm:$0xff] %v16518_v45  ;;  %v21105_v61 = vcombine.low %v16305_v43, %v16313_v60  ;;  %v6188_v26 = vsel %vm1337_vm0, %v16273_v27, 0  ;;  %v5649_v55 = vrot.slane %v16498_v50, 5  ;;  %v21106_v16 = vshrl.u32 %v16150_v59, 16 }
 0x187   :  { %13397 = vmatprep.mubr.msk.bf16.mxu0 %vm1312_vm8, %v12007_v4  ;;  %v12008_v63 = vcombine.low %v5295_v18, %v5305_v35  ;;  %v16534_v54 = vsel %vm14417_vm15, %v12025_v5, %v5639_v31  ;;  %v5648_v22 = vrot.slane %v5646_v9, 4  ;;  %v21107_v25 = vshll.u32 %v16150_v59, 16  ;;  %v16540_v4 = vpop.f32.mrf.mxu0  ;;  %v21110_v5 = vld [vmem:[#allocation23_spill] sm:$0xff] }
 0x188   :  { %13391 = vmatprep.mubr.msk.bf16.mxu1 %vm1312_vm8, %v21105_v61  ;;  %v5309_v13 = vrot.slane %v21106_v16, 4  ;;  %v16538_v61 = vpop.f32.mrf.mxu1  ;;  %v16544_v27 = vsel %vm14417_vm15, %v5641_v47, %v5642_v38  ;;  %v5316_v44 = vshll.u32 %v16160_v40, 16  ;;  %v21109_v18 = vshrl.u32 %v16160_v40, 16 }
 0x189   :  { %v5312_v21 = vrot.slane %v21107_v25, 5  ;;  %21108 = vst [vmem:[#allocation59_spill] sm:$0xff] %v16538_v61  ;;  %v5326_v16 = vshll.u32 %v5061_v33, 16  ;;  %v16551_v31 = vsel %vm14417_vm15, %v12026_v8, %v5646_v9  ;;  %v21111_v25 = vld [vmem:[#allocation33_spill] sm:$0xff]  ;;  %v21112_v39 = vshrl.u32 %v16213_v23, 16  ;;  %v16559_v47 = vpop.f32.mrf.mxu0 }
 0x18a   :  { %v5322_v35 = vrot.slane %v21109_v18, 4  ;;  %v2031_v32 = vadd.f32 %v21111_v25, %v21110_v5  ;;  %v16557_v6 = vpop.f32.mrf.mxu1  ;;  %v16563_v40 = vsel %vm14417_vm15, %v5648_v22, %v5649_v55  ;;  %v5318_v33 = vrot.slane %v5316_v44, 5 }
 0x18b   :  { %v5313_v59 = vor.u32 %v5312_v21, %v5309_v13  ;;  %v5333_v45 = vrot.slane %v21112_v39, 4  ;;  %21113 = vst [vmem:[#allocation23_spill] sm:$0xff] %v16557_v6  ;;  %v5328_v38 = vrot.slane %v5326_v16, 5  ;;  %v21114_v8 = vshll.u32 %v16213_v23, 16  ;;  %v16575_v6 = vpop.f32.mrf.mxu0  ;;  %v21117_v16 = vld [vmem:[#allocation21_spill] sm:$0xff]  ;;  %v21118_v23 = vld [vmem:[#allocation35_spill] sm:$0xff] }
 0x18c   :  { %v16568_v21 = vadd.f32 %v16317_v34, %v2031_v32  ;;  %v5340_v18 = vshll.u32 %v16222_v56, 16  ;;  %v21115_v39 = vshrl.u32 %v16222_v56, 16  ;;  %v16573_v25 = vpop.f32.mrf.mxu1  ;;  %v5323_v55 = vor.u32 %v5322_v35, %v5318_v33  ;;  %v16583_v34 = vld [vmem:[%s20896_s1 + $0x4] sm:$0x3] }
 0x18d   :  { %v5336_v9 = vrot.slane %v21114_v8, 5  ;;  %v5314_v13 = vrot.slane %v5313_v59, 4  ;;  %21116 = vst [vmem:[#allocation33_spill] sm:$0xff] %v16573_v25  ;;  %v5350_v44 = vshll.u32 %v16498_v50, 16  ;;  %v2029_v8 = vadd.f32 %v21118_v23, %v21117_v16  ;;  %v5067_v59 = vld [vmem:[#allocation2 + $0xb0] sm:$0x1] }
 0x18e   :  { %v5346_v5 = vrot.slane %v21115_v39, 4  ;;  %v21119_v56 = vcombine.low %v16343_v2, %v16348_v11  ;;  %13398 = vmatmul.mubr.msk.bf16.vlgmr.msra.gmra.mxu0 %vm1312_vm8, %v12008_v63  ;;  %v5342_v50 = vrot.slane %v5340_v18, 5  ;;  %v5653_v35 = vrot.slane %v16242_v14, 5  ;;  %v16596_v39 = vpop.f32.mrf.mxu0  ;;  %v5070_v25 = vld [vmem:[#allocation2 + $0xbc] sm:$0x1] }
 0x18f   :  { %v5337_v22 = vor.u32 %v5336_v9, %v5333_v45  ;;  %v5319_v32 = vsel %vm14369_vm14, %v5314_v13, %v5318_v33  ;;  %v12027_v45 = vrot.slane %v16240_v12, 9  ;;  %v16594_v9 = vpop.f32.mrf.mxu1  ;;  %21121 = vst [vmem:[#allocation35_spill] sm:$0xff] %v16596_v39  ;;  %v21122_v16 = vcombine.low %v16425_v53, %v16440_v7  ;;  %13432 = vmatpush3.bf16.msra.mxu0 %v6188_v26  ;;  %v21123_v26 = vld [vmem:[#allocation36_spill] sm:$0xff] }
 0x190   :  { %13392 = vmatmul.mubr.msk.bf16.gmra.mxu1 %vm1312_vm8, %v21119_v56  ;;  %21120 = vst [vmem:[#allocation21_spill] sm:$0xff] %v16594_v9  ;;  %v5324_v23 = vrot.slane %v5323_v55, 4  ;;  %v5352_v56 = vrot.slane %v5350_v44, 5  ;;  %v16603_v33 = vadd.f32 %v16333_v42, %v2029_v8  ;;  %v5347_v13 = vor.u32 %v5346_v5, %v5342_v50  ;;  %13775 = vmatprep.subr.msk.bf16.mxu0 %vm1337_vm0, %v16583_v34  ;;  %v16611_v53 = vpop.f32.mrf.mxu0 }
 0x191   :  { %13415 = vmatprep.mubr.msk.bf16.mxu1 %vm1312_vm8, %v21122_v16  ;;  %v5338_v63 = vrot.slane %v5337_v22, 4  ;;  %v16607_v18 = vsel %vm14417_vm15, %v12027_v45, %v5653_v35  ;;  %v5655_v9 = vrot.slane %v5653_v35, 4  ;;  %v5656_v61 = vrot.slane %v5067_v59, 5  ;;  %v16625_v35 = vpop.f32.mrf.mxu1 }
 0x192   :  { %v5329_v7 = vsel %vm14369_vm14, %v5324_v23, %v5328_v38  ;;  %v2032_v5 = vadd.f32 %v21123_v26, %v16258_v15  ;;  %v12028_v55 = vrot.slane %v16268_v24, 9  ;;  %v5348_v44 = vrot.slane %v5347_v13, 4  ;;  %21124 = vst [vmem:[#allocation36_spill] sm:$0xff] %v16625_v35  ;;  %v16627_v16 = vpop.f32.mrf.mxu0 }
 0x193   :  { %v5343_v42 = vsel %vm14369_vm14, %v5338_v63, %v5342_v50  ;;  %v12009_v22 = vcombine.low %v5319_v32, %v5329_v7  ;;  %v16622_v8 = vsel %vm14417_vm15, %v5655_v9, %v5656_v61  ;;  %v5660_v45 = vrot.slane %v16283_v28, 5 }
 0x194   :  { %v6352_v38 = vsel %vm1337_vm0, %v16364_v51, 0  ;;  %v12034_v15 = vcombine.low %v16534_v54, %v16544_v27  ;;  %v16634_v50 = vadd.f32 %v16352_v10, %v2032_v5  ;;  %v5663_v32 = vrot.slane %v5070_v25, 5  ;;  %v16643_v51 = vpop.f32.mrf.mxu0  ;;  %v21129_v5 = vld [vmem:[#allocation39_spill] sm:$0xff] }
 0x195   :  { %v12035_v61 = vcombine.low %v16551_v31, %v16563_v40  ;;  %13401 = vmatprep.mubr.msk.bf16.mxu0 %vm1312_vm8, %v12009_v22  ;;  %v5353_v9 = vsel %vm14369_vm14, %v5348_v44, %v5352_v56  ;;  %v5662_v23 = vrot.slane %v5660_v45, 4  ;;  %v21125_v63 = vshrl.u32 %v16240_v12, 16  ;;  %v16653_v40 = vld [vmem:[%s20896_s1 + $0x6] sm:$0x3]  ;;  %v16667_v44 = vpop.f32.mrf.mxu1 }
 0x196   :  { %v12010_v7 = vcombine.low %v5343_v42, %v5353_v9  ;;  %v12036_v10 = vcombine.low %v16607_v18, %v16622_v8  ;;  %v21126_v54 = vshll.u32 %v16240_v12, 16  ;;  %v5364_v31 = vshll.u32 %v16242_v14, 16  ;;  %21130 = vst [vmem:[#allocation39_spill] sm:$0xff] %v16667_v44  ;;  %v16669_v8 = vpop.f32.mrf.mxu0 }
 0x197   :  { %v5357_v13 = vrot.slane %v21125_v63, 4  ;;  %v21127_v56 = vcombine.low %v16473_v19, %v16487_v36  ;;  %v16661_v42 = vsel %vm14417_vm15, %v12028_v55, %v5660_v45  ;;  %v21128_v18 = vshrl.u32 %v16242_v14, 16  ;;  %21131 = vst [vmem:[#allocation60_spill] sm:$0xff] %v16669_v8 }
 0x198   :  { %v5360_v27 = vrot.slane %v21126_v54, 5  ;;  %v5374_v26 = vshll.u32 %v5067_v59, 16  ;;  %v2035_v22 = vadd.f32 %v21129_v5, %v16297_v3  ;;  %v16674_v19 = vsel %vm14417_vm15, %v5662_v23, %v5663_v32  ;;  %13402 = vmatmul.mubr.msk.bf16.gmra.mxu0 %vm1312_vm8, %v12010_v7  ;;  %v16687_v32 = vpop.f32.mrf.mxu0 }
 0x199   :  { %13416 = vmatmul.mubr.msk.bf16.vlgmr.msra.gmra.mxu1 %vm1312_vm8, %v21127_v56  ;;  %v5370_v12 = vrot.slane %v21128_v18, 4  ;;  %v5366_v55 = vrot.slane %v5364_v31, 5  ;;  %v21132_v14 = vshrl.u32 %v16268_v24, 16  ;;  %v21133_v9 = vshll.u32 %v16268_v24, 16  ;;  %v21135_v56 = vld [vmem:[#allocation40_spill] sm:$0xff] }
 0x19a   :  { %13450 = vmatpush3.bf16.msra.mxu1 %v6352_v38  ;;  %13419 = vmatprep.mubr.msk.bf16.mxu1 %vm1312_vm8, %v12034_v15  ;;  %v5361_v36 = vor.u32 %v5360_v27, %v5357_v13  ;;  %v5376_v59 = vrot.slane %v5374_v26, 5  ;;  %v16680_v3 = vadd.f32 %v16405_v49, %v2035_v22  ;;  %v5388_v15 = vshll.u32 %v16283_v28, 16  ;;  %v5073_v27 = vld [vmem:[#allocation2 + $0xc8] sm:$0x1]  ;;  %v16694_v26 = vpop.f32.mrf.mxu1  ;;  %v16696_v5 = vpop.f32.mrf.mxu0 }
 0x19b   :  { %v5381_v45 = vrot.slane %v21132_v14, 4  ;;  %v5384_v38 = vrot.slane %v21133_v9, 5  ;;  %13776 = vmatprep.subr.msk.bf16.mxu1 %vm1337_vm0, %v16653_v40  ;;  %v5371_v63 = vor.u32 %v5370_v12, %v5366_v55  ;;  %v21134_v13 = vshrl.u32 %v16283_v28, 16  ;;  %21136 = vst [vmem:[#allocation40_spill] sm:$0xff] %v16694_v26  ;;  %v954_v26 = vld [vmem:[#allocation2 + $0xe4] sm:$0xf] }
 0x19c   :  { %v5362_v23 = vrot.slane %v5361_v36, 4  ;;  %v5398_v7 = vshll.u32 %v5070_v25, 16  ;;  %v5390_v49 = vrot.slane %v5388_v15, 5  ;;  %v2033_v24 = vadd.f32 %v21135_v56, %v16303_v62  ;;  %v16704_v62 = vld [vmem:[#allocation2 + $0xd4] sm:$0x1]  ;;  %v16718_v56 = vpop.f32.mrf.mxu1 }
 0x19d   :  { %v5394_v54 = vrot.slane %v21134_v13, 4  ;;  %v5385_v31 = vor.u32 %v5384_v38, %v5381_v45  ;;  %v12029_v18 = vrot.slane %v16305_v43, 9  ;;  %v5372_v12 = vrot.slane %v5371_v63, 4  ;;  %v16712_v63 = vpop.f32.mrf.mxu0 }
 0x19e   :  { %v5367_v22 = vsel %vm14369_vm14, %v5362_v23, %v5366_v55  ;;  %v5400_v36 = vrot.slane %v5398_v7, 5  ;;  %v5667_v28 = vrot.slane %v16313_v60, 5  ;;  %v16702_v45 = vadd.f32 %v16415_v20, %v2033_v24  ;;  %v21137_v55 = vld [vmem:[#allocation42_spill] sm:$0xff] }
 0x19f   :  { %v5386_v25 = vrot.slane %v5385_v31, 4  ;;  %v5395_v14 = vor.u32 %v5394_v54, %v5390_v49  ;;  %v5670_v9 = vrot.slane %v5073_v27, 5  ;;  %v5377_v38 = vsel %vm14369_vm14, %v5372_v12, %v5376_v59 }
 0x1a0   :  { %v5668_v15 = vsel %vm14417_vm15, %v12029_v18, %v5667_v28  ;;  %v5669_v13 = vrot.slane %v5667_v28, 4  ;;  %v2036_v23 = vadd.f32 %v21137_v55, %v16331_v37  ;;  %v12011_v54 = vcombine.low %v5367_v22, %v5377_v38  ;;  %v16742_v38 = vpop.f32.mrf.mxu0 }
 0x1a1   :  { %13420 = vmatmul.mubr.msk.bf16.gmra.mxu1 %vm1312_vm8, %v12035_v61  ;;  %v5391_v20 = vsel %vm14369_vm14, %v5386_v25, %v5390_v49  ;;  %v5396_v7 = vrot.slane %v5395_v14, 4  ;;  %v12030_v31 = vrot.slane %v16343_v2, 9  ;;  %v5674_v24 = vrot.slane %v16348_v11, 5  ;;  %21140 = vst [vmem:[#allocation42_spill] sm:$0xff] %v16742_v38 }
 0x1a2   :  { %13423 = vmatprep.mubr.msk.bf16.mxu1 %vm1312_vm8, %v12036_v10  ;;  %v5671_v59 = vsel %vm14417_vm15, %v5669_v13, %v5670_v9  ;;  %v16724_v37 = vadd.f32 %v16434_v1, %v2036_v23  ;;  %v5677_v61 = vrot.slane %v16704_v62, 5  ;;  %v5440_v18 = vshrl.u32 %v16348_v11, 16  ;;  %13405 = vmatprep.mubr.msk.bf16.mxu0 %vm1312_vm8, %v12011_v54  ;;  %v16747_v23 = vpop.f32.mrf.mxu1 }
 0x1a3   :  { %v12037_v49 = vcombine.low %v16661_v42, %v16674_v19  ;;  %v5401_v10 = vsel %vm14369_vm14, %v5396_v7, %v5400_v36  ;;  %v21138_v22 = vshrl.u32 %v16305_v43, 16  ;;  %v16738_v1 = vsel %vm14417_vm15, %v12030_v31, %v5674_v24 }
 0x1a4   :  { %v12012_v28 = vcombine.low %v5391_v20, %v5401_v10  ;;  %v5676_v25 = vrot.slane %v5674_v24, 4  ;;  %v21139_v14 = vshll.u32 %v16305_v43, 16  ;;  %v12038_v42 = vcombine.low %v5668_v15, %v5671_v59  ;;  %v21142_v43 = vld [vmem:[#allocation45_spill] sm:$0xff] }
 0x1a5   :  { %v5405_v12 = vrot.slane %v21138_v22, 4  ;;  %v5412_v19 = vshll.u32 %v16313_v60, 16  ;;  %v21141_v13 = vshrl.u32 %v16313_v60, 16  ;;  %v5422_v55 = vshll.u32 %v5073_v27, 16  ;;  %v16759_v22 = vld [vmem:[#allocation2 + $0xd8] sm:$0xf] }
 0x1a6   :  { %v5408_v9 = vrot.slane %v21139_v14, 5  ;;  %13406 = vmatmul.mubr.msk.bf16.gmra.mxu0 %vm1312_vm8, %v12012_v28  ;;  %v5678_v54 = vsel %vm14417_vm15, %v5676_v25, %v5677_v61  ;;  %v2039_v7 = vadd.f32 %v21142_v43, %v16358_v29  ;;  %v21143_v31 = vshrl.u32 %v16343_v2, 16  ;;  %v16765_v29 = vpop.f32.mrf.mxu0 }
 0x1a7   :  { %v5418_v36 = vrot.slane %v21141_v13, 4  ;;  %v12039_v59 = vcombine.low %v16738_v1, %v5678_v54  ;;  %v5414_v24 = vrot.slane %v5412_v19, 5  ;;  %v5424_v60 = vrot.slane %v5422_v55, 5  ;;  %v16771_v13 = vld [vmem:[#allocation2 + $0xdc] sm:$0xf]  ;;  %v16773_v55 = vpop.f32.mrf.mxu1 }
 0x1a8   :  { %v5409_v20 = vor.u32 %v5408_v9, %v5405_v12  ;;  %v5429_v15 = vrot.slane %v21143_v31, 4  ;;  %v21144_v27 = vshll.u32 %v16343_v2, 16  ;;  %v16762_v14 = vadd.f32 %v16468_v17, %v2039_v7  ;;  %v21145_v2 = vld [vmem:[#allocation46_spill] sm:$0xff] }
 0x1a9   :  { %v5436_v61 = vshll.u32 %v16348_v11, 16  ;;  %v5442_v12 = vrot.slane %v5440_v18, 4  ;;  %13424 = vmatmul.mubr.msk.bf16.gmra.mxu1 %vm1312_vm8, %v12037_v49  ;;  %v5419_v25 = vor.u32 %v5418_v36, %v5414_v24  ;;  %v5446_v9 = vshll.u32 %v16704_v62, 16  ;;  %v161_v62 = vld [vmem:[%s20895_s0 + $0x80] sm:$0xf]  ;;  %v16783_v36 = vpop.f32.mrf.mxu0 }
 0x1aa   :  { %v5432_v10 = vrot.slane %v21144_v27, 5  ;;  %v5410_v28 = vrot.slane %v5409_v20, 4  ;;  %v2037_v19 = vadd.f32 %v21145_v2, %v16378_v0  ;;  %13427 = vmatprep.mubr.msk.bf16.mxu1 %vm1312_vm8, %v12038_v42  ;;  %v5947_v18 = vshrl.u32 %v16759_v22, 16  ;;  %v162_v42 = vld [vmem:[%s20895_s0 + $0x84] sm:$0xf]  ;;  %v21147_v27 = vld [vmem:[#allocation47_spill] sm:$0xff] }
 0x1ab   :  { %v5438_v17 = vrot.slane %v5436_v61, 5  ;;  %v5950_v49 = vshll.u32 %v16759_v22, 16  ;;  %v5420_v0 = vrot.slane %v5419_v25, 4  ;;  %v5448_v20 = vrot.slane %v5446_v9, 5  ;;  %v16802_v9 = vpop.f32.mrf.mxu1 }
 0x1ac   :  { %v5433_v1 = vor.u32 %v5432_v10, %v5429_v15  ;;  %v5415_v11 = vsel %vm14369_vm14, %v5410_v28, %v5414_v24  ;;  %v16786_v43 = vadd.f32 %v16479_v57, %v2037_v19  ;;  %v5960_v31 = vshrl.u32 %v16771_v13, 16  ;;  %v21146_v24 = vld [vmem:[#allocation54_spill] sm:$0xff]  ;;  %v16796_v28 = vpop.f32.mrf.mxu0  ;;  %21148 = vst [vmem:[#allocation45_spill] sm:$0xff] %v16802_v9 }
 0x1ad   :  { %v5443_v7 = vor.u32 %v5442_v12, %v5438_v17  ;;  %v12065_v15 = vcombine.low %v16759_v22, %v16771_v13  ;;  %v2040_v10 = vadd.f32 %v21147_v27, %v21146_v24  ;;  %v5425_v61 = vsel %vm14369_vm14, %v5420_v0, %v5424_v60 }
 0x1ae   :  { %v5434_v54 = vrot.slane %v5433_v1, 4  ;;  %v469_v25 = vshrl.u32 %v161_v62, 16  ;;  %v472_v1 = vshll.u32 %v161_v62, 16  ;;  %v12013_v12 = vcombine.low %v5415_v11, %v5425_v61  ;;  %v16807_v44 = vpop.f32.mrf.mxu0  ;;  %v16812_v62 = vld [vmem:[#allocation2 + $0xe0] sm:$0x1] }
 0x1af   :  { %v5444_v2 = vrot.slane %v5443_v7, 4  ;;  %v16805_v19 = vadd.f32 %v16500_v30, %v2040_v10  ;;  %v477_v38 = vshrl.u32 %v162_v42, 16  ;;  %21149 = vst [vmem:[#allocation46_spill] sm:$0xff] %v16807_v44  ;;  %v480_v27 = vshll.u32 %v162_v42, 16  ;;  %v16816_v10 = vpop.f32.mrf.mxu1  ;;  %v961_v44 = vld [vmem:[#allocation2 + $0xf0] sm:$0xf] }
 0x1b0   :  { %v5439_v57 = vsel %vm14369_vm14, %v5434_v54, %v5438_v17  ;;  %v471_v24 = vrot.slane %v469_v25, 7  ;;  %v5949_v35 = vrot.slane %v5947_v18, 4  ;;  %13409 = vmatprep.mubr.msk.bf16.mxu0 %vm1312_vm8, %v12013_v12  ;;  %v5952_v11 = vrot.slane %v5950_v49, 5  ;;  %21150 = vst [vmem:[#allocation54_spill] sm:$0xff] %v16816_v10 }
 0x1b1   :  { %v5449_v60 = vsel %vm14369_vm14, %v5444_v2, %v5448_v20  ;;  %v479_v17 = vrot.slane %v477_v38, 7  ;;  %v5956_v0 = vshll.u32 %v16771_v13, 16  ;;  %13428 = vmatmul.mubr.msk.bf16.gmra.mxu1 %vm1312_vm8, %v12039_v59  ;;  %v5962_v25 = vrot.slane %v5960_v31, 4  ;;  %v958_v20 = vld [vmem:[#allocation2 + $0xec] sm:$0x1]  ;;  %v16819_v38 = vpop.f32.mrf.mxu0 }
 0x1b2   :  { %v12014_v30 = vcombine.low %v5439_v57, %v5449_v60  ;;  %v474_v54 = vor.u32 %v472_v1, %v471_v24  ;;  %v475_v7 = vrot.slane %v471_v24, 4  ;;  %13451 = vmatprep.mubr.msk.bf16.mxu1 %vm1312_vm8, %v12065_v15  ;;  %v5953_v42 = vor.u32 %v5952_v11, %v5949_v35  ;;  %21151 = vst [vmem:[#allocation47_spill] sm:$0xff] %v16819_v38  ;;  %v21153_v57 = vld [vmem:[#allocation18_spill] sm:$0xff]  ;;  %v16830_v15 = vpop.f32.mrf.mxu1 }
 0x1b3   :  { %v482_v18 = vor.u32 %v480_v27, %v479_v17  ;;  %v5958_v61 = vrot.slane %v5956_v0, 5  ;;  %v5966_v59 = vshll.u32 %v16812_v62, 16  ;;  %v2615_v1 = vadd.f32 %v21153_v57, %v16464_v46  ;;  %v163_v35 = vld [vmem:[%s20895_s0 + $0x88] sm:$0xf]  ;;  %21154 = vst [vmem:[#allocation8_spill] sm:$0xff] %v16830_v15 }
 0x1b4   :  { %13410 = vmatmul.mubr.msk.bf16.gmra.mxu0 %vm1312_vm8, %v12014_v30  ;;  %v955_v12 = vsel %vm14321_vm10, %v474_v54, %v954_v26  ;;  %v484_v2 = vrot.slane %v479_v17, 4  ;;  %v5954_v27 = vrot.slane %v5953_v42, 4  ;;  %v164_v26 = vld [vmem:[%s20895_s0 + $0x8c] sm:$0xf] }
 0x1b5   :  { %v483_v24 = vsel %vm14298_vm9, %v475_v7, %v482_v18  ;;  %956 = vst [vmem:[#allocation2 + $0xe4] sm:$0xf] %v955_v12  ;;  %v5963_v60 = vor.u32 %v5962_v25, %v5958_v61  ;;  %v5968_v46 = vrot.slane %v5966_v59, 5  ;;  %v16839_v17 = vadd.f32 %v16540_v4, %v2615_v1  ;;  %v21158_v30 = vld [vmem:[#allocation10_spill] sm:$0xff]  ;;  %v165_v7 = vld [vmem:[%s20895_s0 + $0x90] sm:$0xf]  ;;  %v16853_v12 = vpop.f32.mrf.mxu1 }
 0x1b6   :  { %957 = vst.msk [vmem:[#allocation2 + $0xe8] sm:$0xf] %vm19_vm1, %v483_v24  ;;  %v959_v0 = vsel %vm14339_vm11, %v484_v2, %v958_v20  ;;  %v2613_v54 = vadd.f32 %v21158_v30, %v16490_v48  ;;  %v5959_v18 = vsel %vm14369_vm14, %v5954_v27, %v5958_v61  ;;  %v486_v25 = vshrl.u32 %v163_v35, 16  ;;  %v166_v4 = vld [vmem:[%s20895_s0 + $0x94] sm:$0xf]  ;;  %21159 = vst [vmem:[#allocation7_spill] sm:$0xff] %v16853_v12  ;;  %v16855_v20 = vpop.f32.mrf.mxu0 }
 0x1b7   :  { %21156 = vst [vmem:[#allocation18_spill] sm:$0xff] %v16839_v17  ;;  %v5964_v42 = vrot.slane %v5963_v60, 4  ;;  %960 = vst [vmem:[#allocation2 + $0xec] sm:$0x1] %v959_v0  ;;  %v489_v59 = vshll.u32 %v163_v35, 16  ;;  %v494_v57 = vshrl.u32 %v164_v26, 16 }
 0x1b8   :  { %21160 = vst [vmem:[#allocation10_spill] sm:$0xff] %v16855_v20  ;;  %v16858_v48 = vadd.f32 %v16559_v47, %v2613_v54  ;;  %v497_v1 = vshll.u32 %v164_v26, 16  ;;  %v488_v2 = vrot.slane %v486_v25, 7  ;;  %v21162_v24 = vld [vmem:[#allocation24_spill] sm:$0xff]  ;;  %v503_v60 = vshrl.u32 %v165_v7, 16  ;;  %v16867_v26 = vpop.f32.mrf.mxu1  ;;  %v16869_v54 = vpop.f32.mrf.mxu0 }
 0x1b9   :  { %v5969_v61 = vsel %vm14369_vm14, %v5964_v42, %v5968_v46  ;;  %v2616_v27 = vadd.f32 %v21162_v24, %v16512_v52  ;;  %v496_v30 = vrot.slane %v494_v57, 7  ;;  %v506_v9 = vshll.u32 %v165_v7, 16  ;;  %21164 = vst [vmem:[#allocation62_spill] sm:$0xff] %v16867_v26  ;;  %21165 = vst [vmem:[#allocation63_spill] sm:$0xff] %v16869_v54 }
 0x1ba   :  { %21161 = vst [vmem:[#allocation61_spill] sm:$0xff] %v16858_v48  ;;  %v12049_v0 = vcombine.low %v5959_v18, %v5969_v61  ;;  %v511_v8 = vshrl.u32 %v166_v4, 16  ;;  %v491_v38 = vor.u32 %v489_v59, %v488_v2  ;;  %v492_v17 = vrot.slane %v488_v2, 4  ;;  %v968_v2 = vld [vmem:[#allocation2 + $0xfc] sm:$0xf]  ;;  %v16899_v26 = vpop.f32.mrf.mxu0 }
 0x1bb   :  { %v16865_v47 = vadd.f32 %v16575_v6, %v2616_v27  ;;  %v505_v35 = vrot.slane %v503_v60, 7  ;;  %v6771_v52 = vsel %vm1337_vm0, %v16653_v40, 0  ;;  %v499_v18 = vor.u32 %v497_v1, %v496_v30  ;;  %21167 = vst [vmem:[#allocation65_spill] sm:$0xff] %v16899_v26  ;;  %v170_v26 = vld [vmem:[%s20895_s0 + $0xa4] sm:$0xf] }
 0x1bc   :  { %v16871_v46 = vld [vmem:[#allocation2 + $0xe4] sm:$0xf]  ;;  %13433 = vmatprep.mubr.msk.bf16.mxu0 %vm1312_vm8, %v12049_v0  ;;  %v513_v7 = vrot.slane %v511_v8, 7  ;;  %v514_v42 = vshll.u32 %v166_v4, 16  ;;  %v962_v57 = vsel %vm14321_vm10, %v491_v38, %v961_v44  ;;  %v16897_v38 = vld [vmem:[%s20896_s1 + $0xa] sm:$0x3] }
 0x1bd   :  { %21163 = vst [vmem:[#allocation24_spill] sm:$0xff] %v16865_v47  ;;  %v16876_v25 = vld [vmem:[#allocation2 + $0xe8] sm:$0xf]  ;;  %v5971_v6 = vshrl.u32 %v16871_v46, 16  ;;  %v5974_v59 = vshll.u32 %v16871_v46, 16  ;;  %v508_v61 = vor.u32 %v506_v9, %v505_v35  ;;  %v500_v4 = vsel %vm14298_vm9, %v492_v17, %v499_v18  ;;  %v16892_v9 = vpop.f32.mrf.mxu1 }
 0x1be   :  { %v5984_v24 = vshrl.u32 %v16876_v25, 16  ;;  %v12066_v27 = vcombine.low %v16871_v46, %v16876_v25  ;;  %v16885_v40 = vld [vmem:[#allocation2 + $0xec] sm:$0x1]  ;;  %v5980_v8 = vshll.u32 %v16876_v25, 16  ;;  %963 = vst [vmem:[#allocation2 + $0xf0] sm:$0xf] %v962_v57 }
 0x1bf   :  { %v5973_v1 = vrot.slane %v5971_v6, 4  ;;  %v5976_v60 = vrot.slane %v5974_v59, 5  ;;  %v5990_v0 = vshll.u32 %v16885_v40, 16  ;;  %964 = vst.msk [vmem:[#allocation2 + $0xf4] sm:$0xf] %vm19_vm1, %v500_v4  ;;  %v509_v44 = vrot.slane %v505_v35, 4 }
 0x1c0   :  { %21166 = vst [vmem:[#allocation64_spill] sm:$0xff] %v16892_v9  ;;  %13452 = vmatmul.mubr.msk.bf16.vlgmr.msra.gmra.mxu1 %vm1312_vm8, %v12066_v27  ;;  %v5982_v17 = vrot.slane %v5980_v8, 5  ;;  %v5986_v18 = vrot.slane %v5984_v24, 4  ;;  %v516_v6 = vor.u32 %v514_v42, %v513_v7  ;;  %v969_v59 = vsel %vm14321_vm10, %v508_v61, %v968_v2  ;;  %v965_v57 = vld [vmem:[#allocation2 + $0xf8] sm:$0x1] }
 0x1c1   :  { %v167_v35 = vld [vmem:[%s20895_s0 + $0x98] sm:$0xf]  ;;  %v5977_v4 = vor.u32 %v5976_v60, %v5973_v1  ;;  %v5992_v9 = vrot.slane %v5990_v0, 5  ;;  %v6565_v54 = vsel %vm1337_vm0, %v16583_v34, 0  ;;  %13486 = vmatpush3.bf16.msra.mxu1 %v6771_v52  ;;  %970 = vst [vmem:[#allocation2 + $0xfc] sm:$0xf] %v969_v59 }
 0x1c2   :  { %v501_v47 = vrot.slane %v496_v30, 4  ;;  %v972_v27 = vld [vmem:[#allocation2 + $0x104] sm:$0x1]  ;;  %v5987_v8 = vor.u32 %v5986_v18, %v5982_v17  ;;  %v517_v42 = vsel %vm14298_vm9, %v509_v44, %v516_v6  ;;  %v21168_v61 = vld [vmem:[#allocation28_spill] sm:$0xff]  ;;  %v518_v24 = vrot.slane %v513_v7, 4  ;;  %13778 = vmatprep.subr.msk.bf16.mxu1 %vm1337_vm0, %v16897_v38  ;;  %v16927_v7 = vpop.f32.mrf.mxu0 }
 0x1c3   :  { %v2619_v2 = vadd.f32 %v21168_v61, %v16568_v21  ;;  %v16916_v1 = vld [vmem:[%s20895_s0 + $0x9c] sm:$0xf]  ;;  %v5978_v34 = vrot.slane %v5977_v4, 4  ;;  %971 = vst.msk [vmem:[#allocation2 + $0x100] sm:$0xf] %vm19_vm1, %v517_v42  ;;  %v21169_v52 = vld [vmem:[#allocation29_spill] sm:$0xff]  ;;  %v16925_v21 = vpop.f32.mrf.mxu1 }
 0x1c4   :  { %v966_v30 = vsel %vm14339_vm11, %v501_v47, %v965_v57  ;;  %v2617_v60 = vadd.f32 %v21169_v52, %v16603_v33  ;;  %v520_v0 = vshrl.u32 %v167_v35, 16  ;;  %21170 = vst [vmem:[#allocation28_spill] sm:$0xff] %v16925_v21  ;;  %21171 = vst [vmem:[#allocation29_spill] sm:$0xff] %v16927_v7  ;;  %v5988_v44 = vrot.slane %v5987_v8, 4  ;;  %v16960_v52 = vpop.f32.mrf.mxu0 }
 0x1c5   :  { %967 = vst [vmem:[#allocation2 + $0xf8] sm:$0x1] %v966_v30  ;;  %v16930_v18 = vadd.f32 %v16611_v53, %v2619_v2  ;;  %v973_v6 = vsel %vm14339_vm11, %v518_v24, %v972_v27  ;;  %v523_v59 = vshll.u32 %v167_v35, 16  ;;  %v5983_v47 = vsel %vm14369_vm14, %v5978_v34, %v5982_v17  ;;  %v16936_v57 = vld [vmem:[#allocation2 + $0xf0] sm:$0xf]  ;;  %v16958_v30 = vpop.f32.mrf.mxu1  ;;  %21175 = vst [vmem:[#allocation69_spill] sm:$0xff] %v16960_v52 }
 0x1c6   :  { %974 = vst [vmem:[#allocation2 + $0x104] sm:$0x1] %v973_v6  ;;  %v16939_v33 = vadd.f32 %v16627_v16, %v2617_v60  ;;  %v522_v4 = vrot.slane %v520_v0, 7  ;;  %v528_v8 = vshrl.u32 %v16916_v1, 16  ;;  %v5993_v53 = vsel %vm14369_vm14, %v5988_v44, %v5992_v9  ;;  %v16944_v42 = vld [vmem:[#allocation2 + $0xf4] sm:$0xf] }
 0x1c7   :  { %21172 = vst [vmem:[#allocation66_spill] sm:$0xff] %v16930_v18  ;;  %v5995_v27 = vshrl.u32 %v16936_v57, 16  ;;  %v5998_v35 = vshll.u32 %v16936_v57, 16  ;;  %v531_v17 = vshll.u32 %v16916_v1, 16  ;;  %v12050_v61 = vcombine.low %v5983_v47, %v5993_v53  ;;  %v975_v34 = vld [vmem:[#allocation2 + $0x108] sm:$0xf] }
 0x1c8   :  { %21173 = vst [vmem:[#allocation67_spill] sm:$0xff] %v16939_v33  ;;  %v6008_v2 = vshrl.u32 %v16944_v42, 16  ;;  %v12067_v16 = vcombine.low %v16936_v57, %v16944_v42  ;;  %v6004_v24 = vshll.u32 %v16944_v42, 16  ;;  %v16956_v9 = vld [vmem:[%s20896_s1 + $0x8] sm:$0x3]  ;;  %21174 = vst [vmem:[#allocation68_spill] sm:$0xff] %v16958_v30  ;;  %v525_v44 = vor.u32 %v523_v59, %v522_v4 }
 0x1c9   :  { %v16962_v60 = vld [vmem:[#allocation2 + $0xfc] sm:$0xf]  ;;  %v5997_v1 = vrot.slane %v5995_v27, 4  ;;  %v6000_v0 = vrot.slane %v5998_v35, 5  ;;  %v526_v6 = vrot.slane %v522_v4, 4  ;;  %13434 = vmatmul.mubr.msk.bf16.vlgmr.msra.gmra.mxu0 %vm1312_vm8, %v12050_v61  ;;  %v530_v52 = vrot.slane %v528_v8, 7  ;;  %v16984_v8 = vpop.f32.mrf.mxu1 }
 0x1ca   :  { %13455 = vmatprep.mubr.msk.bf16.mxu1 %vm1312_vm8, %v12067_v16  ;;  %v6019_v47 = vshrl.u32 %v16962_v60, 16  ;;  %v6022_v53 = vshll.u32 %v16962_v60, 16  ;;  %v6006_v21 = vrot.slane %v6004_v24, 5  ;;  %v6010_v7 = vrot.slane %v6008_v2, 4  ;;  %13468 = vmatpush3.bf16.msra.mxu0 %v6565_v54  ;;  %v16968_v30 = vld [vmem:[#allocation2 + $0x100] sm:$0xf] }
 0x1cb   :  { %v6001_v18 = vor.u32 %v6000_v0, %v5997_v1  ;;  %v976_v27 = vsel %vm14321_vm10, %v525_v44, %v975_v34  ;;  %v21176_v59 = vld [vmem:[#allocation19_spill] sm:$0xff]  ;;  %v6032_v35 = vshrl.u32 %v16968_v30, 16  ;;  %v12068_v61 = vcombine.low %v16962_v60, %v16968_v30  ;;  %v169_v54 = vld [vmem:[%s20895_s0 + $0xa0] sm:$0xf]  ;;  %13777 = vmatprep.subr.msk.bf16.mxu0 %vm1337_vm0, %v16956_v9 }
 0x1cc   :  { %v2620_v4 = vadd.f32 %v21176_v59, %v16634_v50  ;;  %v16977_v16 = vld [vmem:[#allocation2 + $0xf8] sm:$0x1]  ;;  %v6011_v24 = vor.u32 %v6010_v7, %v6006_v21  ;;  %v6021_v2 = vrot.slane %v6019_v47, 4  ;;  %977 = vst [vmem:[#allocation2 + $0x108] sm:$0xf] %v976_v27  ;;  %21177 = vst [vmem:[#allocation19_spill] sm:$0xff] %v16984_v8  ;;  %v16986_v50 = vpop.f32.mrf.mxu0  ;;  %v533_v33 = vor.u32 %v531_v17, %v530_v52 }
 0x1cd   :  { %21178 = vst [vmem:[#allocation70_spill] sm:$0xff] %v16986_v50  ;;  %v6002_v34 = vrot.slane %v6001_v18, 4  ;;  %v6014_v1 = vshll.u32 %v16977_v16, 16  ;;  %v16989_v0 = vld [vmem:[#allocation2 + $0x104] sm:$0x1]  ;;  %v6024_v44 = vrot.slane %v6022_v53, 5  ;;  %13456 = vmatmul.mubr.msk.bf16.gmra.mxu1 %vm1312_vm8, %v12068_v61 }
 0x1ce   :  { %v6028_v7 = vshll.u32 %v16968_v30, 16  ;;  %v6012_v47 = vrot.slane %v6011_v24, 4  ;;  %v6034_v27 = vrot.slane %v6032_v35, 4  ;;  %v6038_v59 = vshll.u32 %v16989_v0, 16  ;;  %v17004_v24 = vpop.f32.mrf.mxu1  ;;  %v17006_v17 = vpop.f32.mrf.mxu0 }
 0x1cf   :  { %v6007_v8 = vsel %vm14369_vm14, %v6002_v34, %v6006_v21  ;;  %v6016_v20 = vrot.slane %v6014_v1, 5  ;;  %v6025_v50 = vor.u32 %v6024_v44, %v6021_v2  ;;  %v534_v48 = vsel %vm14298_vm9, %v526_v6, %v533_v33  ;;  %21180 = vst [vmem:[#allocation72_spill] sm:$0xff] %v17004_v24  ;;  %21181 = vst [vmem:[#allocation73_spill] sm:$0xff] %v17006_v17  ;;  %v982_v33 = vld [vmem:[#allocation2 + $0x114] sm:$0xf] }
 0x1d0   :  { %v6030_v18 = vrot.slane %v6028_v7, 5  ;;  %v6040_v53 = vrot.slane %v6038_v59, 5  ;;  %v17002_v61 = vadd.f32 %v16643_v51, %v2620_v4  ;;  %v537_v35 = vshrl.u32 %v169_v54, 16  ;;  %978 = vst.msk [vmem:[#allocation2 + $0x10c] sm:$0xf] %vm19_vm1, %v534_v48 }
 0x1d1   :  { %v6017_v21 = vsel %vm14369_vm14, %v6012_v47, %v6016_v20  ;;  %v6026_v2 = vrot.slane %v6025_v50, 4  ;;  %v540_v1 = vshll.u32 %v169_v54, 16  ;;  %v545_v59 = vshrl.u32 %v170_v26, 16  ;;  %v979_v6 = vld [vmem:[#allocation2 + $0x110] sm:$0x1]  ;;  %v17020_v50 = vpop.f32.mrf.mxu0 }
 0x1d2   :  { %21179 = vst [vmem:[#allocation71_spill] sm:$0xff] %v17002_v61  ;;  %v6035_v34 = vor.u32 %v6034_v27, %v6030_v18  ;;  %v12051_v44 = vcombine.low %v6007_v8, %v6017_v21  ;;  %v539_v7 = vrot.slane %v537_v35, 7  ;;  %v548_v61 = vshll.u32 %v170_v26, 16  ;;  %v17018_v8 = vpop.f32.mrf.mxu1  ;;  %v172_v35 = vld [vmem:[%s20895_s0 + $0xac] sm:$0xf] }
 0x1d3   :  { %v6031_v51 = vsel %vm14369_vm14, %v6026_v2, %v6030_v18  ;;  %v17013_v24 = vld [vmem:[#allocation2 + $0x108] sm:$0xf]  ;;  %v535_v17 = vrot.slane %v530_v52, 4  ;;  %21182 = vst [vmem:[#allocation74_spill] sm:$0xff] %v17018_v8  ;;  %v547_v18 = vrot.slane %v545_v59, 7 }
 0x1d4   :  { %v6036_v4 = vrot.slane %v6035_v34, 4  ;;  %13437 = vmatprep.mubr.msk.bf16.mxu0 %vm1312_vm8, %v12051_v44  ;;  %v6043_v20 = vshrl.u32 %v17013_v24, 16  ;;  %v6046_v48 = vshll.u32 %v17013_v24, 16  ;;  %v542_v54 = vor.u32 %v540_v1, %v539_v7  ;;  %v171_v52 = vld [vmem:[%s20895_s0 + $0xa8] sm:$0xf] }
 0x1d5   :  { %v543_v27 = vrot.slane %v539_v7, 4  ;;  %v980_v26 = vsel %vm14339_vm11, %v535_v17, %v979_v6  ;;  %v550_v1 = vor.u32 %v548_v61, %v547_v18  ;;  %v21183_v44 = vld [vmem:[#allocation50_spill] sm:$0xff]  ;;  %v552_v7 = vrot.slane %v547_v18, 4  ;;  %v986_v59 = vld [vmem:[#allocation2 + $0x11c] sm:$0x1]  ;;  %v21184_v6 = vld [vmem:[#allocation51_spill] sm:$0xff]  ;;  %v17043_v61 = vpop.f32.mrf.mxu0 }
 0x1d6   :  { %v6041_v47 = vsel %vm14369_vm14, %v6036_v4, %v6040_v53  ;;  %v983_v2 = vsel %vm14321_vm10, %v542_v54, %v982_v33  ;;  %981 = vst [vmem:[#allocation2 + $0x110] sm:$0x1] %v980_v26  ;;  %v6045_v34 = vrot.slane %v6043_v20, 4  ;;  %v6048_v53 = vrot.slane %v6046_v48, 5  ;;  %v17041_v20 = vpop.f32.mrf.mxu1  ;;  %v173_v26 = vld [vmem:[%s20895_s0 + $0xb0] sm:$0xf] }
 0x1d7   :  { %v12052_v21 = vcombine.low %v6031_v51, %v6041_v47  ;;  %984 = vst [vmem:[#allocation2 + $0x114] sm:$0xf] %v983_v2  ;;  %v2623_v17 = vadd.f32 %v21183_v44, %v16680_v3  ;;  %v2621_v4 = vadd.f32 %v21184_v6, %v16702_v45  ;;  %v17039_v8 = vld [vmem:[#allocation2 + $0x10c] sm:$0xf]  ;;  %v554_v47 = vshrl.u32 %v171_v52, 16  ;;  %21185 = vst [vmem:[#allocation50_spill] sm:$0xff] %v17041_v20 }
 0x1d8   :  { %v6049_v51 = vor.u32 %v6048_v53, %v6045_v34  ;;  %v557_v33 = vshll.u32 %v171_v52, 16  ;;  %v562_v54 = vshrl.u32 %v172_v35, 16  ;;  %v6056_v48 = vshrl.u32 %v17039_v8, 16  ;;  %v17068_v39 = vpop.f32.mrf.mxu1 }
 0x1d9   :  { %13438 = vmatmul.mubr.msk.bf16.gmra.mxu0 %vm1312_vm8, %v12052_v21  ;;  %v12069_v3 = vcombine.low %v17013_v24, %v17039_v8  ;;  %v551_v45 = vsel %vm14298_vm9, %v543_v27, %v550_v1  ;;  %v6052_v18 = vshll.u32 %v17039_v8, 16  ;;  %v17056_v21 = vadd.f32 %v16687_v32, %v2623_v17  ;;  %21187 = vst [vmem:[#allocation51_spill] sm:$0xff] %v17068_v39 }
 0x1da   :  { %985 = vst.msk [vmem:[#allocation2 + $0x118] sm:$0xf] %vm19_vm1, %v551_v45  ;;  %v6050_v52 = vrot.slane %v6049_v51, 4  ;;  %v987_v2 = vsel %vm14339_vm11, %v552_v7, %v986_v59  ;;  %v17061_v34 = vadd.f32 %v16696_v5, %v2621_v4  ;;  %v6058_v53 = vrot.slane %v6056_v48, 4  ;;  %v989_v45 = vld [vmem:[#allocation2 + $0x120] sm:$0xf]  ;;  %v17070_v7 = vpop.f32.mrf.mxu0 }
 0x1db   :  { %13459 = vmatprep.mubr.msk.bf16.mxu1 %vm1312_vm8, %v12069_v3  ;;  %v6054_v27 = vrot.slane %v6052_v18, 5  ;;  %988 = vst [vmem:[#allocation2 + $0x11c] sm:$0x1] %v987_v2  ;;  %v556_v1 = vrot.slane %v554_v47, 7  ;;  %v17064_v44 = vrot.slane %v562_v54, 7  ;;  %v565_v6 = vshll.u32 %v172_v35, 16 }
 0x1dc   :  { %v21186_v51 = vld [vmem:[#allocation41_spill] sm:$0xff]  ;;  %v571_v17 = vshrl.u32 %v173_v26, 16  ;;  %v574_v20 = vshll.u32 %v173_v26, 16  ;;  %v174_v18 = vld [vmem:[%s20895_s0 + $0xb4] sm:$0xf]  ;;  %v17094_v39 = vpop.f32.mrf.mxu0 }
 0x1dd   :  { %v2624_v32 = vadd.f32 %v21186_v51, %v16724_v37  ;;  %v17072_v5 = vld [vmem:[#allocation2 + $0x110] sm:$0x1]  ;;  %v6055_v59 = vsel %vm14369_vm14, %v6050_v52, %v6054_v27  ;;  %v6059_v4 = vor.u32 %v6058_v53, %v6054_v27  ;;  %v559_v47 = vor.u32 %v557_v33, %v556_v1  ;;  %v996_v51 = vld [vmem:[#allocation2 + $0x12c] sm:$0xf]  ;;  %21189 = vst [vmem:[#allocation75_spill] sm:$0xff] %v17094_v39 }
 0x1de   :  { %v560_v54 = vrot.slane %v556_v1, 4  ;;  %v17076_v48 = vld [vmem:[#allocation2 + $0x114] sm:$0xf]  ;;  %v6062_v35 = vshll.u32 %v17072_v5, 16  ;;  %v567_v37 = vor.u32 %v565_v6, %v17064_v44  ;;  %v573_v26 = vrot.slane %v571_v17, 7 }
 0x1df   :  { %v17081_v3 = vadd.f32 %v16712_v63, %v2624_v32  ;;  %v6067_v2 = vshrl.u32 %v17076_v48, 16  ;;  %v6070_v52 = vshll.u32 %v17076_v48, 16  ;;  %v6060_v33 = vrot.slane %v6059_v4, 4  ;;  %v17092_v32 = vpop.f32.mrf.mxu1  ;;  %v993_v39 = vld [vmem:[#allocation2 + $0x128] sm:$0x1] }
 0x1e0   :  { %v990_v27 = vsel %vm14321_vm10, %v559_v47, %v989_v45  ;;  %v6064_v53 = vrot.slane %v6062_v35, 5  ;;  %v568_v1 = vsel %vm14298_vm9, %v560_v54, %v567_v37  ;;  %v576_v63 = vor.u32 %v574_v20, %v573_v26  ;;  %21188 = vst [vmem:[#allocation41_spill] sm:$0xff] %v17092_v32 }
 0x1e1   :  { %991 = vst [vmem:[#allocation2 + $0x120] sm:$0xf] %v990_v27  ;;  %v577_v6 = vrot.slane %v573_v26, 4  ;;  %v17096_v17 = vld [vmem:[#allocation2 + $0x118] sm:$0xf]  ;;  %v6069_v12 = vrot.slane %v6067_v2, 4  ;;  %v17111_v10 = vpop.f32.mrf.mxu1 }
 0x1e2   :  { %v6072_v15 = vrot.slane %v6070_v52, 5  ;;  %992 = vst.msk [vmem:[#allocation2 + $0x124] sm:$0xf] %vm19_vm1, %v568_v1  ;;  %v579_v4 = vshrl.u32 %v174_v18, 16  ;;  %v582_v45 = vshll.u32 %v174_v18, 16  ;;  %v6080_v47 = vshrl.u32 %v17096_v17, 16 }
 0x1e3   :  { %v12070_v54 = vcombine.low %v17076_v48, %v17096_v17  ;;  %v6065_v20 = vsel %vm14369_vm14, %v6060_v33, %v6064_v53  ;;  %v17104_v35 = vld [vmem:[#allocation2 + $0x11c] sm:$0x1]  ;;  %v6076_v37 = vshll.u32 %v17096_v17, 16  ;;  %v997_v32 = vsel %vm14321_vm10, %v576_v63, %v996_v51  ;;  %21190 = vst [vmem:[#allocation76_spill] sm:$0xff] %v17111_v10  ;;  %v17113_v33 = vpop.f32.mrf.mxu0 }
 0x1e4   :  { %v12053_v26 = vcombine.low %v6055_v59, %v6065_v20  ;;  %v6073_v27 = vor.u32 %v6072_v15, %v6069_v12  ;;  %v6086_v2 = vshll.u32 %v17104_v35, 16  ;;  %v581_v52 = vrot.slane %v579_v4, 7  ;;  %998 = vst [vmem:[#allocation2 + $0x12c] sm:$0xf] %v997_v32  ;;  %v21193_v32 = vld [vmem:[#allocation56_spill] sm:$0xff] }
 0x1e5   :  { %13460 = vmatmul.mubr.msk.bf16.gmra.mxu1 %vm1312_vm8, %v12070_v54  ;;  %v6078_v18 = vrot.slane %v6076_v37, 5  ;;  %v6082_v1 = vrot.slane %v6080_v47, 4  ;;  %v569_v15 = vrot.slane %v17064_v44, 4  ;;  %v21191_v54 = vld [vmem:[#allocation55_spill] sm:$0xff]  ;;  %v17119_v63 = vpop.f32.mrf.mxu0 }
 0x1e6   :  { %13441 = vmatprep.mubr.msk.bf16.mxu0 %vm1312_vm8, %v12053_v26  ;;  %v6074_v53 = vrot.slane %v6073_v27, 4  ;;  %v584_v59 = vor.u32 %v582_v45, %v581_v52  ;;  %v6088_v4 = vrot.slane %v6086_v2, 5  ;;  %v2627_v47 = vadd.f32 %v21191_v54, %v16762_v14  ;;  %v1000_v37 = vld [vmem:[#allocation2 + $0x134] sm:$0x1]  ;;  %21192 = vst [vmem:[#allocation55_spill] sm:$0xff] %v17119_v63 }
 0x1e7   :  { %v6083_v12 = vor.u32 %v6082_v1, %v6078_v18  ;;  %v586_v20 = vrot.slane %v581_v52, 4  ;;  %v994_v44 = vsel %vm14339_vm11, %v569_v15, %v993_v39  ;;  %v2625_v26 = vadd.f32 %v21193_v32, %v16786_v43  ;;  %v17141_v1 = vpop.f32.mrf.mxu0 }
 0x1e8   :  { %v6079_v51 = vsel %vm14369_vm14, %v6074_v53, %v6078_v18  ;;  %v17123_v10 = vld [vmem:[#allocation2 + $0x120] sm:$0xf]  ;;  %v585_v45 = vsel %vm14298_vm9, %v577_v6, %v584_v59  ;;  %995 = vst [vmem:[#allocation2 + $0x128] sm:$0x1] %v994_v44  ;;  %v17137_v18 = vadd.f32 %v16765_v29, %v2627_v47  ;;  %v17139_v6 = vpop.f32.mrf.mxu1  ;;  %21195 = vst [vmem:[#allocation77_spill] sm:$0xff] %v17141_v1  ;;  %v12081_v1 = vrot.slane %v16759_v22, 9 }
 0x1e9   :  { %v6084_v27 = vrot.slane %v6083_v12, 4  ;;  %v17131_v14 = vld [vmem:[#allocation2 + $0x124] sm:$0xf]  ;;  %v6091_v2 = vshrl.u32 %v17123_v10, 16  ;;  %v6094_v52 = vshll.u32 %v17123_v10, 16  ;;  %21194 = vst [vmem:[#allocation56_spill] sm:$0xff] %v17139_v6  ;;  %v1001_v59 = vsel %vm14339_vm11, %v586_v20, %v1000_v37  ;;  %v17154_v47 = vpop.f32.mrf.mxu0 }
 0x1ea   :  { %999 = vst.msk [vmem:[#allocation2 + $0x130] sm:$0xf] %vm19_vm1, %v585_v45  ;;  %v6104_v39 = vshrl.u32 %v17131_v14, 16  ;;  %v12071_v43 = vcombine.low %v17123_v10, %v17131_v14  ;;  %v6100_v53 = vshll.u32 %v17131_v14, 16  ;;  %1002 = vst [vmem:[#allocation2 + $0x134] sm:$0x1] %v1001_v59  ;;  %v17152_v54 = vadd.f32 %v16783_v36, %v2625_v26 }
 0x1eb   :  { %v6089_v15 = vsel %vm14369_vm14, %v6084_v27, %v6088_v4  ;;  %v6093_v12 = vrot.slane %v6091_v2, 4  ;;  %v6096_v29 = vrot.slane %v6094_v52, 5  ;;  %21196 = vst [vmem:[#allocation78_spill] sm:$0xff] %v17154_v47  ;;  %v17157_v6 = vld [vmem:[#allocation2 + $0x12c] sm:$0xf]  ;;  %v17163_v4 = vpop.f32.mrf.mxu1  ;;  %v17165_v27 = vpop.f32.mrf.mxu0  ;;  %v21200_v2 = vld [vmem:[#allocation57_spill] sm:$0xff] }
 0x1ec   :  { %v12054_v45 = vcombine.low %v6079_v51, %v6089_v15  ;;  %13463 = vmatprep.mubr.msk.bf16.mxu1 %vm1312_vm8, %v12071_v43  ;;  %v6102_v44 = vrot.slane %v6100_v53, 5  ;;  %v6106_v32 = vrot.slane %v6104_v39, 4  ;;  %v17159_v20 = vld [vmem:[#allocation2 + $0xe4] sm:$0xf]  ;;  %v17161_v37 = vld [vmem:[#allocation2 + $0xe8] sm:$0xf]  ;;  %v2628_v52 = vadd.f32 %v21200_v2, %v16805_v19 }
 0x1ed   :  { %v6097_v11 = vor.u32 %v6096_v29, %v6093_v12  ;;  %21197 = vst [vmem:[#allocation79_spill] sm:$0xff] %v17161_v37  ;;  %21198 = vst [vmem:[#allocation80_spill] sm:$0xff] %v17163_v4  ;;  %v6115_v36 = vshrl.u32 %v17157_v6, 16  ;;  %v6118_v51 = vshll.u32 %v17157_v6, 16  ;;  %v17172_v43 = vpop.f32.mrf.mxu0  ;;  %v12107_v12 = vcombine.low %v17159_v20, %v17161_v37  ;;  %v17187_v2 = vpop.f32.mrf.mxu1 }
 0x1ee   :  { %21199 = vst [vmem:[#allocation81_spill] sm:$0xff] %v17165_v27  ;;  %13442 = vmatmul.mubr.msk.bf16.gmra.mxu0 %vm1312_vm8, %v12054_v45  ;;  %v6107_v26 = vor.u32 %v6106_v32, %v6102_v44  ;;  %21201 = vst [vmem:[#allocation57_spill] sm:$0xff] %v17172_v43  ;;  %v17181_v29 = vadd.f32 %v16796_v28, %v2628_v52  ;;  %v6468_v37 = vrot.slane %v16876_v25, 5  ;;  %v6471_v25 = vrot.slane %v16885_v40, 5  ;;  %v17252_v40 = vld [vmem:[%s20896_s1 + $0xe] sm:$0x3] }
 0x1ef   :  { %v6098_v39 = vrot.slane %v6097_v11, 4  ;;  %v17176_v59 = vld [vmem:[#allocation2 + $0x128] sm:$0x1]  ;;  %v6117_v15 = vrot.slane %v6115_v36, 4  ;;  %21203 = vst [vmem:[#allocation83_spill] sm:$0xff] %v17187_v2  ;;  %v17189_v47 = vpop.f32.mrf.mxu0  ;;  %v6120_v27 = vrot.slane %v6118_v51, 5 }
 0x1f0   :  { %21202 = vst [vmem:[#allocation82_spill] sm:$0xff] %v17181_v29  ;;  %v6108_v19 = vrot.slane %v6107_v26, 4  ;;  %v6110_v11 = vshll.u32 %v17176_v59, 16  ;;  %21204 = vst [vmem:[#allocation84_spill] sm:$0xff] %v17189_v47  ;;  %v17199_v29 = vpop.f32.mrf.mxu1  ;;  %v17206_v51 = vld [vmem:[#allocation2 + $0xf4] sm:$0xf] }
 0x1f1   :  { %v17174_v53 = vld [vmem:[#allocation2 + $0x130] sm:$0xf]  ;;  %v6103_v36 = vsel %vm14369_vm14, %v6098_v39, %v6102_v44  ;;  %v17193_v4 = vld [vmem:[#allocation2 + $0x134] sm:$0x1]  ;;  %21205 = vst [vmem:[#allocation85_spill] sm:$0xff] %v17199_v29  ;;  %v17201_v2 = vpop.f32.mrf.mxu0  ;;  %v6121_v47 = vor.u32 %v6120_v27, %v6117_v15  ;;  %v6461_v39 = vrot.slane %v16771_v13, 5 }
 0x1f2   :  { %v6128_v45 = vshrl.u32 %v17174_v53, 16  ;;  %v12072_v32 = vcombine.low %v17157_v6, %v17174_v53  ;;  %v6124_v28 = vshll.u32 %v17174_v53, 16  ;;  %v6112_v52 = vrot.slane %v6110_v11, 5  ;;  %21206 = vst [vmem:[#allocation86_spill] sm:$0xff] %v17201_v2  ;;  %v17204_v44 = vld [vmem:[#allocation2 + $0xf0] sm:$0xf]  ;;  %v17212_v22 = vpop.f32.mrf.mxu1 }
 0x1f3   :  { %v6134_v26 = vshll.u32 %v17193_v4, 16  ;;  %21207 = vst [vmem:[#allocation87_spill] sm:$0xff] %v17212_v22  ;;  %v17214_v11 = vpop.f32.mrf.mxu0  ;;  %v6122_v27 = vrot.slane %v6121_v47, 4  ;;  %v6462_v2 = vsel %vm14417_vm15, %v12081_v1, %v6461_v39  ;;  %v6463_v13 = vrot.slane %v6461_v39, 4 }
 0x1f4   :  { %13464 = vmatmul.mubr.msk.bf16.gmra.mxu1 %vm1312_vm8, %v12072_v32  ;;  %v6130_v43 = vrot.slane %v6128_v45, 4  ;;  %v6126_v63 = vrot.slane %v6124_v28, 5  ;;  %v6113_v45 = vsel %vm14369_vm14, %v6108_v19, %v6112_v52  ;;  %v6464_v32 = vrot.slane %v16812_v62, 5  ;;  %21208 = vst [vmem:[#allocation88_spill] sm:$0xff] %v17214_v11  ;;  %v17221_v19 = vpop.f32.mrf.mxu1  ;;  %v17230_v52 = vld [vmem:[#allocation2 + $0x100] sm:$0xf] }
 0x1f5   :  { %13487 = vmatprep.mubr.msk.bf16.mxu1 %vm1312_vm8, %v12107_v12  ;;  %v12055_v29 = vcombine.low %v6103_v36, %v6113_v45  ;;  %v6136_v28 = vrot.slane %v6134_v26, 5  ;;  %v12108_v12 = vcombine.low %v17204_v44, %v17206_v51  ;;  %21209 = vst [vmem:[#allocation89_spill] sm:$0xff] %v17221_v19  ;;  %v17223_v62 = vpop.f32.mrf.mxu0  ;;  %v17228_v36 = vld [vmem:[#allocation2 + $0xfc] sm:$0xf]  ;;  %v12082_v26 = vrot.slane %v16871_v46, 9 }
 0x1f6   :  { %v6131_v15 = vor.u32 %v6130_v43, %v6126_v63  ;;  %21210 = vst [vmem:[#allocation90_spill] sm:$0xff] %v17223_v62  ;;  %v6127_v47 = vsel %vm14369_vm14, %v6122_v27, %v6126_v63  ;;  %v6465_v1 = vsel %vm14417_vm15, %v6463_v13, %v6464_v32  ;;  %v17236_v39 = vpop.f32.mrf.mxu1  ;;  %v6470_v27 = vrot.slane %v6468_v37, 4 }
 0x1f7   :  { %13445 = vmatprep.mubr.msk.bf16.mxu0 %vm1312_vm8, %v12055_v29  ;;  %21211 = vst [vmem:[#allocation91_spill] sm:$0xff] %v17236_v39  ;;  %v17238_v45 = vpop.f32.mrf.mxu0  ;;  %v12090_v63 = vcombine.low %v6462_v2, %v6465_v1  ;;  %v12109_v46 = vcombine.low %v17228_v36, %v17230_v52  ;;  %v17256_v2 = vld [vmem:[#allocation2 + $0x108] sm:$0xf]  ;;  %v12083_v1 = vrot.slane %v16936_v57, 9  ;;  %v6482_v57 = vrot.slane %v16968_v30, 5 }
 0x1f8   :  { %v6132_v43 = vrot.slane %v6131_v15, 4  ;;  %21212 = vst [vmem:[#allocation92_spill] sm:$0xff] %v17238_v45  ;;  %v7357_v15 = vsel %vm1337_vm0, %v16897_v38, 0  ;;  %v17247_v32 = vpop.f32.mrf.mxu1  ;;  %v12084_v39 = vrot.slane %v16962_v60, 9  ;;  %v17313_v60 = vld [vmem:[%s20896_s1 + $0xc] sm:$0x3] }
 0x1f9   :  { %21213 = vst [vmem:[#allocation93_spill] sm:$0xff] %v17247_v32  ;;  %v17254_v13 = vpop.f32.mrf.mxu0 }
 0x1fa   :  { %v6137_v29 = vsel %vm14369_vm14, %v6132_v43, %v6136_v28  ;;  %21214 = vst [vmem:[#allocation94_spill] sm:$0xff] %v17254_v13  ;;  %v17258_v28 = vld [vmem:[#allocation2 + $0x10c] sm:$0xf]  ;;  %v17262_v38 = vpop.f32.mrf.mxu1  ;;  %v6472_v43 = vsel %vm14417_vm15, %v6470_v27, %v6471_v25  ;;  %v17287_v27 = vld [vmem:[#allocation2 + $0x118] sm:$0xf] }
 0x1fb   :  { %v12056_v19 = vcombine.low %v6127_v47, %v6137_v29  ;;  %21215 = vst [vmem:[#allocation95_spill] sm:$0xff] %v17262_v38  ;;  %v6469_v47 = vsel %vm14417_vm15, %v12082_v26, %v6468_v37  ;;  %v6475_v29 = vrot.slane %v16944_v42, 5  ;;  %v17285_v42 = vld [vmem:[#allocation2 + $0x114] sm:$0xf] }
 0x1fc   :  { %13488 = vmatmul.mubr.msk.bf16.vlgmr.msra.gmra.mxu1 %vm1312_vm8, %v12108_v12  ;;  %v17264_v12 = vpop.f32.mrf.mxu0  ;;  %v12091_v25 = vcombine.low %v6469_v47, %v6472_v43  ;;  %v6484_v47 = vrot.slane %v6482_v57, 4 }
 0x1fd   :  { %13522 = vmatpush3.bf16.msra.mxu1 %v7357_v15  ;;  %13446 = vmatmul.mubr.msk.bf16.gmra.mxu0 %vm1312_vm8, %v12056_v19  ;;  %21216 = vst [vmem:[#allocation96_spill] sm:$0xff] %v17264_v12  ;;  %v12110_v19 = vcombine.low %v17256_v2, %v17258_v28  ;;  %v6478_v15 = vrot.slane %v16977_v16, 5  ;;  %v6476_v37 = vsel %vm14417_vm15, %v12083_v1, %v6475_v29  ;;  %v6477_v26 = vrot.slane %v6475_v29, 4 }
 0x1fe   :  { %13491 = vmatprep.mubr.msk.bf16.mxu1 %vm1312_vm8, %v12109_v46  ;;  %13469 = vmatprep.mubr.msk.bf16.mxu0 %vm1312_vm8, %v12090_v63  ;;  %v17278_v46 = vpop.f32.mrf.mxu1  ;;  %v17280_v63 = vpop.f32.mrf.mxu0  ;;  %v7128_v1 = vsel %vm1337_vm0, %v16956_v9, 0 }
 0x1ff   :  { %13780 = vmatprep.subr.msk.bf16.mxu1 %vm1337_vm0, %v17252_v40  ;;  %21217 = vst [vmem:[#allocation97_spill] sm:$0xff] %v17278_v46  ;;  %21218 = vst [vmem:[#allocation98_spill] sm:$0xff] %v17280_v63  ;;  %v6479_v16 = vsel %vm14417_vm15, %v6477_v26, %v6478_v15  ;;  %v6485_v63 = vrot.slane %v16989_v0, 5  ;;  %v17308_v15 = vld [vmem:[#allocation2 + $0x124] sm:$0xf] }
 0x200   :  { %v17289_v38 = vpop.f32.mrf.mxu1  ;;  %v17291_v22 = vpop.f32.mrf.mxu0  ;;  %v12092_v30 = vcombine.low %v6476_v37, %v6479_v16  ;;  %v190_v46 = vld [vmem:[%s20895_s0 + $0xf4] sm:$0xf] }
 0x201   :  { %21219 = vst [vmem:[#allocation99_spill] sm:$0xff] %v17289_v38  ;;  %21220 = vst [vmem:[#allocation100_spill] sm:$0xff] %v17291_v22  ;;  %v12111_v38 = vcombine.low %v17285_v42, %v17287_v27  ;;  %v17306_v22 = vld [vmem:[#allocation2 + $0x120] sm:$0xf]  ;;  %v6486_v37 = vsel %vm14417_vm15, %v6484_v47, %v6485_v63 }
 0x202   :  { %v17300_v43 = vpop.f32.mrf.mxu1  ;;  %v17302_v29 = vpop.f32.mrf.mxu0  ;;  %v12112_v26 = vcombine.low %v17306_v22, %v17308_v15 }
 0x203   :  { %21221 = vst [vmem:[#allocation101_spill] sm:$0xff] %v17300_v43  ;;  %21222 = vst [vmem:[#allocation102_spill] sm:$0xff] %v17302_v29 }
 0x204   :  { %13492 = vmatmul.mubr.msk.bf16.gmra.mxu1 %vm1312_vm8, %v12110_v19  ;;  %v17316_v9 = vpop.f32.mrf.mxu1  ;;  %v17318_v0 = vpop.f32.mrf.mxu0  ;;  %v6483_v19 = vsel %vm14417_vm15, %v12084_v39, %v6482_v57  ;;  %v6489_v39 = vrot.slane %v17039_v8, 5  ;;  %v6492_v57 = vrot.slane %v17072_v5, 5  ;;  %v17351_v5 = vld [vmem:[#allocation2 + $0x12c] sm:$0xf] }
 0x205   :  { %13470 = vmatmul.mubr.msk.bf16.vlgmr.msra.gmra.mxu0 %vm1312_vm8, %v12091_v25  ;;  %21223 = vst [vmem:[#allocation103_spill] sm:$0xff] %v17316_v9  ;;  %21224 = vst [vmem:[#allocation104_spill] sm:$0xff] %v17318_v0  ;;  %13495 = vmatprep.mubr.msk.bf16.mxu1 %vm1312_vm8, %v12111_v38  ;;  %v3188_v38 = vadd.f32 %v16718_v56, %v17056_v21  ;;  %v12086_v9 = vrot.slane %v17076_v48, 9  ;;  %v17353_v56 = vld [vmem:[#allocation2 + $0x130] sm:$0xf] }
 0x206   :  { %13504 = vmatpush3.bf16.msra.mxu0 %v7128_v1  ;;  %13473 = vmatprep.mubr.msk.bf16.mxu0 %vm1312_vm8, %v12092_v30  ;;  %v17330_v25 = vpop.f32.mrf.mxu1  ;;  %v17332_v16 = vpop.f32.mrf.mxu0  ;;  %v12085_v1 = vrot.slane %v17013_v24, 9  ;;  %v12093_v30 = vcombine.low %v6483_v19, %v6486_v37  ;;  %v6491_v19 = vrot.slane %v6489_v39, 4 }
 0x207   :  { %13779 = vmatprep.subr.msk.bf16.mxu0 %vm1337_vm0, %v17313_v60  ;;  %21225 = vst [vmem:[#allocation105_spill] sm:$0xff] %v17330_v25  ;;  %21226 = vst [vmem:[#allocation106_spill] sm:$0xff] %v17332_v16  ;;  %v6496_v25 = vrot.slane %v17096_v17, 5  ;;  %v17349_v8 = vadd.f32 %v17020_v50, %v3188_v38  ;;  %v3186_v50 = vadd.f32 %v16747_v23, %v17061_v34  ;;  %v176_v34 = vld [vmem:[%s20895_s0 + $0xbc] sm:$0xf] }
 0x208   :  { %v17339_v63 = vpop.f32.mrf.mxu1  ;;  %v17341_v47 = vpop.f32.mrf.mxu0  ;;  %v6490_v24 = vsel %vm14417_vm15, %v12085_v1, %v6489_v39  ;;  %v6493_v17 = vsel %vm14417_vm15, %v6491_v19, %v6492_v57 }
 0x209   :  { %21227 = vst [vmem:[#allocation107_spill] sm:$0xff] %v17339_v63  ;;  %21228 = vst [vmem:[#allocation108_spill] sm:$0xff] %v17341_v47  ;;  %v6498_v48 = vrot.slane %v6496_v25, 4  ;;  %v12094_v38 = vcombine.low %v6490_v24, %v6493_v17  ;;  %v12113_v63 = vcombine.low %v17351_v5, %v17353_v56  ;;  %v17379_v23 = vadd.f32 %v17043_v61, %v3186_v50 }
 0x20a   :  { %21229 = vst [vmem:[#allocation109_spill] sm:$0xff] %v17349_v8  ;;  %v17355_v21 = vpop.f32.mrf.mxu1  ;;  %v17357_v37 = vpop.f32.mrf.mxu0  ;;  %v3189_v24 = vadd.f32 %v16773_v55, %v17081_v3  ;;  %v599_v50 = vshll.u32 %v176_v34, 16  ;;  %v1003_v55 = vld [vmem:[#allocation2 + $0x138] sm:$0xf]  ;;  %v6503_v3 = vrot.slane %v17131_v14, 5 }
 0x20b   :  { %21230 = vst [vmem:[#allocation110_spill] sm:$0xff] %v17355_v21  ;;  %21231 = vst [vmem:[#allocation111_spill] sm:$0xff] %v17357_v37  ;;  %v6497_v21 = vsel %vm14417_vm15, %v12086_v9, %v6496_v25 }
 0x20c   :  { %13496 = vmatmul.mubr.msk.bf16.gmra.mxu1 %vm1312_vm8, %v12112_v26  ;;  %v6499_v26 = vrot.slane %v17104_v35, 5  ;;  %v17365_v1 = vpop.f32.mrf.mxu1  ;;  %v17367_v39 = vpop.f32.mrf.mxu0  ;;  %21234 = vst [vmem:[#allocation114_spill] sm:$0xff] %v17379_v23 }
 0x20d   :  { %13474 = vmatmul.mubr.msk.bf16.gmra.mxu0 %vm1312_vm8, %v12093_v30  ;;  %21232 = vst [vmem:[#allocation112_spill] sm:$0xff] %v17365_v1  ;;  %21233 = vst [vmem:[#allocation113_spill] sm:$0xff] %v17367_v39  ;;  %v175_v30 = vld [vmem:[%s20895_s0 + $0xb8] sm:$0xf]  ;;  %13499 = vmatprep.mubr.msk.bf16.mxu1 %vm1312_vm8, %v12113_v63 }
 0x20e   :  { %v6500_v35 = vsel %vm14417_vm15, %v6498_v48, %v6499_v26  ;;  %v17384_v57 = vpop.f32.mrf.mxu1  ;;  %v17386_v9 = vpop.f32.mrf.mxu0  ;;  %13477 = vmatprep.mubr.msk.bf16.mxu0 %vm1312_vm8, %v12094_v38  ;;  %v588_v19 = vshrl.u32 %v175_v30, 16  ;;  %v591_v48 = vshll.u32 %v175_v30, 16  ;;  %v596_v26 = vshrl.u32 %v176_v34, 16 }
 0x20f   :  { %21235 = vst [vmem:[#allocation115_spill] sm:$0xff] %v17384_v57  ;;  %21236 = vst [vmem:[#allocation116_spill] sm:$0xff] %v17386_v9  ;;  %v12095_v25 = vcombine.low %v6497_v21, %v6500_v35  ;;  %v17397_v57 = vadd.f32 %v17070_v7, %v3189_v24  ;;  %v12087_v38 = vrot.slane %v17123_v10, 9  ;;  %v6506_v30 = vrot.slane %v17176_v59, 5 }
 0x210   :  { %v17392_v61 = vpop.f32.mrf.mxu1  ;;  %v17394_v17 = vpop.f32.mrf.mxu0  ;;  %v590_v1 = vrot.slane %v588_v19, 7  ;;  %v17404_v21 = vrot.slane %v596_v26, 7  ;;  %v6505_v26 = vrot.slane %v6503_v3, 4  ;;  %v12088_v59 = vrot.slane %v17157_v6, 9 }
 0x211   :  { %21237 = vst [vmem:[#allocation117_spill] sm:$0xff] %v17392_v61  ;;  %21238 = vst [vmem:[#allocation118_spill] sm:$0xff] %v17394_v17  ;;  %v6504_v19 = vsel %vm14417_vm15, %v12087_v38, %v6503_v3  ;;  %v6513_v6 = vrot.slane %v17193_v4, 5 }
 0x212   :  { %21239 = vst [vmem:[#allocation119_spill] sm:$0xff] %v17397_v57  ;;  %v17400_v43 = vpop.f32.mrf.mxu1  ;;  %v17402_v63 = vpop.f32.mrf.mxu0  ;;  %v593_v35 = vor.u32 %v591_v48, %v590_v1  ;;  %v594_v34 = vrot.slane %v590_v1, 4  ;;  %v601_v10 = vor.u32 %v599_v50, %v17404_v21  ;;  %v6507_v50 = vsel %vm14417_vm15, %v6505_v26, %v6506_v30  ;;  %v21250_v30 = vld [vmem:[#allocation8_spill] sm:$0xff] }
 0x213   :  { %21240 = vst [vmem:[#allocation120_spill] sm:$0xff] %v17400_v43  ;;  %21241 = vst [vmem:[#allocation121_spill] sm:$0xff] %v17402_v63  ;;  %v21244_v43 = vld [vmem:[#allocation54_spill] sm:$0xff] }
 0x214   :  { %v17409_v7 = vpop.f32.mrf.mxu1  ;;  %v17411_v24 = vpop.f32.mrf.mxu0  ;;  %v3192_v61 = vadd.f32 %v21244_v43, %v17137_v18  ;;  %v1004_v14 = vsel %vm14321_vm10, %v593_v35, %v1003_v55  ;;  %v602_v48 = vsel %vm14298_vm9, %v594_v34, %v601_v10  ;;  %v6510_v18 = vrot.slane %v17174_v53, 5  ;;  %v6683_v55 = vld [vmem:[#allocation2 + $0xec] sm:$0x1] }
 0x215   :  { %13478 = vmatmul.mubr.msk.bf16.gmra.mxu0 %vm1312_vm8, %v12095_v25  ;;  %21242 = vst [vmem:[#allocation122_spill] sm:$0xff] %v17409_v7  ;;  %21243 = vst [vmem:[#allocation123_spill] sm:$0xff] %v17411_v24  ;;  %v12096_v43 = vcombine.low %v6504_v19, %v6507_v50  ;;  %v12140_v53 = vrot.slane %v17159_v20, 9  ;;  %v6686_v7 = vld [vmem:[#allocation2 + $0xf8] sm:$0x1]  ;;  %v6906_v17 = vshll.u32 %v6683_v55, 16 }
 0x216   :  { %v17421_v25 = vpop.f32.mrf.mxu1  ;;  %v17423_v1 = vpop.f32.mrf.mxu0  ;;  %1005 = vst [vmem:[#allocation2 + $0x138] sm:$0xf] %v1004_v14  ;;  %v17430_v38 = vadd.f32 %v17113_v33, %v3192_v61  ;;  %1006 = vst.msk [vmem:[#allocation2 + $0x13c] sm:$0xf] %vm19_vm1, %v602_v48  ;;  %v6511_v34 = vsel %vm14417_vm15, %v12088_v59, %v6510_v18  ;;  %v6512_v10 = vrot.slane %v6510_v18, 4  ;;  %v3190_v33 = vadd.f32 %v21250_v30, %v17152_v54  ;;  %v21251_v61 = vld [vmem:[#allocation79_spill] sm:$0xff] }
 0x217   :  { %21245 = vst [vmem:[#allocation54_spill] sm:$0xff] %v17421_v25  ;;  %21246 = vst [vmem:[#allocation124_spill] sm:$0xff] %v17423_v1  ;;  %13481 = vmatprep.mubr.msk.bf16.mxu0 %vm1312_vm8, %v12096_v43  ;;  %v7253_v19 = vrot.slane %v21251_v61, 5  ;;  %v21254_v48 = vld [vmem:[#allocation55_spill] sm:$0xff]  ;;  %v7256_v59 = vrot.slane %v6683_v55, 5  ;;  %v21256_v18 = vld [vmem:[#allocation82_spill] sm:$0xff] }
 0x218   :  { %21247 = vst [vmem:[#allocation125_spill] sm:$0xff] %v17430_v38  ;;  %v17435_v3 = vpop.f32.mrf.mxu1  ;;  %v17437_v35 = vpop.f32.mrf.mxu0  ;;  %v6514_v14 = vsel %vm14417_vm15, %v6512_v10, %v6513_v6  ;;  %v17453_v50 = vadd.f32 %v21254_v48, %v3190_v33  ;;  %v21257_v38 = vld [vmem:[#allocation7_spill] sm:$0xff]  ;;  %v6890_v6 = vshll.u32 %v17159_v20, 16  ;;  %v21260_v10 = vld [vmem:[#allocation77_spill] sm:$0xff]  ;;  %v6900_v48 = vshrl.u32 %v21251_v61, 16 }
 0x219   :  { %21248 = vst [vmem:[#allocation126_spill] sm:$0xff] %v17435_v3  ;;  %21249 = vst [vmem:[#allocation127_spill] sm:$0xff] %v17437_v35  ;;  %v3193_v54 = vadd.f32 %v21257_v38, %v21256_v18  ;;  %v12097_v30 = vcombine.low %v6511_v34, %v6514_v14  ;;  %v7254_v43 = vsel %vm14417_vm15, %v12140_v53, %v7253_v19  ;;  %v7255_v25 = vrot.slane %v7253_v19, 4 }
 0x21a   :  { %v17446_v26 = vpop.f32.mrf.mxu1  ;;  %v17448_v4 = vpop.f32.mrf.mxu0  ;;  %21255 = vst [vmem:[#allocation55_spill] sm:$0xff] %v17453_v50  ;;  %v12141_v53 = vrot.slane %v17204_v44, 9  ;;  %v7260_v19 = vrot.slane %v17206_v51, 5  ;;  %v6892_v24 = vrot.slane %v6890_v6, 5  ;;  %v6920_v55 = vshll.u32 %v17206_v51, 16 }
 0x21b   :  { %21252 = vst [vmem:[#allocation8_spill] sm:$0xff] %v17446_v26  ;;  %21253 = vst [vmem:[#allocation79_spill] sm:$0xff] %v17448_v4  ;;  %v6887_v4 = vshrl.u32 %v17159_v20, 16  ;;  %v17466_v33 = vadd.f32 %v21260_v10, %v3193_v54  ;;  %v7257_v34 = vsel %vm14417_vm15, %v7255_v25, %v7256_v59  ;;  %v7263_v54 = vrot.slane %v6686_v7, 5 }
 0x21c   :  { %v17459_v3 = vpop.f32.mrf.mxu1  ;;  %v17461_v35 = vpop.f32.mrf.mxu0  ;;  %v12149_v20 = vcombine.low %v7254_v43, %v7257_v34  ;;  %v6924_v59 = vshrl.u32 %v17206_v51, 16  ;;  %v7261_v43 = vsel %vm14417_vm15, %v12141_v53, %v7260_v19  ;;  %v6896_v34 = vshll.u32 %v21251_v61, 16  ;;  %v17516_v51 = vld [vmem:[%s20896_s1 + $0x2] sm:$0x3] }
 0x21d   :  { %21258 = vst [vmem:[#allocation82_spill] sm:$0xff] %v17459_v3  ;;  %21259 = vst [vmem:[#allocation7_spill] sm:$0xff] %v17461_v35  ;;  %v17469_v38 = vld [vmem:[#allocation2 + $0x138] sm:$0xf]  ;;  %13482 = vmatmul.mubr.msk.bf16.gmra.mxu0 %vm1312_vm8, %v12097_v30  ;;  %v17478_v18 = vld [vmem:[#allocation2 + $0x13c] sm:$0xf] }
 0x21e   :  { %21261 = vst [vmem:[#allocation77_spill] sm:$0xff] %v17466_v33  ;;  %v17476_v14 = vpop.f32.mrf.mxu1  ;;  %v17480_v10 = vpop.f32.mrf.mxu0  ;;  %v6911_v33 = vshrl.u32 %v17204_v44, 16  ;;  %v6914_v3 = vshll.u32 %v17204_v44, 16  ;;  %v12114_v30 = vcombine.low %v17469_v38, %v17478_v18  ;;  %v7262_v35 = vrot.slane %v7260_v19, 4 }
 0x21f   :  { %21262 = vst [vmem:[#allocation128_spill] sm:$0xff] %v17476_v14  ;;  %21263 = vst [vmem:[#allocation129_spill] sm:$0xff] %v17480_v10  ;;  %v6889_v1 = vrot.slane %v6887_v4, 4  ;;  %v6902_v10 = vrot.slane %v6900_v48, 4  ;;  %v6898_v4 = vrot.slane %v6896_v34, 5  ;;  %v6908_v19 = vrot.slane %v6906_v17, 5 }
 0x220   :  { %v17486_v25 = vpop.f32.mrf.mxu1  ;;  %13500 = vmatmul.mubr.msk.bf16.gmra.mxu1 %vm1312_vm8, %v12114_v30  ;;  %v17498_v14 = vpop.f32.mrf.mxu0  ;;  %v6913_v6 = vrot.slane %v6911_v33, 4  ;;  %v6916_v61 = vrot.slane %v6914_v3, 5  ;;  %v6930_v37 = vshll.u32 %v6686_v7, 16  ;;  %v6922_v33 = vrot.slane %v6920_v55, 5  ;;  %v17511_v3 = vld [vmem:[#allocation2 + $0x104] sm:$0x1] }
 0x221   :  { %21264 = vst [vmem:[#allocation130_spill] sm:$0xff] %v17486_v25  ;;  %13523 = vmatprep.mubr.msk.bf16.mxu1 %vm1312_vm8, %v12149_v20  ;;  %v7264_v25 = vsel %vm14417_vm15, %v7262_v35, %v7263_v54  ;;  %v6893_v26 = vor.u32 %v6892_v24, %v6889_v1  ;;  %21266 = vst [vmem:[#allocation132_spill] sm:$0xff] %v17498_v14  ;;  %v6903_v48 = vor.u32 %v6902_v10, %v6898_v4  ;;  %v17527_v34 = vld [vmem:[#allocation2 + $0x110] sm:$0x1] }
 0x222   :  { %v17493_v44 = vpop.f32.mrf.mxu1  ;;  %v12150_v39 = vcombine.low %v7261_v43, %v7264_v25  ;;  %v6917_v47 = vor.u32 %v6916_v61, %v6913_v6  ;;  %v17505_v35 = vpop.f32.mrf.mxu0  ;;  %v6932_v17 = vrot.slane %v6930_v37, 5  ;;  %v7920_v25 = vsel %vm1337_vm0, %v17252_v40, 0 }
 0x223   :  { %21265 = vst [vmem:[#allocation131_spill] sm:$0xff] %v17493_v44  ;;  %v6894_v53 = vrot.slane %v6893_v26, 4  ;;  %v6926_v44 = vrot.slane %v6924_v59, 4  ;;  %21269 = vst [vmem:[#allocation135_spill] sm:$0xff] %v17505_v35  ;;  %v6904_v1 = vrot.slane %v6903_v48, 4  ;;  %v12142_v59 = vrot.slane %v17228_v36, 9 }
 0x224   :  { %v17500_v30 = vpop.f32.mrf.mxu1  ;;  %v6918_v26 = vrot.slane %v6917_v47, 4  ;;  %v6935_v37 = vshrl.u32 %v17228_v36, 16  ;;  %v7270_v40 = vrot.slane %v17511_v3, 5  ;;  %v6948_v61 = vshrl.u32 %v17230_v52, 16 }
 0x225   :  { %21267 = vst [vmem:[#allocation133_spill] sm:$0xff] %v17500_v30  ;;  %v6899_v24 = vsel %vm14369_vm14, %v6894_v53, %v6898_v4  ;;  %v6909_v7 = vsel %vm14369_vm14, %v6904_v1, %v6908_v19  ;;  %v6927_v10 = vor.u32 %v6926_v44, %v6922_v33  ;;  %v7267_v44 = vrot.slane %v17230_v52, 5 }
 0x226   :  { %v17503_v20 = vpop.f32.mrf.mxu1  ;;  %v12124_v43 = vcombine.low %v6899_v24, %v6909_v7  ;;  %v17529_v4 = vpop.f32.mrf.mxu0  ;;  %v6938_v19 = vshll.u32 %v17228_v36, 16  ;;  %v12143_v48 = vrot.slane %v17256_v2, 9  ;;  %v7274_v55 = vrot.slane %v17258_v28, 5 }
 0x227   :  { %21268 = vst [vmem:[#allocation134_spill] sm:$0xff] %v17503_v20  ;;  %21272 = vst [vmem:[#allocation138_spill] sm:$0xff] %v17529_v4  ;;  %v6928_v6 = vrot.slane %v6927_v10, 4  ;;  %v7277_v7 = vrot.slane %v17527_v34, 5  ;;  %v6959_v36 = vshrl.u32 %v17256_v2, 16  ;;  %v6962_v10 = vshll.u32 %v17256_v2, 16 }
 0x228   :  { %v17509_v54 = vpop.f32.mrf.mxu1  ;;  %13524 = vmatmul.mubr.msk.bf16.vlgmr.msra.gmra.mxu1 %vm1312_vm8, %v12150_v39  ;;  %v6923_v39 = vsel %vm14369_vm14, %v6918_v26, %v6922_v33  ;;  %13505 = vmatprep.mubr.msk.bf16.mxu0 %vm1312_vm8, %v12124_v43  ;;  %v17544_v24 = vpop.f32.mrf.mxu0  ;;  %v7268_v33 = vsel %vm14417_vm15, %v12142_v59, %v7267_v44  ;;  %v7269_v26 = vrot.slane %v7267_v44, 4  ;;  %v7563_v43 = vsel %vm1337_vm0, %v17313_v60, 0  ;;  %v17566_v2 = vld [vmem:[%s20896_s1 + $0x10] sm:$0x3] }
 0x229   :  { %21270 = vst [vmem:[#allocation136_spill] sm:$0xff] %v17509_v54  ;;  %13558 = vmatpush3.bf16.msra.mxu1 %v7920_v25  ;;  %21274 = vst [vmem:[#allocation140_spill] sm:$0xff] %v17544_v24  ;;  %v6933_v1 = vsel %vm14369_vm14, %v6928_v6, %v6932_v17  ;;  %v7275_v59 = vsel %vm14417_vm15, %v12143_v48, %v7274_v55  ;;  %v7276_v6 = vrot.slane %v7274_v55, 4  ;;  %v6937_v44 = vrot.slane %v6935_v37, 4  ;;  %v17881_v24 = vld [vmem:[#allocation2 + $0x134] sm:$0x1] }
 0x22a   :  { %v17524_v47 = vpop.f32.mrf.mxu1  ;;  %13782 = vmatprep.subr.msk.bf16.mxu1 %vm1337_vm0, %v17516_v51  ;;  %v12125_v25 = vcombine.low %v6923_v39, %v6933_v1  ;;  %v7271_v17 = vsel %vm14417_vm15, %v7269_v26, %v7270_v40  ;;  %v6972_v39 = vshrl.u32 %v17258_v28, 16  ;;  %v6944_v37 = vshll.u32 %v17230_v52, 16 }
 0x22b   :  { %21271 = vst [vmem:[#allocation137_spill] sm:$0xff] %v17524_v47  ;;  %v17557_v47 = vpop.f32.mrf.mxu0  ;;  %v12151_v1 = vcombine.low %v7268_v33, %v7271_v17  ;;  %v7278_v40 = vsel %vm14417_vm15, %v7276_v6, %v7277_v7  ;;  %v6950_v48 = vrot.slane %v6948_v61, 4  ;;  %v6954_v55 = vshll.u32 %v17511_v3, 16 }
 0x22c   :  { %v17537_v53 = vpop.f32.mrf.mxu1  ;;  %21276 = vst [vmem:[#allocation142_spill] sm:$0xff] %v17557_v47  ;;  %13506 = vmatmul.mubr.msk.bf16.vlgmr.msra.gmra.mxu0 %vm1312_vm8, %v12125_v25  ;;  %v6940_v47 = vrot.slane %v6938_v19, 5  ;;  %v6986_v26 = vshll.u32 %v17285_v42, 16  ;;  %v12152_v25 = vcombine.low %v7275_v59, %v7278_v40  ;;  %v6946_v3 = vrot.slane %v6944_v37, 5 }
 0x22d   :  { %21273 = vst [vmem:[#allocation139_spill] sm:$0xff] %v17537_v53  ;;  %13540 = vmatpush3.bf16.msra.mxu0 %v7563_v43  ;;  %13527 = vmatprep.mubr.msk.bf16.mxu1 %vm1312_vm8, %v12151_v1  ;;  %v6961_v7 = vrot.slane %v6959_v36, 4  ;;  %v6964_v59 = vrot.slane %v6962_v10, 5  ;;  %v6956_v52 = vrot.slane %v6954_v55, 5  ;;  %v6974_v60 = vrot.slane %v6972_v39, 4 }
 0x22e   :  { %v17555_v53 = vpop.f32.mrf.mxu1  ;;  %v6941_v33 = vor.u32 %v6940_v47, %v6937_v44  ;;  %13781 = vmatprep.subr.msk.bf16.mxu0 %vm1337_vm0, %v17566_v2  ;;  %v6968_v47 = vshll.u32 %v17258_v28, 16  ;;  %v17591_v44 = vld [vmem:[#allocation2 + $0x11c] sm:$0x1]  ;;  %v6951_v54 = vor.u32 %v6950_v48, %v6946_v3  ;;  %v6978_v37 = vshll.u32 %v17527_v34, 16  ;;  %v6698_v55 = vld [vmem:[#allocation2 + $0x128] sm:$0x1] }
 0x22f   :  { %21275 = vst [vmem:[#allocation141_spill] sm:$0xff] %v17555_v53  ;;  %v17571_v53 = vpop.f32.mrf.mxu0  ;;  %v6965_v17 = vor.u32 %v6964_v59, %v6961_v7  ;;  %v7281_v48 = vrot.slane %v17287_v27, 5  ;;  %v7284_v39 = vrot.slane %v17591_v44, 5  ;;  %v12145_v7 = vrot.slane %v17306_v22, 9 }
 0x230   :  { %21277 = vst [vmem:[#allocation143_spill] sm:$0xff] %v17571_v53  ;;  %v17582_v19 = vpop.f32.mrf.mxu1  ;;  %13528 = vmatmul.mubr.msk.bf16.gmra.mxu1 %vm1312_vm8, %v12152_v25  ;;  %v6942_v6 = vrot.slane %v6941_v33, 4  ;;  %v6970_v61 = vrot.slane %v6968_v47, 5  ;;  %v12144_v25 = vrot.slane %v17285_v42, 9  ;;  %v6980_v36 = vrot.slane %v6978_v37, 5 }
 0x231   :  { %21278 = vst [vmem:[#allocation144_spill] sm:$0xff] %v17582_v19  ;;  %v17584_v43 = vpop.f32.mrf.mxu0  ;;  %v6952_v19 = vrot.slane %v6951_v54, 4  ;;  %v6966_v34 = vrot.slane %v6965_v17, 4  ;;  %v7291_v37 = vrot.slane %v6698_v55, 5 }
 0x232   :  { %21279 = vst [vmem:[#allocation145_spill] sm:$0xff] %v17584_v43  ;;  %v17593_v1 = vpop.f32.mrf.mxu1  ;;  %v6947_v33 = vsel %vm14369_vm14, %v6942_v6, %v6946_v3  ;;  %v7282_v54 = vsel %vm14417_vm15, %v12144_v25, %v7281_v48  ;;  %v7283_v3 = vrot.slane %v7281_v48, 4  ;;  %v7288_v6 = vrot.slane %v17308_v15, 5 }
 0x233   :  { %21280 = vst [vmem:[#allocation146_spill] sm:$0xff] %v17593_v1  ;;  %v17595_v40 = vpop.f32.mrf.mxu0  ;;  %v6975_v1 = vor.u32 %v6974_v60, %v6970_v61  ;;  %v6971_v60 = vsel %vm14369_vm14, %v6966_v34, %v6970_v61  ;;  %v6988_v48 = vrot.slane %v6986_v26, 5  ;;  %v7002_v26 = vshll.u32 %v17591_v44, 16 }
 0x234   :  { %21281 = vst [vmem:[#allocation147_spill] sm:$0xff] %v17595_v40  ;;  %v17600_v10 = vpop.f32.mrf.mxu1  ;;  %v7290_v25 = vrot.slane %v7288_v6, 4  ;;  %v21295_v44 = vshrl.u32 %v17308_v15, 16 }
 0x235   :  { %21282 = vst [vmem:[#allocation148_spill] sm:$0xff] %v17600_v10  ;;  %v17602_v28 = vpop.f32.mrf.mxu0  ;;  %v6957_v10 = vsel %vm14369_vm14, %v6952_v19, %v6956_v52  ;;  %v6976_v17 = vrot.slane %v6975_v1, 4  ;;  %v7285_v19 = vsel %vm14417_vm15, %v7283_v3, %v7284_v39  ;;  %v7289_v52 = vsel %vm14417_vm15, %v12145_v7, %v7288_v6 }
 0x236   :  { %21283 = vst [vmem:[#allocation149_spill] sm:$0xff] %v17602_v28  ;;  %v17609_v59 = vpop.f32.mrf.mxu1  ;;  %v12126_v20 = vcombine.low %v6947_v33, %v6957_v10  ;;  %v12153_v1 = vcombine.low %v7282_v54, %v7285_v19  ;;  %v21288_v10 = vshrl.u32 %v17285_v42, 16  ;;  %v7292_v39 = vsel %vm14417_vm15, %v7290_v25, %v7291_v37  ;;  %v17856_v28 = vld [vmem:[#allocation2 + $0x128] sm:$0x1] }
 0x237   :  { %21284 = vst [vmem:[#allocation150_spill] sm:$0xff] %v17609_v59  ;;  %v17611_v47 = vpop.f32.mrf.mxu0  ;;  %v6981_v61 = vsel %vm14369_vm14, %v6976_v17, %v6980_v36  ;;  %v6992_v3 = vshll.u32 %v17287_v27, 16  ;;  %v21290_v7 = vshrl.u32 %v17287_v27, 16  ;;  %v7044_v36 = vshrl.u32 %v17353_v56, 16 }
 0x238   :  { %21285 = vst [vmem:[#allocation151_spill] sm:$0xff] %v17611_v47  ;;  %v17620_v30 = vpop.f32.mrf.mxu1  ;;  %13509 = vmatprep.mubr.msk.bf16.mxu0 %vm1312_vm8, %v12126_v20  ;;  %v6985_v33 = vrot.slane %v21288_v10, 4  ;;  %v12127_v53 = vcombine.low %v6971_v60, %v6981_v61  ;;  %13531 = vmatprep.mubr.msk.bf16.mxu1 %vm1312_vm8, %v12153_v1  ;;  %v12154_v42 = vcombine.low %v7289_v52, %v7292_v39  ;;  %v21293_v37 = vshrl.u32 %v17306_v22, 16 }
 0x239   :  { %21286 = vst [vmem:[#allocation152_spill] sm:$0xff] %v17620_v30  ;;  %v17622_v59 = vpop.f32.mrf.mxu0  ;;  %v6998_v6 = vrot.slane %v21290_v7, 4  ;;  %v6994_v60 = vrot.slane %v6992_v3, 5  ;;  %v21294_v27 = vshll.u32 %v17306_v22, 16  ;;  %v7016_v61 = vshll.u32 %v17308_v15, 16 }
 0x23a   :  { %21287 = vst [vmem:[#allocation153_spill] sm:$0xff] %v17622_v59  ;;  %v17634_v34 = vpop.f32.mrf.mxu1  ;;  %v6989_v54 = vor.u32 %v6988_v48, %v6985_v33  ;;  %13510 = vmatmul.mubr.msk.bf16.gmra.mxu0 %vm1312_vm8, %v12127_v53  ;;  %v7009_v19 = vrot.slane %v21293_v37, 4  ;;  %v7055_v10 = vshrl.u32 %v17469_v38, 16  ;;  %13532 = vmatmul.mubr.msk.bf16.gmra.mxu1 %vm1312_vm8, %v12154_v42  ;;  %v7022_v1 = vrot.slane %v21295_v44, 4  ;;  %v6701_v48 = vld [vmem:[#allocation2 + $0x134] sm:$0x1] }
 0x23b   :  { %21289 = vst [vmem:[#allocation154_spill] sm:$0xff] %v17634_v34  ;;  %v17641_v20 = vpop.f32.mrf.mxu0  ;;  %v7012_v25 = vrot.slane %v21294_v27, 5  ;;  %v7026_v33 = vshll.u32 %v6698_v55, 16  ;;  %v6999_v39 = vor.u32 %v6998_v6, %v6994_v60  ;;  %v7004_v3 = vrot.slane %v7002_v26, 5  ;;  %v1007_v6 = vld [vmem:[#allocation2 + $0x140] sm:$0x1] }
 0x23c   :  { %21291 = vst [vmem:[#allocation155_spill] sm:$0xff] %v17641_v20  ;;  %v17646_v17 = vpop.f32.mrf.mxu1  ;;  %v6990_v52 = vrot.slane %v6989_v54, 4  ;;  %v7018_v37 = vrot.slane %v7016_v61, 5  ;;  %v12146_v42 = vrot.slane %v17351_v5, 9  ;;  %v7295_v54 = vrot.slane %v17353_v56, 5 }
 0x23d   :  { %21292 = vst [vmem:[#allocation156_spill] sm:$0xff] %v17646_v17  ;;  %v7013_v7 = vor.u32 %v7012_v25, %v7009_v19  ;;  %v17660_v22 = vpop.f32.mrf.mxu0  ;;  %v7028_v17 = vrot.slane %v7026_v33, 5  ;;  %v7000_v55 = vrot.slane %v6999_v39, 4  ;;  %v7298_v20 = vrot.slane %v6701_v48, 5  ;;  %v17728_v59 = vld [vmem:[#allocation2 + $0xfc] sm:$0xf] }
 0x23e   :  { %v17658_v53 = vpop.f32.mrf.mxu1  ;;  %21297 = vst [vmem:[#allocation158_spill] sm:$0xff] %v17660_v22  ;;  %v6995_v27 = vsel %vm14369_vm14, %v6990_v52, %v6994_v60  ;;  %v7023_v30 = vor.u32 %v7022_v1, %v7018_v37  ;;  %v7058_v26 = vshll.u32 %v17469_v38, 16  ;;  %v7296_v19 = vsel %vm14417_vm15, %v12146_v42, %v7295_v54 }
 0x23f   :  { %21296 = vst [vmem:[#allocation157_spill] sm:$0xff] %v17658_v53  ;;  %v7014_v44 = vrot.slane %v7013_v7, 4  ;;  %v7297_v25 = vrot.slane %v7295_v54, 4  ;;  %v603_v60 = vrot.slane %v17404_v21, 4  ;;  %v7005_v52 = vsel %vm14369_vm14, %v7000_v55, %v7004_v3  ;;  %v17679_v7 = vpop.f32.mrf.mxu0 }
 0x240   :  { %v17666_v15 = vpop.f32.mrf.mxu1  ;;  %v7024_v39 = vrot.slane %v7023_v30, 4  ;;  %v12147_v1 = vrot.slane %v17469_v38, 9  ;;  %21300 = vst [vmem:[#allocation161_spill] sm:$0xff] %v17679_v7  ;;  %v12128_v22 = vcombine.low %v6995_v27, %v7005_v52  ;;  %v7302_v38 = vrot.slane %v17478_v18, 5  ;;  %v17702_v52 = vld [vmem:[#allocation2 + $0xf0] sm:$0xf] }
 0x241   :  { %21298 = vst [vmem:[#allocation159_spill] sm:$0xff] %v17666_v15  ;;  %v7019_v33 = vsel %vm14369_vm14, %v7014_v44, %v7018_v37  ;;  %v7068_v15 = vshrl.u32 %v17478_v18, 16  ;;  %v7299_v42 = vsel %vm14417_vm15, %v7297_v25, %v7298_v20  ;;  %v1008_v54 = vsel %vm14339_vm11, %v603_v60, %v1007_v6 }
 0x242   :  { %v17672_v61 = vpop.f32.mrf.mxu1  ;;  %v7029_v3 = vsel %vm14369_vm14, %v7024_v39, %v7028_v17  ;;  %v12155_v37 = vcombine.low %v7296_v19, %v7299_v42  ;;  %1009 = vst [vmem:[#allocation2 + $0x140] sm:$0x1] %v1008_v54  ;;  %v21303_v30 = vshrl.u32 %v17351_v5, 16  ;;  %13513 = vmatprep.mubr.msk.bf16.mxu0 %vm1312_vm8, %v12128_v22  ;;  %v21304_v20 = vshll.u32 %v17351_v5, 16  ;;  %v17704_v39 = vpop.f32.mrf.mxu0  ;;  %v17708_v54 = vld [vmem:[#allocation2 + $0xf4] sm:$0xf] }
 0x243   :  { %21299 = vst [vmem:[#allocation160_spill] sm:$0xff] %v17672_v61  ;;  %v12129_v27 = vcombine.low %v7019_v33, %v7029_v3  ;;  %v7303_v17 = vsel %vm14417_vm15, %v12147_v1, %v7302_v38  ;;  %v7040_v6 = vshll.u32 %v17353_v56, 16  ;;  %v7046_v19 = vrot.slane %v7044_v36, 4  ;;  %21306 = vst [vmem:[#allocation163_spill] sm:$0xff] %v17704_v39 }
 0x244   :  { %v17686_v61 = vpop.f32.mrf.mxu1  ;;  %v7033_v55 = vrot.slane %v21303_v30, 4  ;;  %v7036_v44 = vrot.slane %v21304_v20, 5  ;;  %13535 = vmatprep.mubr.msk.bf16.mxu1 %vm1312_vm8, %v12155_v37  ;;  %v7050_v60 = vshll.u32 %v6701_v48, 16  ;;  %v7057_v5 = vrot.slane %v7055_v10, 4 }
 0x245   :  { %21302 = vst [vmem:[#allocation9_spill] sm:$0xff] %v17686_v61  ;;  %13514 = vmatmul.mubr.msk.bf16.gmra.mxu0 %vm1312_vm8, %v12129_v27  ;;  %v7060_v33 = vrot.slane %v7058_v26, 5  ;;  %v7064_v42 = vshll.u32 %v17478_v18, 16  ;;  %v7304_v1 = vrot.slane %v7302_v38, 4  ;;  %v7042_v37 = vrot.slane %v7040_v6, 5  ;;  %v17718_v27 = vpop.f32.mrf.mxu0 }
 0x246   :  { %v17696_v25 = vpop.f32.mrf.mxu1  ;;  %v7037_v22 = vor.u32 %v7036_v44, %v7033_v55  ;;  %v7052_v56 = vrot.slane %v7050_v60, 5  ;;  %v7070_v36 = vrot.slane %v7068_v15, 4  ;;  %v7679_v61 = vshrl.u32 %v17702_v52, 16  ;;  %21309 = vst [vmem:[#allocation166_spill] sm:$0xff] %v17718_v27 }
 0x247   :  { %21305 = vst [vmem:[#allocation162_spill] sm:$0xff] %v17696_v25  ;;  %v7061_v30 = vor.u32 %v7060_v33, %v7057_v5  ;;  %v7066_v20 = vrot.slane %v7064_v42, 5  ;;  %v7047_v55 = vor.u32 %v7046_v19, %v7042_v37  ;;  %v7682_v10 = vshll.u32 %v17702_v52, 16  ;;  %v17724_v42 = vld [vmem:[#allocation2 + $0xf8] sm:$0x1] }
 0x248   :  { %v17710_v3 = vpop.f32.mrf.mxu1  ;;  %v7038_v48 = vrot.slane %v7037_v22, 4  ;;  %v7688_v18 = vshll.u32 %v17708_v54, 16  ;;  %v7692_v26 = vshrl.u32 %v17708_v54, 16  ;;  %v7681_v60 = vrot.slane %v7679_v61, 4 }
 0x249   :  { %21307 = vst [vmem:[#allocation164_spill] sm:$0xff] %v17710_v3  ;;  %v6704_v38 = vld [vmem:[#allocation2 + $0x140] sm:$0x1]  ;;  %v7062_v44 = vrot.slane %v7061_v30, 4  ;;  %v7071_v6 = vor.u32 %v7070_v36, %v7066_v20  ;;  %v7048_v33 = vrot.slane %v7047_v55, 4  ;;  %v17736_v55 = vpop.f32.mrf.mxu0 }
 0x24a   :  { %v17713_v25 = vpop.f32.mrf.mxu1  ;;  %v7043_v15 = vsel %vm14369_vm14, %v7038_v48, %v7042_v37  ;;  %v7305_v5 = vrot.slane %v6704_v38, 5  ;;  %v7074_v19 = vshll.u32 %v6704_v38, 16  ;;  %v7690_v27 = vrot.slane %v7688_v18, 5  ;;  %21312 = vst [vmem:[#allocation169_spill] sm:$0xff] %v17736_v55 }
 0x24b   :  { %21308 = vst [vmem:[#allocation165_spill] sm:$0xff] %v17713_v25  ;;  %v7684_v25 = vrot.slane %v7682_v10, 5  ;;  %v7067_v3 = vsel %vm14369_vm14, %v7062_v44, %v7066_v20  ;;  %v7072_v39 = vrot.slane %v7071_v6, 4  ;;  %v7694_v7 = vrot.slane %v7692_v26, 4  ;;  %v17739_v26 = vld [vmem:[#allocation2 + $0x100] sm:$0xf] }
 0x24c   :  { %v17722_v22 = vpop.f32.mrf.mxu1  ;;  %v7306_v61 = vsel %vm14417_vm15, %v7304_v1, %v7305_v5  ;;  %v7053_v36 = vsel %vm14369_vm14, %v7048_v33, %v7052_v56  ;;  %v7076_v48 = vrot.slane %v7074_v19, 5  ;;  %v7698_v18 = vshll.u32 %v17724_v42, 16  ;;  %v17745_v5 = vld [vmem:[#allocation2 + $0x104] sm:$0x1] }
 0x24d   :  { %21310 = vst [vmem:[#allocation167_spill] sm:$0xff] %v17722_v22  ;;  %v7685_v30 = vor.u32 %v7684_v25, %v7681_v60  ;;  %v12156_v10 = vcombine.low %v7303_v17, %v7306_v61  ;;  %v12130_v38 = vcombine.low %v7043_v15, %v7053_v36  ;;  %v7695_v20 = vor.u32 %v7694_v7, %v7690_v27  ;;  %v17755_v61 = vpop.f32.mrf.mxu0  ;;  %v17798_v22 = vld [vmem:[#allocation2 + $0x118] sm:$0xf] }
 0x24e   :  { %v17730_v37 = vpop.f32.mrf.mxu1  ;;  %v7077_v6 = vsel %vm14369_vm14, %v7072_v39, %v7076_v48  ;;  %v7703_v56 = vshrl.u32 %v17728_v59, 16  ;;  %v7700_v17 = vrot.slane %v7698_v18, 5  ;;  %v7706_v15 = vshll.u32 %v17728_v59, 16  ;;  %21314 = vst [vmem:[#allocation171_spill] sm:$0xff] %v17755_v61  ;;  %v17765_v18 = vld [vmem:[#allocation2 + $0x108] sm:$0xf] }
 0x24f   :  { %21311 = vst [vmem:[#allocation168_spill] sm:$0xff] %v17730_v37  ;;  %v7686_v1 = vrot.slane %v7685_v30, 4  ;;  %13536 = vmatmul.mubr.msk.bf16.gmra.mxu1 %vm1312_vm8, %v12156_v10  ;;  %13517 = vmatprep.mubr.msk.bf16.mxu0 %vm1312_vm8, %v12130_v38  ;;  %v12131_v25 = vcombine.low %v7067_v3, %v7077_v6  ;;  %v7696_v7 = vrot.slane %v7695_v20, 4  ;;  %v7712_v39 = vshll.u32 %v17739_v26, 16  ;;  %v17767_v6 = vpop.f32.mrf.mxu0  ;;  %v17802_v61 = vld [vmem:[#allocation2 + $0x11c] sm:$0x1] }
 0x250   :  { %v17741_v44 = vpop.f32.mrf.mxu1  ;;  %v7705_v33 = vrot.slane %v7703_v56, 4  ;;  %v7716_v19 = vshrl.u32 %v17739_v26, 16  ;;  %v7708_v48 = vrot.slane %v7706_v15, 5  ;;  %v7722_v30 = vshll.u32 %v17745_v5, 16  ;;  %21316 = vst [vmem:[#allocation173_spill] sm:$0xff] %v17767_v6 }
 0x251   :  { %21313 = vst [vmem:[#allocation170_spill] sm:$0xff] %v17741_v44  ;;  %v7691_v60 = vsel %vm14369_vm14, %v7686_v1, %v7690_v27  ;;  %13518 = vmatmul.mubr.msk.bf16.gmra.mxu0 %vm1312_vm8, %v12131_v25  ;;  %v7701_v3 = vsel %vm14369_vm14, %v7696_v7, %v7700_v17  ;;  %v7714_v38 = vrot.slane %v7712_v39, 5  ;;  %v12166_v20 = vcombine.low %v17702_v52, %v17708_v54  ;;  %v17771_v25 = vld [vmem:[#allocation2 + $0x10c] sm:$0xf]  ;;  %v17775_v15 = vld [vmem:[#allocation2 + $0x110] sm:$0x1] }
 0x252   :  { %v17757_v36 = vpop.f32.mrf.mxu1  ;;  %v12183_v10 = vcombine.low %v7691_v60, %v7701_v3  ;;  %v7718_v27 = vrot.slane %v7716_v19, 4  ;;  %v7709_v56 = vor.u32 %v7708_v48, %v7705_v33  ;;  %v7724_v17 = vrot.slane %v7722_v30, 5  ;;  %v17777_v60 = vpop.f32.mrf.mxu0 }
 0x253   :  { %21315 = vst [vmem:[#allocation172_spill] sm:$0xff] %v17757_v36  ;;  %13541 = vmatprep.mubr.msk.bf16.mxu0 %vm1312_vm8, %v12166_v20  ;;  %21318 = vst [vmem:[#allocation175_spill] sm:$0xff] %v17777_v60  ;;  %v12167_v3 = vcombine.low %v17728_v59, %v17739_v26  ;;  %v7727_v33 = vshrl.u32 %v17765_v18, 16  ;;  %v7730_v48 = vshll.u32 %v17765_v18, 16  ;;  %v8149_v30 = vsel %vm1337_vm0, %v17566_v2, 0 }
 0x254   :  { %v17769_v1 = vpop.f32.mrf.mxu1  ;;  %13559 = vmatprep.mubr.msk.bf16.mxu1 %vm1312_vm8, %v12183_v10  ;;  %v7719_v7 = vor.u32 %v7718_v27, %v7714_v38  ;;  %v7710_v19 = vrot.slane %v7709_v56, 4  ;;  %v7736_v10 = vshll.u32 %v17771_v25, 16  ;;  %v7740_v27 = vshrl.u32 %v17771_v25, 16  ;;  %v17789_v20 = vld [vmem:[#allocation2 + $0x114] sm:$0xf]  ;;  %v17791_v44 = vpop.f32.mrf.mxu0 }
 0x255   :  { %21317 = vst [vmem:[#allocation174_spill] sm:$0xff] %v17769_v1  ;;  %21320 = vst [vmem:[#allocation177_spill] sm:$0xff] %v17791_v44  ;;  %v7732_v36 = vrot.slane %v7730_v48, 5  ;;  %v17807_v44 = vld [vmem:[%s20896_s1] sm:$0x3] }
 0x256   :  { %v17779_v39 = vpop.f32.mrf.mxu1  ;;  %v7720_v1 = vrot.slane %v7719_v7, 4  ;;  %v7715_v6 = vsel %vm14369_vm14, %v7710_v19, %v7714_v38  ;;  %v7746_v7 = vshll.u32 %v17775_v15, 16  ;;  %v7738_v37 = vrot.slane %v7736_v10, 5  ;;  %v17809_v55 = vpop.f32.mrf.mxu0 }
 0x257   :  { %21319 = vst [vmem:[#allocation176_spill] sm:$0xff] %v17779_v39  ;;  %v7729_v39 = vrot.slane %v7727_v33, 4  ;;  %v7742_v60 = vrot.slane %v7740_v27, 4  ;;  %21322 = vst [vmem:[#allocation179_spill] sm:$0xff] %v17809_v55  ;;  %v8608_v33 = vsel %vm1337_vm0, %v17516_v51, 0  ;;  %v7754_v27 = vshll.u32 %v17789_v20, 16 }
 0x258   :  { %v7725_v2 = vsel %vm14369_vm14, %v7720_v1, %v7724_v17  ;;  %v7751_v17 = vshrl.u32 %v17789_v20, 16  ;;  %v7748_v10 = vrot.slane %v7746_v7, 5  ;;  %v17822_v55 = vld [vmem:[%s20896_s1 + $0x4] sm:$0x3] }
 0x259   :  { %v17793_v56 = vpop.f32.mrf.mxu1  ;;  %v12184_v19 = vcombine.low %v7715_v6, %v7725_v2  ;;  %13542 = vmatmul.mubr.msk.bf16.vlgmr.msra.gmra.mxu0 %vm1312_vm8, %v12167_v3  ;;  %v7733_v1 = vor.u32 %v7732_v36, %v7729_v39  ;;  %v7743_v48 = vor.u32 %v7742_v60, %v7738_v37  ;;  %v17824_v6 = vpop.f32.mrf.mxu0  ;;  %v7764_v60 = vshrl.u32 %v17798_v22, 16 }
 0x25a   :  { %21321 = vst [vmem:[#allocation178_spill] sm:$0xff] %v17793_v56  ;;  %13576 = vmatpush3.bf16.msra.mxu0 %v8149_v30  ;;  %v7760_v56 = vshll.u32 %v17798_v22, 16  ;;  %21324 = vst [vmem:[#allocation181_spill] sm:$0xff] %v17824_v6  ;;  %v7753_v36 = vrot.slane %v7751_v17, 4  ;;  %v7770_v39 = vshll.u32 %v17802_v61, 16  ;;  %v7756_v7 = vrot.slane %v7754_v27, 5 }
 0x25b   :  { %v17811_v38 = vpop.f32.mrf.mxu1  ;;  %13560 = vmatmul.mubr.msk.bf16.vlgmr.msra.gmra.mxu1 %vm1312_vm8, %v12184_v19  ;;  %v7734_v51 = vrot.slane %v7733_v1, 4  ;;  %13783 = vmatprep.subr.msk.bf16.mxu0 %vm1337_vm0, %v17807_v44  ;;  %v7744_v30 = vrot.slane %v7743_v48, 4  ;;  %v7766_v1 = vrot.slane %v7764_v60, 4  ;;  %v12168_v17 = vcombine.low %v17765_v18, %v17771_v25  ;;  %v17847_v48 = vld [vmem:[#allocation2 + $0x124] sm:$0xf] }
 0x25c   :  { %21323 = vst [vmem:[#allocation180_spill] sm:$0xff] %v17811_v38  ;;  %13594 = vmatpush3.bf16.msra.mxu1 %v8608_v33  ;;  %v7762_v2 = vrot.slane %v7760_v56, 5  ;;  %v17833_v38 = vpop.f32.mrf.mxu0  ;;  %v7757_v56 = vor.u32 %v7756_v7, %v7753_v36  ;;  %v7772_v60 = vrot.slane %v7770_v39, 5  ;;  %v7784_v39 = vshll.u32 %v17847_v48, 16 }
 0x25d   :  { %v17826_v3 = vpop.f32.mrf.mxu1  ;;  %21326 = vst [vmem:[#allocation183_spill] sm:$0xff] %v17833_v38  ;;  %v7739_v19 = vsel %vm14369_vm14, %v7734_v51, %v7738_v37  ;;  %13784 = vmatprep.subr.msk.bf16.mxu1 %vm1337_vm0, %v17822_v55  ;;  %v7749_v33 = vsel %vm14369_vm14, %v7744_v30, %v7748_v10  ;;  %13545 = vmatprep.mubr.msk.bf16.mxu0 %vm1312_vm8, %v12168_v17  ;;  %v17868_v17 = vld [vmem:[#allocation2 + $0x12c] sm:$0xf] }
 0x25e   :  { %21325 = vst [vmem:[#allocation182_spill] sm:$0xff] %v17826_v3  ;;  %v17841_v3 = vld [vmem:[#allocation2 + $0x120] sm:$0xf]  ;;  %v17849_v27 = vpop.f32.mrf.mxu0  ;;  %v12185_v37 = vcombine.low %v7739_v19, %v7749_v33  ;;  %v7767_v51 = vor.u32 %v7766_v1, %v7762_v2  ;;  %v12169_v38 = vcombine.low %v17789_v20, %v17798_v22  ;;  %v7758_v34 = vrot.slane %v7757_v56, 4 }
 0x25f   :  { %v17835_v6 = vpop.f32.mrf.mxu1  ;;  %21328 = vst [vmem:[#allocation185_spill] sm:$0xff] %v17849_v27  ;;  %v7775_v10 = vshrl.u32 %v17841_v3, 16  ;;  %v7778_v36 = vshll.u32 %v17841_v3, 16  ;;  %v7788_v1 = vshrl.u32 %v17847_v48, 16  ;;  %v7794_v27 = vshll.u32 %v17856_v28, 16 }
 0x260   :  { %21327 = vst [vmem:[#allocation184_spill] sm:$0xff] %v17835_v6  ;;  %v17860_v30 = vpop.f32.mrf.mxu0  ;;  %13563 = vmatprep.mubr.msk.bf16.mxu1 %vm1312_vm8, %v12185_v37  ;;  %v7768_v19 = vrot.slane %v7767_v51, 4  ;;  %v7763_v33 = vsel %vm14369_vm14, %v7758_v34, %v7762_v2  ;;  %v7786_v51 = vrot.slane %v7784_v39, 5  ;;  %v7799_v34 = vshrl.u32 %v17868_v17, 16 }
 0x261   :  { %v17851_v6 = vpop.f32.mrf.mxu1  ;;  %21330 = vst [vmem:[#allocation187_spill] sm:$0xff] %v17860_v30  ;;  %13546 = vmatmul.mubr.msk.bf16.gmra.mxu0 %vm1312_vm8, %v12169_v38  ;;  %v7777_v56 = vrot.slane %v7775_v10, 4  ;;  %v17873_v30 = vld [vmem:[#allocation2 + $0x130] sm:$0xf]  ;;  %v7790_v43 = vrot.slane %v7788_v1, 4  ;;  %v7796_v14 = vrot.slane %v7794_v27, 5 }
 0x262   :  { %21329 = vst [vmem:[#allocation186_spill] sm:$0xff] %v17851_v6  ;;  %v7780_v6 = vrot.slane %v7778_v36, 5  ;;  %v7773_v38 = vsel %vm14369_vm14, %v7768_v19, %v7772_v60  ;;  %v7801_v19 = vrot.slane %v7799_v34, 4  ;;  %v7812_v39 = vshrl.u32 %v17873_v30, 16 }
 0x263   :  { %v17862_v7 = vpop.f32.mrf.mxu1  ;;  %v12186_v4 = vcombine.low %v7763_v33, %v7773_v38  ;;  %v7791_v36 = vor.u32 %v7790_v43, %v7786_v51 }
 0x264   :  { %21331 = vst [vmem:[#allocation188_spill] sm:$0xff] %v17862_v7  ;;  %v17875_v7 = vpop.f32.mrf.mxu0  ;;  %v7781_v35 = vor.u32 %v7780_v6, %v7777_v56  ;;  %v7818_v6 = vshll.u32 %v17881_v24, 16  ;;  %v7814_v27 = vrot.slane %v7812_v39, 4 }
 0x265   :  { %21332 = vst [vmem:[#allocation189_spill] sm:$0xff] %v17875_v7  ;;  %v17877_v37 = vpop.f32.mrf.mxu1  ;;  %v7802_v7 = vshll.u32 %v17868_v17, 16  ;;  %13564 = vmatmul.mubr.msk.bf16.gmra.mxu1 %vm1312_vm8, %v12186_v4  ;;  %v7792_v33 = vrot.slane %v7791_v36, 4  ;;  %v12170_v4 = vcombine.low %v17841_v3, %v17847_v48  ;;  %v17907_v36 = vld [vmem:[#allocation2 + $0x13c] sm:$0xf] }
 0x266   :  { %21333 = vst [vmem:[#allocation190_spill] sm:$0xff] %v17877_v37  ;;  %v17884_v2 = vpop.f32.mrf.mxu0  ;;  %v7808_v37 = vshll.u32 %v17873_v30, 16  ;;  %v7782_v60 = vrot.slane %v7781_v35, 4  ;;  %v17901_v35 = vld [vmem:[#allocation2 + $0x138] sm:$0xf] }
 0x267   :  { %21334 = vst [vmem:[#allocation191_spill] sm:$0xff] %v17884_v2  ;;  %v17886_v10 = vpop.f32.mrf.mxu1  ;;  %v7804_v56 = vrot.slane %v7802_v7, 5  ;;  %v7797_v2 = vsel %vm14369_vm14, %v7792_v33, %v7796_v14  ;;  %13549 = vmatprep.mubr.msk.bf16.mxu0 %vm1312_vm8, %v12170_v4  ;;  %v7823_v53 = vshrl.u32 %v17901_v35, 16  ;;  %v178_v4 = vld [vmem:[%s20895_s0 + $0xc4] sm:$0xf] }
 0x268   :  { %21335 = vst [vmem:[#allocation192_spill] sm:$0xff] %v17886_v10  ;;  %v17893_v1 = vpop.f32.mrf.mxu0  ;;  %v7810_v38 = vrot.slane %v7808_v37, 5  ;;  %v7787_v43 = vsel %vm14369_vm14, %v7782_v60, %v7786_v51  ;;  %v12171_v51 = vcombine.low %v17868_v17, %v17873_v30  ;;  %v17912_v60 = vld [vmem:[#allocation2 + $0x140] sm:$0x1]  ;;  %v616_v12 = vshll.u32 %v178_v4, 16 }
 0x269   :  { %21336 = vst [vmem:[#allocation193_spill] sm:$0xff] %v17893_v1  ;;  %v17895_v10 = vpop.f32.mrf.mxu1  ;;  %v7805_v1 = vor.u32 %v7804_v56, %v7801_v19  ;;  %v12187_v7 = vcombine.low %v7787_v43, %v7797_v2  ;;  %v7832_v19 = vshll.u32 %v17907_v36, 16  ;;  %v7825_v56 = vrot.slane %v7823_v53, 4 }
 0x26a   :  { %21337 = vst [vmem:[#allocation194_spill] sm:$0xff] %v17895_v10  ;;  %v17903_v34 = vpop.f32.mrf.mxu0  ;;  %v7815_v37 = vor.u32 %v7814_v27, %v7810_v38  ;;  %v7820_v10 = vrot.slane %v7818_v6, 5  ;;  %13550 = vmatmul.mubr.msk.bf16.gmra.mxu0 %vm1312_vm8, %v12171_v51  ;;  %v7836_v6 = vshrl.u32 %v17907_v36, 16  ;;  %v7842_v27 = vshll.u32 %v17912_v60, 16 }
 0x26b   :  { %21338 = vst [vmem:[#allocation195_spill] sm:$0xff] %v17903_v34  ;;  %v7806_v39 = vrot.slane %v7805_v1, 4  ;;  %v7826_v34 = vshll.u32 %v17901_v35, 16  ;;  %v17916_v40 = vpop.f32.mrf.mxu1  ;;  %13567 = vmatprep.mubr.msk.bf16.mxu1 %vm1312_vm8, %v12187_v7  ;;  %v177_v1 = vld [vmem:[%s20895_s0 + $0xc0] sm:$0xf] }
 0x26c   :  { %21339 = vst [vmem:[#allocation196_spill] sm:$0xff] %v17916_v40  ;;  %v17918_v14 = vpop.f32.mrf.mxu0  ;;  %v7816_v2 = vrot.slane %v7815_v37, 4  ;;  %v7834_v37 = vrot.slane %v7832_v19, 5  ;;  %v7838_v51 = vrot.slane %v7836_v6, 4  ;;  %v605_v47 = vshrl.u32 %v177_v1, 16 }
 0x26d   :  { %21340 = vst [vmem:[#allocation197_spill] sm:$0xff] %v17918_v14  ;;  %v7811_v33 = vsel %vm14369_vm14, %v7806_v39, %v7810_v38  ;;  %v7828_v43 = vrot.slane %v7826_v34, 5  ;;  %v17935_v16 = vpop.f32.mrf.mxu1  ;;  %v7844_v38 = vrot.slane %v7842_v27, 5  ;;  %v608_v34 = vshll.u32 %v177_v1, 16  ;;  %v17942_v6 = vld [vmem:[#allocation2 + $0x138] sm:$0xf] }
 0x26e   :  { %v7821_v7 = vsel %vm14369_vm14, %v7816_v2, %v7820_v10  ;;  %21341 = vst [vmem:[#allocation198_spill] sm:$0xff] %v17935_v16  ;;  %v17937_v0 = vpop.f32.mrf.mxu0  ;;  %v7839_v53 = vor.u32 %v7838_v51, %v7834_v37  ;;  %v613_v39 = vshrl.u32 %v178_v4, 16  ;;  %v607_v9 = vrot.slane %v605_v47, 7  ;;  %v1010_v2 = vld [vmem:[#allocation2 + $0x144] sm:$0xf] }
 0x26f   :  { %v12188_v40 = vcombine.low %v7811_v33, %v7821_v7  ;;  %v7829_v14 = vor.u32 %v7828_v43, %v7825_v56  ;;  %21342 = vst [vmem:[#allocation199_spill] sm:$0xff] %v17937_v0  ;;  %v12172_v19 = vcombine.low %v17901_v35, %v17907_v36  ;;  %v1014_v1 = vld [vmem:[#allocation2 + $0x14c] sm:$0x1]  ;;  %v17946_v27 = vld [vmem:[#allocation2 + $0x13c] sm:$0xf] }
 0x270   :  { %v7840_v13 = vrot.slane %v7839_v53, 4  ;;  %v615_v10 = vrot.slane %v613_v39, 7  ;;  %v610_v56 = vor.u32 %v608_v34, %v607_v9  ;;  %v611_v43 = vrot.slane %v607_v9, 4  ;;  %v17950_v47 = vpop.f32.mrf.mxu0 }
 0x271   :  { %13568 = vmatmul.mubr.msk.bf16.gmra.mxu1 %vm1312_vm8, %v12188_v40  ;;  %v7830_v29 = vrot.slane %v7829_v14, 4  ;;  %v17948_v40 = vpop.f32.mrf.mxu1  ;;  %21344 = vst [vmem:[#allocation201_spill] sm:$0xff] %v17950_v47  ;;  %13553 = vmatprep.mubr.msk.bf16.mxu0 %vm1312_vm8, %v12172_v19  ;;  %v8367_v9 = vshrl.u32 %v17942_v6, 16  ;;  %v8380_v39 = vshrl.u32 %v17946_v27, 16 }
 0x272   :  { %21343 = vst [vmem:[#allocation200_spill] sm:$0xff] %v17948_v40  ;;  %v7845_v14 = vsel %vm14369_vm14, %v7840_v13, %v7844_v38  ;;  %v618_v4 = vor.u32 %v616_v12, %v615_v10  ;;  %v620_v7 = vrot.slane %v615_v10, 4  ;;  %v8370_v13 = vshll.u32 %v17942_v6, 16 }
 0x273   :  { %v7835_v33 = vsel %vm14369_vm14, %v7830_v29, %v7834_v37  ;;  %v1011_v29 = vsel %vm14321_vm10, %v610_v56, %v1010_v2  ;;  %v17957_v37 = vld [vmem:[#allocation2 + $0x140] sm:$0x1]  ;;  %v8376_v12 = vshll.u32 %v17946_v27, 16  ;;  %v8369_v38 = vrot.slane %v8367_v9, 4  ;;  %v17969_v10 = vpop.f32.mrf.mxu1  ;;  %v17971_v2 = vpop.f32.mrf.mxu0 }
 0x274   :  { %v12189_v51 = vcombine.low %v7835_v33, %v7845_v14  ;;  %v619_v53 = vsel %vm14298_vm9, %v611_v43, %v618_v4  ;;  %1012 = vst [vmem:[#allocation2 + $0x144] sm:$0xf] %v1011_v29  ;;  %v1015_v34 = vsel %vm14339_vm11, %v620_v7, %v1014_v1  ;;  %21345 = vst [vmem:[#allocation202_spill] sm:$0xff] %v17969_v10  ;;  %v8372_v19 = vrot.slane %v8370_v13, 5 }
 0x275   :  { %1013 = vst.msk [vmem:[#allocation2 + $0x148] sm:$0xf] %vm19_vm1, %v619_v53  ;;  %1016 = vst [vmem:[#allocation2 + $0x14c] sm:$0x1] %v1015_v34  ;;  %v17973_v33 = vrot.slane %v8376_v12, 5  ;;  %v8386_v56 = vshll.u32 %v17957_v37, 16  ;;  %v17982_v53 = vpop.f32.mrf.mxu1  ;;  %v17984_v34 = vpop.f32.mrf.mxu0 }
 0x276   :  { %13571 = vmatprep.mubr.msk.bf16.mxu1 %vm1312_vm8, %v12189_v51  ;;  %21346 = vst [vmem:[#allocation203_spill] sm:$0xff] %v17971_v2  ;;  %v8382_v43 = vrot.slane %v8380_v39, 4  ;;  %v12199_v1 = vrot.slane %v17702_v52, 9  ;;  %v8045_v14 = vrot.slane %v17708_v54, 5  ;;  %v8373_v4 = vor.u32 %v8372_v19, %v8369_v38  ;;  %21347 = vst [vmem:[#allocation204_spill] sm:$0xff] %v17982_v53 }
 0x277   :  { %v8048_v7 = vrot.slane %v17724_v42, 5  ;;  %21348 = vst [vmem:[#allocation205_spill] sm:$0xff] %v17984_v34  ;;  %v8388_v12 = vrot.slane %v8386_v56, 5  ;;  %v12200_v39 = vrot.slane %v17728_v59, 9  ;;  %v8052_v52 = vrot.slane %v17739_v26, 5  ;;  %v18010_v34 = vpop.f32.mrf.mxu0 }
 0x278   :  { %v8383_v51 = vor.u32 %v8382_v43, %v17973_v33  ;;  %v8046_v29 = vsel %vm14417_vm15, %v12199_v1, %v8045_v14  ;;  %v8047_v9 = vrot.slane %v8045_v14, 4  ;;  %v8374_v13 = vrot.slane %v8373_v4, 4  ;;  %21350 = vst [vmem:[#allocation207_spill] sm:$0xff] %v18010_v34 }
 0x279   :  { %v8055_v43 = vrot.slane %v17745_v5, 5  ;;  %v18008_v5 = vpop.f32.mrf.mxu1 }
 0x27a   :  { %v8384_v38 = vrot.slane %v8383_v51, 4  ;;  %v8049_v19 = vsel %vm14417_vm15, %v8047_v9, %v8048_v7  ;;  %21349 = vst [vmem:[#allocation206_spill] sm:$0xff] %v18008_v5 }
 0x27b   :  { %v17988_v54 = vld [vmem:[#allocation2 + $0x144] sm:$0xf]  ;;  %v12208_v4 = vcombine.low %v8046_v29, %v8049_v19  ;;  %v8379_v29 = vsel %vm14369_vm14, %v8374_v13, %v17973_v33 }
 0x27c   :  { %v17990_v42 = vld [vmem:[#allocation2 + $0x144] sm:$0xf]  ;;  %v17995_v1 = vld [vmem:[#allocation2 + $0x148] sm:$0xf]  ;;  %v17997_v14 = vld [vmem:[#allocation2 + $0x14c] sm:$0x1]  ;;  %v8389_v5 = vsel %vm14369_vm14, %v8384_v38, %v8388_v12 }
 0x27d   :  { %v7847_v56 = vshrl.u32 %v17988_v54, 16  ;;  %v7850_v59 = vshll.u32 %v17988_v54, 16  ;;  %v7856_v26 = vshll.u32 %v17995_v1, 16  ;;  %v7860_v51 = vshrl.u32 %v17995_v1, 16  ;;  %v18006_v9 = vld [vmem:[#allocation2 + $0x148] sm:$0xf] }
 0x27e   :  { %v7866_v10 = vshll.u32 %v17997_v14, 16  ;;  %v12173_v7 = vcombine.low %v17988_v54, %v17995_v1  ;;  %v18015_v19 = vld [vmem:[#allocation2 + $0x14c] sm:$0x1]  ;;  %v8391_v47 = vshrl.u32 %v17990_v42, 16  ;;  %v8404_v13 = vshrl.u32 %v18006_v9, 16 }
 0x27f   :  { %v7849_v53 = vrot.slane %v7847_v56, 4  ;;  %v7852_v16 = vrot.slane %v7850_v59, 5  ;;  %v7858_v40 = vrot.slane %v7856_v26, 5  ;;  %v7862_v2 = vrot.slane %v7860_v51, 4  ;;  %v18028_v51 = vpop.f32.mrf.mxu1 }
 0x280   :  { %v7868_v0 = vrot.slane %v7866_v10, 5  ;;  %13554 = vmatmul.mubr.msk.bf16.gmra.mxu0 %vm1312_vm8, %v12173_v7  ;;  %v8393_v34 = vrot.slane %v8391_v47, 4  ;;  %v8394_v56 = vshll.u32 %v17990_v42, 16  ;;  %v8400_v59 = vshll.u32 %v18006_v9, 16  ;;  %21351 = vst [vmem:[#allocation208_spill] sm:$0xff] %v18028_v51  ;;  %v18030_v7 = vpop.f32.mrf.mxu0 }
 0x281   :  { %v7853_v45 = vor.u32 %v7852_v16, %v7849_v53  ;;  %13577 = vmatprep.mubr.msk.bf16.mxu0 %vm1312_vm8, %v12208_v4  ;;  %v7863_v33 = vor.u32 %v7862_v2, %v7858_v40  ;;  %v8410_v26 = vshll.u32 %v18015_v19, 16  ;;  %v8053_v10 = vsel %vm14417_vm15, %v12200_v39, %v8052_v52  ;;  %21352 = vst [vmem:[#allocation209_spill] sm:$0xff] %v18030_v7  ;;  %v179_v4 = vld [vmem:[%s20895_s0 + $0xc8] sm:$0xf] }
 0x282   :  { %v8396_v47 = vrot.slane %v8394_v56, 5  ;;  %v8402_v53 = vrot.slane %v8400_v59, 5  ;;  %v8054_v12 = vrot.slane %v8052_v52, 4  ;;  %v8406_v62 = vrot.slane %v8404_v13, 4  ;;  %v180_v52 = vld [vmem:[%s20895_s0 + $0xcc] sm:$0xf] }
 0x283   :  { %v7854_v16 = vrot.slane %v7853_v45, 4  ;;  %v7864_v38 = vrot.slane %v7863_v33, 4  ;;  %v8772_v2 = vsel %vm1337_vm0, %v17807_v44, 0  ;;  %v12225_v63 = vcombine.low %v8379_v29, %v8389_v5  ;;  %v181_v13 = vld [vmem:[%s20895_s0 + $0xd0] sm:$0xf] }
 0x284   :  { %v8397_v51 = vor.u32 %v8396_v47, %v8393_v34  ;;  %v8056_v45 = vsel %vm14417_vm15, %v8054_v12, %v8055_v43  ;;  %v8407_v44 = vor.u32 %v8406_v62, %v8402_v53  ;;  %v8412_v59 = vrot.slane %v8410_v26, 5  ;;  %v18052_v34 = vpop.f32.mrf.mxu1  ;;  %v18054_v43 = vpop.f32.mrf.mxu0  ;;  %v18059_v62 = vld [vmem:[%s20896_s1 + $0x6] sm:$0x3] }
 0x285   :  { %v7859_v39 = vsel %vm14369_vm14, %v7854_v16, %v7858_v40  ;;  %v7869_v56 = vsel %vm14369_vm14, %v7864_v38, %v7868_v0  ;;  %v12209_v33 = vcombine.low %v8053_v10, %v8056_v45  ;;  %v182_v40 = vld [vmem:[%s20895_s0 + $0xd4] sm:$0xf]  ;;  %21353 = vst [vmem:[#allocation210_spill] sm:$0xff] %v18052_v34  ;;  %21354 = vst [vmem:[#allocation211_spill] sm:$0xff] %v18054_v43  ;;  %v622_v16 = vshrl.u32 %v179_v4, 16 }
 0x286   :  { %v12190_v5 = vcombine.low %v7859_v39, %v7869_v56  ;;  %v8398_v29 = vrot.slane %v8397_v51, 4  ;;  %v625_v47 = vshll.u32 %v179_v4, 16  ;;  %v8408_v0 = vrot.slane %v8407_v44, 4  ;;  %v1017_v56 = vld [vmem:[#allocation2 + $0x150] sm:$0xf] }
 0x287   :  { %v630_v26 = vshrl.u32 %v180_v52, 16  ;;  %v633_v10 = vshll.u32 %v180_v52, 16  ;;  %v624_v12 = vrot.slane %v622_v16, 7  ;;  %v639_v38 = vshrl.u32 %v181_v13, 16  ;;  %v18070_v52 = vpop.f32.mrf.mxu1  ;;  %v1024_v43 = vld [vmem:[#allocation2 + $0x15c] sm:$0xf] }
 0x288   :  { %13578 = vmatmul.mubr.msk.bf16.vlgmr.msra.gmra.mxu0 %vm1312_vm8, %v12209_v33  ;;  %13572 = vmatmul.mubr.msk.bf16.gmra.mxu1 %vm1312_vm8, %v12190_v5  ;;  %v642_v45 = vshll.u32 %v181_v13, 16  ;;  %v8403_v51 = vsel %vm14369_vm14, %v8398_v29, %v8402_v53  ;;  %v8413_v4 = vsel %vm14369_vm14, %v8408_v0, %v8412_v59  ;;  %v647_v44 = vshrl.u32 %v182_v40, 16  ;;  %21355 = vst [vmem:[#allocation212_spill] sm:$0xff] %v18070_v52  ;;  %v1021_v5 = vld [vmem:[#allocation2 + $0x158] sm:$0x1] }
 0x289   :  { %13612 = vmatpush3.bf16.msra.mxu0 %v8772_v2  ;;  %13595 = vmatprep.mubr.msk.bf16.mxu1 %vm1312_vm8, %v12225_v63  ;;  %v632_v39 = vrot.slane %v630_v26, 7  ;;  %v18072_v2 = vpop.f32.mrf.mxu0  ;;  %v627_v33 = vor.u32 %v625_v47, %v624_v12  ;;  %v628_v13 = vrot.slane %v624_v12, 4  ;;  %v641_v63 = vrot.slane %v639_v38, 7  ;;  %v18074_v59 = vpop.f32.mrf.mxu1 }
 0x28a   :  { %13785 = vmatprep.subr.msk.bf16.mxu0 %vm1337_vm0, %v18059_v62  ;;  %21356 = vst [vmem:[#allocation213_spill] sm:$0xff] %v18072_v2  ;;  %v649_v53 = vrot.slane %v647_v44, 7  ;;  %v650_v29 = vshll.u32 %v182_v40, 16  ;;  %21357 = vst [vmem:[#allocation214_spill] sm:$0xff] %v18074_v59  ;;  %v12226_v26 = vcombine.low %v8403_v51, %v8413_v4  ;;  %v1028_v2 = vld [vmem:[#allocation2 + $0x164] sm:$0x1] }
 0x28b   :  { %v635_v16 = vor.u32 %v633_v10, %v632_v39  ;;  %v637_v7 = vrot.slane %v632_v39, 4  ;;  %v18076_v0 = vpop.f32.mrf.mxu0  ;;  %v1018_v34 = vsel %vm14321_vm10, %v627_v33, %v1017_v56  ;;  %v644_v52 = vor.u32 %v642_v45, %v641_v63  ;;  %v18084_v38 = vpop.f32.mrf.mxu1  ;;  %v184_v33 = vld [vmem:[%s20895_s0 + $0xdc] sm:$0xf] }
 0x28c   :  { %21358 = vst [vmem:[#allocation215_spill] sm:$0xff] %v18076_v0  ;;  %v645_v32 = vrot.slane %v641_v63, 4  ;;  %1019 = vst [vmem:[#allocation2 + $0x150] sm:$0xf] %v1018_v34  ;;  %v652_v40 = vor.u32 %v650_v29, %v649_v53  ;;  %v654_v12 = vrot.slane %v649_v53, 4  ;;  %v8985_v51 = vsel %vm1337_vm0, %v17822_v55, 0 }
 0x28d   :  { %v636_v47 = vsel %vm14298_vm9, %v628_v13, %v635_v16  ;;  %v1022_v10 = vsel %vm14339_vm11, %v637_v7, %v1021_v5  ;;  %21359 = vst [vmem:[#allocation216_spill] sm:$0xff] %v18084_v38  ;;  %v18086_v39 = vpop.f32.mrf.mxu0  ;;  %v1025_v45 = vsel %vm14321_vm10, %v644_v52, %v1024_v43  ;;  %v12201_v34 = vrot.slane %v17765_v18, 9  ;;  %v183_v7 = vld [vmem:[%s20895_s0 + $0xd8] sm:$0xf]  ;;  %v18106_v43 = vld [vmem:[%s20896_s1 + $0x8] sm:$0x3]  ;;  %v18108_v18 = vpop.f32.mrf.mxu1 }
 0x28e   :  { %21360 = vst [vmem:[#allocation217_spill] sm:$0xff] %v18086_v39  ;;  %1020 = vst.msk [vmem:[#allocation2 + $0x154] sm:$0xf] %vm19_vm1, %v636_v47  ;;  %v8059_v4 = vrot.slane %v17771_v25, 5  ;;  %v653_v56 = vsel %vm14298_vm9, %v645_v32, %v652_v40  ;;  %v1029_v55 = vsel %vm14339_vm11, %v654_v12, %v1028_v2  ;;  %v8062_v44 = vrot.slane %v17775_v15, 5 }
 0x28f   :  { %1023 = vst [vmem:[#allocation2 + $0x158] sm:$0x1] %v1022_v10  ;;  %1026 = vst [vmem:[#allocation2 + $0x15c] sm:$0xf] %v1025_v45  ;;  %v12202_v52 = vrot.slane %v17789_v20, 9  ;;  %v8066_v15 = vrot.slane %v17798_v22, 5  ;;  %v18125_v63 = vpop.f32.mrf.mxu0  ;;  %v18127_v16 = vpop.f32.mrf.mxu1 }
 0x290   :  { %21361 = vst [vmem:[#allocation218_spill] sm:$0xff] %v18108_v18  ;;  %13596 = vmatmul.mubr.msk.bf16.vlgmr.msra.gmra.mxu1 %vm1312_vm8, %v12226_v26  ;;  %1027 = vst.msk [vmem:[#allocation2 + $0x160] sm:$0xf] %vm19_vm1, %v653_v56  ;;  %v8060_v32 = vsel %vm14417_vm15, %v12201_v34, %v8059_v4  ;;  %v8061_v25 = vrot.slane %v8059_v4, 4  ;;  %v8069_v2 = vrot.slane %v17802_v61, 5  ;;  %v656_v13 = vshrl.u32 %v183_v7, 16 }
 0x291   :  { %1030 = vst [vmem:[#allocation2 + $0x164] sm:$0x1] %v1029_v55  ;;  %13630 = vmatpush3.bf16.msra.mxu1 %v8985_v51  ;;  %v18123_v5 = vld [vmem:[%s20895_s0 + $0xe0] sm:$0xf]  ;;  %21362 = vst [vmem:[#allocation219_spill] sm:$0xff] %v18125_v63  ;;  %v8067_v61 = vsel %vm14417_vm15, %v12202_v52, %v8066_v15  ;;  %v8068_v20 = vrot.slane %v8066_v15, 4  ;;  %v18140_v34 = vpop.f32.mrf.mxu1 }
 0x292   :  { %21363 = vst [vmem:[#allocation220_spill] sm:$0xff] %v18127_v16  ;;  %v8063_v22 = vsel %vm14417_vm15, %v8061_v25, %v8062_v44  ;;  %v659_v53 = vshll.u32 %v183_v7, 16  ;;  %13786 = vmatprep.subr.msk.bf16.mxu1 %vm1337_vm0, %v18106_v43  ;;  %v658_v26 = vrot.slane %v656_v13, 7  ;;  %v1031_v47 = vld [vmem:[#allocation2 + $0x168] sm:$0xf]  ;;  %v664_v12 = vshrl.u32 %v184_v33, 16 }
 0x293   :  { %v12210_v29 = vcombine.low %v8060_v32, %v8063_v22  ;;  %v18135_v10 = vld [vmem:[#allocation2 + $0x150] sm:$0xf]  ;;  %v8070_v40 = vsel %vm14417_vm15, %v8068_v20, %v8069_v2  ;;  %v667_v51 = vshll.u32 %v184_v33, 16  ;;  %v673_v45 = vshrl.u32 %v18123_v5, 16  ;;  %21364 = vst [vmem:[#allocation221_spill] sm:$0xff] %v18140_v34  ;;  %v18164_v16 = vpop.f32.mrf.mxu1 }
 0x294   :  { %v8415_v56 = vshrl.u32 %v18135_v10, 16  ;;  %v8418_v55 = vshll.u32 %v18135_v10, 16  ;;  %v12211_v44 = vcombine.low %v8067_v61, %v8070_v40  ;;  %v661_v32 = vor.u32 %v659_v53, %v658_v26  ;;  %21366 = vst [vmem:[#allocation223_spill] sm:$0xff] %v18164_v16  ;;  %v1035_v38 = vld [vmem:[#allocation2 + $0x170] sm:$0x1] }
 0x295   :  { %v18142_v4 = vld [vmem:[#allocation2 + $0x154] sm:$0xf]  ;;  %13581 = vmatprep.mubr.msk.bf16.mxu0 %vm1312_vm8, %v12210_v29  ;;  %v662_v13 = vrot.slane %v658_v26, 4 }
 0x296   :  { %v18144_v7 = vld [vmem:[#allocation2 + $0x158] sm:$0x1]  ;;  %v8424_v52 = vshll.u32 %v18142_v4, 16  ;;  %v8428_v15 = vshrl.u32 %v18142_v4, 16  ;;  %v18154_v33 = vld [vmem:[#allocation2 + $0x15c] sm:$0xf]  ;;  %13582 = vmatmul.mubr.msk.bf16.gmra.mxu0 %vm1312_vm8, %v12211_v44  ;;  %v1032_v61 = vsel %vm14321_vm10, %v661_v32, %v1031_v47 }
 0x297   :  { %v8434_v2 = vshll.u32 %v18144_v7, 16  ;;  %v8417_v22 = vrot.slane %v8415_v56, 4  ;;  %v8420_v20 = vrot.slane %v8418_v55, 5  ;;  %v18156_v34 = vld [vmem:[#allocation2 + $0x160] sm:$0xf]  ;;  %v8442_v56 = vshll.u32 %v18154_v33, 16 }
 0x298   :  { %v18158_v18 = vld [vmem:[#allocation2 + $0x164] sm:$0x1]  ;;  %v8426_v53 = vrot.slane %v8424_v52, 5  ;;  %v8430_v29 = vrot.slane %v8428_v15, 4  ;;  %1033 = vst [vmem:[#allocation2 + $0x168] sm:$0xf] %v1032_v61 }
 0x299   :  { %v18149_v25 = vpop.f32.mrf.mxu0  ;;  %v8436_v40 = vrot.slane %v8434_v2, 5  ;;  %v8421_v26 = vor.u32 %v8420_v20, %v8417_v22  ;;  %v8448_v55 = vshll.u32 %v18156_v34, 16  ;;  %v8452_v59 = vshrl.u32 %v18156_v34, 16 }
 0x29a   :  { %21365 = vst [vmem:[#allocation222_spill] sm:$0xff] %v18149_v25  ;;  %v8439_v25 = vshrl.u32 %v18154_v33, 16  ;;  %v8431_v44 = vor.u32 %v8430_v29, %v8426_v53  ;;  %v8458_v47 = vshll.u32 %v18158_v18, 16  ;;  %v666_v32 = vrot.slane %v664_v12, 7  ;;  %v186_v12 = vld [vmem:[%s20895_s0 + $0xe4] sm:$0xf] }
 0x29b   :  { %v18169_v39 = vpop.f32.mrf.mxu0  ;;  %v8422_v52 = vrot.slane %v8421_v26, 4  ;;  %v8444_v15 = vrot.slane %v8442_v56, 5  ;;  %v8450_v2 = vrot.slane %v8448_v55, 5  ;;  %v8454_v61 = vrot.slane %v8452_v59, 4 }
 0x29c   :  { %21367 = vst [vmem:[#allocation224_spill] sm:$0xff] %v18169_v39  ;;  %v8441_v0 = vrot.slane %v8439_v25, 4  ;;  %v8432_v16 = vrot.slane %v8431_v44, 4  ;;  %v8460_v22 = vrot.slane %v8458_v47, 5  ;;  %v669_v20 = vor.u32 %v667_v51, %v666_v32 }
 0x29d   :  { %v671_v63 = vrot.slane %v666_v32, 4  ;;  %v8427_v50 = vsel %vm14369_vm14, %v8422_v52, %v8426_v53  ;;  %v8455_v29 = vor.u32 %v8454_v61, %v8450_v2  ;;  %v675_v25 = vrot.slane %v673_v45, 7  ;;  %v18179_v26 = vpop.f32.mrf.mxu0  ;;  %v1038_v52 = vld [vmem:[#allocation2 + $0x174] sm:$0xf] }
 0x29e   :  { %v8445_v39 = vor.u32 %v8444_v15, %v8441_v0  ;;  %21369 = vst [vmem:[#allocation226_spill] sm:$0xff] %v18179_v26  ;;  %v8437_v59 = vsel %vm14369_vm14, %v8432_v16, %v8436_v40  ;;  %v670_v51 = vsel %vm14298_vm9, %v662_v13, %v669_v20  ;;  %v676_v53 = vshll.u32 %v18123_v5, 16 }
 0x29f   :  { %v1036_v56 = vsel %vm14339_vm11, %v671_v63, %v1035_v38  ;;  %v12227_v55 = vcombine.low %v8427_v50, %v8437_v59  ;;  %v8456_v47 = vrot.slane %v8455_v29, 4  ;;  %1034 = vst.msk [vmem:[#allocation2 + $0x16c] sm:$0xf] %vm19_vm1, %v670_v51  ;;  %v18191_v45 = vld [vmem:[#allocation2 + $0x168] sm:$0xf]  ;;  %v681_v32 = vshrl.u32 %v186_v12, 16  ;;  %v18200_v63 = vpop.f32.mrf.mxu0 }
 0x2a0   :  { %v8446_v44 = vrot.slane %v8445_v39, 4  ;;  %1037 = vst [vmem:[#allocation2 + $0x170] sm:$0x1] %v1036_v56  ;;  %v8463_v16 = vshrl.u32 %v18191_v45, 16  ;;  %v8466_v40 = vshll.u32 %v18191_v45, 16  ;;  %v678_v13 = vor.u32 %v676_v53, %v675_v25  ;;  %21371 = vst [vmem:[#allocation228_spill] sm:$0xff] %v18200_v63 }
 0x2a1   :  { %13599 = vmatprep.mubr.msk.bf16.mxu1 %vm1312_vm8, %v12227_v55  ;;  %v8461_v50 = vsel %vm14369_vm14, %v8456_v47, %v8460_v22  ;;  %v679_v39 = vrot.slane %v675_v25, 4  ;;  %v684_v5 = vshll.u32 %v186_v12, 16  ;;  %v683_v29 = vrot.slane %v681_v32, 7  ;;  %v1042_v56 = vld [vmem:[#allocation2 + $0x17c] sm:$0x1] }
 0x2a2   :  { %v8451_v38 = vsel %vm14369_vm14, %v8446_v44, %v8450_v2  ;;  %v8465_v61 = vrot.slane %v8463_v16, 4  ;;  %v8468_v20 = vrot.slane %v8466_v40, 5  ;;  %v1039_v51 = vsel %vm14321_vm10, %v678_v13, %v1038_v52  ;;  %v1049_v63 = vld [vmem:[#allocation2 + $0x188] sm:$0x1] }
 0x2a3   :  { %v12228_v15 = vcombine.low %v8451_v38, %v8461_v50  ;;  %v12203_v53 = vrot.slane %v17841_v3, 9  ;;  %v8073_v2 = vrot.slane %v17847_v48, 5  ;;  %v686_v12 = vor.u32 %v684_v5, %v683_v29  ;;  %1040 = vst [vmem:[#allocation2 + $0x174] sm:$0xf] %v1039_v51  ;;  %v187_v3 = vld [vmem:[%s20895_s0 + $0xe8] sm:$0xf] }
 0x2a4   :  { %v8469_v22 = vor.u32 %v8468_v20, %v8465_v61  ;;  %v688_v25 = vrot.slane %v683_v29, 4  ;;  %v8076_v55 = vrot.slane %v17856_v28, 5  ;;  %v12204_v16 = vrot.slane %v17868_v17, 9 }
 0x2a5   :  { %v18172_v11 = vpop.f32.mrf.mxu1  ;;  %13600 = vmatmul.mubr.msk.bf16.gmra.mxu1 %vm1312_vm8, %v12228_v15  ;;  %v8074_v44 = vsel %vm14417_vm15, %v12203_v53, %v8073_v2  ;;  %v8075_v47 = vrot.slane %v8073_v2, 4  ;;  %v687_v32 = vsel %vm14298_vm9, %v679_v39, %v686_v12  ;;  %v8080_v52 = vrot.slane %v17873_v30, 5  ;;  %v188_v39 = vld [vmem:[%s20895_s0 + $0xec] sm:$0xf] }
 0x2a6   :  { %21368 = vst [vmem:[#allocation225_spill] sm:$0xff] %v18172_v11  ;;  %v18218_v48 = vld [vmem:[#allocation2 + $0x16c] sm:$0xf]  ;;  %v1043_v28 = vsel %vm14339_vm11, %v688_v25, %v1042_v56  ;;  %1041 = vst.msk [vmem:[#allocation2 + $0x178] sm:$0xf] %vm19_vm1, %v687_v32  ;;  %v8470_v61 = vrot.slane %v8469_v22, 4 }
 0x2a7   :  { %v18188_v0 = vpop.f32.mrf.mxu1  ;;  %v18220_v13 = vld [vmem:[#allocation2 + $0x170] sm:$0x1]  ;;  %v8472_v17 = vshll.u32 %v18218_v48, 16  ;;  %v8476_v50 = vshrl.u32 %v18218_v48, 16  ;;  %1044 = vst [vmem:[#allocation2 + $0x17c] sm:$0x1] %v1043_v28  ;;  %v8077_v15 = vsel %vm14417_vm15, %v8075_v47, %v8076_v55  ;;  %v8081_v53 = vsel %vm14417_vm15, %v12204_v16, %v8080_v52 }
 0x2a8   :  { %21370 = vst [vmem:[#allocation227_spill] sm:$0xff] %v18188_v0  ;;  %v8482_v5 = vshll.u32 %v18220_v13, 16  ;;  %v12212_v30 = vcombine.low %v8074_v44, %v8077_v15  ;;  %v8082_v20 = vrot.slane %v8080_v52, 4  ;;  %v8083_v2 = vrot.slane %v17881_v24, 5 }
 0x2a9   :  { %v18202_v59 = vpop.f32.mrf.mxu1  ;;  %v8474_v51 = vrot.slane %v8472_v17, 5  ;;  %v8478_v56 = vrot.slane %v8476_v50, 4  ;;  %v690_v12 = vshrl.u32 %v187_v3, 16  ;;  %v698_v25 = vshrl.u32 %v188_v39, 16 }
 0x2aa   :  { %13585 = vmatprep.mubr.msk.bf16.mxu0 %vm1312_vm8, %v12212_v30  ;;  %v8484_v32 = vrot.slane %v8482_v5, 5  ;;  %v18246_v22 = vld [vmem:[#allocation2 + $0x174] sm:$0xf]  ;;  %v8084_v44 = vsel %vm14417_vm15, %v8082_v20, %v8083_v2  ;;  %v693_v28 = vshll.u32 %v187_v3, 16  ;;  %v701_v11 = vshll.u32 %v188_v39, 16 }
 0x2ab   :  { %v18227_v38 = vpop.f32.mrf.mxu1  ;;  %v8479_v47 = vor.u32 %v8478_v56, %v8474_v51  ;;  %v8475_v17 = vsel %vm14369_vm14, %v8470_v61, %v8474_v51  ;;  %v8487_v16 = vshrl.u32 %v18246_v22, 16  ;;  %v8490_v24 = vshll.u32 %v18246_v22, 16  ;;  %v1045_v39 = vld [vmem:[#allocation2 + $0x180] sm:$0xf] }
 0x2ac   :  { %v12213_v52 = vcombine.low %v8081_v53, %v8084_v44  ;;  %v692_v5 = vrot.slane %v690_v12, 7  ;;  %v700_v56 = vrot.slane %v698_v25, 7 }
 0x2ad   :  { %v8480_v30 = vrot.slane %v8479_v47, 4  ;;  %v8489_v3 = vrot.slane %v8487_v16, 4  ;;  %v8492_v2 = vrot.slane %v8490_v24, 5  ;;  %v189_v16 = vld [vmem:[%s20895_s0 + $0xf0] sm:$0xf] }
 0x2ae   :  { %v18216_v40 = vpop.f32.mrf.mxu0  ;;  %v18260_v20 = vld [vmem:[#allocation2 + $0x17c] sm:$0x1]  ;;  %13586 = vmatmul.mubr.msk.bf16.gmra.mxu0 %vm1312_vm8, %v12213_v52  ;;  %v695_v0 = vor.u32 %v693_v28, %v692_v5  ;;  %v703_v26 = vor.u32 %v701_v11, %v700_v56  ;;  %v707_v11 = vshrl.u32 %v189_v16, 16 }
 0x2af   :  { %21372 = vst [vmem:[#allocation229_spill] sm:$0xff] %v18216_v40  ;;  %v18258_v40 = vld [vmem:[#allocation2 + $0x178] sm:$0xf]  ;;  %v8485_v51 = vsel %vm14369_vm14, %v8480_v30, %v8484_v32  ;;  %v8506_v12 = vshll.u32 %v18260_v20, 16  ;;  %v8493_v44 = vor.u32 %v8492_v2, %v8489_v3 }
 0x2b0   :  { %v18238_v29 = vpop.f32.mrf.mxu0  ;;  %v8496_v53 = vshll.u32 %v18258_v40, 16  ;;  %v8500_v47 = vshrl.u32 %v18258_v40, 16  ;;  %v12229_v25 = vcombine.low %v8475_v17, %v8485_v51  ;;  %v1046_v3 = vsel %vm14321_vm10, %v695_v0, %v1045_v39 }
 0x2b1   :  { %21373 = vst [vmem:[#allocation230_spill] sm:$0xff] %v18238_v29  ;;  %v696_v29 = vrot.slane %v692_v5, 4  ;;  %v8494_v28 = vrot.slane %v8493_v44, 4  ;;  %v8508_v17 = vrot.slane %v8506_v12, 5  ;;  %v705_v5 = vrot.slane %v700_v56, 4 }
 0x2b2   :  { %v18254_v50 = vpop.f32.mrf.mxu0  ;;  %v8498_v32 = vrot.slane %v8496_v53, 5  ;;  %v8502_v30 = vrot.slane %v8500_v47, 4  ;;  %13603 = vmatprep.mubr.msk.bf16.mxu1 %vm1312_vm8, %v12229_v25  ;;  %1047 = vst [vmem:[#allocation2 + $0x180] sm:$0xf] %v1046_v3  ;;  %v710_v47 = vshll.u32 %v189_v16, 16  ;;  %v715_v44 = vshrl.u32 %v190_v46, 16 }
 0x2b3   :  { %v704_v53 = vsel %vm14298_vm9, %v696_v29, %v703_v26  ;;  %v1050_v25 = vsel %vm14339_vm11, %v705_v5, %v1049_v63  ;;  %v718_v12 = vshll.u32 %v190_v46, 16  ;;  %v709_v26 = vrot.slane %v707_v11, 7 }
 0x2b4   :  { %v18244_v55 = vpop.f32.mrf.mxu1  ;;  %v18273_v24 = vpop.f32.mrf.mxu0  ;;  %v8503_v51 = vor.u32 %v8502_v30, %v8498_v32  ;;  %1048 = vst.msk [vmem:[#allocation2 + $0x184] sm:$0xf] %vm19_vm1, %v704_v53  ;;  %v8499_v0 = vsel %vm14369_vm14, %v8494_v28, %v8498_v32  ;;  %1051 = vst [vmem:[#allocation2 + $0x188] sm:$0x1] %v1050_v25  ;;  %v12205_v29 = vrot.slane %v17901_v35, 9  ;;  %v717_v16 = vrot.slane %v715_v44, 7 }
 0x2b5   :  { %v1052_v30 = vld [vmem:[#allocation2 + $0x18c] sm:$0xf]  ;;  %v8087_v3 = vrot.slane %v17907_v36, 5  ;;  %v8090_v63 = vrot.slane %v17912_v60, 5  ;;  %v713_v32 = vrot.slane %v709_v26, 4 }
 0x2b6   :  { %v18256_v15 = vpop.f32.mrf.mxu1  ;;  %v8504_v39 = vrot.slane %v8503_v51, 4  ;;  %v1056_v28 = vld [vmem:[#allocation2 + $0x194] sm:$0x1]  ;;  %v12206_v51 = vrot.slane %v17988_v54, 9  ;;  %v720_v35 = vor.u32 %v718_v12, %v717_v16  ;;  %v722_v25 = vrot.slane %v717_v16, 4 }
 0x2b8   :  { %v18263_v61 = vpop.f32.mrf.mxu1  ;;  %v8509_v53 = vsel %vm14369_vm14, %v8504_v39, %v8508_v17  ;;  %v8094_v17 = vrot.slane %v17995_v1, 5  ;;  %v721_v54 = vsel %vm14298_vm9, %v713_v32, %v720_v35  ;;  %v1057_v12 = vsel %vm14339_vm11, %v722_v25, %v1056_v28 }
 0x2b9   :  { %v12230_v11 = vcombine.low %v8499_v0, %v8509_v53  ;;  %v8097_v0 = vrot.slane %v17997_v14, 5  ;;  %1055 = vst.msk [vmem:[#allocation2 + $0x190] sm:$0xf] %vm19_vm1, %v721_v54  ;;  %1058 = vst [vmem:[#allocation2 + $0x194] sm:$0x1] %v1057_v12 }
 0x2ba   :  { %v18275_v52 = vpop.f32.mrf.mxu1  ;;  %v8096_v28 = vrot.slane %v8094_v17, 4 }
 0x2bb   :  { %21374 = vst [vmem:[#allocation231_spill] sm:$0xff] %v18275_v52  ;;  %13604 = vmatmul.mubr.msk.bf16.gmra.mxu1 %vm1312_vm8, %v12230_v11  ;;  %v18336_v14 = vld [vmem:[#allocation2 + $0x188] sm:$0x1] }
 0x2bc   :  { %v18283_v2 = vpop.f32.mrf.mxu1 }
 0x2bd   :  { %21375 = vst [vmem:[#allocation232_spill] sm:$0xff] %v18283_v2  ;;  %v18290_v56 = vpop.f32.mrf.mxu0  ;;  %v712_v2 = vor.u32 %v710_v47, %v709_v26  ;;  %v18316_v47 = vld [vmem:[#allocation2 + $0x180] sm:$0xf]  ;;  %v18327_v26 = vld [vmem:[#allocation2 + $0x184] sm:$0xf] }
 0x2be   :  { %v18292_v57 = vpop.f32.mrf.mxu1  ;;  %v8511_v1 = vshrl.u32 %v18316_v47, 16  ;;  %v8524_v53 = vshrl.u32 %v18327_v26, 16 }
 0x2bf   :  { %21376 = vst [vmem:[#allocation233_spill] sm:$0xff] %v18292_v57  ;;  %v18299_v5 = vpop.f32.mrf.mxu0  ;;  %v1053_v60 = vsel %vm14321_vm10, %v712_v2, %v1052_v30  ;;  %v8089_v57 = vrot.slane %v8087_v3, 4  ;;  %v8095_v30 = vsel %vm14417_vm15, %v12206_v51, %v8094_v17 }
 0x2c0   :  { %v18301_v46 = vpop.f32.mrf.mxu1  ;;  %1054 = vst [vmem:[#allocation2 + $0x18c] sm:$0xf] %v1053_v60  ;;  %v8513_v35 = vrot.slane %v8511_v1, 4  ;;  %v8530_v60 = vshll.u32 %v18336_v14, 16  ;;  %v8526_v12 = vrot.slane %v8524_v53, 4  ;;  %v8881_v1 = vrot.slane %v17946_v27, 5 }
 0x2c1   :  { %21377 = vst [vmem:[#allocation234_spill] sm:$0xff] %v18301_v46  ;;  %v18306_v44 = vpop.f32.mrf.mxu0  ;;  %v8088_v46 = vsel %vm14417_vm15, %v12205_v29, %v8087_v3  ;;  %v8514_v29 = vshll.u32 %v18316_v47, 16  ;;  %v8091_v16 = vsel %vm14417_vm15, %v8089_v57, %v8090_v63  ;;  %v8520_v3 = vshll.u32 %v18327_v26, 16 }
 0x2c2   :  { %v18308_v36 = vpop.f32.mrf.mxu1  ;;  %v12214_v32 = vcombine.low %v8088_v46, %v8091_v16  ;;  %v8098_v57 = vsel %vm14417_vm15, %v8096_v28, %v8097_v0  ;;  %v8532_v16 = vrot.slane %v8530_v60, 5  ;;  %v12257_v53 = vrot.slane %v17942_v6, 9  ;;  %v18358_v28 = vld [vmem:[#allocation2 + $0x190] sm:$0xf] }
 0x2c3   :  { %21378 = vst [vmem:[#allocation235_spill] sm:$0xff] %v18308_v36  ;;  %v18323_v2 = vpop.f32.mrf.mxu0  ;;  %v8516_v25 = vrot.slane %v8514_v29, 5  ;;  %v8522_v54 = vrot.slane %v8520_v3, 5  ;;  %v12215_v46 = vcombine.low %v8095_v30, %v8098_v57  ;;  %v8884_v0 = vrot.slane %v17957_v37, 5 }
 0x2c4   :  { %21379 = vst [vmem:[#allocation236_spill] sm:$0xff] %v18323_v2  ;;  %v18325_v39 = vpop.f32.mrf.mxu1  ;;  %13589 = vmatprep.mubr.msk.bf16.mxu0 %vm1312_vm8, %v12214_v32  ;;  %v8544_v57 = vshll.u32 %v18358_v28, 16  ;;  %v8548_v37 = vshrl.u32 %v18358_v28, 16 }
 0x2c5   :  { %21380 = vst [vmem:[#allocation237_spill] sm:$0xff] %v18325_v39  ;;  %v18340_v11 = vpop.f32.mrf.mxu0  ;;  %v8517_v39 = vor.u32 %v8516_v25, %v8513_v35  ;;  %v8527_v17 = vor.u32 %v8526_v12, %v8522_v54  ;;  %13590 = vmatmul.mubr.msk.bf16.gmra.mxu0 %vm1312_vm8, %v12215_v46  ;;  %v18360_v35 = vld [vmem:[#allocation2 + $0x194] sm:$0x1] }
 0x2c6   :  { %21381 = vst [vmem:[#allocation238_spill] sm:$0xff] %v18340_v11  ;;  %v18348_v51 = vpop.f32.mrf.mxu1  ;;  %v8550_v8 = vrot.slane %v8548_v37, 4  ;;  %v9191_v37 = vsel %vm1337_vm0, %v18059_v62, 0 }
 0x2c7   :  { %v18346_v63 = vpop.f32.mrf.mxu0  ;;  %21383 = vst [vmem:[#allocation240_spill] sm:$0xff] %v18348_v51  ;;  %v8518_v11 = vrot.slane %v8517_v39, 4  ;;  %v18353_v3 = vld [vmem:[#allocation2 + $0x18c] sm:$0xf]  ;;  %v8528_v32 = vrot.slane %v8527_v17, 4  ;;  %v8554_v51 = vshll.u32 %v18360_v35, 16 }
 0x2c8   :  { %21382 = vst [vmem:[#allocation239_spill] sm:$0xff] %v18346_v63  ;;  %v8535_v30 = vshrl.u32 %v18353_v3, 16  ;;  %v18365_v60 = vpop.f32.mrf.mxu1  ;;  %v8538_v12 = vshll.u32 %v18353_v3, 16 }
 0x2c9   :  { %v18351_v29 = vpop.f32.mrf.mxu0  ;;  %21386 = vst [vmem:[#allocation243_spill] sm:$0xff] %v18365_v60  ;;  %v8523_v39 = vsel %vm14369_vm14, %v8518_v11, %v8522_v54  ;;  %v8533_v46 = vsel %vm14369_vm14, %v8528_v32, %v8532_v16  ;;  %v8888_v11 = vrot.slane %v18006_v9, 5  ;;  %v8556_v32 = vrot.slane %v8554_v51, 5 }
 0x2ca   :  { %21384 = vst [vmem:[#allocation241_spill] sm:$0xff] %v18351_v29  ;;  %v8537_v17 = vrot.slane %v8535_v30, 4  ;;  %v8883_v29 = vrot.slane %v8881_v1, 4  ;;  %v12231_v63 = vcombine.low %v8523_v39, %v8533_v46  ;;  %v8540_v60 = vrot.slane %v8538_v12, 5  ;;  %v18380_v23 = vpop.f32.mrf.mxu1 }
 0x2cb   :  { %v18363_v25 = vpop.f32.mrf.mxu0  ;;  %21389 = vst [vmem:[#allocation246_spill] sm:$0xff] %v18380_v23  ;;  %v12241_v30 = vcombine.low %v17942_v6, %v17946_v27  ;;  %v8882_v39 = vsel %vm14417_vm15, %v12257_v53, %v8881_v1  ;;  %v18399_v6 = vld [vmem:[%s20896_s1 + $0xa] sm:$0x3]  ;;  %v12258_v27 = vrot.slane %v17990_v42, 9  ;;  %v8891_v51 = vrot.slane %v18015_v19, 5 }
 0x2cc   :  { %21385 = vst [vmem:[#allocation242_spill] sm:$0xff] %v18363_v25  ;;  %v8546_v25 = vrot.slane %v8544_v57, 5  ;;  %13607 = vmatprep.mubr.msk.bf16.mxu1 %vm1312_vm8, %v12231_v63  ;;  %v8541_v52 = vor.u32 %v8540_v60, %v8537_v17  ;;  %v8885_v12 = vsel %vm14417_vm15, %v8883_v29, %v8884_v0  ;;  %v12242_v57 = vcombine.low %v17990_v42, %v18006_v9  ;;  %v18405_v62 = vpop.f32.mrf.mxu1 }
 0x2cd   :  { %v18375_v36 = vpop.f32.mrf.mxu0  ;;  %13613 = vmatprep.mubr.msk.bf16.mxu0 %vm1312_vm8, %v12241_v30  ;;  %v8895_v9 = vrot.slane %v18142_v4, 5  ;;  %21391 = vst [vmem:[#allocation248_spill] sm:$0xff] %v18405_v62  ;;  %v12266_v53 = vcombine.low %v8882_v39, %v8885_v12  ;;  %v8890_v0 = vrot.slane %v8888_v11, 4  ;;  %v12259_v19 = vrot.slane %v18135_v10, 9 }
 0x2ce   :  { %21387 = vst [vmem:[#allocation244_spill] sm:$0xff] %v18375_v36  ;;  %v8551_v16 = vor.u32 %v8550_v8, %v8546_v25  ;;  %v8542_v63 = vrot.slane %v8541_v52, 4  ;;  %13614 = vmatmul.mubr.msk.bf16.vlgmr.msra.gmra.mxu0 %vm1312_vm8, %v12242_v57  ;;  %v8898_v17 = vrot.slane %v18144_v7, 5  ;;  %v8902_v7 = vrot.slane %v18156_v34, 5 }
 0x2cf   :  { %v18378_v54 = vpop.f32.mrf.mxu0  ;;  %13648 = vmatpush3.bf16.msra.mxu0 %v9191_v37  ;;  %v8897_v60 = vrot.slane %v8895_v9, 4  ;;  %v8892_v39 = vsel %vm14417_vm15, %v8890_v0, %v8891_v51  ;;  %v8896_v12 = vsel %vm14417_vm15, %v12259_v19, %v8895_v9  ;;  %v12243_v37 = vcombine.low %v18135_v10, %v18142_v4  ;;  %v18454_v0 = vld [vmem:[%s20896_s1 + $0xc] sm:$0x3] }
 0x2d0   :  { %21388 = vst [vmem:[#allocation245_spill] sm:$0xff] %v18378_v54  ;;  %v8552_v8 = vrot.slane %v8551_v16, 4  ;;  %v8547_v52 = vsel %vm14369_vm14, %v8542_v63, %v8546_v25  ;;  %13787 = vmatprep.subr.msk.bf16.mxu0 %vm1337_vm0, %v18399_v6  ;;  %v18420_v25 = vpop.f32.mrf.mxu1  ;;  %v12244_v63 = vcombine.low %v18154_v33, %v18156_v34  ;;  %v8904_v9 = vrot.slane %v8902_v7, 4 }
 0x2d1   :  { %v18393_v46 = vpop.f32.mrf.mxu0  ;;  %21394 = vst [vmem:[#allocation251_spill] sm:$0xff] %v18420_v25  ;;  %v8899_v57 = vsel %vm14417_vm15, %v8897_v60, %v8898_v17  ;;  %13617 = vmatprep.mubr.msk.bf16.mxu0 %vm1312_vm8, %v12243_v37  ;;  %v8909_v10 = vrot.slane %v18218_v48, 5  ;;  %v9548_v34 = vsel %vm1337_vm0, %v18106_v43, 0  ;;  %v12261_v4 = vrot.slane %v18191_v45, 9 }
 0x2d2   :  { %21390 = vst [vmem:[#allocation247_spill] sm:$0xff] %v18393_v46  ;;  %v8557_v29 = vsel %vm14369_vm14, %v8552_v8, %v8556_v32  ;;  %v8889_v32 = vsel %vm14417_vm15, %v12258_v27, %v8888_v11  ;;  %v12260_v27 = vrot.slane %v18154_v33, 9  ;;  %v18442_v51 = vpop.f32.mrf.mxu1  ;;  %v8916_v19 = vrot.slane %v18258_v40, 5 }
 0x2d3   :  { %v18407_v1 = vpop.f32.mrf.mxu0  ;;  %v12232_v42 = vcombine.low %v8547_v52, %v8557_v29  ;;  %v12267_v11 = vcombine.low %v8889_v32, %v8892_v39  ;;  %21396 = vst [vmem:[#allocation253_spill] sm:$0xff] %v18442_v51  ;;  %v12268_v52 = vcombine.low %v8896_v12, %v8899_v57  ;;  %v8905_v29 = vrot.slane %v18158_v18, 5 }
 0x2d4   :  { %21392 = vst [vmem:[#allocation249_spill] sm:$0xff] %v18407_v1  ;;  %v8911_v33 = vrot.slane %v8909_v10, 4  ;;  %v18459_v18 = vpop.f32.mrf.mxu1  ;;  %v8903_v43 = vsel %vm14417_vm15, %v12260_v27, %v8902_v7  ;;  %v8910_v60 = vsel %vm14417_vm15, %v12261_v4, %v8909_v10  ;;  %v12245_v32 = vcombine.low %v18191_v45, %v18218_v48 }
 0x2d5   :  { %v18417_v16 = vpop.f32.mrf.mxu0  ;;  %13608 = vmatmul.mubr.msk.bf16.gmra.mxu1 %vm1312_vm8, %v12232_v42  ;;  %21398 = vst [vmem:[#allocation255_spill] sm:$0xff] %v18459_v18  ;;  %v12262_v12 = vrot.slane %v18246_v22, 9  ;;  %v12246_v27 = vcombine.low %v18246_v22, %v18258_v40  ;;  %v8923_v45 = vrot.slane %v18327_v26, 5  ;;  %v8930_v10 = vrot.slane %v18358_v28, 5 }
 0x2d6   :  { %21393 = vst [vmem:[#allocation250_spill] sm:$0xff] %v18417_v16  ;;  %13631 = vmatprep.mubr.msk.bf16.mxu1 %vm1312_vm8, %v12266_v53  ;;  %13618 = vmatmul.mubr.msk.bf16.gmra.mxu0 %vm1312_vm8, %v12244_v63  ;;  %v8912_v53 = vrot.slane %v18220_v13, 5  ;;  %v8906_v13 = vsel %vm14417_vm15, %v8904_v9, %v8905_v29  ;;  %v8918_v63 = vrot.slane %v8916_v19, 4  ;;  %v8926_v29 = vrot.slane %v18336_v14, 5 }
 0x2d7   :  { %v18422_v30 = vpop.f32.mrf.mxu0  ;;  %v12269_v7 = vcombine.low %v8903_v43, %v8906_v13  ;;  %13621 = vmatprep.mubr.msk.bf16.mxu0 %vm1312_vm8, %v12245_v32  ;;  %v8917_v40 = vsel %vm14417_vm15, %v12262_v12, %v8916_v19  ;;  %v8925_v4 = vrot.slane %v8923_v45, 4  ;;  %v12264_v13 = vrot.slane %v18353_v3, 9  ;;  %v18515_v12 = vld [vmem:[#allocation2 + $0x144] sm:$0xf] }
 0x2d8   :  { %21395 = vst [vmem:[#allocation252_spill] sm:$0xff] %v18422_v30  ;;  %v8913_v17 = vsel %vm14417_vm15, %v8911_v33, %v8912_v53  ;;  %v8933_v32 = vrot.slane %v18360_v35, 5  ;;  %v12316_v49 = vrot.slane %v18515_v12, 9 }
 0x2d9   :  { %v18438_v8 = vpop.f32.mrf.mxu0  ;;  %v12270_v37 = vcombine.low %v8910_v60, %v8913_v17  ;;  %v8927_v43 = vsel %vm14417_vm15, %v8925_v4, %v8926_v29  ;;  %v8932_v17 = vrot.slane %v8930_v10, 4  ;;  %v8931_v35 = vsel %vm14417_vm15, %v12264_v13, %v8930_v10  ;;  %v18539_v29 = vld [vmem:[#allocation2 + $0x14c] sm:$0x1]  ;;  %v18541_v4 = vld [vmem:[#allocation2 + $0x150] sm:$0xf] }
 0x2db   :  { %v18456_v42 = vpop.f32.mrf.mxu0 }
 0x2dc   :  { %21397 = vst [vmem:[#allocation254_spill] sm:$0xff] %v18456_v42 }
 0x2dd   :  { %13632 = vmatmul.mubr.msk.bf16.vlgmr.msra.gmra.mxu1 %vm1312_vm8, %v12267_v11  ;;  %v18475_v39 = vpop.f32.mrf.mxu0  ;;  %v8919_v11 = vrot.slane %v18260_v20, 5 }
 0x2de   :  { %13666 = vmatpush3.bf16.msra.mxu1 %v9548_v34  ;;  %13635 = vmatprep.mubr.msk.bf16.mxu1 %vm1312_vm8, %v12268_v52  ;;  %21399 = vst [vmem:[#allocation256_spill] sm:$0xff] %v18475_v39  ;;  %v12263_v52 = vrot.slane %v18316_v47, 9 }
 0x2df   :  { %13788 = vmatprep.subr.msk.bf16.mxu1 %vm1337_vm0, %v18454_v0  ;;  %13622 = vmatmul.mubr.msk.bf16.gmra.mxu0 %vm1312_vm8, %v12246_v27  ;;  %v18489_v48 = vpop.f32.mrf.mxu0  ;;  %v8920_v22 = vsel %vm14417_vm15, %v8918_v63, %v8919_v11  ;;  %v12248_v11 = vcombine.low %v18353_v3, %v18358_v28  ;;  %v9310_v3 = vshll.u32 %v18515_v12, 16 }
 0x2e0   :  { %v18478_v57 = vpop.f32.mrf.mxu1  ;;  %21402 = vst [vmem:[#allocation259_spill] sm:$0xff] %v18489_v48  ;;  %v8924_v34 = vsel %vm14417_vm15, %v12263_v52, %v8923_v45  ;;  %v12271_v14 = vcombine.low %v8917_v40, %v8920_v22  ;;  %v8934_v52 = vsel %vm14417_vm15, %v8932_v17, %v8933_v32  ;;  %v9326_v32 = vshll.u32 %v18539_v29, 16 }
 0x2e1   :  { %21400 = vst [vmem:[#allocation257_spill] sm:$0xff] %v18478_v57  ;;  %v18505_v33 = vpop.f32.mrf.mxu0  ;;  %v12272_v60 = vcombine.low %v8924_v34, %v8927_v43  ;;  %v9312_v22 = vrot.slane %v9310_v3, 5  ;;  %v12273_v43 = vcombine.low %v8931_v35, %v8934_v52  ;;  %v9334_v52 = vshll.u32 %v18541_v4, 16  ;;  %v18694_v57 = vld [vmem:[#allocation2 + $0x190] sm:$0xf] }
 0x2e2   :  { %v18485_v9 = vpop.f32.mrf.mxu1  ;;  %21405 = vst [vmem:[#allocation262_spill] sm:$0xff] %v18505_v33  ;;  %v9460_v51 = vshll.u32 %v18694_v57, 16 }
 0x2e3   :  { %21401 = vst [vmem:[#allocation258_spill] sm:$0xff] %v18485_v9  ;;  %v18524_v27 = vpop.f32.mrf.mxu0 }
 0x2e4   :  { %v18493_v20 = vpop.f32.mrf.mxu1  ;;  %21408 = vst [vmem:[#allocation265_spill] sm:$0xff] %v18524_v27 }
 0x2e5   :  { %13636 = vmatmul.mubr.msk.bf16.gmra.mxu1 %vm1312_vm8, %v12269_v7  ;;  %21403 = vst [vmem:[#allocation260_spill] sm:$0xff] %v18493_v20  ;;  %v12247_v7 = vcombine.low %v18316_v47, %v18327_v26  ;;  %v9307_v47 = vshrl.u32 %v18515_v12, 16 }
 0x2e6   :  { %13639 = vmatprep.mubr.msk.bf16.mxu1 %vm1312_vm8, %v12270_v37  ;;  %v18503_v53 = vpop.f32.mrf.mxu1  ;;  %v18517_v37 = vld [vmem:[#allocation2 + $0x148] sm:$0xf] }
 0x2e7   :  { %21404 = vst [vmem:[#allocation261_spill] sm:$0xff] %v18503_v53  ;;  %13625 = vmatprep.mubr.msk.bf16.mxu0 %vm1312_vm8, %v12247_v7  ;;  %v9316_v28 = vshll.u32 %v18517_v37, 16  ;;  %v9320_v45 = vshrl.u32 %v18517_v37, 16  ;;  %v9309_v40 = vrot.slane %v9307_v47, 4  ;;  %v18548_v7 = vld [vmem:[#allocation2 + $0x154] sm:$0xf] }
 0x2e8   :  { %v18510_v19 = vpop.f32.mrf.mxu1  ;;  %13626 = vmatmul.mubr.msk.bf16.gmra.mxu0 %vm1312_vm8, %v12248_v11  ;;  %v9331_v11 = vshrl.u32 %v18541_v4, 16  ;;  %v9340_v16 = vshll.u32 %v18548_v7, 16  ;;  %v9680_v31 = vrot.slane %v18548_v7, 5 }
 0x2e9   :  { %21406 = vst [vmem:[#allocation263_spill] sm:$0xff] %v18510_v19  ;;  %v9318_v10 = vrot.slane %v9316_v28, 5  ;;  %v9322_v34 = vrot.slane %v9320_v45, 4  ;;  %v9328_v28 = vrot.slane %v9326_v32, 5  ;;  %v18554_v45 = vld [vmem:[#allocation2 + $0x158] sm:$0x1] }
 0x2ea   :  { %v18519_v63 = vpop.f32.mrf.mxu1  ;;  %v9333_v35 = vrot.slane %v9331_v11, 4  ;;  %v9344_v32 = vshrl.u32 %v18548_v7, 16  ;;  %v9342_v25 = vrot.slane %v9340_v16, 5  ;;  %v9350_v11 = vshll.u32 %v18554_v45, 16 }
 0x2eb   :  { %21407 = vst [vmem:[#allocation264_spill] sm:$0xff] %v18519_v63  ;;  %v9323_v17 = vor.u32 %v9322_v34, %v9318_v10  ;;  %v9777_v16 = vsel %vm1337_vm0, %v18399_v6, 0 }
 0x2ec   :  { %v18530_v26 = vpop.f32.mrf.mxu1  ;;  %v9346_v30 = vrot.slane %v9344_v32, 4 }
 0x2ed   :  { %13640 = vmatmul.mubr.msk.bf16.gmra.mxu1 %vm1312_vm8, %v12271_v14  ;;  %21409 = vst [vmem:[#allocation266_spill] sm:$0xff] %v18530_v26  ;;  %v18543_v14 = vpop.f32.mrf.mxu0  ;;  %v9324_v3 = vrot.slane %v9323_v17, 4  ;;  %v9336_v17 = vrot.slane %v9334_v52, 5  ;;  %v12284_v52 = vcombine.low %v18541_v4, %v18548_v7  ;;  %v9683_v7 = vrot.slane %v18554_v45, 5 }
 0x2ee   :  { %13643 = vmatprep.mubr.msk.bf16.mxu1 %vm1312_vm8, %v12272_v60  ;;  %21410 = vst [vmem:[#allocation267_spill] sm:$0xff] %v18543_v14  ;;  %v18545_v13 = vpop.f32.mrf.mxu1  ;;  %v9313_v60 = vor.u32 %v9312_v22, %v9309_v40 }
 0x2ef   :  { %21411 = vst [vmem:[#allocation268_spill] sm:$0xff] %v18545_v13  ;;  %v18551_v62 = vpop.f32.mrf.mxu0  ;;  %v9329_v34 = vsel %vm14369_vm14, %v9324_v3, %v9328_v28  ;;  %v18573_v3 = vld [vmem:[#allocation2 + $0x160] sm:$0xf]  ;;  %v18646_v13 = vld [vmem:[#allocation2 + $0x178] sm:$0xf] }
 0x2f0   :  { %21412 = vst [vmem:[#allocation269_spill] sm:$0xff] %v18551_v62  ;;  %v9314_v47 = vrot.slane %v9313_v60, 4  ;;  %v18557_v40 = vpop.f32.mrf.mxu1 }
 0x2f1   :  { %21413 = vst [vmem:[#allocation270_spill] sm:$0xff] %v18557_v40  ;;  %v9337_v40 = vor.u32 %v9336_v17, %v9333_v35  ;;  %v9347_v35 = vor.u32 %v9346_v30, %v9342_v25  ;;  %v18587_v17 = vld [vmem:[%s20896_s1 + $0xe] sm:$0x3] }
 0x2f2   :  { %v9319_v22 = vsel %vm14369_vm14, %v9314_v47, %v9318_v10  ;;  %v12283_v10 = vcombine.low %v18515_v12, %v18517_v37  ;;  %v18571_v47 = vld [vmem:[#allocation2 + $0x15c] sm:$0xf]  ;;  %v18575_v28 = vpop.f32.mrf.mxu1 }
 0x2f3   :  { %v12300_v60 = vcombine.low %v9319_v22, %v9329_v34  ;;  %21415 = vst [vmem:[#allocation272_spill] sm:$0xff] %v18575_v28  ;;  %v18581_v22 = vld [vmem:[#allocation2 + $0x164] sm:$0x1]  ;;  %v9338_v34 = vrot.slane %v9337_v40, 4  ;;  %v9355_v46 = vshrl.u32 %v18571_v47, 16  ;;  %v9358_v6 = vshll.u32 %v18571_v47, 16 }
 0x2f4   :  { %13649 = vmatprep.mubr.msk.bf16.mxu0 %vm1312_vm8, %v12283_v10  ;;  %v9364_v28 = vshll.u32 %v18573_v3, 16  ;;  %v9348_v40 = vrot.slane %v9347_v35, 4  ;;  %v9374_v10 = vshll.u32 %v18581_v22, 16  ;;  %v18599_v36 = vpop.f32.mrf.mxu1 }
 0x2f5   :  { %13644 = vmatmul.mubr.msk.bf16.gmra.mxu1 %vm1312_vm8, %v12273_v43  ;;  %v18565_v43 = vpop.f32.mrf.mxu0  ;;  %13650 = vmatmul.mubr.msk.bf16.vlgmr.msra.gmra.mxu0 %vm1312_vm8, %v12284_v52  ;;  %v9343_v30 = vsel %vm14369_vm14, %v9338_v34, %v9342_v25  ;;  %21417 = vst [vmem:[#allocation274_spill] sm:$0xff] %v18599_v36  ;;  %v9357_v26 = vrot.slane %v9355_v46, 4  ;;  %v9360_v23 = vrot.slane %v9358_v6, 5  ;;  %v18601_v52 = vld [vmem:[#allocation2 + $0x168] sm:$0xf]  ;;  %v9983_v36 = vsel %vm1337_vm0, %v18454_v0, 0 }
 0x2f6   :  { %21414 = vst [vmem:[#allocation271_spill] sm:$0xff] %v18565_v43  ;;  %13667 = vmatprep.mubr.msk.bf16.mxu1 %vm1312_vm8, %v12300_v60  ;;  %v9352_v60 = vrot.slane %v9350_v11, 5  ;;  %13684 = vmatpush3.bf16.msra.mxu0 %v9777_v16  ;;  %v9368_v11 = vshrl.u32 %v18573_v3, 16  ;;  %v9366_v43 = vrot.slane %v9364_v28, 5  ;;  %v18607_v34 = vld [vmem:[#allocation2 + $0x16c] sm:$0xf] }
 0x2f7   :  { %v18589_v32 = vpop.f32.mrf.mxu0  ;;  %13789 = vmatprep.subr.msk.bf16.mxu0 %vm1337_vm0, %v18587_v17  ;;  %v9361_v46 = vor.u32 %v9360_v23, %v9357_v26  ;;  %v9376_v1 = vrot.slane %v9374_v10, 5  ;;  %v9379_v54 = vshrl.u32 %v18601_v52, 16  ;;  %v9382_v63 = vshll.u32 %v18601_v52, 16  ;;  %v18618_v28 = vld [vmem:[%s20896_s1 + $0x10] sm:$0x3] }
 0x2f8   :  { %21416 = vst [vmem:[#allocation273_spill] sm:$0xff] %v18589_v32  ;;  %v9353_v19 = vsel %vm14369_vm14, %v9348_v40, %v9352_v60  ;;  %v9370_v25 = vrot.slane %v9368_v11, 4  ;;  %v18622_v40 = vpop.f32.mrf.mxu1  ;;  %v18625_v0 = vld [vmem:[#allocation2 + $0x170] sm:$0x1]  ;;  %v9388_v23 = vshll.u32 %v18607_v34, 16  ;;  %v9392_v10 = vshrl.u32 %v18607_v34, 16 }
 0x2f9   :  { %v12301_v35 = vcombine.low %v9343_v30, %v9353_v19  ;;  %21420 = vst [vmem:[#allocation277_spill] sm:$0xff] %v18622_v40  ;;  %v9362_v19 = vrot.slane %v9361_v46, 4  ;;  %v9381_v30 = vrot.slane %v9379_v54, 4  ;;  %v9384_v11 = vrot.slane %v9382_v63, 5  ;;  %v18674_v32 = vld [vmem:[#allocation2 + $0x188] sm:$0x1] }
 0x2fa   :  { %v18609_v16 = vpop.f32.mrf.mxu0  ;;  %v9371_v6 = vor.u32 %v9370_v25, %v9366_v43  ;;  %v9394_v40 = vrot.slane %v9392_v10, 4  ;;  %v18638_v54 = vpop.f32.mrf.mxu1  ;;  %v9446_v20 = vshll.u32 %v18674_v32, 16 }
 0x2fb   :  { %21418 = vst [vmem:[#allocation275_spill] sm:$0xff] %v18609_v16  ;;  %v9367_v16 = vsel %vm14369_vm14, %v9362_v19, %v9366_v43  ;;  %v9385_v46 = vor.u32 %v9384_v11, %v9381_v30  ;;  %21422 = vst [vmem:[#allocation279_spill] sm:$0xff] %v18638_v54 }
 0x2fc   :  { %v18620_v60 = vpop.f32.mrf.mxu0  ;;  %v9372_v26 = vrot.slane %v9371_v6, 4  ;;  %v18640_v6 = vld [vmem:[#allocation2 + $0x174] sm:$0xf]  ;;  %v18657_v11 = vpop.f32.mrf.mxu1 }
 0x2fd   :  { %21419 = vst [vmem:[#allocation276_spill] sm:$0xff] %v18620_v60  ;;  %13668 = vmatmul.mubr.msk.bf16.vlgmr.msra.gmra.mxu1 %vm1312_vm8, %v12301_v35  ;;  %v9390_v60 = vrot.slane %v9388_v23, 5  ;;  %v9386_v14 = vrot.slane %v9385_v46, 4  ;;  %v12285_v23 = vcombine.low %v18571_v47, %v18573_v3  ;;  %21424 = vst [vmem:[#allocation281_spill] sm:$0xff] %v18657_v11  ;;  %v9406_v10 = vshll.u32 %v18640_v6, 16 }
 0x2fe   :  { %13702 = vmatpush3.bf16.msra.mxu1 %v9983_v36  ;;  %v18629_v25 = vpop.f32.mrf.mxu0  ;;  %v9377_v35 = vsel %vm14369_vm14, %v9372_v26, %v9376_v1  ;;  %v9398_v36 = vshll.u32 %v18625_v0, 16  ;;  %v12286_v1 = vcombine.low %v18601_v52, %v18607_v34  ;;  %v18651_v26 = vld [vmem:[#allocation2 + $0x17c] sm:$0x1]  ;;  %v18670_v11 = vld [vmem:[#allocation2 + $0x184] sm:$0xf] }
 0x2ff   :  { %21421 = vst [vmem:[#allocation278_spill] sm:$0xff] %v18629_v25  ;;  %13790 = vmatprep.subr.msk.bf16.mxu1 %vm1337_vm0, %v18618_v28  ;;  %v12302_v63 = vcombine.low %v9367_v16, %v9377_v35  ;;  %v9395_v43 = vor.u32 %v9394_v40, %v9390_v60  ;;  %v9391_v16 = vsel %vm14369_vm14, %v9386_v14, %v9390_v60  ;;  %v9403_v40 = vshrl.u32 %v18640_v6, 16 }
 0x300   :  { %v18642_v25 = vpop.f32.mrf.mxu0  ;;  %v9400_v19 = vrot.slane %v9398_v36, 5  ;;  %13653 = vmatprep.mubr.msk.bf16.mxu0 %vm1312_vm8, %v12285_v23  ;;  %v9412_v35 = vshll.u32 %v18646_v13, 16  ;;  %v9416_v14 = vshrl.u32 %v18646_v13, 16  ;;  %v9422_v60 = vshll.u32 %v18651_v26, 16 }
 0x301   :  { %21423 = vst [vmem:[#allocation280_spill] sm:$0xff] %v18642_v25  ;;  %13671 = vmatprep.mubr.msk.bf16.mxu1 %vm1312_vm8, %v12302_v63  ;;  %v9396_v30 = vrot.slane %v9395_v43, 4  ;;  %13654 = vmatmul.mubr.msk.bf16.gmra.mxu0 %vm1312_vm8, %v12286_v1  ;;  %v9405_v63 = vrot.slane %v9403_v40, 4  ;;  %v18668_v43 = vld [vmem:[#allocation2 + $0x180] sm:$0xf]  ;;  %v9408_v54 = vrot.slane %v9406_v10, 5 }
 0x302   :  { %v9414_v25 = vrot.slane %v9412_v35, 5  ;;  %v9418_v62 = vrot.slane %v9416_v14, 4  ;;  %v9427_v40 = vshrl.u32 %v18668_v43, 16  ;;  %v9430_v10 = vshll.u32 %v18668_v43, 16 }
 0x303   :  { %v9401_v36 = vsel %vm14369_vm14, %v9396_v30, %v9400_v19  ;;  %v9409_v19 = vor.u32 %v9408_v54, %v9405_v63  ;;  %v9424_v30 = vrot.slane %v9422_v60, 5  ;;  %v9440_v35 = vshrl.u32 %v18670_v11, 16  ;;  %v18686_v63 = vld [vmem:[#allocation2 + $0x18c] sm:$0xf] }
 0x304   :  { %v12303_v23 = vcombine.low %v9391_v16, %v9401_v36  ;;  %v9419_v16 = vor.u32 %v9418_v62, %v9414_v25  ;;  %v9436_v36 = vshll.u32 %v18670_v11, 16  ;;  %v9432_v9 = vrot.slane %v9430_v10, 5 }
 0x305   :  { %v18662_v46 = vpop.f32.mrf.mxu0  ;;  %v9410_v14 = vrot.slane %v9409_v19, 4  ;;  %v9442_v54 = vrot.slane %v9440_v35, 4  ;;  %v18700_v35 = vld [vmem:[#allocation2 + $0x194] sm:$0x1] }
 0x306   :  { %21425 = vst [vmem:[#allocation282_spill] sm:$0xff] %v18662_v46  ;;  %v18676_v46 = vpop.f32.mrf.mxu1  ;;  %13672 = vmatmul.mubr.msk.bf16.gmra.mxu1 %vm1312_vm8, %v12303_v23  ;;  %v9438_v23 = vrot.slane %v9436_v36, 5  ;;  %v9448_v36 = vrot.slane %v9446_v20, 5 }
 0x307   :  { %v18672_v1 = vpop.f32.mrf.mxu0  ;;  %21427 = vst [vmem:[#allocation284_spill] sm:$0xff] %v18676_v46  ;;  %v9420_v46 = vrot.slane %v9419_v16, 4  ;;  %v9415_v62 = vsel %vm14369_vm14, %v9410_v14, %v9414_v25  ;;  %v12288_v25 = vcombine.low %v18668_v43, %v18670_v11  ;;  %v9451_v14 = vshrl.u32 %v18686_v63, 16 }
 0x308   :  { %21426 = vst [vmem:[#allocation283_spill] sm:$0xff] %v18672_v1  ;;  %v9429_v1 = vrot.slane %v9427_v40, 4  ;;  %v18688_v60 = vpop.f32.mrf.mxu1  ;;  %v9443_v10 = vor.u32 %v9442_v54, %v9438_v23 }
 0x309   :  { %v18680_v53 = vpop.f32.mrf.mxu0  ;;  %21429 = vst [vmem:[#allocation286_spill] sm:$0xff] %v18688_v60  ;;  %v9425_v40 = vsel %vm14369_vm14, %v9420_v46, %v9424_v30  ;;  %v9464_v46 = vshrl.u32 %v18694_v57, 16  ;;  %v192_v30 = vld [vmem:[%s20895_s0 + $0xfc] sm:$0xf] }
 0x30a   :  { %21428 = vst [vmem:[#allocation285_spill] sm:$0xff] %v18680_v53  ;;  %v12287_v53 = vcombine.low %v18640_v6, %v18646_v13  ;;  %v9433_v16 = vor.u32 %v9432_v9, %v9429_v1  ;;  %v12304_v27 = vcombine.low %v9415_v62, %v9425_v40  ;;  %v9444_v18 = vrot.slane %v9443_v10, 4  ;;  %v191_v9 = vld [vmem:[%s20895_s0 + $0xf8] sm:$0xf] }
 0x30b   :  { %v18696_v19 = vpop.f32.mrf.mxu0  ;;  %v9470_v1 = vshll.u32 %v18700_v35, 16  ;;  %v727_v2 = vshll.u32 %v191_v9, 16  ;;  %v732_v48 = vshrl.u32 %v192_v30, 16  ;;  %v735_v39 = vshll.u32 %v192_v30, 16 }
 0x30c   :  { %21430 = vst [vmem:[#allocation287_spill] sm:$0xff] %v18696_v19  ;;  %13657 = vmatprep.mubr.msk.bf16.mxu0 %vm1312_vm8, %v12287_v53  ;;  %v9434_v60 = vrot.slane %v9433_v16, 4  ;;  %v9454_v19 = vshll.u32 %v18686_v63, 16  ;;  %13675 = vmatprep.mubr.msk.bf16.mxu1 %vm1312_vm8, %v12304_v27  ;;  %v9453_v53 = vrot.slane %v9451_v14, 4  ;;  %v9449_v40 = vsel %vm14369_vm14, %v9444_v18, %v9448_v36 }
 0x30d   :  { %13658 = vmatmul.mubr.msk.bf16.gmra.mxu0 %vm1312_vm8, %v12288_v25  ;;  %v9462_v16 = vrot.slane %v9460_v51, 5  ;;  %v9466_v25 = vrot.slane %v9464_v46, 4  ;;  %v724_v14 = vshrl.u32 %v191_v9, 16  ;;  %v12289_v18 = vcombine.low %v18686_v63, %v18694_v57  ;;  %v1059_v46 = vld [vmem:[#allocation2 + $0x198] sm:$0xf] }
 0x30e   :  { %v9439_v62 = vsel %vm14369_vm14, %v9434_v60, %v9438_v23  ;;  %v9456_v27 = vrot.slane %v9454_v19, 5  ;;  %v9472_v23 = vrot.slane %v9470_v1, 5  ;;  %v734_v36 = vrot.slane %v732_v48, 7 }
 0x30f   :  { %v18711_v20 = vpop.f32.mrf.mxu1  ;;  %v12305_v10 = vcombine.low %v9439_v62, %v9449_v40  ;;  %v726_v60 = vrot.slane %v724_v14, 7  ;;  %v1063_v40 = vld [vmem:[#allocation2 + $0x1a0] sm:$0x1]  ;;  %13661 = vmatprep.mubr.msk.bf16.mxu0 %vm1312_vm8, %v12289_v18 }
 0x310   :  { %21431 = vst [vmem:[#allocation288_spill] sm:$0xff] %v18711_v20  ;;  %v9457_v33 = vor.u32 %v9456_v27, %v9453_v53  ;;  %v737_v27 = vor.u32 %v735_v39, %v734_v36 }
 0x311   :  { %v18720_v54 = vpop.f32.mrf.mxu0  ;;  %v18728_v42 = vpop.f32.mrf.mxu1  ;;  %13676 = vmatmul.mubr.msk.bf16.gmra.mxu1 %vm1312_vm8, %v12305_v10  ;;  %v729_v53 = vor.u32 %v727_v2, %v726_v60  ;;  %v730_v9 = vrot.slane %v726_v60, 4  ;;  %v739_v10 = vrot.slane %v734_v36, 4  ;;  %v9676_v60 = vrot.slane %v18539_v29, 5 }
 0x312   :  { %21432 = vst [vmem:[#allocation289_spill] sm:$0xff] %v18720_v54  ;;  %v9467_v54 = vor.u32 %v9466_v25, %v9462_v16  ;;  %v9458_v19 = vrot.slane %v9457_v33, 4  ;;  %v12317_v29 = vrot.slane %v18541_v4, 9 }
 0x313   :  { %v18726_v20 = vpop.f32.mrf.mxu0  ;;  %v18740_v25 = vpop.f32.mrf.mxu1  ;;  %v1060_v48 = vsel %vm14321_vm10, %v729_v53, %v1059_v46  ;;  %v738_v14 = vsel %vm14298_vm9, %v730_v9, %v737_v27  ;;  %v9682_v53 = vrot.slane %v9680_v31, 4 }
 0x314   :  { %v9468_v62 = vrot.slane %v9467_v54, 4  ;;  %v9463_v1 = vsel %vm14369_vm14, %v9458_v19, %v9462_v16  ;;  %1061 = vst [vmem:[#allocation2 + $0x198] sm:$0xf] %v1060_v48  ;;  %v1064_v16 = vsel %vm14339_vm11, %v739_v10, %v1063_v40  ;;  %1062 = vst.msk [vmem:[#allocation2 + $0x19c] sm:$0xf] %vm19_vm1, %v738_v14 }
 0x315   :  { %v18733_v51 = vpop.f32.mrf.mxu0  ;;  %1065 = vst [vmem:[#allocation2 + $0x1a0] sm:$0x1] %v1064_v16  ;;  %v18759_v18 = vpop.f32.mrf.mxu1 }
 0x316   :  { %v9473_v33 = vsel %vm14369_vm14, %v9468_v62, %v9472_v23  ;;  %v9673_v23 = vrot.slane %v18517_v37, 5 }
 0x317   :  { %v18736_v30 = vpop.f32.mrf.mxu0  ;;  %v12306_v54 = vcombine.low %v9463_v1, %v9473_v33 }
 0x318   :  { %v9675_v21 = vrot.slane %v9673_v23, 4  ;;  %v9674_v36 = vsel %vm14417_vm15, %v12316_v49, %v9673_v23 }
 0x319   :  { %v18746_v2 = vpop.f32.mrf.mxu0  ;;  %13679 = vmatprep.mubr.msk.bf16.mxu1 %vm1312_vm8, %v12306_v54 }
 0x31a   :  { %21433 = vst [vmem:[#allocation290_spill] sm:$0xff] %v18746_v2  ;;  %v9677_v62 = vsel %vm14417_vm15, %v9675_v21, %v9676_v60  ;;  %v9681_v21 = vsel %vm14417_vm15, %v12317_v29, %v9680_v31  ;;  %v18803_v31 = vld [vmem:[#allocation2 + $0x150] sm:$0xf]  ;;  %v18805_v29 = vld [vmem:[#allocation2 + $0x154] sm:$0xf] }
 0x31b   :  { %v18753_v39 = vpop.f32.mrf.mxu0  ;;  %v18770_v12 = vpop.f32.mrf.mxu1  ;;  %v18772_v37 = vld [vmem:[#allocation2 + $0x198] sm:$0xf]  ;;  %v18778_v40 = vld [vmem:[#allocation2 + $0x19c] sm:$0xf]  ;;  %v12325_v33 = vcombine.low %v9674_v36, %v9677_v62  ;;  %v9684_v36 = vsel %vm14417_vm15, %v9682_v53, %v9683_v7 }
 0x31c   :  { %21434 = vst [vmem:[#allocation291_spill] sm:$0xff] %v18753_v39  ;;  %21437 = vst [vmem:[#allocation294_spill] sm:$0xff] %v18770_v12  ;;  %v18780_v1 = vld [vmem:[#allocation2 + $0x1a0] sm:$0x1]  ;;  %v9475_v27 = vshrl.u32 %v18772_v37, 16  ;;  %v9478_v10 = vshll.u32 %v18772_v37, 16  ;;  %v12290_v45 = vcombine.low %v18772_v37, %v18778_v40 }
 0x31d   :  { %v18762_v19 = vpop.f32.mrf.mxu0  ;;  %v9484_v48 = vshll.u32 %v18778_v40, 16  ;;  %v9488_v54 = vshrl.u32 %v18778_v40, 16  ;;  %v9494_v4 = vshll.u32 %v18780_v1, 16  ;;  %v18789_v49 = vpop.f32.mrf.mxu1 }
 0x31e   :  { %21435 = vst [vmem:[#allocation292_spill] sm:$0xff] %v18762_v19  ;;  %v9477_v14 = vrot.slane %v9475_v27, 4  ;;  %v9480_v16 = vrot.slane %v9478_v10, 5  ;;  %21439 = vst [vmem:[#allocation296_spill] sm:$0xff] %v18789_v49  ;;  %13662 = vmatmul.mubr.msk.bf16.gmra.mxu0 %vm1312_vm8, %v12290_v45  ;;  %v12318_v27 = vrot.slane %v18571_v47, 9  ;;  %v9687_v10 = vrot.slane %v18573_v3, 5 }
 0x31f   :  { %v18766_v46 = vpop.f32.mrf.mxu0  ;;  %v9486_v23 = vrot.slane %v9484_v48, 5  ;;  %v9490_v60 = vrot.slane %v9488_v54, 4  ;;  %13685 = vmatprep.mubr.msk.bf16.mxu0 %vm1312_vm8, %v12325_v33  ;;  %v9690_v48 = vrot.slane %v18581_v22, 5  ;;  %v9496_v12 = vrot.slane %v9494_v4, 5  ;;  %v18809_v33 = vpop.f32.mrf.mxu1 }
 0x320   :  { %21436 = vst [vmem:[#allocation293_spill] sm:$0xff] %v18766_v46  ;;  %v9694_v45 = vrot.slane %v18607_v34, 5  ;;  %v9688_v53 = vsel %vm14417_vm15, %v12318_v27, %v9687_v10  ;;  %v9689_v7 = vrot.slane %v9687_v10, 4  ;;  %21441 = vst [vmem:[#allocation298_spill] sm:$0xff] %v18809_v33  ;;  %v12319_v3 = vrot.slane %v18601_v52, 9 }
 0x321   :  { %v18776_v9 = vpop.f32.mrf.mxu0  ;;  %v9491_v54 = vor.u32 %v9490_v60, %v9486_v23  ;;  %v12342_v27 = vcombine.low %v18803_v31, %v18805_v29  ;;  %v10340_v52 = vsel %vm1337_vm0, %v18587_v17, 0  ;;  %v18825_v10 = vpop.f32.mrf.mxu1  ;;  %v18941_v33 = vld [vmem:[#allocation2 + $0x19c] sm:$0xf]  ;;  %v9907_v46 = vld [vmem:[#allocation2 + $0x188] sm:$0x1] }
 0x322   :  { %21438 = vst [vmem:[#allocation295_spill] sm:$0xff] %v18776_v9  ;;  %v9481_v9 = vor.u32 %v9480_v16, %v9477_v14  ;;  %v12326_v14 = vcombine.low %v9681_v21, %v9684_v36  ;;  %v9696_v4 = vrot.slane %v9694_v45, 4  ;;  %v9697_v16 = vrot.slane %v18625_v0, 5  ;;  %21443 = vst [vmem:[#allocation300_spill] sm:$0xff] %v18825_v10 }
 0x323   :  { %v18796_v62 = vpop.f32.mrf.mxu0  ;;  %v9492_v47 = vrot.slane %v9491_v54, 4  ;;  %v9695_v0 = vsel %vm14417_vm15, %v12319_v3, %v9694_v45  ;;  %v9701_v54 = vrot.slane %v18646_v13, 5  ;;  %v9708_v45 = vrot.slane %v18670_v11, 5 }
 0x324   :  { %21440 = vst [vmem:[#allocation297_spill] sm:$0xff] %v18796_v62  ;;  %v9482_v19 = vrot.slane %v9481_v9, 4  ;;  %v9691_v9 = vsel %vm14417_vm15, %v9689_v7, %v9690_v48  ;;  %v9698_v17 = vsel %vm14417_vm15, %v9696_v4, %v9697_v16  ;;  %v12320_v48 = vrot.slane %v18640_v6, 9  ;;  %v18845_v7 = vld [vmem:[#allocation2 + $0x168] sm:$0xf] }
 0x325   :  { %v18812_v22 = vpop.f32.mrf.mxu0  ;;  %v9497_v60 = vsel %vm14369_vm14, %v9492_v47, %v9496_v12  ;;  %v12327_v21 = vcombine.low %v9688_v53, %v9691_v9  ;;  %v18835_v12 = vld [vmem:[#allocation2 + $0x160] sm:$0xf]  ;;  %v9704_v53 = vrot.slane %v18651_v26, 5  ;;  %v18847_v47 = vld [vmem:[#allocation2 + $0x16c] sm:$0xf]  ;;  %v9703_v3 = vrot.slane %v9701_v54, 4 }
 0x326   :  { %21442 = vst [vmem:[#allocation299_spill] sm:$0xff] %v18812_v22  ;;  %v9487_v34 = vsel %vm14369_vm14, %v9482_v19, %v9486_v23  ;;  %v18827_v19 = vld [vmem:[#allocation2 + $0x15c] sm:$0xf]  ;;  %13686 = vmatmul.mubr.msk.bf16.vlgmr.msra.gmra.mxu0 %vm1312_vm8, %v12326_v14  ;;  %v9702_v14 = vsel %vm14417_vm15, %v12320_v48, %v9701_v54  ;;  %v12328_v6 = vcombine.low %v9695_v0, %v9698_v17  ;;  %v12321_v11 = vrot.slane %v18668_v43, 9 }
 0x327   :  { %v12307_v36 = vcombine.low %v9487_v34, %v9497_v60  ;;  %v18832_v23 = vpop.f32.mrf.mxu0  ;;  %13720 = vmatpush3.bf16.msra.mxu0 %v10340_v52  ;;  %13689 = vmatprep.mubr.msk.bf16.mxu0 %vm1312_vm8, %v12327_v21  ;;  %v18851_v34 = vpop.f32.mrf.mxu1  ;;  %v12343_v13 = vcombine.low %v18827_v19, %v18835_v12  ;;  %v9705_v9 = vsel %vm14417_vm15, %v9703_v3, %v9704_v53  ;;  %v9710_v4 = vrot.slane %v9708_v45, 4 }
 0x328   :  { %21444 = vst [vmem:[#allocation301_spill] sm:$0xff] %v18832_v23  ;;  %21445 = vst [vmem:[#allocation302_spill] sm:$0xff] %v18851_v34  ;;  %v9711_v16 = vrot.slane %v18674_v32, 5  ;;  %v12344_v60 = vcombine.low %v18845_v7, %v18847_v47  ;;  %v10099_v52 = vshrl.u32 %v18803_v31, 16  ;;  %v10569_v21 = vsel %vm1337_vm0, %v18618_v28, 0 }
 0x329   :  { %13680 = vmatmul.mubr.msk.bf16.gmra.mxu1 %vm1312_vm8, %v12307_v36  ;;  %v18866_v36 = vld [vmem:[#allocation2 + $0x174] sm:$0xf]  ;;  %v12322_v0 = vrot.slane %v18686_v63, 9  ;;  %v18869_v17 = vpop.f32.mrf.mxu1  ;;  %v10102_v43 = vshll.u32 %v18803_v31, 16  ;;  %v10112_v48 = vshrl.u32 %v18805_v29, 16  ;;  %v9715_v54 = vrot.slane %v18694_v57, 5 }
 0x32a   :  { %13703 = vmatprep.mubr.msk.bf16.mxu1 %vm1312_vm8, %v12342_v27  ;;  %v18855_v26 = vpop.f32.mrf.mxu0  ;;  %v12329_v27 = vcombine.low %v9702_v14, %v9705_v9  ;;  %21447 = vst [vmem:[#allocation304_spill] sm:$0xff] %v18869_v17  ;;  %v18873_v32 = vld [vmem:[#allocation2 + $0x178] sm:$0xf]  ;;  %v9718_v53 = vrot.slane %v18700_v35, 5  ;;  %v10123_v28 = vshrl.u32 %v18827_v19, 16  ;;  %v9709_v63 = vsel %vm14417_vm15, %v12321_v11, %v9708_v45 }
 0x32b   :  { %21446 = vst [vmem:[#allocation303_spill] sm:$0xff] %v18855_v26  ;;  %v9712_v3 = vsel %vm14417_vm15, %v9710_v4, %v9711_v16  ;;  %v10126_v57 = vshll.u32 %v18827_v19, 16  ;;  %v10136_v35 = vshrl.u32 %v18835_v12, 16  ;;  %v9716_v9 = vsel %vm14417_vm15, %v12322_v0, %v9715_v54  ;;  %v18900_v16 = vld [vmem:[#allocation2 + $0x184] sm:$0xf] }
 0x32c   :  { %v18878_v14 = vpop.f32.mrf.mxu0  ;;  %v12330_v26 = vcombine.low %v9709_v63, %v9712_v3  ;;  %v9725_v34 = vrot.slane %v18780_v1, 5  ;;  %v10108_v11 = vshll.u32 %v18805_v29, 16  ;;  %v10465_v63 = vrot.slane %v18805_v29, 5  ;;  %v18938_v29 = vld [vmem:[#allocation2 + $0x198] sm:$0xf] }
 0x32d   :  { %21448 = vst [vmem:[#allocation305_spill] sm:$0xff] %v18878_v14  ;;  %v10114_v22 = vrot.slane %v10112_v48, 4  ;;  %v10128_v23 = vrot.slane %v10126_v57, 5  ;;  %v10138_v49 = vrot.slane %v10136_v35, 4  ;;  %v12348_v35 = vcombine.low %v18938_v29, %v18941_v33 }
 0x32e   :  { %13690 = vmatmul.mubr.msk.bf16.gmra.mxu0 %vm1312_vm8, %v12328_v6  ;;  %v9722_v6 = vrot.slane %v18778_v40, 5  ;;  %v12345_v40 = vcombine.low %v18866_v36, %v18873_v32  ;;  %v18908_v45 = vpop.f32.mrf.mxu0  ;;  %v21457_v2 = vshll.u32 %v18866_v36, 16  ;;  %v10180_v39 = vshll.u32 %v18873_v32, 16 }
 0x32f   :  { %13693 = vmatprep.mubr.msk.bf16.mxu0 %vm1312_vm8, %v12329_v27  ;;  %v9717_v27 = vrot.slane %v9715_v54, 4  ;;  %v12323_v54 = vrot.slane %v18772_v37, 9  ;;  %v12375_v37 = vrot.slane %v18803_v31, 9  ;;  %v18930_v31 = vld [vmem:[#allocation2 + $0x190] sm:$0xf] }
 0x330   :  { %v9724_v14 = vrot.slane %v9722_v6, 4  ;;  %v18927_v17 = vpop.f32.mrf.mxu0 }
 0x331   :  { %13704 = vmatmul.mubr.msk.bf16.vlgmr.msra.gmra.mxu1 %vm1312_vm8, %v12343_v13  ;;  %v18891_v13 = vld [vmem:[#allocation2 + $0x180] sm:$0xf]  ;;  %v9719_v0 = vsel %vm14417_vm15, %v9717_v27, %v9718_v53  ;;  %v9895_v53 = vld [vmem:[#allocation2 + $0x158] sm:$0x1]  ;;  %v10101_v27 = vrot.slane %v10099_v52, 4  ;;  %v9723_v1 = vsel %vm14417_vm15, %v12323_v54, %v9722_v6  ;;  %v10125_v6 = vrot.slane %v10123_v28, 4 }
 0x332   :  { %13738 = vmatpush3.bf16.msra.mxu1 %v10569_v21  ;;  %13707 = vmatprep.mubr.msk.bf16.mxu1 %vm1312_vm8, %v12344_v60  ;;  %v18902_v21 = vpop.f32.mrf.mxu1  ;;  %v12331_v4 = vcombine.low %v9716_v9, %v9719_v0  ;;  %v10104_v60 = vrot.slane %v10102_v43, 5  ;;  %v18921_v0 = vld [vmem:[#allocation2 + $0x18c] sm:$0xf]  ;;  %v10118_v3 = vshll.u32 %v9895_v53, 16  ;;  %v9726_v52 = vsel %vm14417_vm15, %v9724_v14, %v9725_v34  ;;  %v18935_v43 = vld [vmem:[#allocation2 + $0x164] sm:$0x1] }
 0x333   :  { %21449 = vst [vmem:[#allocation306_spill] sm:$0xff] %v18902_v21  ;;  %v12346_v21 = vcombine.low %v18891_v13, %v18900_v16  ;;  %v10468_v48 = vrot.slane %v9895_v53, 5  ;;  %v10142_v34 = vshll.u32 %v18935_v43, 16  ;;  %v10467_v28 = vrot.slane %v10465_v63, 4 }
 0x334   :  { %v18919_v9 = vpop.f32.mrf.mxu1  ;;  %v10120_v54 = vrot.slane %v10118_v3, 5  ;;  %v12347_v57 = vcombine.low %v18921_v0, %v18930_v31  ;;  %v10472_v3 = vrot.slane %v18835_v12, 5 }
 0x335   :  { %21450 = vst [vmem:[#allocation307_spill] sm:$0xff] %v18919_v9  ;;  %v10110_v9 = vrot.slane %v10108_v11, 5  ;;  %v12332_v11 = vcombine.low %v9723_v1, %v9726_v52 }
 0x336   :  { %13694 = vmatmul.mubr.msk.bf16.gmra.mxu0 %vm1312_vm8, %v12330_v26  ;;  %v10105_v26 = vor.u32 %v10104_v60, %v10101_v27  ;;  %v18944_v14 = vpop.f32.mrf.mxu1  ;;  %v10129_v60 = vor.u32 %v10128_v23, %v10125_v6  ;;  %v10144_v23 = vrot.slane %v10142_v34, 5  ;;  %v10469_v34 = vsel %vm14417_vm15, %v10467_v28, %v10468_v48  ;;  %v9901_v48 = vld [vmem:[#allocation2 + $0x170] sm:$0x1] }
 0x337   :  { %13697 = vmatprep.mubr.msk.bf16.mxu0 %vm1312_vm8, %v12331_v4  ;;  %v10115_v62 = vor.u32 %v10114_v22, %v10110_v9  ;;  %21451 = vst [vmem:[#allocation308_spill] sm:$0xff] %v18944_v14  ;;  %v18959_v14 = vld [vmem:[#allocation2 + $0x1a8] sm:$0xf]  ;;  %v10474_v6 = vrot.slane %v10472_v3, 4  ;;  %v21453_v28 = vshrl.u32 %v18845_v7, 16 }
 0x338   :  { %v10106_v4 = vrot.slane %v10105_v26, 4  ;;  %v18955_v26 = vld [vmem:[#allocation2 + $0x1a4] sm:$0xf]  ;;  %v10130_v1 = vrot.slane %v10129_v60, 4 }
 0x339   :  { %13708 = vmatmul.mubr.msk.bf16.gmra.mxu1 %vm1312_vm8, %v12345_v40  ;;  %v10132_v40 = vshll.u32 %v18835_v12, 16  ;;  %v10116_v22 = vrot.slane %v10115_v62, 4  ;;  %v12376_v12 = vrot.slane %v18827_v19, 9  ;;  %v18964_v62 = vpop.f32.mrf.mxu1  ;;  %v21456_v19 = vshrl.u32 %v18866_v36, 16 }
 0x33a   :  { %13711 = vmatprep.mubr.msk.bf16.mxu1 %vm1312_vm8, %v12346_v21  ;;  %v10111_v53 = vsel %vm14369_vm14, %v10106_v4, %v10110_v9  ;;  %21452 = vst [vmem:[#allocation309_spill] sm:$0xff] %v18964_v62  ;;  %v9904_v62 = vld [vmem:[#allocation2 + $0x17c] sm:$0x1] }
 0x33b   :  { %v10134_v21 = vrot.slane %v10132_v40, 5  ;;  %v10121_v9 = vsel %vm14369_vm14, %v10116_v22, %v10120_v54  ;;  %v10475_v54 = vrot.slane %v18935_v43, 5 }
 0x33c   :  { %v12359_v60 = vcombine.low %v10111_v53, %v10121_v9  ;;  %v10479_v53 = vrot.slane %v18847_v47, 5 }
 0x33d   :  { %v10139_v52 = vor.u32 %v10138_v49, %v10134_v21  ;;  %v10466_v49 = vsel %vm14417_vm15, %v12375_v37, %v10465_v63  ;;  %v10135_v22 = vsel %vm14369_vm14, %v10130_v1, %v10134_v21  ;;  %v12349_v63 = vcombine.low %v18955_v26, %v18959_v14 }
 0x33e   :  { %13698 = vmatmul.mubr.msk.bf16.gmra.mxu0 %vm1312_vm8, %v12332_v11  ;;  %v12377_v11 = vrot.slane %v18845_v7, 9  ;;  %v12384_v43 = vcombine.low %v10466_v49, %v10469_v34  ;;  %v18989_v21 = vsel %vm14417_vm15, %v12376_v12, %v10472_v3  ;;  %v10166_v49 = vshll.u32 %v9901_v48, 16 }
 0x33f   :  { %v10140_v40 = vrot.slane %v10139_v52, 4  ;;  %13721 = vmatprep.mubr.msk.bf16.mxu0 %vm1312_vm8, %v12359_v60  ;;  %v18994_v52 = vpop.f32.mrf.mxu1  ;;  %v21455_v60 = vshrl.u32 %v18847_v47, 16  ;;  %v10476_v3 = vsel %vm14417_vm15, %v10474_v6, %v10475_v54  ;;  %v10482_v12 = vrot.slane %v9901_v48, 5 }
 0x340   :  { %v18946_v27 = vpop.f32.mrf.mxu0  ;;  %v21458_v6 = vshrl.u32 %v18873_v32, 16 }
 0x341   :  { %13712 = vmatmul.mubr.msk.bf16.gmra.mxu1 %vm1312_vm8, %v12347_v57  ;;  %v10145_v37 = vsel %vm14369_vm14, %v10140_v40, %v10144_v23  ;;  %v10149_v57 = vrot.slane %v21453_v28, 4  ;;  %v10156_v40 = vshll.u32 %v18847_v47, 16  ;;  %v10162_v28 = vrot.slane %v21455_v60, 4  ;;  %v19013_v48 = vpop.f32.mrf.mxu1 }
 0x342   :  { %v18966_v4 = vpop.f32.mrf.mxu0  ;;  %13715 = vmatprep.mubr.msk.bf16.mxu1 %vm1312_vm8, %v12348_v35  ;;  %v21454_v35 = vshll.u32 %v18845_v7, 16  ;;  %v12360_v23 = vcombine.low %v10135_v22, %v10145_v37  ;;  %v10173_v7 = vrot.slane %v21456_v19, 4  ;;  %v10486_v22 = vrot.slane %v18873_v32, 5  ;;  %21459 = vst [vmem:[#allocation310_spill] sm:$0xff] %v19013_v48 }
 0x343   :  { %v10158_v37 = vrot.slane %v10156_v40, 5  ;;  %v10176_v47 = vrot.slane %v21457_v2, 5  ;;  %v10481_v60 = vrot.slane %v10479_v53, 4  ;;  %v10186_v54 = vrot.slane %v21458_v6, 4 }
 0x344   :  { %v10152_v1 = vrot.slane %v21454_v35, 5  ;;  %v18996_v9 = vpop.f32.mrf.mxu0  ;;  %v10480_v35 = vsel %vm14417_vm15, %v12377_v11, %v10479_v53  ;;  %v10190_v40 = vshll.u32 %v9904_v62, 16  ;;  %v12378_v2 = vrot.slane %v18866_v36, 9 }
 0x345   :  { %v10163_v11 = vor.u32 %v10162_v28, %v10158_v37  ;;  %v10489_v53 = vrot.slane %v9904_v62, 5  ;;  %v10493_v32 = vrot.slane %v18900_v16, 5  ;;  %v10488_v6 = vrot.slane %v10486_v22, 4 }
 0x346   :  { %v10153_v34 = vor.u32 %v10152_v1, %v10149_v57  ;;  %v19015_v19 = vpop.f32.mrf.mxu0  ;;  %13722 = vmatmul.mubr.msk.bf16.vlgmr.msra.gmra.mxu0 %vm1312_vm8, %v12360_v23  ;;  %v10168_v57 = vrot.slane %v10166_v49, 5  ;;  %v10177_v1 = vor.u32 %v10176_v47, %v10173_v7  ;;  %v10483_v49 = vsel %vm14417_vm15, %v10481_v60, %v10482_v12 }
 0x347   :  { %21460 = vst [vmem:[#allocation311_spill] sm:$0xff] %v19015_v19  ;;  %v10164_v23 = vrot.slane %v10163_v11, 4  ;;  %v12379_v36 = vrot.slane %v18891_v13, 9  ;;  %v10232_v47 = vshrl.u32 %v18930_v31, 16  ;;  %v10495_v48 = vrot.slane %v10493_v32, 4 }
 0x348   :  { %v10154_v10 = vrot.slane %v10153_v34, 4  ;;  %v10182_v34 = vrot.slane %v10180_v39, 5  ;;  %v10178_v28 = vrot.slane %v10177_v1, 4  ;;  %v19027_v62 = vpop.f32.mrf.mxu1  ;;  %v19029_v39 = vpop.f32.mrf.mxu0  ;;  %v12386_v1 = vcombine.low %v10480_v35, %v10483_v49 }
 0x349   :  { %13716 = vmatmul.mubr.msk.bf16.gmra.mxu1 %vm1312_vm8, %v12349_v63  ;;  %v10192_v63 = vrot.slane %v10190_v40, 5  ;;  %21461 = vst [vmem:[#allocation312_spill] sm:$0xff] %v19029_v39  ;;  %v10487_v40 = vsel %vm14417_vm15, %v12378_v2, %v10486_v22  ;;  %v10490_v39 = vsel %vm14417_vm15, %v10488_v6, %v10489_v53  ;;  %v21463_v53 = vshll.u32 %v18891_v13, 16 }
 0x34a   :  { %13739 = vmatprep.mubr.msk.bf16.mxu1 %vm1312_vm8, %v12384_v43  ;;  %v10159_v19 = vsel %vm14369_vm14, %v10154_v10, %v10158_v37  ;;  %v10187_v7 = vor.u32 %v10186_v54, %v10182_v34  ;;  %v10169_v43 = vsel %vm14369_vm14, %v10164_v23, %v10168_v57  ;;  %v10496_v10 = vrot.slane %v9907_v46, 5  ;;  %v19050_v35 = vpop.f32.mrf.mxu1  ;;  %v19052_v23 = vpop.f32.mrf.mxu0 }
 0x34b   :  { %v12385_v37 = vcombine.low %v18989_v21, %v10476_v3  ;;  %v12361_v11 = vcombine.low %v10159_v19, %v10169_v43  ;;  %v10183_v12 = vsel %vm14369_vm14, %v10178_v28, %v10182_v34  ;;  %v10243_v54 = vshrl.u32 %v18938_v29, 16  ;;  %v9910_v43 = vld [vmem:[#allocation2 + $0x194] sm:$0x1] }
 0x34c   :  { %v10188_v60 = vrot.slane %v10187_v7, 4  ;;  %v10494_v3 = vsel %vm14417_vm15, %v12379_v36, %v10493_v32  ;;  %v21462_v19 = vshrl.u32 %v18891_v13, 16  ;;  %v10497_v2 = vsel %vm14417_vm15, %v10495_v48, %v10496_v10 }
 0x34d   :  { %13725 = vmatprep.mubr.msk.bf16.mxu0 %vm1312_vm8, %v12361_v11  ;;  %v10200_v6 = vrot.slane %v21463_v53, 5  ;;  %v10204_v28 = vshll.u32 %v18900_v16, 16  ;;  %v12387_v49 = vcombine.low %v10487_v40, %v10490_v39  ;;  %v10500_v32 = vrot.slane %v18930_v31, 5 }
 0x34e   :  { %v10193_v21 = vsel %vm14369_vm14, %v10188_v60, %v10192_v63  ;;  %v10197_v34 = vrot.slane %v21462_v19, 4  ;;  %v21464_v7 = vshrl.u32 %v18900_v16, 16  ;;  %v10214_v36 = vshll.u32 %v9907_v46, 16  ;;  %v19071_v46 = vpop.f32.mrf.mxu1 }
 0x34f   :  { %v12362_v22 = vcombine.low %v10183_v12, %v10193_v21  ;;  %v12380_v48 = vrot.slane %v18921_v0, 9  ;;  %v10206_v10 = vrot.slane %v10204_v28, 5  ;;  %v21465_v11 = vshrl.u32 %v18921_v0, 16 }
 0x350   :  { %v10210_v63 = vrot.slane %v21464_v7, 4  ;;  %v10201_v13 = vor.u32 %v10200_v6, %v10197_v34  ;;  %v10216_v39 = vrot.slane %v10214_v36, 5  ;;  %v21466_v60 = vshll.u32 %v18921_v0, 16  ;;  %v9913_v34 = vld [vmem:[#allocation2 + $0x1a0] sm:$0x1] }
 0x351   :  { %13740 = vmatmul.mubr.msk.bf16.vlgmr.msra.gmra.mxu1 %vm1312_vm8, %v12385_v37  ;;  %13726 = vmatmul.mubr.msk.bf16.gmra.mxu0 %vm1312_vm8, %v12362_v22  ;;  %v10221_v12 = vrot.slane %v21465_v11, 4  ;;  %v12388_v37 = vcombine.low %v10494_v3, %v10497_v2  ;;  %v10228_v16 = vshll.u32 %v18930_v31, 16  ;;  %v10234_v22 = vrot.slane %v10232_v47, 4 }
 0x352   :  { %13743 = vmatprep.mubr.msk.bf16.mxu1 %vm1312_vm8, %v12386_v1  ;;  %v10224_v40 = vrot.slane %v21466_v60, 5  ;;  %v19073_v1 = vpop.f32.mrf.mxu0  ;;  %v10202_v21 = vrot.slane %v10201_v13, 4  ;;  %v10211_v19 = vor.u32 %v10210_v63, %v10206_v10  ;;  %v10238_v53 = vshll.u32 %v9910_v43, 16  ;;  %v19079_v63 = vpop.f32.mrf.mxu1 }
 0x353   :  { %21467 = vst [vmem:[#allocation313_spill] sm:$0xff] %v19073_v1  ;;  %v10502_v6 = vrot.slane %v10500_v32, 4  ;;  %v10503_v28 = vrot.slane %v9910_v43, 5  ;;  %v10230_v11 = vrot.slane %v10228_v16, 5  ;;  %v12381_v2 = vrot.slane %v18938_v29, 9 }
 0x354   :  { %v10225_v7 = vor.u32 %v10224_v40, %v10221_v12  ;;  %v10207_v3 = vsel %vm14369_vm14, %v10202_v21, %v10206_v10  ;;  %v10212_v0 = vrot.slane %v10211_v19, 4  ;;  %v10507_v31 = vrot.slane %v18941_v33, 5  ;;  %v19081_v47 = vpop.f32.mrf.mxu0 }
 0x355   :  { %v10235_v60 = vor.u32 %v10234_v22, %v10230_v11  ;;  %v10240_v57 = vrot.slane %v10238_v53, 5  ;;  %v10510_v13 = vrot.slane %v9913_v34, 5  ;;  %v10256_v43 = vshrl.u32 %v18941_v33, 16 }
 0x356   :  { %v10226_v36 = vrot.slane %v10225_v7, 4  ;;  %v10501_v12 = vsel %vm14417_vm15, %v12380_v48, %v10500_v32  ;;  %v10217_v10 = vsel %vm14369_vm14, %v10212_v0, %v10216_v39  ;;  %v10509_v40 = vrot.slane %v10507_v31, 4  ;;  %v9916_v48 = vld [vmem:[#allocation2 + $0x1ac] sm:$0x1] }
 0x357   :  { %v10504_v16 = vsel %vm14417_vm15, %v10502_v6, %v10503_v28  ;;  %v12363_v21 = vcombine.low %v10207_v3, %v10217_v10  ;;  %v10236_v22 = vrot.slane %v10235_v60, 4  ;;  %v10267_v53 = vshrl.u32 %v18955_v26, 16  ;;  %v19107_v3 = vpop.f32.mrf.mxu1 }
 0x358   :  { %v10231_v19 = vsel %vm14369_vm14, %v10226_v36, %v10230_v11  ;;  %v10270_v7 = vshll.u32 %v18955_v26, 16  ;;  %v10280_v32 = vshrl.u32 %v18959_v14, 16  ;;  %v10514_v39 = vrot.slane %v18959_v14, 5 }
 0x359   :  { %13744 = vmatmul.mubr.msk.bf16.gmra.mxu1 %vm1312_vm8, %v12387_v49  ;;  %13729 = vmatprep.mubr.msk.bf16.mxu0 %vm1312_vm8, %v12363_v21  ;;  %v10241_v49 = vsel %vm14369_vm14, %v10236_v22, %v10240_v57  ;;  %v10508_v6 = vsel %vm14417_vm15, %v12381_v2, %v10507_v31  ;;  %v10511_v28 = vsel %vm14417_vm15, %v10509_v40, %v10510_v13  ;;  %v10245_v11 = vrot.slane %v10243_v54, 4 }
 0x35a   :  { %13747 = vmatprep.mubr.msk.bf16.mxu1 %vm1312_vm8, %v12388_v37  ;;  %v19109_v37 = vpop.f32.mrf.mxu0  ;;  %v12389_v0 = vcombine.low %v10501_v12, %v10504_v16  ;;  %v12364_v36 = vcombine.low %v10231_v19, %v10241_v49  ;;  %v12382_v60 = vrot.slane %v18955_v26, 9  ;;  %v21468_v10 = vshll.u32 %v18938_v29, 16  ;;  %v19118_v26 = vpop.f32.mrf.mxu1 }
 0x35b   :  { %v10517_v21 = vrot.slane %v9916_v48, 5  ;;  %v10252_v2 = vshll.u32 %v18941_v33, 16  ;;  %v10258_v31 = vrot.slane %v10256_v43, 4  ;;  %v10262_v22 = vshll.u32 %v9913_v34, 16 }
 0x35c   :  { %v10248_v57 = vrot.slane %v21468_v10, 5  ;;  %13730 = vmatmul.mubr.msk.bf16.gmra.mxu0 %vm1312_vm8, %v12364_v36  ;;  %v12390_v13 = vcombine.low %v10508_v6, %v10511_v28  ;;  %v10516_v54 = vrot.slane %v10514_v39, 4  ;;  %v10269_v1 = vrot.slane %v10267_v53, 4  ;;  %v19120_v29 = vpop.f32.mrf.mxu0  ;;  %v21469_v36 = vld [vmem:[#allocation254_spill] sm:$0xff]  ;;  %v21470_v10 = vld [vmem:[#allocation256_spill] sm:$0xff] }
 0x35d   :  { %v6432_v12 = vadd.f32 %v18202_v59, %v18254_v50  ;;  %v10254_v16 = vrot.slane %v10252_v2, 5  ;;  %v10272_v19 = vrot.slane %v10270_v7, 5  ;;  %v6424_v33 = vadd.f32 %v18227_v38, %v18273_v24 }
 0x35e   :  { %v10249_v40 = vor.u32 %v10248_v57, %v10245_v11  ;;  %v10276_v34 = vshll.u32 %v18959_v14, 16  ;;  %v10282_v49 = vrot.slane %v10280_v32, 4  ;;  %v10264_v53 = vrot.slane %v10262_v22, 5 }
 0x35f   :  { %v10259_v6 = vor.u32 %v10258_v31, %v10254_v16  ;;  %v10273_v28 = vor.u32 %v10272_v19, %v10269_v1  ;;  %v10286_v11 = vshll.u32 %v9916_v48, 16  ;;  %v6445_v59 = vadd.f32 %v18244_v55, %v18290_v56  ;;  %v19137_v48 = vpop.f32.mrf.mxu1  ;;  %v19139_v55 = vpop.f32.mrf.mxu0 }
 0x360   :  { %v10250_v43 = vrot.slane %v10249_v40, 4  ;;  %v10515_v50 = vsel %vm14417_vm15, %v12382_v60, %v10514_v39  ;;  %v10518_v38 = vsel %vm14417_vm15, %v10516_v54, %v10517_v21  ;;  %v10278_v24 = vrot.slane %v10276_v34, 5  ;;  %v21471_v21 = vld [vmem:[#allocation259_spill] sm:$0xff] }
 0x361   :  { %13748 = vmatmul.mubr.msk.bf16.gmra.mxu1 %vm1312_vm8, %v12389_v0  ;;  %v6437_v14 = vadd.f32 %v18256_v15, %v18299_v5  ;;  %v10260_v1 = vrot.slane %v10259_v6, 4  ;;  %v10274_v32 = vrot.slane %v10273_v28, 4  ;;  %v6448_v56 = vadd.f32 %v18263_v61, %v18306_v44  ;;  %v19151_v61 = vpop.f32.mrf.mxu1  ;;  %v19153_v44 = vpop.f32.mrf.mxu0  ;;  %v21473_v54 = vld [vmem:[#allocation231_spill] sm:$0xff] }
 0x362   :  { %13751 = vmatprep.mubr.msk.bf16.mxu1 %vm1312_vm8, %v12390_v13  ;;  %v10255_v7 = vsel %vm14369_vm14, %v10250_v43, %v10254_v16  ;;  %v6675_v39 = vadd.f32 %v18438_v8, %v6432_v12  ;;  %v10283_v41 = vor.u32 %v10282_v49, %v10278_v24  ;;  %v10288_v0 = vrot.slane %v10286_v11, 5  ;;  %v21472_v8 = vld [vmem:[#allocation236_spill] sm:$0xff]  ;;  %v21474_v12 = vld [vmem:[#allocation262_spill] sm:$0xff]  ;;  %v21476_v34 = vld [vmem:[#allocation255_spill] sm:$0xff] }
 0x363   :  { %v6673_v60 = vadd.f32 %v21469_v36, %v6424_v33  ;;  %v6678_v15 = vadd.f32 %v21470_v10, %v6445_v59  ;;  %v12391_v5 = vcombine.low %v10515_v50, %v10518_v38  ;;  %v10265_v57 = vsel %vm14369_vm14, %v10260_v1, %v10264_v53  ;;  %v21475_v33 = vld [vmem:[#allocation253_spill] sm:$0xff]  ;;  %v21479_v50 = vld [vmem:[#allocation258_spill] sm:$0xff] }
 0x364   :  { %v6676_v2 = vadd.f32 %v21471_v21, %v6437_v14  ;;  %v12365_v31 = vcombine.low %v10255_v7, %v10265_v57  ;;  %v10279_v22 = vsel %vm14369_vm14, %v10274_v32, %v10278_v24  ;;  %v10284_v13 = vrot.slane %v10283_v41, 4  ;;  %v21477_v53 = vld [vmem:[#allocation265_spill] sm:$0xff]  ;;  %v21481_v7 = vld [vmem:[#allocation287_spill] sm:$0xff]  ;;  %v21485_v57 = vld [vmem:[#allocation284_spill] sm:$0xff] }
 0x365   :  { %v6440_v40 = vadd.f32 %v21473_v54, %v21472_v8  ;;  %v6679_v16 = vadd.f32 %v21474_v12, %v6448_v56  ;;  %v6881_v43 = vadd.f32 %v21475_v33, %v6675_v39  ;;  %v6879_v49 = vadd.f32 %v21476_v34, %v6673_v60  ;;  %v21478_v11 = vld [vmem:[#allocation257_spill] sm:$0xff]  ;;  %v19170_v58 = vpop.f32.mrf.mxu1  ;;  %v21487_v8 = vld [vmem:[#allocation288_spill] sm:$0xff] }
 0x366   :  { %13733 = vmatprep.mubr.msk.bf16.mxu0 %vm1312_vm8, %v12365_v31  ;;  %v10289_v19 = vsel %vm14369_vm14, %v10284_v13, %v10288_v0  ;;  %v6884_v59 = vadd.f32 %v21478_v11, %v6678_v15  ;;  %v6882_v38 = vadd.f32 %v21479_v50, %v6676_v2  ;;  %v21480_v24 = vld [vmem:[#allocation285_spill] sm:$0xff]  ;;  %v21483_v0 = vld [vmem:[#allocation260_spill] sm:$0xff]  ;;  %v21486_v2 = vld [vmem:[#allocation286_spill] sm:$0xff] }
 0x367   :  { %v12366_v6 = vcombine.low %v10279_v22, %v10289_v19  ;;  %v6677_v28 = vadd.f32 %v21477_v53, %v6440_v40  ;;  %v7238_v14 = vadd.f32 %v21480_v24, %v6881_v43  ;;  %v7236_v1 = vadd.f32 %v21481_v7, %v6879_v49  ;;  %v21482_v56 = vld [vmem:[#allocation289_spill] sm:$0xff]  ;;  %v19183_v22 = vpop.f32.mrf.mxu1  ;;  %v21493_v50 = vld [vmem:[#allocation11_spill] sm:$0xff] }
 0x368   :  { %v7241_v39 = vadd.f32 %v21482_v56, %v6884_v59  ;;  %v7239_v41 = vadd.f32 %v18726_v20, %v6882_v38  ;;  %v6885_v36 = vadd.f32 %v21483_v0, %v6679_v16  ;;  %v21484_v15 = vld [vmem:[#allocation261_spill] sm:$0xff] }
 0x369   :  { %13752 = vmatmul.mubr.msk.bf16.gmra.mxu1 %vm1312_vm8, %v12391_v5  ;;  %13734 = vmatmul.mubr.msk.bf16.gmra.mxu0 %vm1312_vm8, %v12366_v6  ;;  %v6883_v5 = vadd.f32 %v21484_v15, %v6677_v28  ;;  %v7467_v21 = vadd.f32 %v21485_v57, %v7238_v14  ;;  %v7465_v31 = vadd.f32 %v21486_v2, %v7236_v1  ;;  %v13602_v43 = vpop.f32.mrf.mxu1  ;;  %v21489_v28 = vld [vmem:[#allocation311_spill] sm:$0xff]  ;;  %v21500_v15 = vld [vmem:[#allocation30_spill] sm:$0xff] }
 0x36a   :  { %v7242_v10 = vadd.f32 %v18733_v51, %v6885_v36  ;;  %v7470_v54 = vadd.f32 %v21487_v8, %v7241_v39  ;;  %v7468_v20 = vadd.f32 %v18728_v42, %v7239_v41  ;;  %v21488_v42 = vld [vmem:[#allocation310_spill] sm:$0xff] }
 0x36b   :  { %v7240_v13 = vadd.f32 %v18736_v30, %v6883_v5  ;;  %v7673_v12 = vadd.f32 %v18908_v45, %v7467_v21  ;;  %v7671_v16 = vadd.f32 %v18927_v17, %v7465_v31  ;;  %v8663_v11 = vpop.f32.mrf.mxu1 }
 0x36c   :  { %v7676_v51 = vadd.f32 %v18946_v27, %v7470_v54  ;;  %v7674_v19 = vadd.f32 %v18966_v4, %v7468_v20  ;;  %v7471_v33 = vadd.f32 %v18740_v25, %v7242_v10 }
 0x36d   :  { %v7469_v30 = vadd.f32 %v18759_v18, %v7240_v13  ;;  %v8030_v6 = vadd.f32 %v18994_v52, %v7673_v12  ;;  %v8028_v53 = vadd.f32 %v21488_v42, %v7671_v16  ;;  %v21492_v52 = vld [vmem:[#allocation12_spill] sm:$0xff]  ;;  %v21501_v13 = vld [vmem:[#allocation49_spill] sm:$0xff]  ;;  %v21502_v12 = vld [vmem:[#allocation35_spill] sm:$0xff] }
 0x36e   :  { %v19172_v32 = vpop.f32.mrf.mxu0  ;;  %v7677_v34 = vadd.f32 %v18996_v9, %v7471_v33  ;;  %v8033_v17 = vadd.f32 %v19027_v62, %v7676_v51  ;;  %v8031_v27 = vadd.f32 %v19050_v35, %v7674_v19  ;;  %v1543_v38 = vadd.f32 %v21493_v50, %v21492_v52  ;;  %v21495_v35 = vld [vmem:[#allocation38_spill] sm:$0xff]  ;;  %v21504_v33 = vld [vmem:[#allocation13_spill] sm:$0xff] }
 0x36f   :  { %v7675_v45 = vadd.f32 %v21489_v28, %v7469_v30  ;;  %v21503_v19 = vld [vmem:[#allocation14_spill] sm:$0xff]  ;;  %v21509_v52 = vld [vmem:[#allocation65_spill] sm:$0xff] }
 0x370   :  { %v19177_v60 = vpop.f32.mrf.mxu0  ;;  %v8034_v9 = vadd.f32 %v19071_v46, %v7677_v34  ;;  %v1820_v7 = vadd.f32 %v21495_v35, %v1543_v38  ;;  %v1559_v34 = vadd.f32 %v21504_v33, %v21503_v19 }
 0x371   :  { %v8032_v18 = vadd.f32 %v19079_v63, %v7675_v45  ;;  %v21498_v63 = vld [vmem:[#allocation31_spill] sm:$0xff] }
 0x372   :  { %v13588_v40 = vpop.f32.mrf.mxu0  ;;  %v2026_v0 = vadd.f32 %v21498_v63, %v1820_v7 }
 0x373   :  { %v19200_v4 = vadd.f32 %v13588_v40, %v8030_v6  ;;  %v21505_v6 = vld [vmem:[#allocation44_spill] sm:$0xff] }
 0x374   :  { %v8220_v49 = vpop.f32.mrf.mxu0  ;;  %v2384_v5 = vadd.f32 %v21500_v15, %v2026_v0  ;;  %v1824_v42 = vadd.f32 %v21505_v6, %v1559_v34 }
 0x375   :  { %21490 = vst [vmem:[#allocation254_spill] sm:$0xff] %v19200_v4  ;;  %v19202_v25 = vadd.f32 %v8220_v49, %v8028_v53  ;;  %v21618_v4 = vld [vmem:[#allocation103_spill] sm:$0xff] }
 0x376   :  { %v2614_v8 = vadd.f32 %v21501_v13, %v2384_v5 }
 0x377   :  { %21491 = vst [vmem:[#allocation256_spill] sm:$0xff] %v19202_v25 }
 0x378   :  { %v2821_v16 = vadd.f32 %v21502_v12, %v2614_v8 }
 0x37b   :  { %v19206_v59 = vpop.f32.mrf.mxu1 }
 0x37d   :  { %v19210_v14 = vpop.f32.mrf.mxu1 }
 0x37f   :  { %v19217_v41 = vpop.f32.mrf.mxu1 }
 0x381   :  { %v19225_v57 = vpop.f32.mrf.mxu1 }
 0x385   :  { %v13591_v24 = vpop.f32.mrf.mxu0 }
 0x386   :  { %v19212_v62 = vadd.f32 %v13591_v24, %v8033_v17  ;;  %v21511_v24 = vld [vmem:[#allocation37_spill] sm:$0xff] }
 0x387   :  { %v8233_v1 = vpop.f32.mrf.mxu0 }
 0x388   :  { %21494 = vst [vmem:[#allocation259_spill] sm:$0xff] %v19212_v62  ;;  %v19215_v56 = vadd.f32 %v8233_v1, %v8031_v27  ;;  %v21512_v1 = vld [vmem:[#allocation10_spill] sm:$0xff] }
 0x389   :  { %v13592_v39 = vpop.f32.mrf.mxu0 }
 0x38a   :  { %21496 = vst [vmem:[#allocation236_spill] sm:$0xff] %v19215_v56  ;;  %v19219_v46 = vadd.f32 %v13592_v39, %v8034_v9  ;;  %v21508_v9 = vld [vmem:[#allocation59_spill] sm:$0xff] }
 0x38b   :  { %v8236_v36 = vpop.f32.mrf.mxu0 }
 0x38c   :  { %21497 = vst [vmem:[#allocation231_spill] sm:$0xff] %v19219_v46  ;;  %v19222_v10 = vadd.f32 %v8236_v36, %v8032_v18  ;;  %v21514_v36 = vld [vmem:[#allocation52_spill] sm:$0xff] }
 0x38d   :  { %v21593_v46 = vld [vmem:[#allocation96_spill] sm:$0xff] }
 0x38e   :  { %21499 = vst [vmem:[#allocation262_spill] sm:$0xff] %v19222_v10  ;;  %v13615_v21 = vpop.f32.mrf.mxu0  ;;  %v21607_v10 = vld [vmem:[#allocation106_spill] sm:$0xff] }
 0x38f   :  { %v8817_v2 = vadd.f32 %v13615_v21, %v19107_v3  ;;  %v21515_v21 = vld [vmem:[#allocation18_spill] sm:$0xff] }
 0x390   :  { %v8808_v31 = vpop.f32.mrf.mxu0 }
 0x391   :  { %v8809_v54 = vadd.f32 %v8808_v31, %v19118_v26  ;;  %v21506_v26 = vld [vmem:[#allocation33_spill] sm:$0xff]  ;;  %v21516_v31 = vld [vmem:[#allocation27_spill] sm:$0xff] }
 0x392   :  { %v13616_v40 = vpop.f32.mrf.mxu0  ;;  %v3179_v28 = vadd.f32 %v21506_v26, %v2821_v16  ;;  %v3180_v13 = vadd.f32 %v21516_v31, %v21515_v21  ;;  %v21520_v26 = vld [vmem:[#allocation24_spill] sm:$0xff] }
 0x393   :  { %v8820_v51 = vadd.f32 %v13616_v40, %v19137_v48  ;;  %v21507_v48 = vld [vmem:[#allocation61_spill] sm:$0xff] }
 0x394   :  { %v8811_v49 = vpop.f32.mrf.mxu0  ;;  %v3178_v18 = vadd.f32 %v21508_v9, %v21507_v48  ;;  %v19249_v50 = vadd.f32 %v21509_v52, %v3179_v28  ;;  %v21521_v28 = vld [vmem:[#allocation23_spill] sm:$0xff] }
 0x395   :  { %v19230_v20 = vpop.f32.mrf.mxu1  ;;  %v8812_v3 = vadd.f32 %v8811_v49, %v19151_v61  ;;  %v2030_v61 = vadd.f32 %v21511_v24, %v1824_v42  ;;  %v21519_v49 = vld [vmem:[#allocation34_spill] sm:$0xff] }
 0x396   :  { %v13619_v45 = vpop.f32.mrf.mxu0  ;;  %21510 = vst [vmem:[#allocation253_spill] sm:$0xff] %v19249_v50  ;;  %v19254_v39 = vadd.f32 %v21512_v1, %v3178_v18  ;;  %v3447_v40 = vmul.f32 %v19249_v50, %v19249_v50 }
 0x397   :  { %v19236_v30 = vpop.f32.mrf.mxu1  ;;  %v8833_v27 = vadd.f32 %v13619_v45, %v19170_v58  ;;  %v2388_v58 = vadd.f32 %v21514_v36, %v2030_v61  ;;  %v3181_v45 = vadd.f32 %v21521_v28, %v21520_v26  ;;  %v21523_v61 = vld [vmem:[#allocation63_spill] sm:$0xff]  ;;  %v21525_v36 = vld [vmem:[#allocation20_spill] sm:$0xff] }
 0x398   :  { %v8824_v38 = vpop.f32.mrf.mxu0  ;;  %21513 = vst [vmem:[#allocation255_spill] sm:$0xff] %v19254_v39  ;;  %v3424_v8 = vadd.f32 %v19249_v50, %v19254_v39 }
 0x399   :  { %v19240_v53 = vpop.f32.mrf.mxu1  ;;  %v8825_v7 = vadd.f32 %v8824_v38, %v19183_v22  ;;  %v2618_v6 = vadd.f32 %v21519_v49, %v2388_v58  ;;  %v21522_v38 = vld [vmem:[#allocation60_spill] sm:$0xff] }
 0x39a   :  { %v13620_v63 = vpop.f32.mrf.mxu0  ;;  %v21526_v58 = vld [vmem:[#allocation16_spill] sm:$0xff] }
 0x39b   :  { %v19243_v17 = vpop.f32.mrf.mxu1  ;;  %v8836_v5 = vadd.f32 %v13620_v63, %v13602_v43  ;;  %v3446_v43 = vmul.f32 %v19254_v39, %v19254_v39  ;;  %v2825_v24 = vadd.f32 %v21522_v38, %v2618_v6  ;;  %v21534_v38 = vld [vmem:[#allocation73_spill] sm:$0xff] }
 0x39c   :  { %v8827_v22 = vpop.f32.mrf.mxu0  ;;  %v21592_v39 = vld [vmem:[#allocation41_spill] sm:$0xff] }
 0x39d   :  { %v13633_v35 = vpop.f32.mrf.mxu1  ;;  %v8828_v19 = vadd.f32 %v8827_v22, %v8663_v11 }
 0x39e   :  { %v19256_v0 = vadd.f32 %v13633_v35, %v8817_v2  ;;  %v21517_v2 = vld [vmem:[#allocation47_spill] sm:$0xff]  ;;  %v19285_v35 = vadd.f32 %v21523_v61, %v3181_v45 }
 0x39f   :  { %v9021_v15 = vpop.f32.mrf.mxu1  ;;  %v19268_v33 = vadd.f32 %v21517_v2, %v3180_v13  ;;  %v13623_v9 = vpop.f32.mrf.mxu0  ;;  %v21527_v13 = vld [vmem:[#allocation67_spill] sm:$0xff] }
 0x3a0   :  { %v19265_v12 = vadd.f32 %v9021_v15, %v8809_v54  ;;  %v3462_v54 = vadd.f32 %v3447_v40, %v3446_v43  ;;  %v8849_v52 = vadd.f32 %v13623_v9, %v19206_v59  ;;  %21524 = vst [vmem:[#allocation257_spill] sm:$0xff] %v19285_v35  ;;  %v1575_v15 = vadd.f32 %v21526_v58, %v21525_v36  ;;  %v21528_v59 = vld [vmem:[#allocation36_spill] sm:$0xff]  ;;  %v21529_v2 = vld [vmem:[#allocation15_spill] sm:$0xff] }
 0x3a1   :  { %v13634_v16 = vpop.f32.mrf.mxu1  ;;  %21518 = vst [vmem:[#allocation265_spill] sm:$0xff] %v19268_v33  ;;  %v3425_v48 = vadd.f32 %v3424_v8, %v19268_v33  ;;  %v8840_v1 = vpop.f32.mrf.mxu0  ;;  %v3182_v8 = vadd.f32 %v21528_v59, %v21527_v13  ;;  %v3449_v6 = vmul.f32 %v19285_v35, %v19285_v35  ;;  %v21537_v61 = vld [vmem:[#allocation43_spill] sm:$0xff]  ;;  %v21540_v13 = vld [vmem:[#allocation21_spill] sm:$0xff] }
 0x3a2   :  { %v19272_v34 = vadd.f32 %v13634_v16, %v8820_v51  ;;  %v3448_v51 = vmul.f32 %v19268_v33, %v19268_v33  ;;  %v1828_v43 = vadd.f32 %v21529_v2, %v1575_v15  ;;  %v21538_v15 = vld [vmem:[#allocation25_spill] sm:$0xff] }
 0x3a3   :  { %v9024_v42 = vpop.f32.mrf.mxu1  ;;  %v3426_v40 = vadd.f32 %v3425_v48, %v19285_v35  ;;  %v13624_v22 = vpop.f32.mrf.mxu0 }
 0x3a4   :  { %v19278_v18 = vadd.f32 %v9024_v42, %v8812_v3  ;;  %v8841_v3 = vadd.f32 %v8840_v1, %v19210_v14  ;;  %v3463_v31 = vadd.f32 %v3462_v54, %v3448_v51  ;;  %v21530_v42 = vld [vmem:[#allocation69_spill] sm:$0xff]  ;;  %v21532_v14 = vld [vmem:[#allocation40_spill] sm:$0xff]  ;;  %v2034_v1 = vadd.f32 %v21537_v61, %v1828_v43 }
 0x3a5   :  { %v13637_v11 = vpop.f32.mrf.mxu1  ;;  %v19302_v26 = vadd.f32 %v21530_v42, %v3182_v8  ;;  %v3183_v28 = vadd.f32 %v21532_v14, %v2825_v24  ;;  %v8843_v45 = vpop.f32.mrf.mxu0 }
 0x3a6   :  { %v19287_v63 = vadd.f32 %v13637_v11, %v8833_v27  ;;  %v8852_v27 = vadd.f32 %v13624_v22, %v19217_v41  ;;  %v3464_v11 = vadd.f32 %v3463_v31, %v3449_v6  ;;  %v21542_v6 = vld [vmem:[#allocation29_spill] sm:$0xff] }
 0x3a7   :  { %v9037_v21 = vpop.f32.mrf.mxu1  ;;  %21531 = vst [vmem:[#allocation258_spill] sm:$0xff] %v19302_v26  ;;  %v3427_v9 = vadd.f32 %v3426_v40, %v19302_v26  ;;  %v19310_v51 = vadd.f32 %v21534_v38, %v3183_v28  ;;  %v3450_v24 = vmul.f32 %v19302_v26, %v19302_v26  ;;  %v21547_v38 = vld [vmem:[#allocation39_spill] sm:$0xff]  ;;  %v21583_v26 = vld [vmem:[#allocation88_spill] sm:$0xff] }
 0x3a8   :  { %v19295_v16 = vadd.f32 %v9037_v21, %v8825_v7  ;;  %v8844_v7 = vadd.f32 %v8843_v45, %v19225_v57  ;;  %v13627_v58 = vpop.f32.mrf.mxu0  ;;  %v2392_v21 = vadd.f32 %v21538_v15, %v2034_v1  ;;  %v21539_v57 = vld [vmem:[#allocation66_spill] sm:$0xff]  ;;  %v21545_v45 = vld [vmem:[#allocation53_spill] sm:$0xff] }
 0x3a9   :  { %v13638_v49 = vpop.f32.mrf.mxu1  ;;  %21535 = vst [vmem:[#allocation287_spill] sm:$0xff] %v19310_v51  ;;  %v3184_v59 = vadd.f32 %v21540_v13, %v21539_v57  ;;  %v8865_v8 = vadd.f32 %v13627_v58, %v19230_v20  ;;  %v3465_v40 = vadd.f32 %v3464_v11, %v3450_v24  ;;  %v3451_v22 = vmul.f32 %v19310_v51, %v19310_v51  ;;  %v21546_v11 = vld [vmem:[#allocation71_spill] sm:$0xff]  ;;  %v21549_v15 = vld [vmem:[#allocation42_spill] sm:$0xff] }
 0x3aa   :  { %v19305_v54 = vadd.f32 %v13638_v49, %v8836_v5  ;;  %v8856_v2 = vpop.f32.mrf.mxu0  ;;  %v2622_v20 = vadd.f32 %v21545_v45, %v2392_v21  ;;  %v3185_v61 = vadd.f32 %v21547_v38, %v21546_v11  ;;  %v21550_v57 = vld [vmem:[#allocation70_spill] sm:$0xff] }
 0x3ab   :  { %v9040_v48 = vpop.f32.mrf.mxu1  ;;  %v19330_v42 = vadd.f32 %v21542_v6, %v3184_v59  ;;  %v3466_v1 = vadd.f32 %v3465_v40, %v3451_v22  ;;  %v21554_v22 = vld [vmem:[#allocation22_spill] sm:$0xff]  ;;  %v21555_v6 = vld [vmem:[#allocation45_spill] sm:$0xff] }
 0x3ac   :  { %21533 = vst [vmem:[#allocation285_spill] sm:$0xff] %v19305_v54  ;;  %v19312_v41 = vadd.f32 %v9040_v48, %v8828_v19  ;;  %v3428_v19 = vadd.f32 %v3427_v9, %v19310_v51  ;;  %v13628_v14 = vpop.f32.mrf.mxu0  ;;  %v19346_v13 = vadd.f32 %v21550_v57, %v3185_v61  ;;  %v21558_v11 = vld [vmem:[#allocation114_spill] sm:$0xff]  ;;  %v21582_v51 = vld [vmem:[#allocation72_spill] sm:$0xff]  ;;  %v21622_v54 = vld [vmem:[#allocation107_spill] sm:$0xff] }
 0x3ad   :  { %v13641_v36 = vpop.f32.mrf.mxu1  ;;  %21543 = vst [vmem:[#allocation261_spill] sm:$0xff] %v19330_v42  ;;  %v8868_v9 = vadd.f32 %v13628_v14, %v19240_v53  ;;  %v3452_v21 = vmul.f32 %v19330_v42, %v19330_v42 }
 0x3ae   :  { %21536 = vst [vmem:[#allocation289_spill] sm:$0xff] %v19312_v41  ;;  %v19317_v5 = vadd.f32 %v13641_v36, %v8849_v52  ;;  %v8857_v52 = vadd.f32 %v8856_v2, %v19236_v30  ;;  %v8859_v36 = vpop.f32.mrf.mxu0  ;;  %21551 = vst [vmem:[#allocation288_spill] sm:$0xff] %v19346_v13  ;;  %v21631_v41 = vld [vmem:[#allocation7_spill] sm:$0xff] }
 0x3af   :  { %v9053_v31 = vpop.f32.mrf.mxu1  ;;  %v8860_v58 = vadd.f32 %v8859_v36, %v19243_v17 }
 0x3b0   :  { %v19326_v43 = vadd.f32 %v9053_v31, %v8841_v3  ;;  %v3429_v3 = vadd.f32 %v3428_v19, %v19330_v42  ;;  %v3467_v31 = vadd.f32 %v3466_v1, %v3452_v21 }
 0x3b1   :  { %v13642_v49 = vpop.f32.mrf.mxu1 }
 0x3b2   :  { %21541 = vst [vmem:[#allocation260_spill] sm:$0xff] %v19326_v43  ;;  %v19332_v28 = vadd.f32 %v13642_v49, %v8852_v27  ;;  %v2829_v27 = vadd.f32 %v21549_v15, %v2622_v20  ;;  %v3430_v40 = vadd.f32 %v3429_v3, %v19346_v13  ;;  %v3453_v49 = vmul.f32 %v19346_v13, %v19346_v13  ;;  %v21557_v20 = vld [vmem:[#allocation17_spill] sm:$0xff]  ;;  %v21559_v3 = vld [vmem:[#allocation75_spill] sm:$0xff] }
 0x3b3   :  { %v9056_v48 = vpop.f32.mrf.mxu1  ;;  %v3454_v15 = vmul.f32 %v21558_v11, %v21558_v11  ;;  %v21577_v13 = vld [vmem:[#allocation97_spill] sm:$0xff] }
 0x3b4   :  { %21544 = vst [vmem:[#allocation284_spill] sm:$0xff] %v19332_v28  ;;  %v19339_v24 = vadd.f32 %v9056_v48, %v8844_v7  ;;  %v21553_v7 = vld [vmem:[#allocation32_spill] sm:$0xff]  ;;  %v3187_v14 = vadd.f32 %v21555_v6, %v2829_v27  ;;  %v3431_v38 = vadd.f32 %v3430_v40, %v21558_v11  ;;  %v3468_v61 = vadd.f32 %v3467_v31, %v3453_v49  ;;  %v21563_v40 = vld [vmem:[#allocation58_spill] sm:$0xff]  ;;  %v21606_v28 = vld [vmem:[#allocation85_spill] sm:$0xff] }
 0x3b5   :  { %v13645_v30 = vpop.f32.mrf.mxu1  ;;  %v1591_v2 = vadd.f32 %v21554_v22, %v21553_v7  ;;  %v13651_v1 = vpop.f32.mrf.mxu0  ;;  %v4017_v56 = vadd.f32 %v21607_v10, %v21606_v28 }
 0x3b6   :  { %21548 = vst [vmem:[#allocation286_spill] sm:$0xff] %v19339_v24  ;;  %v19348_v53 = vadd.f32 %v13645_v30, %v8865_v8  ;;  %v9292_v30 = vadd.f32 %v13651_v1, %v19256_v0  ;;  %v3469_v57 = vadd.f32 %v3468_v61, %v3454_v15  ;;  %v21565_v0 = vld [vmem:[#allocation109_spill] sm:$0xff]  ;;  %v21568_v61 = vld [vmem:[#allocation19_spill] sm:$0xff]  ;;  %v21570_v15 = vld [vmem:[#allocation46_spill] sm:$0xff] }
 0x3b7   :  { %v9069_v59 = vpop.f32.mrf.mxu1  ;;  %v1832_v8 = vadd.f32 %v21557_v20, %v1591_v2  ;;  %v19370_v27 = vpop.f32.mrf.mxu0  ;;  %v21604_v24 = vld [vmem:[#allocation83_spill] sm:$0xff] }
 0x3b8   :  { %v19351_v19 = vadd.f32 %v9069_v59, %v8857_v52  ;;  %v19363_v52 = vadd.f32 %v21559_v3, %v3187_v14  ;;  %v21566_v14 = vld [vmem:[#allocation26_spill] sm:$0xff] }
 0x3b9   :  { %v13646_v17 = vpop.f32.mrf.mxu1  ;;  %v21569_v3 = vld [vmem:[#allocation86_spill] sm:$0xff] }
 0x3ba   :  { %21552 = vst [vmem:[#allocation310_spill] sm:$0xff] %v19351_v19  ;;  %v19358_v45 = vadd.f32 %v13646_v17, %v8868_v9  ;;  %21560 = vst [vmem:[#allocation12_spill] sm:$0xff] %v19363_v52  ;;  %v21562_v9 = vld [vmem:[#allocation48_spill] sm:$0xff]  ;;  %v3432_v59 = vadd.f32 %v3431_v38, %v19363_v52  ;;  %v3455_v31 = vmul.f32 %v19363_v52, %v19363_v52  ;;  %v21576_v52 = vld [vmem:[#allocation81_spill] sm:$0xff] }
 0x3bb   :  { %v9072_v48 = vpop.f32.mrf.mxu1  ;;  %v2038_v21 = vadd.f32 %v21562_v9, %v1832_v8  ;;  %v3456_v8 = vmul.f32 %v21565_v0, %v21565_v0  ;;  %v3972_v1 = vadd.f32 %v21569_v3, %v21568_v61  ;;  %v21602_v19 = vld [vmem:[#allocation80_spill] sm:$0xff] }
 0x3bc   :  { %21556 = vst [vmem:[#allocation311_spill] sm:$0xff] %v19358_v45  ;;  %v19365_v36 = vadd.f32 %v9072_v48, %v8860_v58  ;;  %v19377_v58 = vpop.f32.mrf.mxu0  ;;  %v3433_v17 = vadd.f32 %v3432_v59, %v21565_v0  ;;  %v3470_v49 = vadd.f32 %v3469_v57, %v3455_v31  ;;  %v21572_v57 = vld [vmem:[#allocation28_spill] sm:$0xff]  ;;  %v21573_v31 = vld [vmem:[#allocation57_spill] sm:$0xff] }
 0x3bd   :  { %v2396_v7 = vadd.f32 %v21563_v40, %v2038_v21  ;;  %v13669_v22 = vpop.f32.mrf.mxu1  ;;  %v21571_v21 = vld [vmem:[#allocation119_spill] sm:$0xff]  ;;  %v3969_v40 = vadd.f32 %v21573_v31, %v21572_v57  ;;  %v21575_v0 = vld [vmem:[#allocation64_spill] sm:$0xff]  ;;  %v4245_v42 = vadd.f32 %v21577_v13, %v3972_v1  ;;  %v21585_v1 = vld [vmem:[#allocation121_spill] sm:$0xff] }
 0x3be   :  { %21561 = vst [vmem:[#allocation11_spill] sm:$0xff] %v19365_v36  ;;  %v19379_v2 = vadd.f32 %v13669_v22, %v9292_v30  ;;  %v19389_v38 = vpop.f32.mrf.mxu0  ;;  %v3471_v9 = vadd.f32 %v3470_v49, %v3456_v8  ;;  %v3434_v59 = vadd.f32 %v3433_v17, %v21571_v21  ;;  %v3977_v11 = vadd.f32 %v21576_v52, %v21575_v0  ;;  %v21579_v8 = vld [vmem:[#allocation62_spill] sm:$0xff]  ;;  %v21580_v57 = vld [vmem:[#allocation68_spill] sm:$0xff]  ;;  %v21584_v0 = vld [vmem:[#allocation93_spill] sm:$0xff] }
 0x3bf   :  { %v19382_v6 = vpop.f32.mrf.mxu1  ;;  %v2626_v20 = vadd.f32 %v21566_v14, %v2396_v7  ;;  %v3457_v7 = vmul.f32 %v21571_v21, %v21571_v21  ;;  %v21581_v31 = vld [vmem:[#allocation84_spill] sm:$0xff]  ;;  %v3993_v52 = vadd.f32 %v21583_v26, %v21582_v51  ;;  %v4244_v13 = vadd.f32 %v21584_v0, %v3969_v40  ;;  %v21596_v51 = vld [vmem:[#allocation98_spill] sm:$0xff]  ;;  %v21597_v0 = vld [vmem:[#allocation91_spill] sm:$0xff] }
 0x3c0   :  { %21564 = vst [vmem:[#allocation38_spill] sm:$0xff] %v19379_v2  ;;  %v3980_v21 = vadd.f32 %v21581_v31, %v21580_v57  ;;  %v4009_v36 = vadd.f32 %v21593_v46, %v21592_v39  ;;  %v21595_v26 = vld [vmem:[#allocation76_spill] sm:$0xff] }
 0x3c1   :  { %v19387_v48 = vpop.f32.mrf.mxu1  ;;  %v2833_v30 = vadd.f32 %v21570_v15, %v2626_v20  ;;  %v13655_v14 = vpop.f32.mrf.mxu0  ;;  %v21578_v20 = vld [vmem:[#allocation55_spill] sm:$0xff]  ;;  %v19408_v17 = vadd.f32 %v3471_v9, %v3457_v7  ;;  %v21588_v9 = vld [vmem:[#allocation50_spill] sm:$0xff]  ;;  %v21589_v7 = vld [vmem:[#allocation92_spill] sm:$0xff]  ;;  %v4001_v40 = vadd.f32 %v21596_v51, %v21595_v26 }
 0x3c2   :  { %21567 = vst [vmem:[#allocation31_spill] sm:$0xff] %v19387_v48  ;;  %v9296_v61 = vadd.f32 %v13655_v14, %v19287_v63  ;;  %v19406_v49 = vadd.f32 %v3434_v59, %v21578_v20  ;;  %v4451_v63 = vadd.f32 %v21585_v1, %v4245_v42  ;;  %v21586_v14 = vld [vmem:[#allocation74_spill] sm:$0xff]  ;;  %v3996_v33 = vadd.f32 %v21589_v7, %v21588_v9  ;;  %v21598_v1 = vld [vmem:[#allocation116_spill] sm:$0xff]  ;;  %v21609_v26 = vld [vmem:[#allocation87_spill] sm:$0xff] }
 0x3c3   :  { %v19399_v22 = vpop.f32.mrf.mxu1  ;;  %v19411_v3 = vadd.f32 %v21579_v8, %v2833_v30  ;;  %v19413_v15 = vpop.f32.mrf.mxu0  ;;  %v21587_v59 = vld [vmem:[#allocation90_spill] sm:$0xff]  ;;  %v21590_v30 = vld [vmem:[#allocation51_spill] sm:$0xff]  ;;  %v4246_v42 = vadd.f32 %v21597_v0, %v3977_v11  ;;  %v4450_v45 = vadd.f32 %v21598_v1, %v4244_v13  ;;  %v21601_v9 = vld [vmem:[#allocation100_spill] sm:$0xff] }
 0x3c4   :  { %21574 = vst [vmem:[#allocation30_spill] sm:$0xff] %v19399_v22  ;;  %v3985_v35 = vadd.f32 %v21587_v59, %v21586_v14  ;;  %v21591_v8 = vld [vmem:[#allocation94_spill] sm:$0xff]  ;;  %v21600_v59 = vld [vmem:[#allocation56_spill] sm:$0xff]  ;;  %v21611_v13 = vld [vmem:[#allocation89_spill] sm:$0xff]  ;;  %v4251_v10 = vadd.f32 %v21618_v4, %v3996_v33 }
 0x3c5   :  { %v3988_v50 = vadd.f32 %v21591_v8, %v21590_v30  ;;  %v19429_v31 = vpop.f32.mrf.mxu0  ;;  %v4012_v7 = vadd.f32 %v21601_v9, %v21600_v59  ;;  %v21603_v30 = vld [vmem:[#allocation102_spill] sm:$0xff]  ;;  %v21605_v46 = vld [vmem:[#allocation104_spill] sm:$0xff]  ;;  %v21613_v0 = vld [vmem:[#allocation113_spill] sm:$0xff] }
 0x3c6   :  { %v13673_v57 = vpop.f32.mrf.mxu1  ;;  %21594 = vst [vmem:[#allocation49_spill] sm:$0xff] %v19429_v31  ;;  %v4004_v8 = vadd.f32 %v21603_v30, %v21602_v19  ;;  %v4025_v39 = vadd.f32 %v21605_v46, %v21604_v24  ;;  %v21610_v11 = vld [vmem:[#allocation108_spill] sm:$0xff]  ;;  %v4452_v1 = vadd.f32 %v21613_v0, %v4246_v42  ;;  %v21616_v30 = vld [vmem:[#allocation99_spill] sm:$0xff]  ;;  %v21617_v24 = vld [vmem:[#allocation101_spill] sm:$0xff] }
 0x3c7   :  { %v19435_v14 = vadd.f32 %v13673_v57, %v9296_v61  ;;  %v4028_v51 = vadd.f32 %v21610_v11, %v21609_v26  ;;  %v21612_v61 = vld [vmem:[#allocation111_spill] sm:$0xff]  ;;  %v21614_v59 = vld [vmem:[#allocation128_spill] sm:$0xff]  ;;  %v4250_v62 = vadd.f32 %v21616_v30, %v3993_v52  ;;  %v4248_v46 = vadd.f32 %v21617_v24, %v3985_v35  ;;  %v19459_v31 = vpop.f32.mrf.mxu0  ;;  %v21621_v26 = vld [vmem:[#allocation105_spill] sm:$0xff] }
 0x3c8   :  { %v19445_v43 = vpop.f32.mrf.mxu1  ;;  %v4020_v57 = vadd.f32 %v21612_v61, %v21611_v13  ;;  %v4808_v9 = vadd.f32 %v21614_v59, %v4451_v63  ;;  %21620 = vst [vmem:[#allocation44_spill] sm:$0xff] %v19459_v31  ;;  %v4249_v11 = vadd.f32 %v21621_v26, %v3988_v50  ;;  %v4254_v13 = vadd.f32 %v21622_v54, %v4009_v36  ;;  %v21623_v61 = vld [vmem:[#allocation8_spill] sm:$0xff]  ;;  %v21624_v0 = vld [vmem:[#allocation151_spill] sm:$0xff]  ;;  %v21625_v59 = vld [vmem:[#allocation118_spill] sm:$0xff] }
 0x3c9   :  { %21599 = vst [vmem:[#allocation35_spill] sm:$0xff] %v19435_v14  ;;  %21608 = vst [vmem:[#allocation14_spill] sm:$0xff] %v19445_v43  ;;  %v21615_v14 = vld [vmem:[#allocation95_spill] sm:$0xff]  ;;  %v4807_v42 = vadd.f32 %v21623_v61, %v4450_v45  ;;  %v21627_v30 = vld [vmem:[#allocation124_spill] sm:$0xff] }
 0x3ca   :  { %v4247_v19 = vadd.f32 %v21615_v14, %v3980_v21  ;;  %v19457_v28 = vpop.f32.mrf.mxu1  ;;  %v5037_v63 = vadd.f32 %v21624_v0, %v4808_v9  ;;  %v21626_v14 = vld [vmem:[#allocation123_spill] sm:$0xff]  ;;  %v4454_v35 = vadd.f32 %v21627_v30, %v4248_v46  ;;  %v21628_v24 = vld [vmem:[#allocation110_spill] sm:$0xff]  ;;  %v4460_v50 = vadd.f32 %v21631_v41, %v4254_v13  ;;  %v21633_v36 = vld [vmem:[#allocation129_spill] sm:$0xff] }
 0x3cb   :  { %21619 = vst [vmem:[#allocation13_spill] sm:$0xff] %v19457_v28  ;;  %v4456_v52 = vadd.f32 %v21626_v14, %v4250_v62  ;;  %v4252_v4 = vadd.f32 %v21628_v24, %v4001_v40  ;;  %v21629_v33 = vld [vmem:[#allocation127_spill] sm:$0xff]  ;;  %v21634_v61 = vld [vmem:[#allocation112_spill] sm:$0xff] }
 0x3cc   :  { %v4453_v21 = vadd.f32 %v21625_v59, %v4247_v19  ;;  %v4457_v28 = vadd.f32 %v21629_v33, %v4251_v10  ;;  %v21630_v43 = vld [vmem:[#allocation79_spill] sm:$0xff]  ;;  %v4255_v9 = vadd.f32 %v21634_v61, %v4012_v7  ;;  %v21636_v59 = vld [vmem:[#allocation117_spill] sm:$0xff]  ;;  %v19477_v14 = vpop.f32.mrf.mxu1  ;;  %v21638_v40 = vld [vmem:[#allocation120_spill] sm:$0xff] }
 0x3cd   :  { %v4455_v31 = vadd.f32 %v21630_v43, %v4249_v11  ;;  %v21632_v26 = vld [vmem:[#allocation147_spill] sm:$0xff]  ;;  %v4458_v45 = vadd.f32 %v21633_v36, %v4252_v4  ;;  %v4258_v62 = vadd.f32 %v21636_v59, %v4025_v39  ;;  %21637 = vst [vmem:[#allocation33_spill] sm:$0xff] %v19477_v14  ;;  %v13659_v46 = vpop.f32.mrf.mxu0  ;;  %v4256_v30 = vadd.f32 %v21638_v40, %v4017_v56  ;;  %v21639_v10 = vld [vmem:[#allocation126_spill] sm:$0xff]  ;;  %v21640_v43 = vld [vmem:[#allocation157_spill] sm:$0xff] }
 0x3ce   :  { %v5036_v54 = vadd.f32 %v21632_v26, %v4807_v42  ;;  %v21635_v0 = vld [vmem:[#allocation115_spill] sm:$0xff]  ;;  %v4809_v24 = vadd.f32 %v21639_v10, %v4452_v1  ;;  %v5243_v11 = vadd.f32 %v21640_v43, %v5037_v63  ;;  %v9300_v41 = vadd.f32 %v13659_v46, %v19317_v5  ;;  %v21641_v13 = vld [vmem:[#allocation132_spill] sm:$0xff]  ;;  %v21643_v7 = vld [vmem:[#allocation138_spill] sm:$0xff] }
 0x3cf   :  { %v4253_v19 = vadd.f32 %v21635_v0, %v4004_v8  ;;  %v4461_v42 = vadd.f32 %v21641_v13, %v4255_v9  ;;  %v21642_v4 = vld [vmem:[#allocation135_spill] sm:$0xff]  ;;  %v19486_v26 = vadd.f32 %v21643_v7, %v4258_v62  ;;  %v21644_v8 = vld [vmem:[#allocation82_spill] sm:$0xff]  ;;  %v21645_v36 = vld [vmem:[#allocation140_spill] sm:$0xff] }
 0x3d0   :  { %v4810_v39 = vadd.f32 %v21644_v8, %v4453_v21  ;;  %v4462_v61 = vadd.f32 %v21645_v36, %v4256_v30  ;;  %v21646_v0 = vld [vmem:[#allocation145_spill] sm:$0xff]  ;;  %v21647_v56 = vld [vmem:[#allocation154_spill] sm:$0xff]  ;;  %v21648_v1 = vld [vmem:[#allocation187_spill] sm:$0xff] }
 0x3d1   :  { %v4459_v33 = vadd.f32 %v21642_v4, %v4253_v19  ;;  %v5038_v59 = vadd.f32 %v21646_v0, %v4809_v24  ;;  %v5242_v40 = vadd.f32 %v21647_v56, %v5036_v54  ;;  %v5600_v10 = vadd.f32 %v21648_v1, %v5243_v11  ;;  %v21649_v63 = vld [vmem:[#allocation122_spill] sm:$0xff]  ;;  %v21651_v46 = vld [vmem:[#allocation149_spill] sm:$0xff]  ;;  %v21652_v13 = vld [vmem:[#allocation219_spill] sm:$0xff]  ;;  %v13677_v7 = vpop.f32.mrf.mxu1 }
 0x3d2   :  { %v19494_v43 = vadd.f32 %v21649_v63, %v4028_v51  ;;  %v21650_v5 = vld [vmem:[#allocation54_spill] sm:$0xff]  ;;  %v5039_v19 = vadd.f32 %v21651_v46, %v4810_v39  ;;  %v21653_v62 = vld [vmem:[#allocation216_spill] sm:$0xff]  ;;  %v21655_v30 = vld [vmem:[#allocation131_spill] sm:$0xff]  ;;  %v19503_v54 = vadd.f32 %v13677_v7, %v9300_v41 }
 0x3d3   :  { %v4257_v9 = vadd.f32 %v21650_v5, %v4020_v57  ;;  %v6392_v4 = vadd.f32 %v21653_v62, %v21652_v13  ;;  %v21654_v21 = vld [vmem:[#allocation130_spill] sm:$0xff]  ;;  %v4811_v36 = vadd.f32 %v21655_v30, %v4454_v35  ;;  %v21656_v24 = vld [vmem:[#allocation183_spill] sm:$0xff]  ;;  %v21659_v51 = vld [vmem:[#allocation133_spill] sm:$0xff] }
 0x3d4   :  { %v4813_v8 = vadd.f32 %v21654_v21, %v4456_v52  ;;  %v5599_v0 = vadd.f32 %v21656_v24, %v5242_v40  ;;  %21657 = vst [vmem:[#allocation61_spill] sm:$0xff] %v19503_v54  ;;  %v21658_v11 = vld [vmem:[#allocation143_spill] sm:$0xff]  ;;  %v4814_v1 = vadd.f32 %v21659_v51, %v4457_v28  ;;  %v21661_v63 = vld [vmem:[#allocation212_spill] sm:$0xff]  ;;  %v21662_v5 = vld [vmem:[#allocation242_spill] sm:$0xff] }
 0x3d5   :  { %v19506_v56 = vadd.f32 %v21658_v11, %v4257_v9  ;;  %v21660_v57 = vld [vmem:[#allocation215_spill] sm:$0xff]  ;;  %v6665_v46 = vadd.f32 %v21662_v5, %v6392_v4  ;;  %v21663_v13 = vld [vmem:[#allocation153_spill] sm:$0xff]  ;;  %v21665_v21 = vld [vmem:[#allocation152_spill] sm:$0xff] }
 0x3d6   :  { %v6389_v39 = vadd.f32 %v21661_v63, %v21660_v57  ;;  %v5042_v62 = vadd.f32 %v21663_v13, %v4813_v8  ;;  %v21664_v14 = vld [vmem:[#allocation155_spill] sm:$0xff]  ;;  %v5244_v35 = vadd.f32 %v21665_v21, %v5038_v59  ;;  %v21666_v30 = vld [vmem:[#allocation184_spill] sm:$0xff]  ;;  %v21668_v41 = vld [vmem:[#allocation158_spill] sm:$0xff]  ;;  %v19522_v57 = vpop.f32.mrf.mxu0 }
 0x3d7   :  { %v5040_v52 = vadd.f32 %v21664_v14, %v4811_v36  ;;  %v19516_v40 = vadd.f32 %v21666_v30, %v5600_v10  ;;  %v5043_v7 = vadd.f32 %v21668_v41, %v4814_v1  ;;  %v21669_v9 = vld [vmem:[#allocation134_spill] sm:$0xff]  ;;  %v21670_v11 = vld [vmem:[#allocation136_spill] sm:$0xff]  ;;  %v21671_v51 = vld [vmem:[#allocation239_spill] sm:$0xff]  ;;  %21672 = vst [vmem:[#allocation65_spill] sm:$0xff] %v19522_v57 }
 0x3d8   :  { %v4812_v24 = vadd.f32 %v21669_v9, %v4455_v31  ;;  %v4817_v28 = vadd.f32 %v21670_v11, %v4460_v50  ;;  %v6664_v54 = vadd.f32 %v21671_v51, %v6389_v39  ;;  %v21673_v4 = vld [vmem:[#allocation137_spill] sm:$0xff]  ;;  %v21675_v14 = vld [vmem:[#allocation180_spill] sm:$0xff]  ;;  %v21679_v1 = vld [vmem:[#allocation163_spill] sm:$0xff] }
 0x3d9   :  { %21667 = vst [vmem:[#allocation59_spill] sm:$0xff] %v19516_v40  ;;  %v4815_v63 = vadd.f32 %v21673_v4, %v4458_v45  ;;  %v21674_v8 = vld [vmem:[#allocation181_spill] sm:$0xff]  ;;  %v19527_v36 = vadd.f32 %v21675_v14, %v5599_v0  ;;  %v21677_v59 = vld [vmem:[#allocation156_spill] sm:$0xff]  ;;  %v21681_v50 = vld [vmem:[#allocation210_spill] sm:$0xff] }
 0x3da   :  { %v5601_v5 = vadd.f32 %v21674_v8, %v5244_v35  ;;  %v5245_v10 = vadd.f32 %v21677_v59, %v5039_v19  ;;  %v21678_v13 = vld [vmem:[#allocation161_spill] sm:$0xff]  ;;  %v19532_v30 = vadd.f32 %v21679_v1, %v4817_v28  ;;  %v21682_v39 = vld [vmem:[#allocation235_spill] sm:$0xff]  ;;  %v21683_v11 = vld [vmem:[#allocation166_spill] sm:$0xff]  ;;  %v5867_v19 = vmul.f32 %v19516_v40, %v19516_v40 }
 0x3db   :  { %21676 = vst [vmem:[#allocation37_spill] sm:$0xff] %v19527_v36  ;;  %v5041_v21 = vadd.f32 %v21678_v13, %v4812_v24  ;;  %v21680_v31 = vld [vmem:[#allocation213_spill] sm:$0xff]  ;;  %v6871_v9 = vadd.f32 %v21682_v39, %v6665_v46  ;;  %v19538_v51 = vadd.f32 %v21683_v11, %v4815_v63  ;;  %v21684_v45 = vld [vmem:[#allocation139_spill] sm:$0xff]  ;;  %v21687_v14 = vld [vmem:[#allocation238_spill] sm:$0xff] }
 0x3dc   :  { %v6397_v41 = vadd.f32 %v21681_v50, %v21680_v31  ;;  %v4818_v35 = vadd.f32 %v21684_v45, %v4461_v42  ;;  %v21685_v4 = vld [vmem:[#allocation185_spill] sm:$0xff]  ;;  %v19548_v50 = vpop.f32.mrf.mxu0  ;;  %v21691_v46 = vld [vmem:[#allocation178_spill] sm:$0xff]  ;;  %v5866_v42 = vmul.f32 %v19527_v36, %v19527_v36  ;;  %v21693_v39 = vld [vmem:[#allocation159_spill] sm:$0xff] }
 0x3dd   :  { %v5602_v0 = vadd.f32 %v21685_v4, %v5245_v10  ;;  %v21686_v8 = vld [vmem:[#allocation141_spill] sm:$0xff]  ;;  %21690 = vst [vmem:[#allocation10_spill] sm:$0xff] %v19548_v50  ;;  %v19551_v63 = vadd.f32 %v21691_v46, %v5601_v5  ;;  %v5844_v10 = vadd.f32 %v19516_v40, %v19527_v36  ;;  %v5248_v11 = vadd.f32 %v21693_v39, %v5042_v62  ;;  %v21697_v4 = vld [vmem:[#allocation214_spill] sm:$0xff]  ;;  %v21702_v40 = vld [vmem:[#allocation160_spill] sm:$0xff] }
 0x3de   :  { %v4816_v24 = vadd.f32 %v21686_v8, %v4459_v33  ;;  %v6666_v28 = vadd.f32 %v21687_v14, %v6397_v41  ;;  %v21688_v59 = vld [vmem:[#allocation233_spill] sm:$0xff]  ;;  %v21695_v41 = vld [vmem:[#allocation171_spill] sm:$0xff]  ;;  %v5882_v46 = vadd.f32 %v5867_v19, %v5866_v42  ;;  %v5246_v36 = vadd.f32 %v21702_v40, %v5040_v52  ;;  %v21703_v62 = vld [vmem:[#allocation146_spill] sm:$0xff]  ;;  %v19576_v22 = vpop.f32.mrf.mxu0  ;;  %v19583_v52 = vpop.f32.mrf.mxu1 }
 0x3df   :  { %v6870_v13 = vadd.f32 %v21688_v59, %v6664_v54  ;;  %v21689_v1 = vld [vmem:[#allocation273_spill] sm:$0xff]  ;;  %21692 = vst [vmem:[#allocation52_spill] sm:$0xff] %v19551_v63  ;;  %v21699_v59 = vld [vmem:[#allocation182_spill] sm:$0xff]  ;;  %v4819_v39 = vadd.f32 %v21703_v62, %v4462_v61  ;;  %v21705_v48 = vld [vmem:[#allocation232_spill] sm:$0xff] }
 0x3e0   :  { %v7228_v31 = vadd.f32 %v21689_v1, %v6871_v9  ;;  %v21694_v33 = vld [vmem:[#allocation169_spill] sm:$0xff]  ;;  %v19562_v54 = vadd.f32 %v21695_v41, %v4816_v24  ;;  %v19568_v1 = vadd.f32 %v21699_v59, %v5602_v0  ;;  %v6872_v24 = vadd.f32 %v21705_v48, %v6666_v28  ;;  %v21706_v41 = vld [vmem:[#allocation268_spill] sm:$0xff]  ;;  %21707 = vst [vmem:[#allocation27_spill] sm:$0xff] %v19576_v22  ;;  %v21708_v19 = vld [vmem:[#allocation191_spill] sm:$0xff] }
 0x3e1   :  { %v19559_v45 = vadd.f32 %v21694_v33, %v4818_v35  ;;  %v21696_v9 = vld [vmem:[#allocation217_spill] sm:$0xff]  ;;  %v5845_v0 = vadd.f32 %v5844_v10, %v19551_v63  ;;  %v5603_v42 = vadd.f32 %v21708_v19, %v5246_v36  ;;  %21710 = vst [vmem:[#allocation47_spill] sm:$0xff] %v19583_v52  ;;  %v21711_v61 = vld [vmem:[#allocation224_spill] sm:$0xff]  ;;  %v21716_v10 = vld [vmem:[#allocation186_spill] sm:$0xff] }
 0x3e2   :  { %v6400_v8 = vadd.f32 %v21697_v4, %v21696_v9  ;;  %v21698_v14 = vld [vmem:[#allocation269_spill] sm:$0xff]  ;;  %21700 = vst [vmem:[#allocation18_spill] sm:$0xff] %v19568_v1  ;;  %v7457_v2 = vadd.f32 %v21706_v41, %v7228_v31  ;;  %v21712_v40 = vld [vmem:[#allocation220_spill] sm:$0xff]  ;;  %v21713_v4 = vld [vmem:[#allocation267_spill] sm:$0xff]  ;;  %v5869_v59 = vmul.f32 %v19568_v1, %v19568_v1 }
 0x3e3   :  { %v7227_v5 = vadd.f32 %v21698_v14, %v6870_v13  ;;  %v21701_v50 = vld [vmem:[#allocation189_spill] sm:$0xff]  ;;  %v5868_v13 = vmul.f32 %v19551_v63, %v19551_v63  ;;  %v6405_v9 = vadd.f32 %v21712_v40, %v21711_v61  ;;  %v7229_v48 = vadd.f32 %v21713_v4, %v6872_v24  ;;  %v21714_v28 = vld [vmem:[#allocation264_spill] sm:$0xff]  ;;  %v21718_v36 = vld [vmem:[#allocation195_spill] sm:$0xff] }
 0x3e4   :  { %v5605_v57 = vadd.f32 %v21701_v50, %v5248_v11  ;;  %v21704_v35 = vld [vmem:[#allocation241_spill] sm:$0xff]  ;;  %v21709_v50 = vld [vmem:[#allocation162_spill] sm:$0xff]  ;;  %v21719_v41 = vld [vmem:[#allocation228_spill] sm:$0xff] }
 0x3e5   :  { %v6667_v33 = vadd.f32 %v21704_v35, %v6400_v8  ;;  %v5247_v11 = vadd.f32 %v21709_v50, %v5041_v21  ;;  %v7456_v31 = vadd.f32 %v21714_v28, %v7227_v5  ;;  %v21715_v8 = vld [vmem:[#allocation293_spill] sm:$0xff]  ;;  %v5883_v62 = vadd.f32 %v5882_v46, %v5868_v13  ;;  %v21720_v19 = vld [vmem:[#allocation223_spill] sm:$0xff]  ;;  %v21722_v40 = vld [vmem:[#allocation234_spill] sm:$0xff]  ;;  %v13663_v28 = vpop.f32.mrf.mxu0 }
 0x3e6   :  { %v7663_v14 = vadd.f32 %v21715_v8, %v7457_v2  ;;  %v19593_v35 = vadd.f32 %v21716_v10, %v5605_v57  ;;  %v6408_v50 = vadd.f32 %v21720_v19, %v21719_v41  ;;  %v21721_v63 = vld [vmem:[#allocation245_spill] sm:$0xff]  ;;  %v21723_v4 = vld [vmem:[#allocation291_spill] sm:$0xff]  ;;  %v21724_v2 = vld [vmem:[#allocation188_spill] sm:$0xff]  ;;  %v5846_v46 = vadd.f32 %v5845_v0, %v19568_v1  ;;  %v19606_v10 = vpop.f32.mrf.mxu1 }
 0x3e7   :  { %v5604_v21 = vadd.f32 %v21718_v36, %v5247_v11  ;;  %v6668_v61 = vadd.f32 %v21721_v63, %v6405_v9  ;;  %v6873_v24 = vadd.f32 %v21722_v40, %v6667_v33  ;;  %v7662_v5 = vadd.f32 %v21723_v4, %v7456_v31  ;;  %v21726_v13 = vld [vmem:[#allocation9_spill] sm:$0xff]  ;;  %21727 = vst [vmem:[#allocation23_spill] sm:$0xff] %v19606_v10  ;;  %v21729_v19 = vld [vmem:[#allocation271_spill] sm:$0xff]  ;;  %v21731_v40 = vld [vmem:[#allocation300_spill] sm:$0xff]  ;;  %v19613_v4 = vpop.f32.mrf.mxu0 }
 0x3e8   :  { %21717 = vst [vmem:[#allocation34_spill] sm:$0xff] %v19593_v35  ;;  %v19602_v8 = vadd.f32 %v21724_v2, %v5603_v42  ;;  %v5249_v57 = vadd.f32 %v21726_v13, %v5043_v7  ;;  %v9304_v11 = vadd.f32 %v13663_v28, %v19348_v53  ;;  %v21728_v36 = vld [vmem:[#allocation249_spill] sm:$0xff]  ;;  %v21730_v9 = vld [vmem:[#allocation263_spill] sm:$0xff]  ;;  %v8020_v31 = vadd.f32 %v21731_v40, %v7663_v14  ;;  %v21735_v13 = vld [vmem:[#allocation192_spill] sm:$0xff] }
 0x3e9   :  { %v6669_v41 = vadd.f32 %v21728_v36, %v6408_v50  ;;  %v7230_v63 = vadd.f32 %v21729_v19, %v6873_v24  ;;  %v7458_v33 = vadd.f32 %v21730_v9, %v7229_v48  ;;  %21732 = vst [vmem:[#allocation60_spill] sm:$0xff] %v19613_v4  ;;  %v21733_v42 = vld [vmem:[#allocation175_spill] sm:$0xff]  ;;  %v5884_v0 = vadd.f32 %v5883_v62, %v5869_v59  ;;  %v21734_v1 = vld [vmem:[#allocation193_spill] sm:$0xff]  ;;  %v21737_v53 = vld [vmem:[#allocation240_spill] sm:$0xff]  ;;  %v19628_v14 = vpop.f32.mrf.mxu0 }
 0x3ea   :  { %21725 = vst [vmem:[#allocation24_spill] sm:$0xff] %v19602_v8  ;;  %v19616_v2 = vadd.f32 %v21733_v42, %v4819_v39  ;;  %v5606_v7 = vadd.f32 %v21734_v1, %v5249_v57  ;;  %v19620_v10 = vadd.f32 %v21735_v13, %v5604_v21  ;;  %v6874_v28 = vadd.f32 %v21737_v53, %v6668_v61  ;;  %v21738_v50 = vld [vmem:[#allocation290_spill] sm:$0xff]  ;;  %v21739_v24 = vld [vmem:[#allocation296_spill] sm:$0xff]  ;;  %v19637_v57 = vpop.f32.mrf.mxu1 }
 0x3eb   :  { %v7664_v36 = vadd.f32 %v21738_v50, %v7458_v33  ;;  %v8019_v19 = vadd.f32 %v21739_v24, %v7662_v5  ;;  %v19626_v48 = vadd.f32 %v19081_v47, %v8020_v31  ;;  %21741 = vst [vmem:[#allocation16_spill] sm:$0xff] %v19628_v14  ;;  %v5872_v39 = vmul.f32 %v19593_v35, %v19593_v35  ;;  %v21742_v62 = vld [vmem:[#allocation222_spill] sm:$0xff]  ;;  %v21745_v9 = vld [vmem:[#allocation276_spill] sm:$0xff]  ;;  %v19645_v13 = vpop.f32.mrf.mxu0 }
 0x3ec   :  { %21736 = vst [vmem:[#allocation63_spill] sm:$0xff] %v19620_v10  ;;  %v5847_v59 = vadd.f32 %v5846_v46, %v19602_v8  ;;  %v5870_v1 = vmul.f32 %v19602_v8, %v19602_v8  ;;  %v21743_v21 = vld [vmem:[#allocation218_spill] sm:$0xff]  ;;  %21744 = vst [vmem:[#allocation67_spill] sm:$0xff] %v19637_v57  ;;  %v7231_v5 = vadd.f32 %v21745_v9, %v6874_v28  ;;  %v21753_v8 = vld [vmem:[#allocation280_spill] sm:$0xff] }
 0x3ed   :  { %21740 = vst [vmem:[#allocation20_spill] sm:$0xff] %v19626_v48  ;;  %v6413_v61 = vadd.f32 %v21743_v21, %v21742_v62  ;;  %v21746_v33 = vld [vmem:[#allocation246_spill] sm:$0xff]  ;;  %v19643_v42 = vadd.f32 %v19052_v23, %v8019_v19  ;;  %21749 = vst [vmem:[#allocation15_spill] sm:$0xff] %v19645_v13  ;;  %v5871_v24 = vmul.f32 %v19620_v10, %v19620_v10  ;;  %v21752_v62 = vld [vmem:[#allocation244_spill] sm:$0xff]  ;;  %v19658_v19 = vpop.f32.mrf.mxu0 }
 0x3ee   :  { %v6875_v47 = vadd.f32 %v21746_v33, %v6669_v41  ;;  %v21747_v40 = vld [vmem:[#allocation266_spill] sm:$0xff]  ;;  %v5885_v46 = vadd.f32 %v5884_v0, %v5870_v1  ;;  %v21754_v9 = vld [vmem:[#allocation292_spill] sm:$0xff]  ;;  %v8287_v23 = vmul.f32 %v19626_v48, %v19626_v48  ;;  %v5848_v0 = vadd.f32 %v5847_v59, %v19620_v10 }
 0x3ef   :  { %v7459_v31 = vadd.f32 %v21747_v40, %v7230_v63  ;;  %21748 = vst [vmem:[#allocation36_spill] sm:$0xff] %v19643_v42  ;;  %v21750_v53 = vld [vmem:[#allocation190_spill] sm:$0xff]  ;;  %v6670_v21 = vadd.f32 %v21752_v62, %v6413_v61  ;;  %v21757_v40 = vld [vmem:[#allocation165_spill] sm:$0xff]  ;;  %v8286_v13 = vmul.f32 %v19643_v42, %v19643_v42  ;;  %v19673_v14 = vpop.f32.mrf.mxu0 }
 0x3f0   :  { %v19648_v50 = vadd.f32 %v21750_v53, %v5606_v7  ;;  %v7232_v28 = vadd.f32 %v21753_v8, %v6875_v47  ;;  %v21755_v33 = vld [vmem:[#allocation294_spill] sm:$0xff]  ;;  %v21756_v7 = vld [vmem:[#allocation164_spill] sm:$0xff]  ;;  %v5250_v53 = vadd.f32 %v21757_v40, %v19538_v51  ;;  %v21759_v62 = vld [vmem:[#allocation221_spill] sm:$0xff]  ;;  %v13681_v47 = vpop.f32.mrf.mxu1 }
 0x3f1   :  { %v7665_v41 = vadd.f32 %v21754_v9, %v7459_v31  ;;  %v8021_v63 = vadd.f32 %v21755_v33, %v7664_v36  ;;  %v5252_v1 = vadd.f32 %v21756_v7, %v19532_v30  ;;  %v21758_v61 = vld [vmem:[#allocation226_spill] sm:$0xff]  ;;  %v21760_v31 = vld [vmem:[#allocation272_spill] sm:$0xff]  ;;  %v19675_v59 = vadd.f32 %v13681_v47, %v9304_v11  ;;  %v21764_v7 = vld [vmem:[#allocation247_spill] sm:$0xff]  ;;  %v19686_v22 = vpop.f32.mrf.mxu0 }
 0x3f2   :  { %21751 = vst [vmem:[#allocation69_spill] sm:$0xff] %v19648_v50  ;;  %v6416_v8 = vadd.f32 %v21759_v62, %v21758_v61  ;;  %v7460_v9 = vadd.f32 %v21760_v31, %v7231_v5  ;;  %v21761_v36 = vld [vmem:[#allocation312_spill] sm:$0xff]  ;;  %v5886_v30 = vadd.f32 %v5885_v46, %v5871_v24  ;;  %v21765_v51 = vld [vmem:[#allocation237_spill] sm:$0xff]  ;;  %v8264_v61 = vadd.f32 %v19626_v48, %v19643_v42  ;;  %v19681_v62 = vpop.f32.mrf.mxu1  ;;  %v21769_v4 = vld [vmem:[#allocation298_spill] sm:$0xff] }
 0x3f3   :  { %v19669_v33 = vadd.f32 %v21761_v36, %v8021_v63  ;;  %21763 = vst [vmem:[#allocation73_spill] sm:$0xff] %v19675_v59  ;;  %v6876_v40 = vadd.f32 %v21765_v51, %v6670_v21  ;;  %21766 = vst [vmem:[#allocation43_spill] sm:$0xff] %v19681_v62  ;;  %v21767_v5 = vld [vmem:[#allocation297_spill] sm:$0xff]  ;;  %v8022_v57 = vadd.f32 %v21769_v4, %v7665_v41  ;;  %v21770_v46 = vld [vmem:[#allocation199_spill] sm:$0xff] }
 0x3f4   :  { %v6671_v10 = vadd.f32 %v21764_v7, %v6416_v8  ;;  %v7666_v63 = vadd.f32 %v21767_v5, %v7460_v9  ;;  %v21768_v31 = vld [vmem:[#allocation277_spill] sm:$0xff]  ;;  %v8302_v52 = vadd.f32 %v8287_v23, %v8286_v13  ;;  %v5849_v11 = vadd.f32 %v5848_v0, %v19593_v35  ;;  %v21771_v21 = vld [vmem:[#allocation168_spill] sm:$0xff]  ;;  %v21772_v47 = vld [vmem:[#allocation230_spill] sm:$0xff]  ;;  %v19694_v48 = vpop.f32.mrf.mxu1  ;;  %v19703_v23 = vpop.f32.mrf.mxu0 }
 0x3f5   :  { %21762 = vst [vmem:[#allocation40_spill] sm:$0xff] %v19669_v33  ;;  %v7461_v36 = vadd.f32 %v21768_v31, %v7232_v28  ;;  %v5607_v24 = vadd.f32 %v21770_v46, %v5250_v53  ;;  %v5251_v8 = vadd.f32 %v21771_v21, %v19562_v54  ;;  %v21773_v7 = vld [vmem:[#allocation227_spill] sm:$0xff]  ;;  %21774 = vst [vmem:[#allocation25_spill] sm:$0xff] %v19694_v48  ;;  %v21776_v28 = vld [vmem:[#allocation301_spill] sm:$0xff] }
 0x3f6   :  { %v6421_v51 = vadd.f32 %v21773_v7, %v21772_v47  ;;  %v21775_v9 = vld [vmem:[#allocation275_spill] sm:$0xff]  ;;  %v8288_v4 = vmul.f32 %v19669_v33, %v19669_v33  ;;  %v21777_v13 = vld [vmem:[#allocation313_spill] sm:$0xff]  ;;  %v5887_v0 = vadd.f32 %v5886_v30, %v5872_v39  ;;  %v8265_v47 = vadd.f32 %v8264_v61, %v19669_v33  ;;  %v19708_v7 = vpop.f32.mrf.mxu1  ;;  %v21783_v42 = vld [vmem:[#allocation304_spill] sm:$0xff] }
 0x3f7   :  { %v7233_v5 = vadd.f32 %v21775_v9, %v6876_v40  ;;  %v7667_v31 = vadd.f32 %v21776_v28, %v7461_v36  ;;  %v19701_v41 = vadd.f32 %v21777_v13, %v8022_v57  ;;  %v21779_v53 = vld [vmem:[#allocation203_spill] sm:$0xff]  ;;  %21781 = vst [vmem:[#allocation21_spill] sm:$0xff] %v19708_v7  ;;  %v5873_v40 = vmul.f32 %v19648_v50, %v19648_v50  ;;  %v21782_v36 = vld [vmem:[#allocation252_spill] sm:$0xff]  ;;  %v19714_v13 = vpop.f32.mrf.mxu0  ;;  %v21784_v35 = vld [vmem:[#allocation197_spill] sm:$0xff] }
 0x3f8   :  { %v5608_v54 = vadd.f32 %v21779_v53, %v5251_v8  ;;  %v21780_v46 = vld [vmem:[#allocation243_spill] sm:$0xff]  ;;  %v6672_v9 = vadd.f32 %v21782_v36, %v6421_v51  ;;  %v8303_v28 = vadd.f32 %v8302_v52, %v8288_v4  ;;  %v8023_v57 = vadd.f32 %v21783_v42, %v7666_v63  ;;  %v21785_v30 = vld [vmem:[#allocation196_spill] sm:$0xff]  ;;  %v21787_v61 = vld [vmem:[#allocation278_spill] sm:$0xff] }
 0x3f9   :  { %21778 = vst [vmem:[#allocation66_spill] sm:$0xff] %v19701_v41  ;;  %v6877_v21 = vadd.f32 %v21780_v46, %v6671_v10  ;;  %v5609_v39 = vadd.f32 %v21784_v35, %v5252_v1  ;;  %v19718_v8 = vadd.f32 %v21785_v30, %v5607_v24  ;;  %v5850_v10 = vadd.f32 %v5849_v11, %v19648_v50  ;;  %v19722_v46 = vpop.f32.mrf.mxu1  ;;  %v21788_v33 = vld [vmem:[#allocation270_spill] sm:$0xff]  ;;  %v21790_v63 = vld [vmem:[#allocation307_spill] sm:$0xff]  ;;  %v19731_v35 = vpop.f32.mrf.mxu0  ;;  %v21792_v4 = vld [vmem:[#allocation200_spill] sm:$0xff] }
 0x3fa   :  { %v7462_v7 = vadd.f32 %v21788_v33, %v7233_v5  ;;  %v8289_v52 = vmul.f32 %v19701_v41, %v19701_v41  ;;  %v19728_v42 = vadd.f32 %v19120_v29, %v8023_v57  ;;  %v8024_v51 = vadd.f32 %v21790_v63, %v7667_v31  ;;  %v21791_v1 = vld [vmem:[#allocation150_spill] sm:$0xff]  ;;  %v21794_v5 = vld [vmem:[#allocation251_spill] sm:$0xff] }
 0x3fb   :  { %21786 = vst [vmem:[#allocation29_spill] sm:$0xff] %v19718_v8  ;;  %v7234_v53 = vadd.f32 %v21787_v61, %v6877_v21  ;;  %v4820_v24 = vadd.f32 %v21791_v1, %v19506_v56  ;;  %v5888_v11 = vadd.f32 %v5887_v0, %v5873_v40  ;;  %v19736_v21 = vadd.f32 %v21792_v4, %v5608_v54  ;;  %v19739_v33 = vpop.f32.mrf.mxu1  ;;  %v21795_v61 = vld [vmem:[#allocation295_spill] sm:$0xff]  ;;  %v19746_v63 = vpop.f32.mrf.mxu0  ;;  %v21797_v50 = vld [vmem:[#allocation194_spill] sm:$0xff]  ;;  %v21800_v40 = vld [vmem:[#allocation225_spill] sm:$0xff] }
 0x3fc   :  { %21789 = vst [vmem:[#allocation53_spill] sm:$0xff] %v19728_v42  ;;  %v8266_v36 = vadd.f32 %v8265_v47, %v19701_v41  ;;  %v6878_v30 = vadd.f32 %v21794_v5, %v6672_v9  ;;  %v7668_v29 = vadd.f32 %v21795_v61, %v7462_v7  ;;  %v8304_v57 = vadd.f32 %v8303_v28, %v8289_v52  ;;  %v21799_v47 = vld [vmem:[#allocation229_spill] sm:$0xff]  ;;  %v21801_v7 = vld [vmem:[#allocation167_spill] sm:$0xff]  ;;  %v21804_v61 = vld [vmem:[#allocation250_spill] sm:$0xff] }
 0x3fd   :  { %21793 = vst [vmem:[#allocation71_spill] sm:$0xff] %v19736_v21  ;;  %v19744_v31 = vadd.f32 %v19153_v44, %v8024_v51  ;;  %v19749_v56 = vadd.f32 %v21797_v50, %v5609_v39  ;;  %v5851_v0 = vadd.f32 %v5850_v10, %v19718_v8  ;;  %v5874_v54 = vmul.f32 %v19718_v8, %v19718_v8  ;;  %v19756_v9 = vpop.f32.mrf.mxu1  ;;  %v21802_v44 = vld [vmem:[#allocation283_spill] sm:$0xff]  ;;  %v21803_v51 = vld [vmem:[#allocation274_spill] sm:$0xff]  ;;  %v19764_v39 = vpop.f32.mrf.mxu0 }
 0x3fe   :  { %v6429_v1 = vadd.f32 %v21800_v40, %v21799_v47  ;;  %v5253_v28 = vadd.f32 %v21801_v7, %v19559_v45  ;;  %v7235_v52 = vadd.f32 %v21802_v44, %v6878_v30  ;;  %v7463_v4 = vadd.f32 %v21803_v51, %v7234_v53  ;;  %v21805_v45 = vld [vmem:[#allocation299_spill] sm:$0xff]  ;;  %v21806_v30 = vld [vmem:[#allocation302_spill] sm:$0xff] }
 0x3ff   :  { %21796 = vst [vmem:[#allocation39_spill] sm:$0xff] %v19744_v31  ;;  %21798 = vst [vmem:[#allocation42_spill] sm:$0xff] %v19749_v56  ;;  %v8290_v50 = vmul.f32 %v19728_v42, %v19728_v42  ;;  %v5889_v10 = vadd.f32 %v5888_v11, %v5874_v54  ;;  %v5875_v5 = vmul.f32 %v19736_v21, %v19736_v21  ;;  %v19770_v41 = vpop.f32.mrf.mxu1  ;;  %v19776_v8 = vpop.f32.mrf.mxu0  ;;  %v21808_v11 = vld [vmem:[#allocation78_spill] sm:$0xff]  ;;  %v21809_v48 = vld [vmem:[#allocation179_spill] sm:$0xff] }
 0x400   :  { %v6674_v47 = vadd.f32 %v21804_v61, %v6429_v1  ;;  %v8267_v40 = vadd.f32 %v8266_v36, %v19728_v42  ;;  %v7669_v7 = vadd.f32 %v21805_v45, %v7463_v4  ;;  %v8025_v44 = vadd.f32 %v21806_v30, %v7668_v29  ;;  %21807 = vst [vmem:[#allocation70_spill] sm:$0xff] %v19776_v8  ;;  %v21810_v61 = vld [vmem:[#allocation201_spill] sm:$0xff]  ;;  %v21811_v29 = vld [vmem:[#allocation142_spill] sm:$0xff]  ;;  %v21812_v4 = vld [vmem:[#allocation144_spill] sm:$0xff] }
 0x401   :  { %v8305_v53 = vadd.f32 %v8304_v57, %v8290_v50  ;;  %v8291_v51 = vmul.f32 %v19744_v31, %v19744_v31  ;;  %v19780_v54 = vadd.f32 %v21808_v11, %v19411_v3  ;;  %v5049_v1 = vadd.f32 %v21809_v48, %v4820_v24  ;;  %v19785_v59 = vpop.f32.mrf.mxu1  ;;  %v21813_v45 = vld [vmem:[#allocation281_spill] sm:$0xff]  ;;  %v19795_v3 = vpop.f32.mrf.mxu0 }
 0x402   :  { %v5610_v36 = vadd.f32 %v21810_v61, %v5253_v28  ;;  %v5852_v42 = vadd.f32 %v5851_v0, %v19736_v21  ;;  %v4465_v57 = vadd.f32 %v21811_v29, %v19494_v43  ;;  %v4821_v50 = vadd.f32 %v21812_v4, %v19486_v26  ;;  %v21815_v0 = vld [vmem:[#allocation172_spill] sm:$0xff]  ;;  %v21817_v29 = vld [vmem:[#allocation305_spill] sm:$0xff]  ;;  %v21818_v4 = vld [vmem:[#allocation306_spill] sm:$0xff] }
 0x403   :  { %v7464_v30 = vadd.f32 %v21813_v45, %v7235_v52  ;;  %v19793_v62 = vadd.f32 %v19109_v37, %v8025_v44  ;;  %v5876_v48 = vmul.f32 %v19749_v56, %v19749_v56  ;;  %v5890_v24 = vadd.f32 %v5889_v10, %v5875_v5  ;;  %v19802_v43 = vpop.f32.mrf.mxu1  ;;  %v21816_v61 = vld [vmem:[#allocation248_spill] sm:$0xff]  ;;  %v19807_v45 = vpop.f32.mrf.mxu0  ;;  %v21819_v21 = vld [vmem:[#allocation198_spill] sm:$0xff]  ;;  %v21821_v5 = vld [vmem:[#allocation207_spill] sm:$0xff] }
 0x404   :  { %v5254_v28 = vadd.f32 %v21815_v0, %v19616_v2  ;;  %v8268_v11 = vadd.f32 %v8267_v40, %v19744_v31  ;;  %v6880_v26 = vadd.f32 %v21816_v61, %v6674_v47  ;;  %v8026_v37 = vadd.f32 %v21818_v4, %v7669_v7  ;;  %v21822_v0 = vld [vmem:[#allocation176_spill] sm:$0xff] }
 0x405   :  { %21814 = vst [vmem:[#allocation32_spill] sm:$0xff] %v19793_v62  ;;  %v7670_v52 = vadd.f32 %v21817_v29, %v7464_v30  ;;  %v8306_v44 = vadd.f32 %v8305_v53, %v8291_v51  ;;  %v19810_v8 = vadd.f32 %v21819_v21, %v5610_v36  ;;  %v5853_v10 = vadd.f32 %v5852_v42, %v19749_v56  ;;  %v19815_v31 = vpop.f32.mrf.mxu1  ;;  %v21823_v30 = vld [vmem:[#allocation282_spill] sm:$0xff]  ;;  %v19825_v21 = vpop.f32.mrf.mxu0  ;;  %v21825_v42 = vld [vmem:[#allocation173_spill] sm:$0xff] }
 0x406   :  { %v5611_v2 = vadd.f32 %v21821_v5, %v5254_v28  ;;  %v5255_v40 = vadd.f32 %v21822_v0, %v5049_v1  ;;  %v3458_v47 = vmul.f32 %v21578_v20, %v21578_v20  ;;  %v7237_v61 = vadd.f32 %v21823_v30, %v6880_v26  ;;  %v21826_v28 = vld [vmem:[#allocation211_spill] sm:$0xff]  ;;  %v21827_v26 = vld [vmem:[#allocation148_spill] sm:$0xff]  ;;  %v21828_v56 = vld [vmem:[#allocation309_spill] sm:$0xff] }
 0x407   :  { %21820 = vst [vmem:[#allocation22_spill] sm:$0xff] %v19810_v8  ;;  %v8292_v7 = vmul.f32 %v19793_v62, %v19793_v62  ;;  %v19823_v53 = vadd.f32 %v19139_v55, %v8026_v37  ;;  %v5050_v51 = vadd.f32 %v21825_v42, %v4821_v50  ;;  %v5891_v36 = vadd.f32 %v5890_v24, %v5876_v48  ;;  %v19830_v4 = vpop.f32.mrf.mxu1  ;;  %v19835_v55 = vpop.f32.mrf.mxu0  ;;  %v21829_v48 = vld [vmem:[#allocation204_spill] sm:$0xff]  ;;  %v21834_v42 = vld [vmem:[#allocation170_spill] sm:$0xff] }
 0x408   :  { %v5612_v1 = vadd.f32 %v21826_v28, %v5255_v40  ;;  %v8269_v29 = vadd.f32 %v8268_v11, %v19793_v62  ;;  %v3473_v5 = vadd.f32 %v19408_v17, %v3458_v47  ;;  %v4822_v0 = vadd.f32 %v21827_v26, %v4465_v57  ;;  %v21831_v17 = vld [vmem:[#allocation177_spill] sm:$0xff]  ;;  %v21835_v26 = vld [vmem:[#allocation208_spill] sm:$0xff] }
 0x409   :  { %21824 = vst [vmem:[#allocation45_spill] sm:$0xff] %v19823_v53  ;;  %v8307_v30 = vadd.f32 %v8306_v44, %v8292_v7  ;;  %v8027_v20 = vadd.f32 %v21828_v56, %v7670_v52  ;;  %v3459_v37 = vmul.f32 %v19780_v54, %v19780_v54  ;;  %v5877_v50 = vmul.f32 %v19810_v8, %v19810_v8  ;;  %v19845_v40 = vpop.f32.mrf.mxu1  ;;  %v21832_v44 = vld [vmem:[#allocation279_spill] sm:$0xff]  ;;  %v19854_v7 = vpop.f32.mrf.mxu0 }
 0x40a   :  { %v19842_v24 = vadd.f32 %v21829_v48, %v5611_v2  ;;  %v5854_v11 = vadd.f32 %v5853_v10, %v19810_v8  ;;  %v5051_v57 = vadd.f32 %v21831_v17, %v4822_v0  ;;  %v7466_v47 = vadd.f32 %v21832_v44, %v7237_v61  ;;  %v21837_v0 = vld [vmem:[#allocation303_spill] sm:$0xff]  ;;  %v21838_v8 = vld [vmem:[#allocation205_spill] sm:$0xff] }
 0x40b   :  { %v8293_v56 = vmul.f32 %v19823_v53, %v19823_v53  ;;  %v19852_v52 = vadd.f32 %v19177_v60, %v8027_v20  ;;  %v5256_v28 = vadd.f32 %v21834_v42, %v5050_v51  ;;  %v5892_v2 = vadd.f32 %v5891_v36, %v5877_v50  ;;  %v19861_v62 = vpop.f32.mrf.mxu1  ;;  %v19864_v44 = vpop.f32.mrf.mxu0 }
 0x40c   :  { %21830 = vst [vmem:[#allocation17_spill] sm:$0xff] %v19842_v24  ;;  %v19858_v48 = vadd.f32 %v21835_v26, %v5612_v1  ;;  %v8270_v10 = vadd.f32 %v8269_v29, %v19823_v53  ;;  %v7672_v61 = vadd.f32 %v21837_v0, %v7466_v47  ;;  %v5855_v20 = vadd.f32 %v5854_v11, %v19842_v24  ;;  %v21844_v53 = vld [vmem:[#allocation209_spill] sm:$0xff] }
 0x40d   :  { %21833 = vst [vmem:[#allocation75_spill] sm:$0xff] %v19852_v52  ;;  %v8308_v17 = vadd.f32 %v8307_v30, %v8293_v56  ;;  %v5613_v60 = vadd.f32 %v21838_v8, %v5256_v28  ;;  %v5878_v51 = vmul.f32 %v19842_v24, %v19842_v24  ;;  %v19870_v36 = vpop.f32.mrf.mxu1  ;;  %v3436_v1 = vadd.f32 %v19406_v49, %v19780_v54  ;;  %v19878_v47 = vpop.f32.mrf.mxu0  ;;  %v21839_v56 = vld [vmem:[#allocation174_spill] sm:$0xff]  ;;  %v21840_v49 = vld [vmem:[#allocation308_spill] sm:$0xff] }
 0x40e   :  { %21836 = vst [vmem:[#allocation48_spill] sm:$0xff] %v19858_v48  ;;  %v3474_v29 = vadd.f32 %v3473_v5, %v3459_v37  ;;  %v8294_v50 = vmul.f32 %v19852_v52, %v19852_v52  ;;  %v9290_v30 = vadd.f32 %v19370_v27, %v19265_v12  ;;  %v5257_v11 = vadd.f32 %v21839_v56, %v5051_v57 }
 0x40f   :  { %v5893_v8 = vadd.f32 %v5892_v2, %v5878_v51  ;;  %v5879_v42 = vmul.f32 %v19858_v48, %v19858_v48  ;;  %v8271_v28 = vadd.f32 %v8270_v10, %v19852_v52  ;;  %v19884_v26 = vpop.f32.mrf.mxu1  ;;  %v8029_v5 = vadd.f32 %v21840_v49, %v7672_v61  ;;  %v13723_v27 = vpop.f32.mrf.mxu0  ;;  %v21841_v2 = vld [vmem:[#allocation125_spill] sm:$0xff]  ;;  %v21842_v51 = vld [vmem:[#allocation202_spill] sm:$0xff] }
 0x410   :  { %v8309_v37 = vadd.f32 %v8308_v17, %v8294_v50  ;;  %v8295_v0 = vmul.f32 %v19202_v25, %v19202_v25  ;;  %v9291_v12 = vadd.f32 %v19389_v38, %v19278_v18  ;;  %v3460_v57 = vmul.f32 %v21841_v2, %v21841_v2  ;;  %v21845_v49 = vld [vmem:[#allocation77_spill] sm:$0xff] }
 0x411   :  { %v19894_v56 = vadd.f32 %v21842_v51, %v5613_v60  ;;  %v5614_v10 = vadd.f32 %v21844_v53, %v5257_v11  ;;  %v5856_v52 = vadd.f32 %v5855_v20, %v19858_v48  ;;  %v19898_v24 = vpop.f32.mrf.mxu1  ;;  %v3437_v61 = vadd.f32 %v3436_v1, %v21841_v2  ;;  %v10376_v50 = vpop.f32.mrf.mxu0 }
 0x412   :  { %v19902_v17 = vadd.f32 %v19172_v32, %v8029_v5  ;;  %v9293_v18 = vadd.f32 %v19377_v58, %v19272_v34  ;;  %v9647_v38 = vadd.f32 %v19382_v6, %v9290_v30  ;;  %v3461_v60 = vmul.f32 %v21845_v49, %v21845_v49  ;;  %v21846_v5 = vld [vmem:[#allocation30_spill] sm:$0xff] }
 0x413   :  { %21843 = vst [vmem:[#allocation58_spill] sm:$0xff] %v19894_v56  ;;  %v3475_v51 = vadd.f32 %v3474_v29, %v3460_v57  ;;  %v5894_v53 = vadd.f32 %v5893_v8, %v5879_v42  ;;  %v8272_v20 = vadd.f32 %v8271_v28, %v19202_v25  ;;  %v19910_v11 = vpop.f32.mrf.mxu1  ;;  %v8310_v48 = vadd.f32 %v8309_v37, %v8295_v0  ;;  %v13724_v58 = vpop.f32.mrf.mxu0  ;;  %v21847_v30 = vld [vmem:[#allocation206_spill] sm:$0xff] }
 0x414   :  { %v9294_v32 = vadd.f32 %v19413_v15, %v19295_v16  ;;  %v9876_v1 = vadd.f32 %v19673_v14, %v9647_v38  ;;  %v9648_v34 = vadd.f32 %v21846_v5, %v9291_v12  ;;  %v5880_v6 = vmul.f32 %v19894_v56, %v19894_v56  ;;  %v21848_v8 = vld [vmem:[#allocation38_spill] sm:$0xff]  ;;  %v21849_v14 = vld [vmem:[#allocation31_spill] sm:$0xff]  ;;  %v21850_v38 = vld [vmem:[#allocation289_spill] sm:$0xff] }
 0x415   :  { %v19919_v2 = vadd.f32 %v21847_v30, %v5614_v10  ;;  %v5857_v29 = vadd.f32 %v5856_v52, %v19894_v56  ;;  %v9878_v42 = vadd.f32 %v19658_v19, %v21848_v8  ;;  %v19924_v28 = vpop.f32.mrf.mxu1  ;;  %v19927_v16 = vadd.f32 %v3437_v61, %v21845_v49  ;;  %v10379_v12 = vpop.f32.mrf.mxu0  ;;  %v21851_v19 = vld [vmem:[#allocation44_spill] sm:$0xff]  ;;  %v21852_v25 = vld [vmem:[#allocation14_spill] sm:$0xff] }
 0x416   :  { %v8296_v15 = vmul.f32 %v19902_v17, %v19902_v17  ;;  %v9650_v37 = vadd.f32 %v21849_v14, %v9293_v18  ;;  %v9877_v0 = vadd.f32 %v19703_v23, %v9648_v34  ;;  %v19933_v57 = vadd.f32 %v3475_v51, %v3461_v60  ;;  %v21853_v51 = vld [vmem:[#allocation285_spill] sm:$0xff]  ;;  %v21855_v14 = vld [vmem:[#allocation254_spill] sm:$0xff] }
 0x417   :  { %v5895_v10 = vadd.f32 %v5894_v53, %v5880_v6  ;;  %v8273_v52 = vadd.f32 %v8272_v20, %v19902_v17  ;;  %v9295_v5 = vadd.f32 %v21851_v19, %v21850_v38  ;;  %v19938_v30 = vpop.f32.mrf.mxu1  ;;  %v9651_v56 = vadd.f32 %v21852_v25, %v9294_v32  ;;  %v21854_v53 = vld [vmem:[#allocation49_spill] sm:$0xff]  ;;  %v13727_v32 = vpop.f32.mrf.mxu0 }
 0x418   :  { %v8311_v61 = vadd.f32 %v8310_v48, %v8296_v15  ;;  %v9879_v8 = vadd.f32 %v19686_v22, %v9650_v37  ;;  %v10082_v18 = vadd.f32 %v19739_v33, %v9876_v1  ;;  %v5881_v23 = vmul.f32 %v19919_v2, %v19919_v2  ;;  %v21856_v15 = vld [vmem:[#allocation33_spill] sm:$0xff] }
 0x419   :  { %v19946_v60 = vadd.f32 %v5857_v29, %v19919_v2  ;;  %v9297_v20 = vadd.f32 %v21854_v53, %v21853_v51  ;;  %v13741_v34 = vpop.f32.mrf.mxu1  ;;  %v10084_v6 = vadd.f32 %v19722_v46, %v9878_v42  ;;  %v8297_v48 = vmul.f32 %v21855_v14, %v21855_v14  ;;  %v21857_v51 = vld [vmem:[#allocation259_spill] sm:$0xff] }
 0x41a   :  { %v9880_v22 = vadd.f32 %v19731_v35, %v9651_v56  ;;  %v10439_v25 = vadd.f32 %v10376_v50, %v10082_v18  ;;  %v10083_v33 = vadd.f32 %v19770_v41, %v9877_v0  ;;  %v19955_v1 = vadd.f32 %v5895_v10, %v5881_v23  ;;  %v10392_v56 = vpop.f32.mrf.mxu0  ;;  %v21858_v50 = vld [vmem:[#allocation260_spill] sm:$0xff]  ;;  %v21859_v41 = vld [vmem:[#allocation65_spill] sm:$0xff]  ;;  %v21860_v10 = vld [vmem:[#allocation35_spill] sm:$0xff] }
 0x41b   :  { %v8274_v29 = vadd.f32 %v8273_v52, %v21855_v14  ;;  %v9652_v37 = vadd.f32 %v21856_v15, %v9295_v5  ;;  %v10605_v38 = vpop.f32.mrf.mxu1  ;;  %v10441_v19 = vadd.f32 %v13723_v27, %v10084_v6  ;;  %v19961_v46 = vmul.f32 %v21857_v51, %v21857_v51  ;;  %v21861_v52 = vld [vmem:[#allocation13_spill] sm:$0xff]  ;;  %v21862_v6 = vld [vmem:[#allocation236_spill] sm:$0xff] }
 0x41c   :  { %v8312_v42 = vadd.f32 %v8311_v61, %v8297_v48  ;;  %v10085_v53 = vadd.f32 %v19756_v9, %v9879_v8  ;;  %v10440_v35 = vadd.f32 %v10379_v12, %v10083_v33  ;;  %v9298_v0 = vadd.f32 %v21859_v41, %v21858_v50  ;;  %v13728_v12 = vpop.f32.mrf.mxu0  ;;  %v21863_v48 = vld [vmem:[#allocation262_spill] sm:$0xff]  ;;  %v21864_v50 = vld [vmem:[#allocation284_spill] sm:$0xff] }
 0x41d   :  { %v9882_v18 = vadd.f32 %v19714_v13, %v21860_v10  ;;  %v9654_v23 = vadd.f32 %v21861_v52, %v9297_v20  ;;  %v9881_v5 = vadd.f32 %v19764_v39, %v9652_v37  ;;  %v13742_v27 = vpop.f32.mrf.mxu1  ;;  %v8298_v15 = vmul.f32 %v21862_v6, %v21862_v6  ;;  %v21865_v41 = vld [vmem:[#allocation10_spill] sm:$0xff] }
 0x41e   :  { %v19972_v14 = vadd.f32 %v10605_v38, %v10439_v25  ;;  %v10442_v61 = vadd.f32 %v13724_v58, %v10085_v53  ;;  %v10086_v9 = vadd.f32 %v19802_v43, %v9880_v22  ;;  %v8275_v8 = vadd.f32 %v8274_v29, %v21862_v6  ;;  %v21866_v38 = vld [vmem:[#allocation286_spill] sm:$0xff]  ;;  %v21867_v43 = vld [vmem:[#allocation27_spill] sm:$0xff] }
 0x41f   :  { %v8299_v33 = vmul.f32 %v21863_v48, %v21863_v48  ;;  %v9883_v13 = vadd.f32 %v19746_v63, %v9654_v23  ;;  %v19979_v20 = vadd.f32 %v13741_v34, %v10441_v19  ;;  %v10608_v39 = vpop.f32.mrf.mxu1  ;;  %v8313_v37 = vadd.f32 %v8312_v42, %v8298_v15  ;;  %v21868_v53 = vld [vmem:[#allocation47_spill] sm:$0xff]  ;;  %v10395_v34 = vpop.f32.mrf.mxu0 }
 0x420   :  { %v9301_v10 = vadd.f32 %v21865_v41, %v21864_v50  ;;  %v19983_v25 = vadd.f32 %v10608_v39, %v10440_v35  ;;  %v10443_v58 = vadd.f32 %v10392_v56, %v10086_v9  ;;  %v9299_v22 = vadd.f32 %v21867_v43, %v21866_v38  ;;  %v21869_v39 = vld [vmem:[#allocation61_spill] sm:$0xff]  ;;  %v21870_v50 = vld [vmem:[#allocation70_spill] sm:$0xff]  ;;  %v21871_v38 = vld [vmem:[#allocation23_spill] sm:$0xff] }
 0x421   :  { %v9655_v29 = vadd.f32 %v21868_v53, %v9298_v0  ;;  %v13745_v52 = vpop.f32.mrf.mxu1  ;;  %v10088_v6 = vadd.f32 %v19785_v59, %v9882_v18  ;;  %v10087_v63 = vadd.f32 %v19830_v4, %v9881_v5  ;;  %v10706_v19 = vmul.f32 %v19972_v14, %v19972_v14  ;;  %v21872_v43 = vld [vmem:[#allocation67_spill] sm:$0xff] }
 0x422   :  { %v19992_v42 = vadd.f32 %v13742_v27, %v10442_v61  ;;  %v10684_v35 = vadd.f32 %v19983_v25, %v19972_v14  ;;  %v10707_v56 = vmul.f32 %v19983_v25, %v19983_v25  ;;  %v10708_v0 = vmul.f32 %v19979_v20, %v19979_v20 }
 0x423   :  { %v9884_v23 = vadd.f32 %v19795_v3, %v9655_v29  ;;  %v10621_v59 = vpop.f32.mrf.mxu1  ;;  %v10445_v18 = vadd.f32 %v13727_v32, %v10088_v6  ;;  %v10089_v4 = vadd.f32 %v19815_v31, %v9883_v13  ;;  %v10444_v61 = vadd.f32 %v10395_v34, %v10087_v63 }
 0x424   :  { %v10685_v5 = vadd.f32 %v10684_v35, %v19979_v20  ;;  %v10722_v15 = vadd.f32 %v10707_v56, %v10706_v19  ;;  %v20003_v27 = vadd.f32 %v10621_v59, %v10443_v58  ;;  %v8276_v9 = vadd.f32 %v8275_v8, %v21863_v48  ;;  %v13731_v58 = vpop.f32.mrf.mxu0 }
 0x425   :  { %v9886_v41 = vadd.f32 %v21870_v50, %v21869_v39  ;;  %v9658_v3 = vadd.f32 %v21871_v38, %v9301_v10  ;;  %v9656_v53 = vadd.f32 %v21872_v43, %v9299_v22  ;;  %v13746_v29 = vpop.f32.mrf.mxu1  ;;  %v10709_v32 = vmul.f32 %v19992_v42, %v19992_v42 }
 0x426   :  { %v10723_v31 = vadd.f32 %v10722_v15, %v10708_v0  ;;  %v10686_v6 = vadd.f32 %v10685_v5, %v19992_v42  ;;  %v10446_v13 = vadd.f32 %v13728_v12, %v10089_v4  ;;  %v20015_v34 = vadd.f32 %v13745_v52, %v10445_v18  ;;  %v10408_v59 = vpop.f32.mrf.mxu0  ;;  %v21873_v4 = vld [vmem:[#allocation310_spill] sm:$0xff] }
 0x427   :  { %v9887_v63 = vadd.f32 %v19807_v45, %v9658_v3  ;;  %v9885_v8 = vadd.f32 %v19825_v21, %v9656_v53  ;;  %v10624_v19 = vpop.f32.mrf.mxu1  ;;  %v10090_v10 = vadd.f32 %v19861_v62, %v9884_v23  ;;  %v10710_v35 = vmul.f32 %v20003_v27, %v20003_v27  ;;  %v21874_v45 = vld [vmem:[#allocation60_spill] sm:$0xff] }
 0x428   :  { %v10687_v22 = vadd.f32 %v10686_v6, %v20003_v27  ;;  %v10724_v56 = vadd.f32 %v10723_v31, %v10709_v32  ;;  %v20021_v0 = vadd.f32 %v10624_v19, %v10444_v61  ;;  %v8277_v12 = vadd.f32 %v8276_v9, %v21857_v51  ;;  %v13732_v61 = vpop.f32.mrf.mxu0  ;;  %v21875_v31 = vld [vmem:[#allocation311_spill] sm:$0xff]  ;;  %v21876_v6 = vld [vmem:[#allocation16_spill] sm:$0xff] }
 0x429   :  { %v9302_v5 = vadd.f32 %v21874_v45, %v21873_v4  ;;  %v13749_v21 = vpop.f32.mrf.mxu1  ;;  %v10092_v52 = vadd.f32 %v19845_v40, %v9886_v41  ;;  %v10447_v18 = vadd.f32 %v10408_v59, %v10090_v10  ;;  %v20027_v62 = vadd.f32 %v13746_v29, %v10446_v13  ;;  %v21877_v19 = vld [vmem:[#allocation11_spill] sm:$0xff] }
 0x42a   :  { %v10725_v15 = vadd.f32 %v10724_v56, %v10710_v35  ;;  %v10688_v23 = vadd.f32 %v10687_v22, %v20021_v0  ;;  %v10711_v39 = vmul.f32 %v20021_v0, %v20021_v0  ;;  %v8314_v50 = vadd.f32 %v8313_v37, %v8299_v33  ;;  %v10411_v32 = vpop.f32.mrf.mxu0  ;;  %v21878_v33 = vld [vmem:[#allocation15_spill] sm:$0xff] }
 0x42b   :  { %v10637_v38 = vpop.f32.mrf.mxu1  ;;  %v10449_v3 = vadd.f32 %v13731_v58, %v10092_v52  ;;  %v10093_v9 = vadd.f32 %v19870_v36, %v9887_v63  ;;  %v10091_v43 = vadd.f32 %v19884_v26, %v9885_v8  ;;  %v10712_v40 = vmul.f32 %v20015_v34, %v20015_v34  ;;  %v21879_v58 = vld [vmem:[#allocation43_spill] sm:$0xff] }
 0x42c   :  { %v10689_v41 = vadd.f32 %v10688_v23, %v20015_v34  ;;  %v10726_v53 = vadd.f32 %v10725_v15, %v10711_v39  ;;  %v20037_v29 = vadd.f32 %v10637_v38, %v10447_v18  ;;  %v9305_v13 = vadd.f32 %v21876_v6, %v21875_v31  ;;  %v21880_v56 = vld [vmem:[#allocation231_spill] sm:$0xff]  ;;  %v21883_v38 = vld [vmem:[#allocation73_spill] sm:$0xff] }
 0x42d   :  { %v9303_v37 = vadd.f32 %v21878_v33, %v21877_v19  ;;  %v9659_v10 = vadd.f32 %v21879_v58, %v9302_v5  ;;  %v13750_v36 = vpop.f32.mrf.mxu1  ;;  %v10448_v63 = vadd.f32 %v10411_v32, %v10091_v43  ;;  %v10713_v26 = vmul.f32 %v20027_v62, %v20027_v62  ;;  %v21884_v43 = vld [vmem:[#allocation25_spill] sm:$0xff] }
 0x42e   :  { %v10727_v8 = vadd.f32 %v10726_v53, %v10712_v40  ;;  %v10690_v22 = vadd.f32 %v10689_v41, %v20027_v62  ;;  %v10450_v35 = vadd.f32 %v13732_v61, %v10093_v9  ;;  %v8301_v59 = vmul.f32 %v21880_v56, %v21880_v56 }
 0x42f   :  { %v8315_v4 = vadd.f32 %v8314_v50, %v19961_v46  ;;  %v9888_v45 = vadd.f32 %v19854_v7, %v9659_v10  ;;  %v20051_v52 = vadd.f32 %v13749_v21, %v10449_v3  ;;  %v10640_v18 = vpop.f32.mrf.mxu1  ;;  %v10714_v15 = vmul.f32 %v20037_v29, %v20037_v29  ;;  %v21885_v50 = vld [vmem:[#allocation21_spill] sm:$0xff] }
 0x430   :  { %v10691_v5 = vadd.f32 %v10690_v22, %v20037_v29  ;;  %v10728_v23 = vadd.f32 %v10727_v8, %v10713_v26  ;;  %v20056_v39 = vadd.f32 %v10640_v18, %v10448_v63  ;;  %v8278_v61 = vadd.f32 %v8277_v12, %v21880_v56 }
 0x431   :  { %21881 = vst [vmem:[#allocation26_spill] sm:$0xff] %v20051_v52  ;;  %v9890_v9 = vadd.f32 %v19835_v55, %v21883_v38  ;;  %v9662_v46 = vadd.f32 %v21884_v43, %v9305_v13  ;;  %v9660_v7 = vadd.f32 %v21885_v50, %v9303_v37  ;;  %v13753_v21 = vpop.f32.mrf.mxu1  ;;  %v20063_v40 = vadd.f32 %v13750_v36, %v10450_v35  ;;  %v13735_v13 = vpop.f32.mrf.mxu0 }
 0x432   :  { %21882 = vst [vmem:[#allocation19_spill] sm:$0xff] %v20056_v39  ;;  %v10729_v3 = vadd.f32 %v10728_v23, %v10714_v15  ;;  %v10692_v41 = vadd.f32 %v10691_v5, %v20056_v39  ;;  %v10715_v53 = vmul.f32 %v20056_v39, %v20056_v39  ;;  %v5859_v32 = vrot.slane %v19946_v60, 4 }
 0x433   :  { %21886 = vst [vmem:[#allocation86_spill] sm:$0xff] %v20063_v40  ;;  %v8316_v31 = vadd.f32 %v8315_v4, %v8301_v59  ;;  %v9891_v12 = vadd.f32 %v19864_v44, %v9662_v46  ;;  %v9889_v55 = vadd.f32 %v19878_v47, %v9660_v7  ;;  %v10653_v6 = vpop.f32.mrf.mxu1  ;;  %v10716_v19 = vmul.f32 %v20051_v52, %v20051_v52  ;;  %v10424_v44 = vpop.f32.mrf.mxu0 }
 0x434   :  { %v10693_v33 = vadd.f32 %v10692_v41, %v20051_v52  ;;  %v10730_v37 = vadd.f32 %v10729_v3, %v10715_v53  ;;  %v10094_v58 = vadd.f32 %v19910_v11, %v9888_v45  ;;  %v3439_v10 = vrot.slane %v19927_v16, 4  ;;  %v21941_v52 = vld [vmem:[#allocation236_spill] sm:$0xff] }
 0x435   :  { %v5897_v36 = vrot.slane %v19955_v1, 4  ;;  %v8279_v63 = vrot.slane %v8278_v61, 4  ;;  %v10096_v26 = vadd.f32 %v19898_v24, %v9890_v9  ;;  %v10717_v47 = vmul.f32 %v20063_v40, %v20063_v40  ;;  %v13754_v45 = vpop.f32.mrf.mxu1  ;;  %v13736_v5 = vpop.f32.mrf.mxu0 }
 0x436   :  { %v10731_v8 = vadd.f32 %v10730_v37, %v10716_v19  ;;  %v10451_v22 = vadd.f32 %v10424_v44, %v10094_v58  ;;  %v10694_v35 = vadd.f32 %v10693_v33, %v20063_v40  ;;  %v3477_v59 = vrot.slane %v19933_v57, 4 }
 0x437   :  { %v5860_v4 = vadd.f32 %v5859_v32, %v19946_v60  ;;  %v8317_v11 = vrot.slane %v8316_v31, 4  ;;  %v10097_v18 = vadd.f32 %v19924_v28, %v9891_v12  ;;  %v10453_v15 = vadd.f32 %v13735_v13, %v10096_v26  ;;  %v10427_v50 = vpop.f32.mrf.mxu0  ;;  %v10656_v32 = vpop.f32.mrf.mxu1 }
 0x438   :  { %v20084_v23 = vadd.f32 %v10653_v6, %v10451_v22  ;;  %v10732_v24 = vadd.f32 %v10731_v8, %v10717_v47  ;;  %v10095_v38 = vadd.f32 %v19938_v30, %v9889_v55  ;;  %v3440_v9 = vadd.f32 %v3439_v10, %v19927_v16 }
 0x439   :  { %v5898_v43 = vadd.f32 %v5897_v36, %v19955_v1  ;;  %v8280_v46 = vadd.f32 %v8279_v63, %v8278_v61  ;;  %v10454_v3 = vadd.f32 %v13736_v5, %v10097_v18  ;;  %v3478_v41 = vadd.f32 %v3477_v59, %v19933_v57 }
 0x43a   :  { %v10695_v7 = vadd.f32 %v10694_v35, %v20084_v23  ;;  %v10718_v60 = vmul.f32 %v20084_v23, %v20084_v23  ;;  %v10452_v28 = vadd.f32 %v10427_v50, %v10095_v38  ;;  %v5861_v53 = vrot.slane %v5860_v4, 2 }
 0x43b   :  { %v8318_v12 = vadd.f32 %v8317_v11, %v8316_v31  ;;  %v20093_v6 = vadd.f32 %v13753_v21, %v10453_v15  ;;  %v3441_v1 = vrot.slane %v3440_v9, 2  ;;  %v5899_v61 = vrot.slane %v5898_v43, 2 }
 0x43c   :  { %v10733_v30 = vadd.f32 %v10732_v24, %v10718_v60  ;;  %v20095_v16 = vadd.f32 %v10656_v32, %v10452_v28  ;;  %v8281_v55 = vrot.slane %v8280_v46, 2  ;;  %v20097_v13 = vadd.f32 %v13754_v45, %v10454_v3 }
 0x43d   :  { %21887 = vst [vmem:[#allocation46_spill] sm:$0xff] %v20093_v6  ;;  %v3479_v37 = vrot.slane %v3478_v41, 2  ;;  %v5862_v57 = vadd.f32 %v5861_v53, %v5860_v4  ;;  %v8319_v58 = vrot.slane %v8318_v12, 2  ;;  %v10720_v21 = vmul.f32 %v20093_v6, %v20093_v6 }
 0x43e   :  { %21888 = vst [vmem:[#allocation28_spill] sm:$0xff] %v20097_v13  ;;  %v10696_v19 = vadd.f32 %v10695_v7, %v20095_v16  ;;  %v10719_v33 = vmul.f32 %v20095_v16, %v20095_v16  ;;  %v3442_v36 = vadd.f32 %v3441_v1, %v3440_v9  ;;  %v5900_v63 = vadd.f32 %v5899_v61, %v5898_v43 }
 0x43f   :  { %v8282_v26 = vadd.f32 %v8281_v55, %v8280_v46  ;;  %v10721_v44 = vmul.f32 %v20097_v13, %v20097_v13  ;;  %v3480_v22 = vadd.f32 %v3479_v37, %v3478_v41  ;;  %v5863_v35 = vrot.slane %v5862_v57, 1 }
 0x440   :  { %v10697_v31 = vadd.f32 %v10696_v19, %v20093_v6  ;;  %v10734_v10 = vadd.f32 %v10733_v30, %v10719_v33  ;;  %v8320_v59 = vadd.f32 %v8319_v58, %v8318_v12  ;;  %v3443_v45 = vrot.slane %v3442_v36, 1 }
 0x441   :  { %v5901_v18 = vrot.slane %v5900_v63, 1  ;;  %v8283_v5 = vrot.slane %v8282_v26, 1  ;;  %v3481_v38 = vrot.slane %v3480_v22, 1  ;;  %v5864_v9 = vadd.f32 %v5863_v35, %v5862_v57 }
 0x442   :  { %v10698_v47 = vadd.f32 %v10697_v31, %v20097_v13  ;;  %v10735_v8 = vadd.f32 %v10734_v10, %v10720_v21  ;;  %v8321_v43 = vrot.slane %v8320_v59, 1  ;;  %v3444_v7 = vadd.f32 %v3443_v45, %v3442_v36  ;;  %v21924_v13 = vld [vmem:[#allocation66_spill] sm:$0xff] }
 0x443   :  { %v5902_v60 = vadd.f32 %v5901_v18, %v5900_v63  ;;  %v8284_v3 = vadd.f32 %v8283_v5, %v8282_v26  ;;  %v3482_v41 = vadd.f32 %v3481_v38, %v3480_v22 }
 0x444   :  { %v10699_v4 = vrot.slane %v10698_v47, 4  ;;  %v10736_v11 = vadd.f32 %v10735_v8, %v10721_v44  ;;  %v5865_v32 = vadd.f32 %v5864_v9, %v3444_v7  ;;  %v8322_v12 = vadd.f32 %v8321_v43, %v8320_v59  ;;  %v10765_v8 = vld [vmem:[%s20897_s2] sm:$0x1]  ;;  %s14026_s2 = smov [#allocation4]  }
 0x445   :  { %v5903_v61 = vadd.f32 %v5902_v60, %v3482_v41  ;;  %v10789_v44 = vlaneseq  ;;  %v21889_v60 = vld [vmem:[#allocation255_spill] sm:$0xff]  ;;  %v21892_v41 = vld [vmem:[#allocation257_spill] sm:$0xff] }
 0x446   :  { %v10700_v15 = vadd.f32 %v10699_v4, %v10698_v47  ;;  %v10737_v24 = vrot.slane %v10736_v11, 4  ;;  %v8285_v55 = vadd.f32 %v8284_v3, %v5865_v32  ;;  %v10769_v4 = vld [vmem:[%s20898_s3] sm:$0x1]  ;;  %s11685_s3 = sshll.u32 %s14026_s2, 4  ;;  %s11686_s3 = int_to_ptr.vmem [resolvable:$true] %s11685_s3 }
 0x447   :  { %v8323_v37 = vadd.f32 %v8322_v12, %v5903_v61  ;;  %v10790_v47 = vshrl.u32 %v10789_v44, 7  ;;  %v21893_v12 = vld [vmem:[#allocation258_spill] sm:$0xff]  ;;  %v21901_v44 = vld [vmem:[#allocation55_spill] sm:$0xff]  ;;  %s14003_s9 = scalar_lea.vmem %s11686_s3, 4096  ;;  %p14008_p1 = scmp.lt.s32.totalorder %s11686_s3, %s11686_s3 }
 0x448   :  { %v10701_v46 = vrot.slane %v10700_v15, 2  ;;  %v10738_v50 = vadd.f32 %v10737_v24, %v10736_v11  ;;  %p14004_p0 = scmp.ne.s32.totalorder %s11686_s3, %s14003_s9  ;;  %p14009_p2 = scmp.lt.s32.totalorder %s14003_s9, %s14003_s9 }
 0x449   :  { %v10791_v22 = vsub.s32 0, %v10790_v47 }
 0x44a   :  { %v10702_v28 = vadd.f32 %v10701_v46, %v10700_v15  ;;  %v10739_v53 = vrot.slane %v10738_v50, 2  ;;  %p14010_p3 = por %p14009_p2, %p14008_p1 }
 0x44c   :  { %v10703_v30 = vrot.slane %v10702_v28, 1  ;;  %v10740_v1 = vadd.f32 %v10739_v53, %v10738_v50  ;;  %v21891_v53 = vld [vmem:[#allocation265_spill] sm:$0xff]  ;;  %p14011_p4 = pnand %p14010_p3, %p14004_p0 }
 0x44e   :  { %v10704_v19 = vadd.f32 %v10703_v30, %v10702_v28  ;;  %v10741_v33 = vrot.slane %v10740_v1, 1  ;;  %v21890_v28 = vld [vmem:[#allocation253_spill] sm:$0xff] }
 0x450   :  { %v10705_v58 = vadd.f32 %v10704_v19, %v8285_v55  ;;  %v10742_v57 = vadd.f32 %v10741_v33, %v10740_v1  ;;  %v21894_v1 = vld [vmem:[#allocation287_spill] sm:$0xff]  ;;  %v21895_v55 = vld [vmem:[#allocation261_spill] sm:$0xff]  ;;  %v21896_v33 = vld [vmem:[#allocation288_spill] sm:$0xff] }
 0x452   :  { %v10743_v21 = vadd.f32 %v10742_v57, %v8323_v37  ;;  %v10761_v31 = vmul.f32 0.001953125, %v10705_v58  ;;  %v21897_v58 = vld [vmem:[#allocation114_spill] sm:$0xff] }
 0x454   :  { %v10762_v10 = vmul.f32 0.001953125, %v10743_v21  ;;  %v10763_v36 = vmul.f32 %v10761_v31, %v10761_v31  ;;  %v21898_v21 = vld [vmem:[#allocation12_spill] sm:$0xff] }
 0x456   :  { %v10764_v63 = vsub.f32 %v10762_v10, %v10763_v36  ;;  %v21899_v10 = vld [vmem:[#allocation109_spill] sm:$0xff] }
 0x458   :  { %v10766_v26 = vadd.f32 1e-05, %v10764_v63  ;;  %v21900_v63 = vld [vmem:[#allocation119_spill] sm:$0xff] }
 0x45a   :  { %13873 = vrsqrt.f32 %v10766_v26 }
 0x467   :  { %v13874_v35 = vpop.eup %13873 }
 0x468   :  { %v10768_v59 = vmul.f32 %v13874_v35, %v10765_v8 }
 0x46a   :  { %v10770_v11 = vmul.f32 %v10768_v59, %v10761_v31  ;;  %v20114_v45 = vrot.slane %v10768_v59, %v10791_v22 }
 0x46c   :  { %v10771_v18 = vsub.f32 %v10769_v4, %v10770_v11  ;;  %v11484_v5 = vmul.f32 %v20114_v45, %v20084_v23  ;;  %v11485_v15 = vmul.f32 %v20114_v45, %v20095_v16  ;;  %v10794_v3 = vmul.f32 %v20114_v45, %v21889_v60  ;;  %v21903_v4 = vld [vmem:[#allocation37_spill] sm:$0xff] }
 0x46d   :  { %v10795_v23 = vmul.f32 %v20114_v45, %v21890_v28  ;;  %v10796_v16 = vmul.f32 %v20114_v45, %v21891_v53  ;;  %v10797_v32 = vmul.f32 %v20114_v45, %v21892_v41  ;;  %v10798_v30 = vmul.f32 %v20114_v45, %v21893_v12  ;;  %v21909_v28 = vld [vmem:[#allocation34_spill] sm:$0xff]  ;;  %v21910_v41 = vld [vmem:[#allocation69_spill] sm:$0xff] }
 0x46e   :  { %v20120_v24 = vrot.slane %v10771_v18, %v10791_v22  ;;  %v10799_v61 = vmul.f32 %v20114_v45, %v21894_v1  ;;  %v10800_v19 = vmul.f32 %v20114_v45, %v21895_v55  ;;  %v10801_v37 = vmul.f32 %v20114_v45, %v21896_v33  ;;  %v21902_v22 = vld [vmem:[#allocation125_spill] sm:$0xff]  ;;  %v21904_v18 = vld [vmem:[#allocation59_spill] sm:$0xff] }
 0x46f   :  { %v10802_v57 = vmul.f32 %v20114_v45, %v21897_v58  ;;  %v10803_v31 = vmul.f32 %v20114_v45, %v21898_v21  ;;  %v10804_v36 = vmul.f32 %v20114_v45, %v21899_v10  ;;  %v10805_v26 = vmul.f32 %v20114_v45, %v21900_v63  ;;  %v21911_v1 = vld [vmem:[#allocation29_spill] sm:$0xff]  ;;  %v21912_v33 = vld [vmem:[#allocation71_spill] sm:$0xff]  ;;  %v21913_v21 = vld [vmem:[#allocation42_spill] sm:$0xff] }
 0x470   :  { %v11500_v38 = vadd.f32 %v11484_v5, %v20120_v24  ;;  %v11501_v9 = vadd.f32 %v11485_v15, %v20120_v24  ;;  %v10806_v47 = vmul.f32 %v20114_v45, %v21901_v44  ;;  %v20152_v8 = vmul.f32 %v20114_v45, %v19780_v54  ;;  %v21905_v54 = vld [vmem:[#allocation52_spill] sm:$0xff]  ;;  %v21914_v63 = vld [vmem:[#allocation22_spill] sm:$0xff] }
 0x471   :  { %v20156_v35 = vmul.f32 %v20114_v45, %v21902_v22  ;;  %v20160_v59 = vmul.f32 %v20114_v45, %v21845_v49  ;;  %v20164_v11 = vmul.f32 %v20114_v45, %v21903_v4  ;;  %v20168_v5 = vmul.f32 %v20114_v45, %v21904_v18  ;;  %v21907_v49 = vld [vmem:[#allocation24_spill] sm:$0xff]  ;;  %v21915_v22 = vld [vmem:[#allocation17_spill] sm:$0xff] }
 0x472   :  { %v11532_v43 = vmin.f32 %v11500_v38, 0.0  ;;  %v11533_v46 = vmin.f32 %v11501_v9, 0.0  ;;  %vm11516_vm0 = vcmp.gt.f32.partialorder %v11500_v38, 0.0  ;;  %vm11517_vm1 = vcmp.gt.f32.partialorder %v11501_v9, 0.0  ;;  %v21916_v18 = vld [vmem:[#allocation48_spill] sm:$0xff] }
 0x473   :  { %v20172_v15 = vmul.f32 %v20114_v45, %v21905_v54  ;;  %v20188_v53 = vmul.f32 %v20114_v45, %v21909_v28  ;;  %v20192_v12 = vmul.f32 %v20114_v45, %v21910_v41  ;;  %v20196_v55 = vmul.f32 %v20114_v45, %v21911_v1  ;;  %v21918_v41 = vld [vmem:[#allocation36_spill] sm:$0xff] }
 0x474   :  { %v11560_v50 = vmul.f32 1.442695, %v11532_v43  ;;  %v11562_v7 = vmul.f32 1.442695, %v11533_v46  ;;  %v21906_v43 = vld [vmem:[#allocation18_spill] sm:$0xff]  ;;  %v20200_v58 = vmul.f32 %v20114_v45, %v21912_v33  ;;  %v20204_v10 = vmul.f32 %v20114_v45, %v21913_v21  ;;  %v21920_v33 = vld [vmem:[#allocation20_spill] sm:$0xff] }
 0x475   :  { %v20176_v46 = vmul.f32 %v20114_v45, %v21906_v43  ;;  %v20208_v44 = vmul.f32 %v20114_v45, %v21914_v63  ;;  %v20212_v4 = vmul.f32 %v20114_v45, %v21915_v22  ;;  %v20216_v54 = vmul.f32 %v20114_v45, %v21916_v18  ;;  %v21917_v43 = vld [vmem:[#allocation58_spill] sm:$0xff]  ;;  %v21922_v63 = vld [vmem:[#allocation40_spill] sm:$0xff] }
 0x476   :  { %13875 = vpow2.f32 %v11560_v50  ;;  %v20180_v50 = vmul.f32 %v20114_v45, %v21907_v49  ;;  %v20220_v49 = vmul.f32 %v20114_v45, %v21917_v43  ;;  %v20224_v28 = vmul.f32 %v20114_v45, %v19919_v2 }
 0x477   :  { %13877 = vpow2.f32 %v11562_v7  ;;  %v21908_v7 = vld [vmem:[#allocation63_spill] sm:$0xff]  ;;  %v20228_v1 = vmul.f32 %v20114_v45, %v21918_v41  ;;  %v20232_v21 = vmul.f32 %v20114_v45, %v21920_v33  ;;  %v20236_v22 = vmul.f32 %v20114_v45, %v21922_v63 }
 0x478   :  { %v20184_v60 = vmul.f32 %v20114_v45, %v21908_v7  ;;  %v20240_v6 = vmul.f32 %v20114_v45, %v21924_v13  ;;  %v20243_v2 = vadd.f32 %v20120_v24, %v10794_v3  ;;  %v20246_v41 = vadd.f32 %v20120_v24, %v10795_v23 }
 0x479   :  { %21919 = vst [vmem:[#allocation57_spill] sm:$0xff] %v20228_v1  ;;  %21921 = vst [vmem:[#allocation64_spill] sm:$0xff] %v20232_v21  ;;  %v21926_v1 = vld [vmem:[#allocation53_spill] sm:$0xff]  ;;  %v20253_v63 = vadd.f32 %v20120_v24, %v10796_v16 }
 0x47a   :  { %21923 = vst [vmem:[#allocation81_spill] sm:$0xff] %v20236_v22  ;;  %21925 = vst [vmem:[#allocation97_spill] sm:$0xff] %v20240_v6  ;;  %v20250_v33 = vmul.f32 %v20114_v45, %v21926_v1  ;;  %v21928_v6 = vld [vmem:[#allocation39_spill] sm:$0xff]  ;;  %v21930_v22 = vld [vmem:[#allocation32_spill] sm:$0xff]  ;;  %vm10832_vm2 = vcmp.gt.f32.partialorder %v20243_v2, 0.0  ;;  %vm10833_vm3 = vcmp.gt.f32.partialorder %v20246_v41, 0.0 }
 0x47b   :  { %v20261_v3 = vmul.f32 %v20114_v45, %v21928_v6  ;;  %v20265_v23 = vmul.f32 %v20114_v45, %v21930_v22  ;;  %v21932_v16 = vld [vmem:[#allocation45_spill] sm:$0xff]  ;;  %v20280_v6 = vadd.f32 %v20120_v24, %v10799_v61  ;;  %v20283_v22 = vadd.f32 %v20120_v24, %v10800_v19 }
 0x47c   :  { %21927 = vst [vmem:[#allocation62_spill] sm:$0xff] %v20250_v33  ;;  %v20273_v33 = vmul.f32 %v20114_v45, %v21932_v16  ;;  %v20292_v16 = vadd.f32 %v20120_v24, %v10801_v37  ;;  %v20298_v19 = vmul.f32 %v20114_v45, %v19902_v17  ;;  %v20309_v37 = vadd.f32 %v20120_v24, %v10803_v31 }
 0x47d   :  { %21929 = vst [vmem:[#allocation68_spill] sm:$0xff] %v20261_v3  ;;  %21931 = vst [vmem:[#allocation84_spill] sm:$0xff] %v20265_v23  ;;  %v10849_v23 = vmin.f32 %v20246_v41, 0.0  ;;  %v10853_v17 = vmin.f32 %v20280_v6, 0.0  ;;  %vm10834_vm4 = vcmp.gt.f32.partialorder %v20253_v63, 0.0  ;;  %vm10837_vm7 = vcmp.gt.f32.partialorder %v20280_v6, 0.0 }
 0x47e   :  { %21933 = vst [vmem:[#allocation72_spill] sm:$0xff] %v20273_v33  ;;  %21938 = vst [vmem:[#allocation121_spill] sm:$0xff] %v20298_v19  ;;  %v20319_v19 = vadd.f32 %v20120_v24, %v10806_v47  ;;  %v20324_v33 = vadd.f32 %v20120_v24, %v20152_v8  ;;  %v10855_v31 = vmin.f32 %v20292_v16, 0.0  ;;  %vm10838_vm8 = vcmp.gt.f32.partialorder %v20283_v22, 0.0 }
 0x47f   :  { %v10874_v8 = vmul.f32 1.442695, %v10853_v17  ;;  %vm10839_vm9 = vcmp.gt.f32.partialorder %v20292_v16, 0.0  ;;  %vm10841_vm11 = vcmp.gt.f32.partialorder %v20309_v37, 0.0 }
 0x480   :  { %v10860_v39 = vmin.f32 %v20319_v19, 0.0  ;;  %vm10844_vm14 = vcmp.gt.f32.partialorder %v20319_v19, 0.0  ;;  %vm10845_vm15 = vcmp.gt.f32.partialorder %v20324_v33, 0.0 }
 0x483   :  { %v13876_v7 = vpop.eup %13875 }
 0x484   :  { %v13878_v18 = vpop.eup %13877  ;;  %v12508_v43 = vadd.f32 -1.0, %v13876_v7  ;;  %v20256_v7 = vadd.f32 %v20120_v24, %v10797_v32  ;;  %v21934_v32 = vld [vmem:[#allocation75_spill] sm:$0xff] }
 0x485   :  { %v12509_v40 = vadd.f32 -1.0, %v13878_v18  ;;  %v20268_v18 = vadd.f32 %v20120_v24, %v10798_v30  ;;  %v10848_v30 = vmin.f32 %v20243_v2, 0.0 }
 0x486   :  { %v11596_v13 = vsel %vm11516_vm0, %v11500_v38, %v12508_v43  ;;  %v20277_v38 = vmul.f32 %v20114_v45, %v21934_v32  ;;  %v10850_v32 = vmin.f32 %v20253_v63, 0.0  ;;  %v10851_v61 = vmin.f32 %v20256_v7, 0.0 }
 0x487   :  { %v11597_v1 = vsel %vm11517_vm1, %v11501_v9, %v12509_v40  ;;  %v21936_v40 = vld [vmem:[#allocation256_spill] sm:$0xff]  ;;  %vm10835_vm5 = vcmp.gt.f32.partialorder %v20256_v7, 0.0  ;;  %vm10836_vm6 = vcmp.gt.f32.partialorder %v20268_v18, 0.0 }
 0x488   :  { %21935 = vst [vmem:[#allocation88_spill] sm:$0xff] %v20277_v38  ;;  %v12745_v43 = vpack.c.bf16 %v11597_v1, %v11596_v13  ;;  %v20289_v9 = vmul.f32 %v20114_v45, %v21936_v40  ;;  %v21939_v13 = vld [vmem:[#allocation254_spill] sm:$0xff]  ;;  %v20305_v38 = vadd.f32 %v20120_v24, %v10802_v57  ;;  %v10852_v40 = vmin.f32 %v20268_v18, 0.0 }
 0x489   :  { %v20302_v1 = vmul.f32 %v20114_v45, %v21939_v13  ;;  %v10854_v13 = vmin.f32 %v20283_v22, 0.0  ;;  %v10864_v57 = vmul.f32 1.442695, %v10848_v30  ;;  %v10870_v3 = vmul.f32 1.442695, %v10851_v61 }
 0x48a   :  { %21937 = vst [vmem:[#allocation93_spill] sm:$0xff] %v20289_v9  ;;  %12781 = vst [vmem:[#allocation4 + $0xf0] sm:$0xff] %v12745_v43   ;;  %v20312_v9 = vadd.f32 %v20120_v24, %v10804_v36  ;;  %v20315_v43 = vadd.f32 %v20120_v24, %v10805_v26  ;;  %v10868_v36 = vmul.f32 1.442695, %v10850_v32  ;;  %v20329_v26 = vadd.f32 %v20120_v24, %v20156_v35 }
 0x48b   :  { %21940 = vst [vmem:[#allocation74_spill] sm:$0xff] %v20302_v1  ;;  %v10866_v1 = vmul.f32 1.442695, %v10849_v23  ;;  %v10856_v21 = vmin.f32 %v20305_v38, 0.0  ;;  %13879 = vpow2.f32 %v10864_v57  ;;  %v10872_v47 = vmul.f32 1.442695, %v10852_v40 }
 0x48c   :  { %v20334_v30 = vadd.f32 %v20120_v24, %v20160_v59  ;;  %v10857_v23 = vmin.f32 %v20309_v37, 0.0  ;;  %v20339_v32 = vmul.f32 %v20114_v45, %v21941_v52  ;;  %v10858_v61 = vmin.f32 %v20312_v9, 0.0 }
 0x48d   :  { %13881 = vpow2.f32 %v10866_v1  ;;  %v10876_v35 = vmul.f32 1.442695, %v10854_v13  ;;  %v20344_v57 = vmul.f32 %v20114_v45, %v21863_v48  ;;  %v10859_v40 = vmin.f32 %v20315_v43, 0.0 }
 0x48e   :  { %21942 = vst [vmem:[#allocation90_spill] sm:$0xff] %v20339_v32  ;;  %13883 = vpow2.f32 %v10868_v36  ;;  %v10878_v59 = vmul.f32 1.442695, %v10855_v31  ;;  %v10861_v1 = vmin.f32 %v20324_v33, 0.0  ;;  %v10880_v17 = vmul.f32 1.442695, %v10856_v21 }
 0x48f   :  { %13885 = vpow2.f32 %v10870_v3  ;;  %v10862_v52 = vmin.f32 %v20329_v26, 0.0  ;;  %v10863_v32 = vmin.f32 %v20334_v30, 0.0  ;;  %v10882_v13 = vmul.f32 1.442695, %v10857_v23 }
 0x490   :  { %13887 = vpow2.f32 %v10872_v47  ;;  %v20353_v48 = vmul.f32 %v20114_v45, %v21857_v51  ;;  %v20357_v3 = vmul.f32 %v20114_v45, %v21880_v56  ;;  %v10884_v31 = vmul.f32 1.442695, %v10858_v61 }
 0x491   :  { %13889 = vpow2.f32 %v10874_v8  ;;  %v10886_v21 = vmul.f32 1.442695, %v10859_v40  ;;  %v20362_v36 = vadd.f32 %v20164_v11, %v20120_v24  ;;  %v10888_v47 = vmul.f32 1.442695, %v10860_v39 }
 0x492   :  { %13891 = vpow2.f32 %v10876_v35  ;;  %v10890_v51 = vmul.f32 1.442695, %v10861_v1  ;;  %v20367_v23 = vadd.f32 %v20168_v5, %v20120_v24  ;;  %v10892_v56 = vmul.f32 1.442695, %v10862_v52 }
 0x493   :  { %13893 = vpow2.f32 %v10878_v59  ;;  %v10894_v8 = vmul.f32 1.442695, %v10863_v32  ;;  %v20372_v61 = vadd.f32 %v20172_v15, %v20120_v24  ;;  %v20377_v39 = vadd.f32 %v20176_v46, %v20120_v24 }
 0x494   :  { %13895 = vpow2.f32 %v10880_v17  ;;  %v20381_v11 = vadd.f32 %v20180_v50, %v20120_v24  ;;  %v20385_v5 = vadd.f32 %v20184_v60, %v20120_v24  ;;  %v20390_v15 = vadd.f32 %v20188_v53, %v20120_v24 }
 0x495   :  { %13897 = vpow2.f32 %v10882_v13  ;;  %v20394_v32 = vadd.f32 %v20192_v12, %v20120_v24  ;;  %v20398_v46 = vadd.f32 %v20196_v55, %v20120_v24  ;;  %v20403_v50 = vadd.f32 %v20200_v58, %v20120_v24 }
 0x496   :  { %13899 = vpow2.f32 %v10884_v31  ;;  %v20407_v60 = vadd.f32 %v20204_v10, %v20120_v24  ;;  %v20411_v53 = vadd.f32 %v20208_v44, %v20120_v24  ;;  %v20416_v55 = vadd.f32 %v20212_v4, %v20120_v24 }
 0x497   :  { %13901 = vpow2.f32 %v10886_v21  ;;  %v20420_v58 = vadd.f32 %v20216_v54, %v20120_v24  ;;  %v20424_v10 = vadd.f32 %v20220_v49, %v20120_v24  ;;  %v20429_v40 = vadd.f32 %v20224_v28, %v20120_v24 }
 0x498   :  { %13903 = vpow2.f32 %v10888_v47  ;;  %v13880_v12 = vpop.eup %13879  ;;  %v11072_v4 = vmin.f32 %v20362_v36, 0.0  ;;  %vm10840_vm10 = vcmp.gt.f32.partialorder %v20305_v38, 0.0  ;;  %v11073_v1 = vmin.f32 %v20367_v23, 0.0 }
 0x499   :  { %13905 = vpow2.f32 %v10890_v51  ;;  %v12400_v44 = vadd.f32 -1.0, %v13880_v12  ;;  %v11074_v49 = vmin.f32 %v20372_v61, 0.0  ;;  %v11075_v13 = vmin.f32 %v20377_v39, 0.0 }
 0x49a   :  { %v13882_v35 = vpop.eup %13881  ;;  %13907 = vpow2.f32 %v10892_v56  ;;  %vm10842_vm12 = vcmp.gt.f32.partialorder %v20312_v9, 0.0  ;;  %vm10843_vm13 = vcmp.gt.f32.partialorder %v20315_v43, 0.0  ;;  %vm10846_vm0 = vcmp.gt.f32.partialorder %v20329_v26, 0.0 }
 0x49b   :  { %v13884_v59 = vpop.eup %13883  ;;  %13909 = vpow2.f32 %v10894_v8  ;;  %v12401_v54 = vadd.f32 -1.0, %v13882_v35  ;;  %v10912_v28 = vsel %vm10832_vm2, %v20243_v2, %v12400_v44  ;;  %vm10847_vm1 = vcmp.gt.f32.partialorder %v20334_v30, 0.0 }
 0x49c   :  { %v13886_v17 = vpop.eup %13885  ;;  %v12402_v52 = vadd.f32 -1.0, %v13884_v59  ;;  %v11079_v59 = vmin.f32 %v20394_v32, 0.0  ;;  %vm11056_vm2 = vcmp.gt.f32.partialorder %v20362_v36, 0.0 }
 0x49d   :  { %v13888_v21 = vpop.eup %13887  ;;  %v12403_v47 = vadd.f32 -1.0, %v13886_v17  ;;  %v10913_v51 = vsel %vm10833_vm3, %v20246_v41, %v12401_v54  ;;  %vm11057_vm3 = vcmp.gt.f32.partialorder %v20367_v23, 0.0 }
 0x49e   :  { %v13890_v12 = vpop.eup %13889  ;;  %v12404_v2 = vadd.f32 -1.0, %v13888_v21  ;;  %v10914_v35 = vsel %vm10834_vm4, %v20253_v63, %v12402_v52  ;;  %v12595_v44 = vpack.c.bf16 %v10913_v51, %v10912_v28  ;;  %vm11058_vm4 = vcmp.gt.f32.partialorder %v20372_v61, 0.0 }
 0x49f   :  { %v13892_v17 = vpop.eup %13891  ;;  %v12405_v31 = vadd.f32 -1.0, %v13890_v12  ;;  %v10915_v41 = vsel %vm10835_vm5, %v20256_v7, %v12403_v47  ;;  %v11083_v12 = vmin.f32 %v20411_v53, 0.0  ;;  %vm11059_vm5 = vcmp.gt.f32.partialorder %v20377_v39, 0.0 }
 0x4a0   :  { %v13894_v21 = vpop.eup %13893  ;;  %v12406_v56 = vadd.f32 -1.0, %v13892_v17  ;;  %v10916_v63 = vsel %vm10836_vm6, %v20268_v18, %v12404_v2  ;;  %12596 = vst [vmem:[#allocation4] sm:$0xff] %v12595_v44   ;;  %v12600_v52 = vpack.c.bf16 %v10915_v41, %v10914_v35  ;;  %v11085_v44 = vmin.f32 %v20420_v58, 0.0 }
 0x4a1   :  { %v13896_v51 = vpop.eup %13895  ;;  %v12407_v7 = vadd.f32 -1.0, %v13894_v21  ;;  %v10917_v47 = vsel %vm10837_vm7, %v20280_v6, %v12405_v31  ;;  %v11088_v31 = vmul.f32 1.442695, %v11072_v4  ;;  %v11090_v17 = vmul.f32 1.442695, %v11073_v1 }
 0x4a2   :  { %v13898_v8 = vpop.eup %13897  ;;  %v12408_v18 = vadd.f32 -1.0, %v13896_v51  ;;  %v10918_v2 = vsel %vm10838_vm8, %v20283_v22, %v12406_v56  ;;  %12752 = vst [vmem:[#allocation4 + $0x8] sm:$0xff] %v12600_v52   ;;  %v12605_v35 = vpack.c.bf16 %v10917_v47, %v10916_v63  ;;  %v11092_v56 = vmul.f32 1.442695, %v11074_v49 }
 0x4a3   :  { %v13900_v41 = vpop.eup %13899  ;;  %v12409_v21 = vadd.f32 -1.0, %v13898_v8  ;;  %v10919_v6 = vsel %vm10839_vm9, %v20292_v16, %v12407_v7  ;;  %13911 = vpow2.f32 %v11088_v31  ;;  %v11094_v47 = vmul.f32 1.442695, %v11075_v13 }
 0x4a4   :  { %v13902_v28 = vpop.eup %13901  ;;  %v12410_v54 = vadd.f32 -1.0, %v13900_v41  ;;  %v10920_v51 = vsel %vm10840_vm10, %v20305_v38, %v12408_v18  ;;  %12753 = vst [vmem:[#allocation4 + $0x10] sm:$0xff] %v12605_v35   ;;  %v12610_v22 = vpack.c.bf16 %v10919_v6, %v10918_v2  ;;  %13913 = vpow2.f32 %v11090_v17 }
 0x4a5   :  { %v13904_v63 = vpop.eup %13903  ;;  %v12411_v52 = vadd.f32 -1.0, %v13902_v28  ;;  %v10921_v8 = vsel %vm10841_vm11, %v20309_v37, %v12409_v21  ;;  %13915 = vpow2.f32 %v11092_v56  ;;  %v21943_v37 = vmin.f32 %v20381_v11, 0.0 }
 0x4a6   :  { %v13906_v16 = vpop.eup %13905  ;;  %v12412_v4 = vadd.f32 -1.0, %v13904_v63  ;;  %v10922_v1 = vsel %vm10842_vm12, %v20312_v9, %v12410_v54  ;;  %12754 = vst [vmem:[#allocation4 + $0x18] sm:$0xff] %v12610_v22   ;;  %v12615_v7 = vpack.c.bf16 %v10921_v8, %v10920_v51  ;;  %13917 = vpow2.f32 %v11094_v47 }
 0x4a7   :  { %v13908_v38 = vpop.eup %13907  ;;  %v12413_v18 = vadd.f32 -1.0, %v13906_v16  ;;  %v10923_v49 = vsel %vm10843_vm13, %v20315_v43, %v12411_v52  ;;  %v11096_v28 = vmul.f32 1.442695, %v21943_v37  ;;  %v21944_v43 = vmin.f32 %v20385_v5, 0.0 }
 0x4a8   :  { %v13910_v13 = vpop.eup %13909  ;;  %v12414_v2 = vadd.f32 -1.0, %v13908_v38  ;;  %v10924_v35 = vsel %vm10844_vm14, %v20319_v19, %v12412_v4  ;;  %12755 = vst [vmem:[#allocation4 + $0x20] sm:$0xff] %v12615_v7   ;;  %v12620_v9 = vpack.c.bf16 %v10923_v49, %v10922_v1  ;;  %v21945_v19 = vmin.f32 %v20390_v15, 0.0 }
 0x4a9   :  { %v12415_v54 = vadd.f32 -1.0, %v13910_v13  ;;  %v10925_v17 = vsel %vm10845_vm15, %v20324_v33, %v12413_v18  ;;  %13919 = vpow2.f32 %v11096_v28  ;;  %v11098_v41 = vmul.f32 1.442695, %v21944_v43  ;;  %v21950_v13 = vld [vmem:[#allocation19_spill] sm:$0xff] }
 0x4aa   :  { %v10926_v21 = vsel %vm10846_vm0, %v20329_v26, %v12414_v2  ;;  %12756 = vst [vmem:[#allocation4 + $0x28] sm:$0xff] %v12620_v9   ;;  %v12625_v6 = vpack.c.bf16 %v10925_v17, %v10924_v35  ;;  %v11100_v31 = vmul.f32 1.442695, %v21945_v19  ;;  %v11102_v51 = vmul.f32 1.442695, %v11079_v59  ;;  %v21951_v2 = vld [vmem:[#allocation26_spill] sm:$0xff] }
 0x4ab   :  { %v10927_v33 = vsel %vm10847_vm1, %v20334_v30, %v12415_v54  ;;  %13921 = vpow2.f32 %v11098_v41  ;;  %v21946_v22 = vmin.f32 %v20398_v46, 0.0  ;;  %v21947_v63 = vmin.f32 %v20403_v50, 0.0 }
 0x4ac   :  { %12757 = vst [vmem:[#allocation4 + $0x30] sm:$0xff] %v12625_v6   ;;  %v12630_v26 = vpack.c.bf16 %v10927_v33, %v10926_v21  ;;  %v11086_v8 = vmin.f32 %v20424_v10, 0.0  ;;  %13923 = vpow2.f32 %v11100_v31  ;;  %v21948_v47 = vmin.f32 %v20407_v60, 0.0 }
 0x4ad   :  { %v11104_v56 = vmul.f32 1.442695, %v21946_v22  ;;  %v11106_v52 = vmul.f32 1.442695, %v21947_v63  ;;  %v20518_v59 = vmul.f32 %v20114_v45, %v19972_v14  ;;  %v11087_v30 = vmin.f32 %v20429_v40, 0.0 }
 0x4ae   :  { %v11108_v16 = vmul.f32 1.442695, %v21948_v47  ;;  %13925 = vpow2.f32 %v11102_v51  ;;  %v11110_v4 = vmul.f32 1.442695, %v11083_v12  ;;  %v20523_v1 = vmul.f32 %v20114_v45, %v19983_v25  ;;  %12758 = vst [vmem:[#allocation4 + $0x38] sm:$0xff] %v12630_v26   ;;  %v21952_v26 = vld [vmem:[#allocation57_spill] sm:$0xff] }
 0x4af   :  { %v20527_v7 = vmul.f32 %v20114_v45, %v19979_v20  ;;  %13927 = vpow2.f32 %v11104_v56  ;;  %v21949_v38 = vmin.f32 %v20416_v55, 0.0  ;;  %v20533_v14 = vmul.f32 %v20114_v45, %v19992_v42 }
 0x4b0   :  { %v20537_v12 = vmul.f32 %v20114_v45, %v20003_v27  ;;  %13929 = vpow2.f32 %v11106_v52  ;;  %v11114_v25 = vmul.f32 1.442695, %v11085_v44  ;;  %v20543_v20 = vmul.f32 %v20114_v45, %v20021_v0  ;;  %v13912_v28 = vpop.eup %13911 }
 0x4b1   :  { %v11112_v18 = vmul.f32 1.442695, %v21949_v38  ;;  %v20547_v49 = vmul.f32 %v20114_v45, %v20015_v34  ;;  %13931 = vpow2.f32 %v11108_v16  ;;  %v11116_v37 = vmul.f32 1.442695, %v11086_v8 }
 0x4b2   :  { %v20551_v42 = vmul.f32 %v20114_v45, %v20027_v62  ;;  %v20555_v27 = vmul.f32 %v20114_v45, %v20037_v29  ;;  %13933 = vpow2.f32 %v11110_v4  ;;  %v11118_v44 = vmul.f32 1.442695, %v11087_v30  ;;  %v13914_v62 = vpop.eup %13913  ;;  %v21954_v4 = vld [vmem:[#allocation81_spill] sm:$0xff] }
 0x4b3   :  { %v20559_v0 = vmul.f32 %v20114_v45, %v21950_v13  ;;  %v20563_v34 = vmul.f32 %v20114_v45, %v21951_v2  ;;  %13935 = vpow2.f32 %v11112_v18  ;;  %v12432_v29 = vadd.f32 -1.0, %v13912_v28  ;;  %v13916_v35 = vpop.eup %13915  ;;  %v21955_v18 = vld [vmem:[#allocation97_spill] sm:$0xff] }
 0x4b4   :  { %13937 = vpow2.f32 %v11114_v25  ;;  %vm11060_vm6 = vcmp.gt.f32.partialorder %v20381_v11, 0.0  ;;  %v12433_v9 = vadd.f32 -1.0, %v13914_v62  ;;  %v13918_v54 = vpop.eup %13917  ;;  %vm11061_vm7 = vcmp.gt.f32.partialorder %v20385_v5, 0.0 }
 0x4b5   :  { %13939 = vpow2.f32 %v11116_v37  ;;  %v12434_v17 = vadd.f32 -1.0, %v13916_v35  ;;  %v11136_v43 = vsel %vm11056_vm2, %v20362_v36, %v12432_v29  ;;  %vm11062_vm8 = vcmp.gt.f32.partialorder %v20390_v15, 0.0 }
 0x4b6   :  { %13941 = vpow2.f32 %v11118_v44  ;;  %v13920_v41 = vpop.eup %13919  ;;  %vm11063_vm9 = vcmp.gt.f32.partialorder %v20394_v32, 0.0  ;;  %v12435_v21 = vadd.f32 -1.0, %v13918_v54  ;;  %v11137_v6 = vsel %vm11057_vm3, %v20367_v23, %v12433_v9  ;;  %v21957_v9 = vld [vmem:[#allocation68_spill] sm:$0xff] }
 0x4b7   :  { %vm11064_vm10 = vcmp.gt.f32.partialorder %v20398_v46, 0.0  ;;  %v12436_v19 = vadd.f32 -1.0, %v13920_v41  ;;  %v11138_v31 = vsel %vm11058_vm4, %v20372_v61, %v12434_v17  ;;  %v12635_v51 = vpack.c.bf16 %v11137_v6, %v11136_v43  ;;  %v21958_v17 = vld [vmem:[#allocation84_spill] sm:$0xff] }
 0x4b8   :  { %v13922_v33 = vpop.eup %13921  ;;  %vm11065_vm11 = vcmp.gt.f32.partialorder %v20403_v50, 0.0  ;;  %vm11066_vm12 = vcmp.gt.f32.partialorder %v20407_v60, 0.0  ;;  %vm11067_vm13 = vcmp.gt.f32.partialorder %v20411_v53, 0.0  ;;  %v11139_v36 = vsel %vm11059_vm5, %v20377_v39, %v12435_v21  ;;  %v21953_v39 = vld [vmem:[#allocation64_spill] sm:$0xff] }
 0x4b9   :  { %v13924_v23 = vpop.eup %13923  ;;  %vm11068_vm14 = vcmp.gt.f32.partialorder %v20416_v55, 0.0  ;;  %v12437_v22 = vadd.f32 -1.0, %v13922_v33  ;;  %v11140_v61 = vsel %vm11060_vm6, %v20381_v11, %v12436_v19  ;;  %12759 = vst [vmem:[#allocation4 + $0x40] sm:$0xff] %v12635_v51   ;;  %v12640_v56 = vpack.c.bf16 %v11139_v36, %v11138_v31  ;;  %v21959_v19 = vld [vmem:[#allocation72_spill] sm:$0xff] }
 0x4ba   :  { %vm11069_vm15 = vcmp.gt.f32.partialorder %v20420_v58, 0.0  ;;  %v12438_v52 = vadd.f32 -1.0, %v13924_v23  ;;  %v20596_v8 = vadd.f32 %v21952_v26, %v20120_v24  ;;  %v20600_v47 = vadd.f32 %v21953_v39, %v20120_v24  ;;  %v21960_v36 = vld [vmem:[#allocation88_spill] sm:$0xff]  ;;  %v21962_v26 = vld [vmem:[#allocation121_spill] sm:$0xff] }
 0x4bb   :  { %v13926_v63 = vpop.eup %13925  ;;  %vm11070_vm0 = vcmp.gt.f32.partialorder %v20424_v10, 0.0  ;;  %v11141_v11 = vsel %vm11061_vm7, %v20385_v5, %v12437_v22  ;;  %12760 = vst [vmem:[#allocation4 + $0x48] sm:$0xff] %v12640_v56   ;;  %v20608_v38 = vadd.f32 %v21954_v4, %v20120_v24  ;;  %v20612_v25 = vadd.f32 %v21955_v18, %v20120_v24  ;;  %v21956_v5 = vld [vmem:[#allocation62_spill] sm:$0xff]  ;;  %v21961_v22 = vld [vmem:[#allocation93_spill] sm:$0xff] }
 0x4bc   :  { %v13928_v16 = vpop.eup %13927  ;;  %v12439_v30 = vadd.f32 -1.0, %v13926_v63  ;;  %vm11071_vm1 = vcmp.gt.f32.partialorder %v20429_v40, 0.0  ;;  %v11142_v28 = vsel %vm11062_vm8, %v20390_v15, %v12438_v52  ;;  %v12645_v13 = vpack.c.bf16 %v11141_v11, %v11140_v61 }
 0x4bd   :  { %v13930_v37 = vpop.eup %13929  ;;  %v12440_v44 = vadd.f32 -1.0, %v13928_v16  ;;  %v20620_v2 = vadd.f32 %v21956_v5, %v20120_v24  ;;  %v20627_v54 = vadd.f32 %v21957_v9, %v20120_v24  ;;  %v20631_v43 = vadd.f32 %v21958_v17, %v20120_v24  ;;  %v21964_v9 = vld [vmem:[#allocation90_spill] sm:$0xff] }
 0x4be   :  { %v13932_v62 = vpop.eup %13931  ;;  %v12441_v29 = vadd.f32 -1.0, %v13930_v37  ;;  %v11143_v35 = vsel %vm11063_vm9, %v20394_v32, %v12439_v30  ;;  %12761 = vst [vmem:[#allocation4 + $0x50] sm:$0xff] %v12645_v13   ;;  %v20638_v31 = vadd.f32 %v21959_v19, %v20120_v24  ;;  %v20645_v23 = vadd.f32 %v21960_v36, %v20120_v24 }
 0x4bf   :  { %v13934_v15 = vpop.eup %13933  ;;  %v12442_v41 = vadd.f32 -1.0, %v13932_v62  ;;  %v11144_v21 = vsel %vm11064_vm10, %v20398_v46, %v12440_v44  ;;  %v12650_v6 = vpack.c.bf16 %v11143_v35, %v11142_v28  ;;  %v20649_v61 = vadd.f32 %v21961_v22, %v20120_v24 }
 0x4c0   :  { %v13936_v32 = vpop.eup %13935  ;;  %v12443_v51 = vadd.f32 -1.0, %v13934_v15  ;;  %v11145_v33 = vsel %vm11065_vm11, %v20403_v50, %v12441_v29  ;;  %v20656_v39 = vadd.f32 %v21962_v26, %v20120_v24  ;;  %v11296_v11 = vmin.f32 %v20596_v8, 0.0 }
 0x4c1   :  { %v13938_v46 = vpop.eup %13937  ;;  %v12444_v56 = vadd.f32 -1.0, %v13936_v32  ;;  %v11146_v63 = vsel %vm11066_vm12, %v20407_v60, %v12442_v41  ;;  %12762 = vst [vmem:[#allocation4 + $0x58] sm:$0xff] %v12650_v6   ;;  %v12655_v52 = vpack.c.bf16 %v11145_v33, %v11144_v21  ;;  %v11297_v4 = vmin.f32 %v20600_v47, 0.0 }
 0x4c2   :  { %v13940_v50 = vpop.eup %13939  ;;  %v12445_v16 = vadd.f32 -1.0, %v13938_v46  ;;  %v11147_v30 = vsel %vm11067_vm13, %v20411_v53, %v12443_v51  ;;  %v11298_v28 = vmin.f32 %v20608_v38, 0.0  ;;  %v21963_v53 = vld [vmem:[#allocation74_spill] sm:$0xff]  ;;  %v11299_v29 = vmin.f32 %v20612_v25, 0.0 }
 0x4c3   :  { %v13942_v18 = vpop.eup %13941  ;;  %v12446_v37 = vadd.f32 -1.0, %v13940_v50  ;;  %v11148_v60 = vsel %vm11068_vm14, %v20416_v55, %v12444_v56  ;;  %12763 = vst [vmem:[#allocation4 + $0x60] sm:$0xff] %v12655_v52   ;;  %v12660_v44 = vpack.c.bf16 %v11147_v30, %v11146_v63  ;;  %v20672_v62 = vadd.f32 %v21963_v53, %v20120_v24 }
 0x4c4   :  { %v12447_v13 = vadd.f32 -1.0, %v13942_v18  ;;  %v11149_v5 = vsel %vm11069_vm15, %v20420_v58, %v12445_v16  ;;  %v20680_v17 = vadd.f32 %v21964_v9, %v20120_v24  ;;  %v11300_v15 = vmin.f32 %v20620_v2, 0.0 }
 0x4c5   :  { %v11150_v35 = vsel %vm11070_vm0, %v20424_v10, %v12446_v37  ;;  %12764 = vst [vmem:[#allocation4 + $0x68] sm:$0xff] %v12660_v44   ;;  %v12665_v55 = vpack.c.bf16 %v11149_v5, %v11148_v60  ;;  %v20688_v41 = vadd.f32 %v20344_v57, %v20120_v24  ;;  %v11301_v21 = vmin.f32 %v20627_v54, 0.0  ;;  %v21966_v37 = vld [vmem:[#allocation46_spill] sm:$0xff] }
 0x4c6   :  { %v11151_v58 = vsel %vm11071_vm1, %v20429_v40, %v12447_v13  ;;  %v11302_v10 = vmin.f32 %v20631_v43, 0.0  ;;  %v11312_v19 = vmul.f32 1.442695, %v11296_v11  ;;  %v11314_v32 = vmul.f32 1.442695, %v11297_v4  ;;  %v21965_v4 = vld [vmem:[#allocation86_spill] sm:$0xff] }
 0x4c7   :  { %12765 = vst [vmem:[#allocation4 + $0x70] sm:$0xff] %v12665_v55   ;;  %v12670_v6 = vpack.c.bf16 %v11151_v58, %v11150_v35  ;;  %v11316_v51 = vmul.f32 1.442695, %v11298_v28  ;;  %v20694_v33 = vadd.f32 %v20353_v48, %v20120_v24  ;;  %v20698_v40 = vadd.f32 %v20357_v3, %v20120_v24  ;;  %v21967_v28 = vld [vmem:[#allocation28_spill] sm:$0xff] }
 0x4c8   :  { %v11303_v57 = vmin.f32 %v20638_v31, 0.0  ;;  %v11318_v36 = vmul.f32 1.442695, %v11299_v29  ;;  %v11304_v22 = vmin.f32 %v20645_v23, 0.0  ;;  %v11305_v46 = vmin.f32 %v20649_v61, 0.0 }
 0x4c9   :  { %12766 = vst [vmem:[#allocation4 + $0x78] sm:$0xff] %v12670_v6   ;;  %13943 = vpow2.f32 %v11312_v19  ;;  %v11320_v56 = vmul.f32 1.442695, %v11300_v15  ;;  %v11306_v63 = vmin.f32 %v20656_v39, 0.0  ;;  %v11307_v52 = vmin.f32 %v20672_v62, 0.0 }
 0x4ca   :  { %13945 = vpow2.f32 %v11314_v32  ;;  %v11322_v48 = vmul.f32 1.442695, %v11301_v21  ;;  %v11308_v26 = vmin.f32 %v20680_v17, 0.0  ;;  %v11309_v3 = vmin.f32 %v20688_v41, 0.0 }
 0x4cb   :  { %13947 = vpow2.f32 %v11316_v51  ;;  %v11324_v50 = vmul.f32 1.442695, %v11302_v10  ;;  %v11310_v16 = vmin.f32 %v20694_v33, 0.0  ;;  %v11311_v30 = vmin.f32 %v20698_v40, 0.0 }
 0x4cc   :  { %13949 = vpow2.f32 %v11318_v36  ;;  %v11326_v11 = vmul.f32 1.442695, %v11303_v57  ;;  %v11483_v18 = vmul.f32 %v20114_v45, %v21965_v4  ;;  %v11486_v60 = vmul.f32 %v20114_v45, %v21966_v37 }
 0x4cd   :  { %13951 = vpow2.f32 %v11320_v56  ;;  %v11328_v44 = vmul.f32 1.442695, %v11304_v22  ;;  %v11487_v13 = vmul.f32 %v20114_v45, %v21967_v28  ;;  %v11330_v5 = vmul.f32 1.442695, %v11305_v46 }
 0x4ce   :  { %13953 = vpow2.f32 %v11322_v48  ;;  %v20717_v53 = vadd.f32 %v20518_v59, %v20120_v24  ;;  %v11332_v29 = vmul.f32 1.442695, %v11306_v63  ;;  %v11334_v35 = vmul.f32 1.442695, %v11307_v52 }
 0x4cf   :  { %13955 = vpow2.f32 %v11324_v50  ;;  %v11336_v55 = vmul.f32 1.442695, %v11308_v26  ;;  %vm11280_vm2 = vcmp.gt.f32.partialorder %v20596_v8, 0.0  ;;  %v11338_v9 = vmul.f32 1.442695, %v11309_v3 }
 0x4d0   :  { %13957 = vpow2.f32 %v11326_v11  ;;  %v11340_v15 = vmul.f32 1.442695, %v11310_v16  ;;  %v11342_v58 = vmul.f32 1.442695, %v11311_v30  ;;  %vm11281_vm3 = vcmp.gt.f32.partialorder %v20600_v47, 0.0 }
 0x4d1   :  { %13959 = vpow2.f32 %v11328_v44  ;;  %v20723_v45 = vadd.f32 %v20523_v1, %v20120_v24  ;;  %v20727_v59 = vadd.f32 %v20527_v7, %v20120_v24  ;;  %v20731_v21 = vadd.f32 %v20533_v14, %v20120_v24 }
 0x4d2   :  { %vm11282_vm4 = vcmp.gt.f32.partialorder %v20608_v38, 0.0  ;;  %13961 = vpow2.f32 %v11330_v5  ;;  %v20736_v10 = vadd.f32 %v20537_v12, %v20120_v24  ;;  %v20740_v6 = vadd.f32 %v20543_v20, %v20120_v24 }
 0x4d3   :  { %v20744_v1 = vadd.f32 %v20547_v49, %v20120_v24  ;;  %vm11283_vm5 = vcmp.gt.f32.partialorder %v20612_v25, 0.0  ;;  %13963 = vpow2.f32 %v11332_v29  ;;  %v20749_v7 = vadd.f32 %v20551_v42, %v20120_v24 }
 0x4d4   :  { %v20753_v14 = vadd.f32 %v20555_v27, %v20120_v24  ;;  %v20757_v12 = vadd.f32 %v20559_v0, %v20120_v24  ;;  %vm11284_vm6 = vcmp.gt.f32.partialorder %v20620_v2, 0.0  ;;  %13965 = vpow2.f32 %v11334_v35 }
 0x4d5   :  { %v20762_v20 = vadd.f32 %v20563_v34, %v20120_v24  ;;  %v20765_v49 = vadd.f32 %v11483_v18, %v20120_v24  ;;  %v20768_v42 = vadd.f32 %v11486_v60, %v20120_v24  ;;  %vm11285_vm7 = vcmp.gt.f32.partialorder %v20627_v54, 0.0 }
 0x4d6   :  { %13967 = vpow2.f32 %v11336_v55  ;;  %v20772_v27 = vadd.f32 %v11487_v13, %v20120_v24  ;;  %v11520_v0 = vmin.f32 %v20717_v53, 0.0  ;;  %v11521_v19 = vmin.f32 %v20723_v45, 0.0  ;;  %v13944_v32 = vpop.eup %13943 }
 0x4d7   :  { %vm11286_vm8 = vcmp.gt.f32.partialorder %v20631_v43, 0.0  ;;  %13969 = vpow2.f32 %v11338_v9  ;;  %v11522_v34 = vmin.f32 %v20727_v59, 0.0  ;;  %v11523_v51 = vmin.f32 %v20731_v21, 0.0  ;;  %v13946_v36 = vpop.eup %13945 }
 0x4d8   :  { %v11524_v57 = vmin.f32 %v20736_v10, 0.0  ;;  %vm11287_vm9 = vcmp.gt.f32.partialorder %v20638_v31, 0.0  ;;  %13971 = vpow2.f32 %v11340_v15  ;;  %v12464_v24 = vadd.f32 -1.0, %v13944_v32  ;;  %v13948_v56 = vpop.eup %13947 }
 0x4d9   :  { %v11525_v22 = vmin.f32 %v20740_v6, 0.0  ;;  %v11526_v46 = vmin.f32 %v20744_v1, 0.0  ;;  %vm11288_vm10 = vcmp.gt.f32.partialorder %v20645_v23, 0.0  ;;  %13973 = vpow2.f32 %v11342_v58  ;;  %v13950_v26 = vpop.eup %13949 }
 0x4da   :  { %v12465_v63 = vadd.f32 -1.0, %v13946_v36  ;;  %v11527_v52 = vmin.f32 %v20749_v7, 0.0  ;;  %v11528_v48 = vmin.f32 %v20753_v14, 0.0  ;;  %vm11289_vm11 = vcmp.gt.f32.partialorder %v20649_v61, 0.0  ;;  %v13952_v11 = vpop.eup %13951 }
 0x4db   :  { %v12466_v3 = vadd.f32 -1.0, %v13948_v56  ;;  %v11360_v50 = vsel %vm11280_vm2, %v20596_v8, %v12464_v24  ;;  %v11529_v16 = vmin.f32 %v20757_v12, 0.0  ;;  %v11530_v30 = vmin.f32 %v20762_v20, 0.0  ;;  %v13954_v44 = vpop.eup %13953 }
 0x4dc   :  { %vm11290_vm12 = vcmp.gt.f32.partialorder %v20656_v39, 0.0  ;;  %v12467_v4 = vadd.f32 -1.0, %v13950_v26  ;;  %v11361_v18 = vsel %vm11281_vm3, %v20600_v47, %v12465_v63  ;;  %v11531_v37 = vmin.f32 %v20765_v49, 0.0  ;;  %v13956_v29 = vpop.eup %13955 }
 0x4dd   :  { %v11534_v60 = vmin.f32 %v20768_v42, 0.0  ;;  %vm11291_vm13 = vcmp.gt.f32.partialorder %v20672_v62, 0.0  ;;  %v12468_v8 = vadd.f32 -1.0, %v13952_v11  ;;  %v11362_v28 = vsel %vm11282_vm4, %v20608_v38, %v12466_v3  ;;  %v13958_v15 = vpop.eup %13957 }
 0x4de   :  { %v12675_v13 = vpack.c.bf16 %v11361_v18, %v11360_v50  ;;  %v11535_v5 = vmin.f32 %v20772_v27, 0.0  ;;  %vm11292_vm14 = vcmp.gt.f32.partialorder %v20680_v17, 0.0  ;;  %v12469_v35 = vadd.f32 -1.0, %v13954_v44  ;;  %v13960_v24 = vpop.eup %13959 }
 0x4df   :  { %v11363_v47 = vsel %vm11283_vm5, %v20612_v25, %v12467_v4  ;;  %v11536_v55 = vmul.f32 1.442695, %v11520_v0  ;;  %v11538_v9 = vmul.f32 1.442695, %v11521_v19  ;;  %vm11293_vm15 = vcmp.gt.f32.partialorder %v20688_v41, 0.0  ;;  %v13962_v19 = vpop.eup %13961 }
 0x4e0   :  { %v12470_v58 = vadd.f32 -1.0, %v13956_v29  ;;  %v11364_v38 = vsel %vm11284_vm6, %v20620_v2, %v12468_v8  ;;  %12767 = vst [vmem:[#allocation4 + $0x80] sm:$0xff] %v12675_v13   ;;  %v12680_v32 = vpack.c.bf16 %v11363_v47, %v11362_v28  ;;  %v11540_v36 = vmul.f32 1.442695, %v11522_v34  ;;  %v13964_v26 = vpop.eup %13963 }
 0x4e1   :  { %vm11294_vm0 = vcmp.gt.f32.partialorder %v20694_v33, 0.0  ;;  %v12471_v56 = vadd.f32 -1.0, %v13958_v15  ;;  %v11365_v25 = vsel %vm11285_vm7, %v20627_v54, %v12469_v35  ;;  %13975 = vpow2.f32 %v11536_v55 }
 0x4e2   :  { %v11542_v0 = vmul.f32 1.442695, %v11523_v51  ;;  %vm11295_vm1 = vcmp.gt.f32.partialorder %v20698_v40, 0.0  ;;  %v12472_v63 = vadd.f32 -1.0, %v13960_v24  ;;  %v11366_v2 = vsel %vm11286_vm8, %v20631_v43, %v12470_v58  ;;  %12768 = vst [vmem:[#allocation4 + $0x88] sm:$0xff] %v12680_v32   ;;  %v13966_v51 = vpop.eup %13965 }
 0x4e3   :  { %v12685_v34 = vpack.c.bf16 %v11365_v25, %v11364_v38  ;;  %13977 = vpow2.f32 %v11538_v9  ;;  %v12473_v3 = vadd.f32 -1.0, %v13962_v19  ;;  %v11367_v50 = vsel %vm11287_vm9, %v20638_v31, %v12471_v56  ;;  %v13968_v43 = vpop.eup %13967 }
 0x4e4   :  { %13979 = vpow2.f32 %v11540_v36  ;;  %v11544_v54 = vmul.f32 1.442695, %v11524_v57  ;;  %v12474_v11 = vadd.f32 -1.0, %v13964_v26  ;;  %v11368_v4 = vsel %vm11288_vm10, %v20645_v23, %v12472_v63  ;;  %v13970_v57 = vpop.eup %13969 }
 0x4e5   :  { %12769 = vst [vmem:[#allocation4 + $0x90] sm:$0xff] %v12685_v34   ;;  %v12690_v18 = vpack.c.bf16 %v11367_v50, %v11366_v2  ;;  %13981 = vpow2.f32 %v11542_v0  ;;  %v12475_v44 = vadd.f32 -1.0, %v13966_v51  ;;  %v11369_v8 = vsel %vm11289_vm11, %v20649_v61, %v12473_v3  ;;  %v13972_v35 = vpop.eup %13971 }
 0x4e6   :  { %13983 = vpow2.f32 %v11544_v54  ;;  %v11546_v31 = vmul.f32 1.442695, %v11525_v22  ;;  %v12476_v28 = vadd.f32 -1.0, %v13968_v43  ;;  %v11370_v13 = vsel %vm11290_vm12, %v20656_v39, %v12474_v11  ;;  %v13974_v55 = vpop.eup %13973 }
 0x4e7   :  { %12770 = vst [vmem:[#allocation4 + $0x98] sm:$0xff] %v12690_v18   ;;  %v12695_v23 = vpack.c.bf16 %v11369_v8, %v11368_v4  ;;  %v11548_v29 = vmul.f32 1.442695, %v11526_v46  ;;  %v12477_v47 = vadd.f32 -1.0, %v13970_v57  ;;  %v11371_v61 = vsel %vm11291_vm13, %v20672_v62, %v12475_v44 }
 0x4e8   :  { %13985 = vpow2.f32 %v11546_v31  ;;  %v11550_v22 = vmul.f32 1.442695, %v11527_v52  ;;  %v12478_v9 = vadd.f32 -1.0, %v13972_v35  ;;  %v11372_v39 = vsel %vm11292_vm14, %v20680_v17, %v12476_v28 }
 0x4e9   :  { %12771 = vst [vmem:[#allocation4 + $0xa0] sm:$0xff] %v12695_v23   ;;  %v12700_v15 = vpack.c.bf16 %v11371_v61, %v11370_v13  ;;  %13987 = vpow2.f32 %v11548_v29  ;;  %v12479_v46 = vadd.f32 -1.0, %v13974_v55  ;;  %v11373_v58 = vsel %vm11293_vm15, %v20688_v41, %v12477_v47 }
 0x4ea   :  { %13989 = vpow2.f32 %v11550_v22  ;;  %v11552_v62 = vmul.f32 1.442695, %v11528_v48  ;;  %v11374_v52 = vsel %vm11294_vm0, %v20694_v33, %v12478_v9  ;;  %v12705_v38 = vpack.c.bf16 %v11373_v58, %v11372_v39 }
 0x4eb   :  { %12772 = vst [vmem:[#allocation4 + $0xa8] sm:$0xff] %v12700_v15   ;;  %v11554_v17 = vmul.f32 1.442695, %v11529_v16  ;;  %v11556_v32 = vmul.f32 1.442695, %v11530_v30  ;;  %v11375_v41 = vsel %vm11295_vm1, %v20698_v40, %v12479_v46  ;;  %vm11504_vm2 = vcmp.gt.f32.partialorder %v20717_v53, 0.0 }
 0x4ec   :  { %13991 = vpow2.f32 %v11552_v62  ;;  %v11558_v48 = vmul.f32 1.442695, %v11531_v37  ;;  %v11564_v36 = vmul.f32 1.442695, %v11534_v60  ;;  %12773 = vst [vmem:[#allocation4 + $0xb0] sm:$0xff] %v12705_v38   ;;  %v12710_v33 = vpack.c.bf16 %v11375_v41, %v11374_v52 }
 0x4ed   :  { %13993 = vpow2.f32 %v11554_v17  ;;  %v11566_v16 = vmul.f32 1.442695, %v11535_v5  ;;  %vm11505_vm3 = vcmp.gt.f32.partialorder %v20723_v45, 0.0  ;;  %vm11506_vm4 = vcmp.gt.f32.partialorder %v20727_v59, 0.0 }
 0x4ee   :  { %13995 = vpow2.f32 %v11556_v32  ;;  %v13976_v24 = vpop.eup %13975  ;;  %12774 = vst [vmem:[#allocation4 + $0xb8] sm:$0xff] %v12710_v33   ;;  %vm11507_vm5 = vcmp.gt.f32.partialorder %v20731_v21, 0.0  ;;  %vm11508_vm6 = vcmp.gt.f32.partialorder %v20736_v10, 0.0  ;;  %vm11509_vm7 = vcmp.gt.f32.partialorder %v20740_v6, 0.0 }
 0x4ef   :  { %13997 = vpow2.f32 %v11558_v48  ;;  %v12496_v40 = vadd.f32 -1.0, %v13976_v24  ;;  %vm11510_vm8 = vcmp.gt.f32.partialorder %v20744_v1, 0.0  ;;  %vm11511_vm9 = vcmp.gt.f32.partialorder %v20749_v7, 0.0 }
 0x4f0   :  { %v13978_v30 = vpop.eup %13977  ;;  %13999 = vpow2.f32 %v11564_v36  ;;  %vm11512_vm10 = vcmp.gt.f32.partialorder %v20753_v14, 0.0  ;;  %vm11513_vm11 = vcmp.gt.f32.partialorder %v20757_v12, 0.0  ;;  %vm11514_vm12 = vcmp.gt.f32.partialorder %v20762_v20, 0.0 }
 0x4f1   :  { %v13980_v56 = vpop.eup %13979  ;;  %14001 = vpow2.f32 %v11566_v16  ;;  %v12497_v37 = vadd.f32 -1.0, %v13978_v30  ;;  %v11584_v0 = vsel %vm11504_vm2, %v20717_v53, %v12496_v40  ;;  %vm11515_vm13 = vcmp.gt.f32.partialorder %v20765_v49, 0.0 }
 0x4f2   :  { %v13982_v25 = vpop.eup %13981  ;;  %v12498_v60 = vadd.f32 -1.0, %v13980_v56  ;;  %vm11518_vm14 = vcmp.gt.f32.partialorder %v20768_v42, 0.0  ;;  %vm11519_vm15 = vcmp.gt.f32.partialorder %v20772_v27, 0.0 }
 0x4f3   :  { %v13984_v19 = vpop.eup %13983  ;;  %v12499_v5 = vadd.f32 -1.0, %v13982_v25  ;;  %v11585_v63 = vsel %vm11505_vm3, %v20723_v45, %v12497_v37 }
 0x4f4   :  { %v12500_v2 = vadd.f32 -1.0, %v13984_v19  ;;  %v11586_v34 = vsel %vm11506_vm4, %v20727_v59, %v12498_v60  ;;  %v12715_v26 = vpack.c.bf16 %v11585_v63, %v11584_v0 }
 0x4f5   :  { %v13986_v3 = vpop.eup %13985  ;;  %v11587_v50 = vsel %vm11507_vm5, %v20731_v21, %v12499_v5 }
 0x4f6   :  { %v13988_v54 = vpop.eup %13987  ;;  %v12501_v51 = vadd.f32 -1.0, %v13986_v3  ;;  %v11588_v53 = vsel %vm11508_vm6, %v20736_v10, %v12500_v2  ;;  %12775 = vst [vmem:[#allocation4 + $0xc0] sm:$0xff] %v12715_v26   ;;  %v12720_v11 = vpack.c.bf16 %v11587_v50, %v11586_v34 }
 0x4f7   :  { %v13990_v4 = vpop.eup %13989  ;;  %v12502_v45 = vadd.f32 -1.0, %v13988_v54 }
 0x4f8   :  { %v12503_v18 = vadd.f32 -1.0, %v13990_v4  ;;  %v11589_v59 = vsel %vm11509_vm7, %v20740_v6, %v12501_v51  ;;  %12776 = vst [vmem:[#allocation4 + $0xc8] sm:$0xff] %v12720_v11  }
 0x4f9   :  { %v13992_v43 = vpop.eup %13991  ;;  %v11590_v21 = vsel %vm11510_vm8, %v20744_v1, %v12502_v45  ;;  %v12725_v44 = vpack.c.bf16 %v11589_v59, %v11588_v53 }
 0x4fa   :  { %v13994_v8 = vpop.eup %13993  ;;  %v12504_v10 = vadd.f32 -1.0, %v13992_v43  ;;  %v11591_v31 = vsel %vm11511_vm9, %v20749_v7, %v12503_v18 }
 0x4fb   :  { %v13996_v57 = vpop.eup %13995  ;;  %v12505_v28 = vadd.f32 -1.0, %v13994_v8  ;;  %12777 = vst [vmem:[#allocation4 + $0xd0] sm:$0xff] %v12725_v44   ;;  %v12730_v13 = vpack.c.bf16 %v11591_v31, %v11590_v21 }
 0x4fc   :  { %v13998_v23 = vpop.eup %13997  ;;  %v12506_v6 = vadd.f32 -1.0, %v13996_v57  ;;  %v11592_v29 = vsel %vm11512_vm10, %v20753_v14, %v12504_v10 }
 0x4fd   :  { %v14000_v35 = vpop.eup %13999  ;;  %v12507_v1 = vadd.f32 -1.0, %v13998_v23  ;;  %v11593_v47 = vsel %vm11513_vm11, %v20757_v12, %v12505_v28  ;;  %12778 = vst [vmem:[#allocation4 + $0xd8] sm:$0xff] %v12730_v13  }
 0x4fe   :  { %v14002_v7 = vpop.eup %14001  ;;  %v12510_v61 = vadd.f32 -1.0, %v14000_v35  ;;  %v11594_v22 = vsel %vm11514_vm12, %v20762_v20, %v12506_v6  ;;  %v12735_v55 = vpack.c.bf16 %v11593_v47, %v11592_v29 }
 0x4ff   :  { %v12511_v9 = vadd.f32 -1.0, %v14002_v7  ;;  %v11595_v14 = vsel %vm11515_vm13, %v20765_v49, %v12507_v1 }
 0x500   :  { %v11598_v39 = vsel %vm11518_vm14, %v20768_v42, %v12510_v61  ;;  %12779 = vst [vmem:[#allocation4 + $0xe0] sm:$0xff] %v12735_v55   ;;  %v12740_v12 = vpack.c.bf16 %v11595_v14, %v11594_v22 }
 0x501   :  { %v11599_v15 = vsel %vm11519_vm15, %v20772_v27, %v12511_v9 }
 0x502   :  { %12780 = vst [vmem:[#allocation4 + $0xe8] sm:$0xff] %v12740_v12   ;;  %v12750_v46 = vpack.c.bf16 %v11599_v15, %v11598_v39 }
 0x504   :  { %12782 = vst [vmem:[#allocation4 + $0xf8] sm:$0xff] %v12750_v46  }
 0x505   :  { %14014 = shalt.err (!%p14011_p4)
}
 0x506   :  { %s14027_s10 = smov 64   ;;  %s14028_s11 = smov 4  }
 0x507   :  { %11691 = dma.vmem_to_hbm [thread:$0]  %s11686_s3, 4096, %s20899_s4, [#allocation5], %s14027_s10, %s14027_s10, %s14028_s11  }
 0x508   :  { %14023 = dma.done.wait [#allocation5], 4096  }
 0x509   :  { %14024 = vsyncadd [#allocation5], 4294963200 }
 0x50a   :  { %11695 = vsyncpa [#allocation5], 1 }

</bundles_post_ra>
